<compile_context>
chip_gen: v6e
topology: v6e:2x2x1
jax: 0.10.0
libtpu: 0.0.40
codegen_flags: <defaults>
</compile_context>

<pallas_src>
import functools

import jax
import jax.numpy as jnp
from jax import lax
from jax.experimental import pallas as pl
from jax.experimental.pallas import tpu as pltpu


FACTOR = 7
EMBED_DIM = 300
PROJ_DIM = 128
N_IMG = 128 * FACTOR * FACTOR          # 6272 conv-feature columns
K_FOLD = N_IMG + FACTOR * PROJ_DIM     # 7168 folded linear1 K (6272 + 896)
LATENT_DIM = 128 * FACTOR * FACTOR * 2  # 12544 (original, pre-fold)


def _round_up(x, m):
    return ((x + m - 1) // m) * m


# ----------------------------------------------------------------------------
# Pallas kernel: single-block  Y = leaky(X @ W + b)   (proj / conv1 / conv2)
# ----------------------------------------------------------------------------
def _single_block_matmul_kernel(x_ref, w_ref, b_ref, o_ref, *, slope):
    y = jnp.dot(x_ref[...], w_ref[...], preferred_element_type=jnp.float32)
    y = y + b_ref[...]
    o_ref[...] = jnp.where(y > 0, y, slope * y).astype(o_ref.dtype)


def small_matmul_leaky(x, w, b, *, n_out, slope, out_dtype=jnp.bfloat16):
    """One-step Pallas matmul + bias + LeakyReLU for the tiny layers.

    `w` (Kp, Np) / `b` (1, Np) come from prepare_params (padded, bf16 weights).
    Everything fits in VMEM, so the grid is a single step: one dispatch,
    no per-step pipeline overhead."""
    M, K = x.shape
    Kp, Np = w.shape
    assert K <= Kp and b.shape == (1, Np)
    Mp = _round_up(max(M, 8), 16)       # bf16-friendly sublane multiple

    xp = x.astype(jnp.bfloat16)
    if (Mp, Kp) != (M, K):
        xp = jnp.pad(xp, ((0, Mp - M), (0, Kp - K)))

    out = pl.pallas_call(
        functools.partial(_single_block_matmul_kernel, slope=slope),
        out_shape=jax.ShapeDtypeStruct((Mp, Np), out_dtype),
        grid=(1,),
        in_specs=[
            pl.BlockSpec((Mp, Kp), lambda i: (0, 0)),
            pl.BlockSpec((Kp, Np), lambda i: (0, 0)),
            pl.BlockSpec((1, Np), lambda i: (0, 0)),
        ],
        out_specs=pl.BlockSpec((Mp, Np), lambda i: (0, 0)),
        compiler_params=pltpu.CompilerParams(
            dimension_semantics=("arbitrary",)),
    )(xp, w, b)
    return out[:M, :n_out]


# ----------------------------------------------------------------------------
# Pallas kernel: fused  l1 -> leaky -> l2 -> leaky -> l3 -> sigmoid
#   grid = (M tiles, K tiles over the folded 7168 reduction)
#   f32 accumulator for l1; tail done in the last K step's epilogue with
#   resident l2/l3 weight blocks (constant block index -> DMA'd once).
# ----------------------------------------------------------------------------
def _fused_mlp_kernel(x_ref, w1_ref, b1_ref, w2_ref, b2_ref, w3_ref, b3_ref,
                      o_ref, acc_ref, *, slope):
    k = pl.program_id(1)

    @pl.when(k == 0)
    def _():
        acc_ref[...] = jnp.zeros_like(acc_ref)

    acc_ref[...] += jnp.dot(
        x_ref[...], w1_ref[...], preferred_element_type=jnp.float32
    )

    @pl.when(k == pl.num_programs(1) - 1)
    def _():
        h = acc_ref[...] + b1_ref[...]                     # (tm, 1024) f32
        h = jnp.where(h > 0, h, slope * h)
        g = jnp.dot(h.astype(jnp.bfloat16), w2_ref[...],
                    preferred_element_type=jnp.float32) + b2_ref[...]
        g = jnp.where(g > 0, g, slope * g)
        y = jnp.dot(g.astype(jnp.bfloat16), w3_ref[...],
                    preferred_element_type=jnp.float32) + b3_ref[...]
        z = jnp.exp(-jnp.abs(y))                           # stable sigmoid
        o_ref[...] = jnp.where(y >= 0, 1.0 / (1.0 + z),
                               z / (1.0 + z)).astype(o_ref.dtype)


def fused_mlp(x, packed, *, slope=0.01, tk=1792):
    """Fused linear1/linear2/linear3 head on the folded (B, 7168) input."""
    w1, b1 = packed["l1_w"], packed["l1_b"]     # (7168, 1024), (1, 1024)
    w2, b2 = packed["l2_w"], packed["l2_b"]     # (1024, 512),  (1, 512)
    w3, b3 = packed["l3_w"], packed["l3_b"]     # (512, 128),   (1, 128)

    M, K = x.shape
    Kp, N1 = w1.shape
    N2 = w2.shape[1]
    N3 = w3.shape[1]
    assert K == Kp and Kp % tk == 0, (K, Kp, tk)

    Mp = _round_up(max(M, 8), 16)
    tm = min(128, Mp)
    Mp = _round_up(Mp, tm)
    xp = x.astype(jnp.bfloat16)
    if Mp != M:
        xp = jnp.pad(xp, ((0, Mp - M), (0, 0)))

    grid = (Mp // tm, Kp // tk)                 # (1, 4) at small batch

    out = pl.pallas_call(
        functools.partial(_fused_mlp_kernel, slope=slope),
        out_shape=jax.ShapeDtypeStruct((Mp, N3), jnp.float32),
        grid=grid,
        in_specs=[
            pl.BlockSpec((tm, tk), lambda i, k: (i, k)),   # activations
            pl.BlockSpec((tk, N1), lambda i, k: (k, 0)),   # l1 weight stream
            pl.BlockSpec((1, N1), lambda i, k: (0, 0)),
            pl.BlockSpec((N1, N2), lambda i, k: (0, 0)),   # resident l2
            pl.BlockSpec((1, N2), lambda i, k: (0, 0)),
            pl.BlockSpec((N2, N3), lambda i, k: (0, 0)),   # resident l3
            pl.BlockSpec((1, N3), lambda i, k: (0, 0)),
        ],
        out_specs=pl.BlockSpec((tm, N3), lambda i, k: (i, 0)),
        scratch_shapes=[pltpu.VMEM((tm, N1), jnp.float32)],
        compiler_params=pltpu.CompilerParams(
            dimension_semantics=("parallel", "arbitrary"),
            # ~10 MB of buffered tiles (7.2 MB l1 double-buffered + 2 MB l2 +
            # small); raise scoped VMEM explicitly for headroom on all chips.
            vmem_limit_bytes=32 * 1024 * 1024,
        ),
    )(xp, w1, b1, w2, b2, w3, b3)
    return out[:M, :1]


# ----------------------------------------------------------------------------
# One-time weight packing (outside jit)
# ----------------------------------------------------------------------------
def prepare_params(params):
    """Fold eval-BN into the projection linear, reshape conv weights to the
    im2col (ci, kh, kw) patch layout, permute + FOLD linear1's rows (image half
    to NHWC order, projection half's 7x inner repetition summed into 896 rows),
    zero-pad to lane/tile grids and cast weights to bf16 (biases f32)."""
    eps = 1e-5
    bn_scale = params["bn_gamma"] / jnp.sqrt(params["bn_var"] + eps)
    w_proj = params["proj_w"] * bn_scale[None, :]
    b_proj = (params["proj_b"] - params["bn_mean"]) * bn_scale + params["bn_beta"]

    # conv weights (Cout,Cin,KH,KW) -> (Cin*KH*KW, Cout); row order (ci,kh,kw)
    # matches lax.conv_general_dilated_patches' channel-major patch layout.
    w_c1 = params["conv1_w"].transpose(1, 2, 3, 0).reshape(1 * 25, 64)
    w_c2 = params["conv2_w"].transpose(1, 2, 3, 0).reshape(64 * 25, 128)

    l1_w = params["l1_w"]                                  # (12544, 1024) f32
    # image half: torch flattens conv2 output as (c,h,w); we flatten (h,w,c).
    l1_img = (l1_w[:N_IMG].reshape(128, FACTOR, FACTOR, -1)
              .transpose(1, 2, 0, 3).reshape(N_IMG, -1))
    # projection half: torch row index is 896*a + 128*s + ch and the repeated
    # value is independent of s, so sum the 7 s-copies (exact fold, in f32).
    l1_proj = (l1_w[N_IMG:].reshape(FACTOR, FACTOR, PROJ_DIM, -1)
               .sum(axis=1).reshape(FACTOR * PROJ_DIM, -1))   # (896, 1024)
    l1_fold = jnp.concatenate([l1_img, l1_proj], axis=0)      # (7168, 1024)

    def pad_w(w, Kp, Np, dtype=jnp.bfloat16):
        K, N = w.shape
        return jnp.zeros((Kp, Np), dtype).at[:K, :N].set(w.astype(dtype))

    def pad_b(b, Np):
        return (jnp.zeros((1, Np), jnp.float32)
                .at[0, :b.shape[0]].set(b.astype(jnp.float32)))

    return {
        "proj_w": pad_w(w_proj, 384, 128),            # K 300 -> 384
        "proj_b": pad_b(b_proj, 128),
        "conv1_w": pad_w(w_c1, 128, 128),             # K 25 -> 128, N 64 -> 128
        "conv1_b": pad_b(params["conv1_b"], 128),
        "conv2_w": pad_w(w_c2, 1664, 128),            # K 1600 -> 1664 (1 tile)
        "conv2_b": pad_b(params["conv2_b"], 128),
        "l1_w": l1_fold.astype(jnp.bfloat16),         # (7168, 1024)
        "l1_b": pad_b(params["l1_b"], 1024),
        "l2_w": params["l2_w"].astype(jnp.bfloat16),  # (1024, 512)
        "l2_b": pad_b(params["l2_b"], 512),
        "l3_w": pad_w(params["l3_w"], 512, 128),      # bf16, N 1 -> 128
        "l3_b": pad_b(params["l3_b"], 128),
    }


# ----------------------------------------------------------------------------
# Discriminator forward
# ----------------------------------------------------------------------------
def discriminator_forward(image_nchw, embed_vector, packed):
    B = image_nchw.shape[0]

    # --- projection path: Linear (+folded eval-mode BN) -> LeakyReLU(0.2)
    proj = small_matmul_leaky(embed_vector, packed["proj_w"], packed["proj_b"],
                              n_out=PROJ_DIM, slope=0.2,
                              out_dtype=jnp.bfloat16)        # (B, 128)

    # torch: projection.repeat(1,1,7,7).view(-1, 6272).  The inner 7x channel
    # repetition was folded into l1's weights at pack time; the outer 7 chunks
    # select batch row (7r + a) % B, reproduced by this tiny gather.
    a_idx = (FACTOR * jnp.arange(B)[:, None] + jnp.arange(FACTOR)[None, :]) % B
    mixed_proj = proj[a_idx].reshape(B, FACTOR * PROJ_DIM)   # (B, 896)

    # --- image path (patch extraction + 1-step Pallas matmuls; Dropout2d == id)
    x = jnp.transpose(image_nchw, (0, 2, 3, 1)).astype(jnp.bfloat16)  # NHWC
    p1 = lax.conv_general_dilated_patches(
        x, (5, 5), (2, 2), ((2, 2), (2, 2)),
        dimension_numbers=("NHWC", "HWIO", "NHWC"))          # (B,14,14,25)
    h1 = small_matmul_leaky(p1.reshape(B * 14 * 14, 25),
                            packed["conv1_w"], packed["conv1_b"],
                            n_out=64, slope=0.01, out_dtype=jnp.bfloat16)
    h1 = h1.reshape(B, 14, 14, 64)

    p2 = lax.conv_general_dilated_patches(
        h1, (5, 5), (2, 2), ((2, 2), (2, 2)),
        dimension_numbers=("NHWC", "HWIO", "NHWC"))          # (B,7,7,1600)
    h2 = small_matmul_leaky(p2.reshape(B * FACTOR * FACTOR, 64 * 25),
                            packed["conv2_w"], packed["conv2_b"],
                            n_out=128, slope=0.01, out_dtype=jnp.bfloat16)

    # NHWC flatten; l1's image rows were pre-permuted at pack time to match
    # torch's NCHW .view() semantics exactly.
    feats = h2.reshape(B, N_IMG)                             # (B, 6272)

    l1_in = jnp.concatenate([feats, mixed_proj], axis=1)     # (B, 7168)

    # --- fused linear1 -> leaky -> linear2 -> leaky -> linear3 -> sigmoid
    return fused_mlp(l1_in, packed, slope=0.01)              # (B, 1) f32


# ----------------------------------------------------------------------------
# Deterministic synthetic parameters (shapes follow the PyTorch module)
# ----------------------------------------------------------------------------
def init_params(key):
    ks = jax.random.split(key, 14)

    def nrm(k, shape, s=0.05):
        return s * jax.random.normal(k, shape, jnp.float32)

    return dict(
        proj_w=nrm(ks[0], (EMBED_DIM, PROJ_DIM)),
        proj_b=nrm(ks[1], (PROJ_DIM,)),
        bn_gamma=1.0 + nrm(ks[2], (PROJ_DIM,), 0.1),
        bn_beta=nrm(ks[3], (PROJ_DIM,), 0.1),
        bn_mean=jnp.zeros((PROJ_DIM,), jnp.float32),
        bn_var=jnp.ones((PROJ_DIM,), jnp.float32),
        conv1_w=nrm(ks[4], (64, 1, 5, 5)),
        conv1_b=nrm(ks[5], (64,)),
        conv2_w=nrm(ks[6], (128, 64, 5, 5)),
        conv2_b=nrm(ks[7], (128,)),
        l1_w=nrm(ks[8], (LATENT_DIM, 1024), 0.02),
        l1_b=nrm(ks[9], (1024,)),
        l2_w=nrm(ks[10], (1024, 512), 0.02),
        l2_b=nrm(ks[11], (512,)),
        l3_w=nrm(ks[12], (512, 1), 0.02),
        l3_b=nrm(ks[13], (1,)),
    )


if __name__ == "__main__":
    key = jax.random.PRNGKey(0)
    k_params, k_img, k_emb = jax.random.split(key, 3)

    params = init_params(k_params)
    packed = prepare_params(params)   # one-time packing, outside the jit

    # Module requires single-channel 28x28 images; batch=2, embedding_dim=300.
    image = jax.random.normal(k_img, (2, 1, 28, 28), jnp.float32)
    embed = jax.random.normal(k_emb, (2, EMBED_DIM), jnp.float32)

    fwd = jax.jit(discriminator_forward)
    out = jax.block_until_ready(fwd(image, embed, packed))

    assert out.shape == (2, 1)
    assert bool(jnp.all(jnp.isfinite(out)))
    assert bool(jnp.all((out >= 0.0) & (out <= 1.0)))
    print("KERNEL_OK")
</pallas_src>

<mosaic_0001>
module attributes {stable_mosaic.version = 11 : i64} {
  func.func @_single_block_matmul_kernel(%arg0: i32, %arg1: memref<400x128xbf16, #tpu.memory_space<vmem>>, %arg2: memref<128x128xbf16, #tpu.memory_space<vmem>>, %arg3: memref<1x128xf32, #tpu.memory_space<vmem>>, %arg4: memref<400x128xbf16, #tpu.memory_space<vmem>>) attributes {dimension_semantics = [#tpu.dimension_semantics<arbitrary>], iteration_bounds = array<i64: 1>, scalar_prefetch = 0 : i64, scratch_operands = 0 : i64, tpu.core_type = #tpu.core_type<tc>, window_params = [{pipeline_mode = #tpu.pipeline_mode<synchronous>, transform_indices = @transform_0, window_bounds = array<i64: 400, 128>}, {pipeline_mode = #tpu.pipeline_mode<synchronous>, transform_indices = @transform_1, window_bounds = array<i64: 128, 128>}, {pipeline_mode = #tpu.pipeline_mode<synchronous>, transform_indices = @transform_2, window_bounds = array<i64: 1, 128>}, {pipeline_mode = #tpu.pipeline_mode<synchronous>, transform_indices = @transform_3, window_bounds = array<i64: 400, 128>}]} {
    %c0 = arith.constant 0 : index
    %c0_0 = arith.constant 0 : index
    %0 = vector.load %arg1[%c0, %c0_0] : memref<400x128xbf16, #tpu.memory_space<vmem>>, vector<400x128xbf16>
    %c0_1 = arith.constant 0 : index
    %c0_2 = arith.constant 0 : index
    %1 = vector.load %arg2[%c0_1, %c0_2] : memref<128x128xbf16, #tpu.memory_space<vmem>>, vector<128x128xbf16>
    %cst = arith.constant dense<0.000000e+00> : vector<400x128xf32>
    %2 = tpu.matmul %0, %1, %cst {dimension_numbers = #tpu.dot_dimension_numbers<[1], [0], [0], [1], [0, 0, 1, 1], [], []>} : vector<400x128xbf16>, vector<128x128xbf16>, vector<400x128xf32> -> vector<400x128xf32>
    %c0_3 = arith.constant 0 : index
    %c0_4 = arith.constant 0 : index
    %3 = vector.load %arg3[%c0_3, %c0_4] : memref<1x128xf32, #tpu.memory_space<vmem>>, vector<1x128xf32>
    %4 = vector.broadcast %3 : vector<1x128xf32> to vector<400x128xf32>
    %5 = arith.addf %2, %4 : vector<400x128xf32>
    %cst_5 = arith.constant 0.000000e+00 : f32
    %6 = vector.broadcast %cst_5 : f32 to vector<400x128xf32>
    %7 = arith.cmpf ogt, %5, %6 : vector<400x128xf32>
    %cst_6 = arith.constant 0.00999999977 : f32
    %8 = vector.broadcast %cst_6 : f32 to vector<400x128xf32>
    %9 = arith.mulf %8, %5 : vector<400x128xf32>
    %10 = arith.select %7, %5, %9 : vector<400x128xi1>, vector<400x128xf32>
    %11 = arith.truncf %10 : vector<400x128xf32> to vector<400x128xbf16>
    %c0_7 = arith.constant 0 : index
    %c0_8 = arith.constant 0 : index
    %12 = vector.load %arg4[%c0_7, %c0_8] : memref<400x128xbf16, #tpu.memory_space<vmem>>, vector<400x128xbf16>
    tpu.vector_store %arg4[%c0_7, %c0_8], %11 {strides = array<i32>} : memref<400x128xbf16, #tpu.memory_space<vmem>>, vector<400x128xbf16>,
    return
  }
  func.func @transform_0(%arg0: i32) -> (i32, i32) {
    %c0_i32 = arith.constant 0 : i32
    %c0_i32_0 = arith.constant 0 : i32
    %c0_i32_1 = arith.constant 0 : i32
    return %c0_i32, %c0_i32_0 : i32, i32
  }
  func.func @transform_1(%arg0: i32) -> (i32, i32) {
    %c0_i32 = arith.constant 0 : i32
    %c0_i32_0 = arith.constant 0 : i32
    %c0_i32_1 = arith.constant 0 : i32
    return %c0_i32, %c0_i32_0 : i32, i32
  }
  func.func @transform_2(%arg0: i32) -> (i32, i32) {
    %c0_i32 = arith.constant 0 : i32
    %c0_i32_0 = arith.constant 0 : i32
    %c0_i32_1 = arith.constant 0 : i32
    return %c0_i32, %c0_i32_0 : i32, i32
  }
  func.func @transform_3(%arg0: i32) -> (i32, i32) {
    %c0_i32 = arith.constant 0 : i32
    %c0_i32_0 = arith.constant 0 : i32
    %c0_i32_1 = arith.constant 0 : i32
    return %c0_i32, %c0_i32_0 : i32, i32
  }
}

module attributes {stable_mosaic.version = 11 : i64} {
  func.func @_single_block_matmul_kernel(%arg0: i32, %arg1: memref<112x1664xbf16, #tpu.memory_space<vmem>>, %arg2: memref<1664x128xbf16, #tpu.memory_space<vmem>>, %arg3: memref<1x128xf32, #tpu.memory_space<vmem>>, %arg4: memref<112x128xbf16, #tpu.memory_space<vmem>>) attributes {dimension_semantics = [#tpu.dimension_semantics<arbitrary>], iteration_bounds = array<i64: 1>, scalar_prefetch = 0 : i64, scratch_operands = 0 : i64, tpu.core_type = #tpu.core_type<tc>, window_params = [{pipeline_mode = #tpu.pipeline_mode<synchronous>, transform_indices = @transform_0, window_bounds = array<i64: 112, 1664>}, {pipeline_mode = #tpu.pipeline_mode<synchronous>, transform_indices = @transform_1, window_bounds = array<i64: 1664, 128>}, {pipeline_mode = #tpu.pipeline_mode<synchronous>, transform_indices = @transform_2, window_bounds = array<i64: 1, 128>}, {pipeline_mode = #tpu.pipeline_mode<synchronous>, transform_indices = @transform_3, window_bounds = array<i64: 112, 128>}]} {
    %c0 = arith.constant 0 : index
    %c0_0 = arith.constant 0 : index
    %0 = vector.load %arg1[%c0, %c0_0] : memref<112x1664xbf16, #tpu.memory_space<vmem>>, vector<112x1664xbf16>
    %c0_1 = arith.constant 0 : index
    %c0_2 = arith.constant 0 : index
    %1 = vector.load %arg2[%c0_1, %c0_2] : memref<1664x128xbf16, #tpu.memory_space<vmem>>, vector<1664x128xbf16>
    %cst = arith.constant dense<0.000000e+00> : vector<112x128xf32>
    %2 = tpu.matmul %0, %1, %cst {dimension_numbers = #tpu.dot_dimension_numbers<[1], [0], [0], [1], [0, 0, 1, 1], [], []>} : vector<112x1664xbf16>, vector<1664x128xbf16>, vector<112x128xf32> -> vector<112x128xf32>
    %c0_3 = arith.constant 0 : index
    %c0_4 = arith.constant 0 : index
    %3 = vector.load %arg3[%c0_3, %c0_4] : memref<1x128xf32, #tpu.memory_space<vmem>>, vector<1x128xf32>
    %4 = vector.broadcast %3 : vector<1x128xf32> to vector<112x128xf32>
    %5 = arith.addf %2, %4 : vector<112x128xf32>
    %cst_5 = arith.constant 0.000000e+00 : f32
    %6 = vector.broadcast %cst_5 : f32 to vector<112x128xf32>
    %7 = arith.cmpf ogt, %5, %6 : vector<112x128xf32>
    %cst_6 = arith.constant 0.00999999977 : f32
    %8 = vector.broadcast %cst_6 : f32 to vector<112x128xf32>
    %9 = arith.mulf %8, %5 : vector<112x128xf32>
    %10 = arith.select %7, %5, %9 : vector<112x128xi1>, vector<112x128xf32>
    %11 = arith.truncf %10 : vector<112x128xf32> to vector<112x128xbf16>
    %c0_7 = arith.constant 0 : index
    %c0_8 = arith.constant 0 : index
    %12 = vector.load %arg4[%c0_7, %c0_8] : memref<112x128xbf16, #tpu.memory_space<vmem>>, vector<112x128xbf16>
    tpu.vector_store %arg4[%c0_7, %c0_8], %11 {strides = array<i32>} : memref<112x128xbf16, #tpu.memory_space<vmem>>, vector<112x128xbf16>,
    return
  }
  func.func @transform_0(%arg0: i32) -> (i32, i32) {
    %c0_i32 = arith.constant 0 : i32
    %c0_i32_0 = arith.constant 0 : i32
    %c0_i32_1 = arith.constant 0 : i32
    return %c0_i32, %c0_i32_0 : i32, i32
  }
  func.func @transform_1(%arg0: i32) -> (i32, i32) {
    %c0_i32 = arith.constant 0 : i32
    %c0_i32_0 = arith.constant 0 : i32
    %c0_i32_1 = arith.constant 0 : i32
    return %c0_i32, %c0_i32_0 : i32, i32
  }
  func.func @transform_2(%arg0: i32) -> (i32, i32) {
    %c0_i32 = arith.constant 0 : i32
    %c0_i32_0 = arith.constant 0 : i32
    %c0_i32_1 = arith.constant 0 : i32
    return %c0_i32, %c0_i32_0 : i32, i32
  }
  func.func @transform_3(%arg0: i32) -> (i32, i32) {
    %c0_i32 = arith.constant 0 : i32
    %c0_i32_0 = arith.constant 0 : i32
    %c0_i32_1 = arith.constant 0 : i32
    return %c0_i32, %c0_i32_0 : i32, i32
  }
}

module attributes {stable_mosaic.version = 11 : i64} {
  func.func @_single_block_matmul_kernel(%arg0: i32, %arg1: memref<16x384xbf16, #tpu.memory_space<vmem>>, %arg2: memref<384x128xbf16, #tpu.memory_space<vmem>>, %arg3: memref<1x128xf32, #tpu.memory_space<vmem>>, %arg4: memref<16x128xbf16, #tpu.memory_space<vmem>>) attributes {dimension_semantics = [#tpu.dimension_semantics<arbitrary>], iteration_bounds = array<i64: 1>, scalar_prefetch = 0 : i64, scratch_operands = 0 : i64, tpu.core_type = #tpu.core_type<tc>, window_params = [{pipeline_mode = #tpu.pipeline_mode<synchronous>, transform_indices = @transform_0, window_bounds = array<i64: 16, 384>}, {pipeline_mode = #tpu.pipeline_mode<synchronous>, transform_indices = @transform_1, window_bounds = array<i64: 384, 128>}, {pipeline_mode = #tpu.pipeline_mode<synchronous>, transform_indices = @transform_2, window_bounds = array<i64: 1, 128>}, {pipeline_mode = #tpu.pipeline_mode<synchronous>, transform_indices = @transform_3, window_bounds = array<i64: 16, 128>}]} {
    %c0 = arith.constant 0 : index
    %c0_0 = arith.constant 0 : index
    %0 = vector.load %arg1[%c0, %c0_0] : memref<16x384xbf16, #tpu.memory_space<vmem>>, vector<16x384xbf16>
    %c0_1 = arith.constant 0 : index
    %c0_2 = arith.constant 0 : index
    %1 = vector.load %arg2[%c0_1, %c0_2] : memref<384x128xbf16, #tpu.memory_space<vmem>>, vector<384x128xbf16>
    %cst = arith.constant dense<0.000000e+00> : vector<16x128xf32>
    %2 = tpu.matmul %0, %1, %cst {dimension_numbers = #tpu.dot_dimension_numbers<[1], [0], [0], [1], [0, 0, 1, 1], [], []>} : vector<16x384xbf16>, vector<384x128xbf16>, vector<16x128xf32> -> vector<16x128xf32>
    %c0_3 = arith.constant 0 : index
    %c0_4 = arith.constant 0 : index
    %3 = vector.load %arg3[%c0_3, %c0_4] : memref<1x128xf32, #tpu.memory_space<vmem>>, vector<1x128xf32>
    %4 = vector.broadcast %3 : vector<1x128xf32> to vector<16x128xf32>
    %5 = arith.addf %2, %4 : vector<16x128xf32>
    %cst_5 = arith.constant 0.000000e+00 : f32
    %6 = vector.broadcast %cst_5 : f32 to vector<16x128xf32>
    %7 = arith.cmpf ogt, %5, %6 : vector<16x128xf32>
    %cst_6 = arith.constant 2.000000e-01 : f32
    %8 = vector.broadcast %cst_6 : f32 to vector<16x128xf32>
    %9 = arith.mulf %8, %5 : vector<16x128xf32>
    %10 = arith.select %7, %5, %9 : vector<16x128xi1>, vector<16x128xf32>
    %11 = arith.truncf %10 : vector<16x128xf32> to vector<16x128xbf16>
    %c0_7 = arith.constant 0 : index
    %c0_8 = arith.constant 0 : index
    %12 = vector.load %arg4[%c0_7, %c0_8] : memref<16x128xbf16, #tpu.memory_space<vmem>>, vector<16x128xbf16>
    tpu.vector_store %arg4[%c0_7, %c0_8], %11 {strides = array<i32>} : memref<16x128xbf16, #tpu.memory_space<vmem>>, vector<16x128xbf16>,
    return
  }
  func.func @transform_0(%arg0: i32) -> (i32, i32) {
    %c0_i32 = arith.constant 0 : i32
    %c0_i32_0 = arith.constant 0 : i32
    %c0_i32_1 = arith.constant 0 : i32
    return %c0_i32, %c0_i32_0 : i32, i32
  }
  func.func @transform_1(%arg0: i32) -> (i32, i32) {
    %c0_i32 = arith.constant 0 : i32
    %c0_i32_0 = arith.constant 0 : i32
    %c0_i32_1 = arith.constant 0 : i32
    return %c0_i32, %c0_i32_0 : i32, i32
  }
  func.func @transform_2(%arg0: i32) -> (i32, i32) {
    %c0_i32 = arith.constant 0 : i32
    %c0_i32_0 = arith.constant 0 : i32
    %c0_i32_1 = arith.constant 0 : i32
    return %c0_i32, %c0_i32_0 : i32, i32
  }
  func.func @transform_3(%arg0: i32) -> (i32, i32) {
    %c0_i32 = arith.constant 0 : i32
    %c0_i32_0 = arith.constant 0 : i32
    %c0_i32_1 = arith.constant 0 : i32
    return %c0_i32, %c0_i32_0 : i32, i32
  }
}

module attributes {stable_mosaic.version = 11 : i64} {
  func.func @_fused_mlp_kernel(%arg0: i32, %arg1: i32, %arg2: memref<16x1792xbf16, #tpu.memory_space<vmem>>, %arg3: memref<1792x1024xbf16, #tpu.memory_space<vmem>>, %arg4: memref<1x1024xf32, #tpu.memory_space<vmem>>, %arg5: memref<1024x512xbf16, #tpu.memory_space<vmem>>, %arg6: memref<1x512xf32, #tpu.memory_space<vmem>>, %arg7: memref<512x128xbf16, #tpu.memory_space<vmem>>, %arg8: memref<1x128xf32, #tpu.memory_space<vmem>>, %arg9: memref<16x128xf32, #tpu.memory_space<vmem>>, %arg10: memref<16x1024xf32, #tpu.memory_space<vmem>>) attributes {dimension_semantics = [#tpu.dimension_semantics<parallel>, #tpu.dimension_semantics<arbitrary>], iteration_bounds = array<i64: 1, 4>, scalar_prefetch = 0 : i64, scratch_operands = 1 : i64, tpu.core_type = #tpu.core_type<tc>, window_params = [{transform_indices = @transform_0, window_bounds = array<i64: 16, 1792>}, {transform_indices = @transform_1, window_bounds = array<i64: 1792, 1024>}, {pipeline_mode = #tpu.pipeline_mode<synchronous>, transform_indices = @transform_2, window_bounds = array<i64: 1, 1024>}, {pipeline_mode = #tpu.pipeline_mode<synchronous>, transform_indices = @transform_3, window_bounds = array<i64: 1024, 512>}, {pipeline_mode = #tpu.pipeline_mode<synchronous>, transform_indices = @transform_4, window_bounds = array<i64: 1, 512>}, {pipeline_mode = #tpu.pipeline_mode<synchronous>, transform_indices = @transform_5, window_bounds = array<i64: 512, 128>}, {pipeline_mode = #tpu.pipeline_mode<synchronous>, transform_indices = @transform_6, window_bounds = array<i64: 1, 128>}, {transform_indices = @transform_7, window_bounds = array<i64: 16, 128>}]} {
    %c0_i32 = arith.constant 0 : i32
    %0 = arith.cmpi eq, %arg1, %c0_i32 : i32
    %1 = arith.extui %0 : i1 to i32
    %c0_i32_0 = arith.constant 0 : i32
    %2 = arith.cmpi ne, %1, %c0_i32_0 : i32
    scf.if %2 {
      %cst_9 = arith.constant 0.000000e+00 : f32
      %12 = vector.broadcast %cst_9 : f32 to vector<16x1024xf32>
      %c0_10 = arith.constant 0 : index
      %c0_11 = arith.constant 0 : index
      %13 = vector.load %arg10[%c0_10, %c0_11] : memref<16x1024xf32, #tpu.memory_space<vmem>>, vector<16x1024xf32>
      tpu.vector_store %arg10[%c0_10, %c0_11], %12 {strides = array<i32>} : memref<16x1024xf32, #tpu.memory_space<vmem>>, vector<16x1024xf32>,
    } else {
    }
    %c0 = arith.constant 0 : index
    %c0_1 = arith.constant 0 : index
    %3 = vector.load %arg10[%c0, %c0_1] : memref<16x1024xf32, #tpu.memory_space<vmem>>, vector<16x1024xf32>
    %c0_2 = arith.constant 0 : index
    %c0_3 = arith.constant 0 : index
    %4 = vector.load %arg2[%c0_2, %c0_3] : memref<16x1792xbf16, #tpu.memory_space<vmem>>, vector<16x1792xbf16>
    %c0_4 = arith.constant 0 : index
    %c0_5 = arith.constant 0 : index
    %5 = vector.load %arg3[%c0_4, %c0_5] : memref<1792x1024xbf16, #tpu.memory_space<vmem>>, vector<1792x1024xbf16>
    %cst = arith.constant dense<0.000000e+00> : vector<16x1024xf32>
    %6 = tpu.matmul %4, %5, %cst {dimension_numbers = #tpu.dot_dimension_numbers<[1], [0], [0], [1], [0, 0, 1, 1], [], []>} : vector<16x1792xbf16>, vector<1792x1024xbf16>, vector<16x1024xf32> -> vector<16x1024xf32>
    %7 = arith.addf %3, %6 : vector<16x1024xf32>
    %c0_6 = arith.constant 0 : index
    %c0_7 = arith.constant 0 : index
    %8 = vector.load %arg10[%c0_6, %c0_7] : memref<16x1024xf32, #tpu.memory_space<vmem>>, vector<16x1024xf32>
    tpu.vector_store %arg10[%c0_6, %c0_7], %7 {strides = array<i32>} : memref<16x1024xf32, #tpu.memory_space<vmem>>, vector<16x1024xf32>,
    %c3_i32 = arith.constant 3 : i32
    %9 = arith.cmpi eq, %arg1, %c3_i32 : i32
    %10 = arith.extui %9 : i1 to i32
    %c0_i32_8 = arith.constant 0 : i32
    %11 = arith.cmpi ne, %10, %c0_i32_8 : i32
    scf.if %11 {
      %c0_9 = arith.constant 0 : index
      %c0_10 = arith.constant 0 : index
      %12 = vector.load %arg10[%c0_9, %c0_10] : memref<16x1024xf32, #tpu.memory_space<vmem>>, vector<16x1024xf32>
      %c0_11 = arith.constant 0 : index
      %c0_12 = arith.constant 0 : index
      %13 = vector.load %arg4[%c0_11, %c0_12] : memref<1x1024xf32, #tpu.memory_space<vmem>>, vector<1x1024xf32>
      %14 = vector.broadcast %13 : vector<1x1024xf32> to vector<16x1024xf32>
      %15 = arith.addf %12, %14 : vector<16x1024xf32>
      %cst_13 = arith.constant 0.000000e+00 : f32
      %16 = vector.broadcast %cst_13 : f32 to vector<16x1024xf32>
      %17 = arith.cmpf ogt, %15, %16 : vector<16x1024xf32>
      %cst_14 = arith.constant 0.00999999977 : f32
      %18 = vector.broadcast %cst_14 : f32 to vector<16x1024xf32>
      %19 = arith.mulf %18, %15 : vector<16x1024xf32>
      %20 = arith.select %17, %15, %19 : vector<16x1024xi1>, vector<16x1024xf32>
      %21 = arith.truncf %20 : vector<16x1024xf32> to vector<16x1024xbf16>
      %c0_15 = arith.constant 0 : index
      %c0_16 = arith.constant 0 : index
      %22 = vector.load %arg5[%c0_15, %c0_16] : memref<1024x512xbf16, #tpu.memory_space<vmem>>, vector<1024x512xbf16>
      %cst_17 = arith.constant dense<0.000000e+00> : vector<16x512xf32>
      %23 = tpu.matmul %21, %22, %cst_17 {dimension_numbers = #tpu.dot_dimension_numbers<[1], [0], [0], [1], [0, 0, 1, 1], [], []>} : vector<16x1024xbf16>, vector<1024x512xbf16>, vector<16x512xf32> -> vector<16x512xf32>
      %c0_18 = arith.constant 0 : index
      %c0_19 = arith.constant 0 : index
      %24 = vector.load %arg6[%c0_18, %c0_19] : memref<1x512xf32, #tpu.memory_space<vmem>>, vector<1x512xf32>
      %25 = vector.broadcast %24 : vector<1x512xf32> to vector<16x512xf32>
      %26 = arith.addf %23, %25 : vector<16x512xf32>
      %cst_20 = arith.constant 0.000000e+00 : f32
      %27 = vector.broadcast %cst_20 : f32 to vector<16x512xf32>
      %28 = arith.cmpf ogt, %26, %27 : vector<16x512xf32>
      %cst_21 = arith.constant 0.00999999977 : f32
      %29 = vector.broadcast %cst_21 : f32 to vector<16x512xf32>
      %30 = arith.mulf %29, %26 : vector<16x512xf32>
      %31 = arith.select %28, %26, %30 : vector<16x512xi1>, vector<16x512xf32>
      %32 = arith.truncf %31 : vector<16x512xf32> to vector<16x512xbf16>
      %c0_22 = arith.constant 0 : index
      %c0_23 = arith.constant 0 : index
      %33 = vector.load %arg7[%c0_22, %c0_23] : memref<512x128xbf16, #tpu.memory_space<vmem>>, vector<512x128xbf16>
      %cst_24 = arith.constant dense<0.000000e+00> : vector<16x128xf32>
      %34 = tpu.matmul %32, %33, %cst_24 {dimension_numbers = #tpu.dot_dimension_numbers<[1], [0], [0], [1], [0, 0, 1, 1], [], []>} : vector<16x512xbf16>, vector<512x128xbf16>, vector<16x128xf32> -> vector<16x128xf32>
      %c0_25 = arith.constant 0 : index
      %c0_26 = arith.constant 0 : index
      %35 = vector.load %arg8[%c0_25, %c0_26] : memref<1x128xf32, #tpu.memory_space<vmem>>, vector<1x128xf32>
      %36 = vector.broadcast %35 : vector<1x128xf32> to vector<16x128xf32>
      %37 = arith.addf %34, %36 : vector<16x128xf32>
      %38 = math.absf %37 : vector<16x128xf32>
      %cst_27 = arith.constant 0.000000e+00 : f32
      %39 = vector.broadcast %cst_27 : f32 to vector<16x128xf32>
      %40 = arith.subf %39, %38 : vector<16x128xf32>
      %41 = math.exp %40 : vector<16x128xf32>
      %cst_28 = arith.constant 0.000000e+00 : f32
      %42 = vector.broadcast %cst_28 : f32 to vector<16x128xf32>
      %43 = arith.cmpf oge, %37, %42 : vector<16x128xf32>
      %cst_29 = arith.constant 1.000000e+00 : f32
      %44 = vector.broadcast %cst_29 : f32 to vector<16x128xf32>
      %45 = arith.addf %44, %41 : vector<16x128xf32>
      %cst_30 = arith.constant 1.000000e+00 : f32
      %46 = vector.broadcast %cst_30 : f32 to vector<16x128xf32>
      %47 = arith.divf %46, %45 : vector<16x128xf32>
      %cst_31 = arith.constant 1.000000e+00 : f32
      %48 = vector.broadcast %cst_31 : f32 to vector<16x128xf32>
      %49 = arith.addf %48, %41 : vector<16x128xf32>
      %50 = arith.divf %41, %49 : vector<16x128xf32>
      %51 = arith.select %43, %47, %50 : vector<16x128xi1>, vector<16x128xf32>
      %c0_32 = arith.constant 0 : index
      %c0_33 = arith.constant 0 : index
      %52 = vector.load %arg9[%c0_32, %c0_33] : memref<16x128xf32, #tpu.memory_space<vmem>>, vector<16x128xf32>
      tpu.vector_store %arg9[%c0_32, %c0_33], %51 {strides = array<i32>} : memref<16x128xf32, #tpu.memory_space<vmem>>, vector<16x128xf32>,
    } else {
    }
    return
  }
  func.func @transform_0(%arg0: i32, %arg1: i32) -> (i32, i32) {
    %c0_i32 = arith.constant 0 : i32
    return %arg0, %arg1 : i32, i32
  }
  func.func @transform_1(%arg0: i32, %arg1: i32) -> (i32, i32) {
    %c0_i32 = arith.constant 0 : i32
    %c0_i32_0 = arith.constant 0 : i32
    return %arg1, %c0_i32 : i32, i32
  }
  func.func @transform_2(%arg0: i32, %arg1: i32) -> (i32, i32) {
    %c0_i32 = arith.constant 0 : i32
    %c0_i32_0 = arith.constant 0 : i32
    %c0_i32_1 = arith.constant 0 : i32
    return %c0_i32, %c0_i32_0 : i32, i32
  }
  func.func @transform_3(%arg0: i32, %arg1: i32) -> (i32, i32) {
    %c0_i32 = arith.constant 0 : i32
    %c0_i32_0 = arith.constant 0 : i32
    %c0_i32_1 = arith.constant 0 : i32
    return %c0_i32, %c0_i32_0 : i32, i32
  }
  func.func @transform_4(%arg0: i32, %arg1: i32) -> (i32, i32) {
    %c0_i32 = arith.constant 0 : i32
    %c0_i32_0 = arith.constant 0 : i32
    %c0_i32_1 = arith.constant 0 : i32
    return %c0_i32, %c0_i32_0 : i32, i32
  }
  func.func @transform_5(%arg0: i32, %arg1: i32) -> (i32, i32) {
    %c0_i32 = arith.constant 0 : i32
    %c0_i32_0 = arith.constant 0 : i32
    %c0_i32_1 = arith.constant 0 : i32
    return %c0_i32, %c0_i32_0 : i32, i32
  }
  func.func @transform_6(%arg0: i32, %arg1: i32) -> (i32, i32) {
    %c0_i32 = arith.constant 0 : i32
    %c0_i32_0 = arith.constant 0 : i32
    %c0_i32_1 = arith.constant 0 : i32
    return %c0_i32, %c0_i32_0 : i32, i32
  }
  func.func @transform_7(%arg0: i32, %arg1: i32) -> (i32, i32) {
    %c0_i32 = arith.constant 0 : i32
    %c0_i32_0 = arith.constant 0 : i32
    return %arg0, %c0_i32 : i32, i32
  }
}

</mosaic_0001>

<bundles_post_ra>
// kernel: discriminator_forward.5
= control target key start
LH: loop header
LB: loop body
LE: loop exit
PB: predicated region body
PF: predicated region fallthrough
CT: control target
= control target key end

     0   :  { %8 = vsyncpa [#allocation3], 0  ;;  %s1782_s0 = inlined_call_operand.vmem [shape: bf16[400,128], index: 0, kind: input, shape index: {}]   ;;  %s1783_s1 = inlined_call_operand.hbm [shape: bf16[128,128], index: 1, kind: input, shape index: {}]   ;;  %s1784_s2 = inlined_call_operand.hbm [shape: f32[1,128], index: 2, kind: input, shape index: {}]   ;;  %s1785_s3 = inlined_call_operand.vmem [shape: bf16[400,128], index: 3, kind: output, shape index: {}]  }
   0x1   :  { %9 = vsyncpa [#allocation5], 0  ;;  %s1482_s12 = smov [#allocation2]  }
   0x2   :  { %s17_s13 = sshll.u32 %s1482_s12, 4  ;;  %s18_s13 = int_to_ptr.vmem [resolvable:$true] %s17_s13 }
   0x3   :  { %s1446_s14 = scalar_lea.vmem %s18_s13, 1024  ;;  %p1451_p1 = scmp.lt.s32.totalorder %s18_s13, %s18_s13 }
   0x4   :  { %p1447_p0 = scmp.ne.s32.totalorder %s18_s13, %s1446_s14  ;;  %p1452_p2 = scmp.lt.s32.totalorder %s1446_s14, %s1446_s14 }
   0x6   :  { %p1453_p3 = por %p1452_p2, %p1451_p1 }
   0x8   :  { %p1454_p4 = pnand %p1453_p3, %p1447_p0 }
   0xa   :  { %1457 = shalt.err (!%p1454_p4)
}
   0xb   :  { %s1483_s15 = smov 64   ;;  %s1484_s16 = smov 4  }
   0xc   :  { %23 = dma.hbm_to_vmem [thread:$0]  %s1783_s1, 1024, %s18_s13, [#allocation3], %s1483_s15, %s1483_s15, %s1484_s16  }
   0xd   :  { %s1485_s19 = smov [#allocation4]  }
   0xe   :  { %s30_s20 = sshll.u32 %s1485_s19, 4  ;;  %s31_s20 = int_to_ptr.vmem [resolvable:$true] %s30_s20 }
   0xf   :  { %s1466_s21 = scalar_lea.vmem %s31_s20, 16  ;;  %s1470_s22 = scalar_lea.vmem %s31_s20, 32 }
  0x10   :  { %p1467_p5 = scmp.ne.s32.totalorder %s31_s20, %s1466_s21  ;;  %p1471_p6 = scmp.lt.s32.totalorder %s31_s20, %s31_s20 }
  0x11   :  { %p1472_p7 = scmp.lt.s32.totalorder %s1470_s22, %s1466_s21 }
  0x13   :  { %p1473_p8 = por %p1472_p7, %p1471_p6 }
  0x15   :  { %p1474_p9 = pnand %p1473_p8, %p1467_p5 }
  0x17   :  { %1477 = shalt.err (!%p1474_p9)
}
  0x18   :  { %33 = dma.hbm_to_vmem [thread:$0]  %s1784_s2, 16, %s31_s20, [#allocation5]  }
  0x19   :  { %1478 = dma.done.wait [#allocation3], 1024  }
  0x1a   :  { %1479 = vsyncadd [#allocation3], 4294966272 }
  0x1b   :  { %1480 = dma.done.wait [#allocation5], 16  }
  0x1c   :  { %1481 = vsyncadd [#allocation5], 4294967280  ;;  %v1486_v0 = vmov 0.0   ;;  %vm1487_vm0 = vmmov 0   ;;  %v1405_v1 = vld [vmem:[#allocation2 + $0x38] sm:$0xff]   ;;  %v1406_v2 = vld [vmem:[#allocation2 + $0x30] sm:$0xff]  }
  0x1d   :  { %1267 = vmatprep.subr.bf16.mxu0 %v1486_v0  ;;  %1383 = vmatprep.subr.bf16.mxu1 %v1486_v0  ;;  %v1407_v3 = vld [vmem:[#allocation2 + $0x28] sm:$0xff]   ;;  %v1408_v4 = vld [vmem:[#allocation2 + $0x20] sm:$0xff]   ;;  %v1409_v5 = vld [vmem:[#allocation2 + $0x18] sm:$0xff]  }
  0x1e   :  { %1283 = vmatprep.mubr.msk.bf16.mxu0 %vm1487_vm0, %v1486_v0  ;;  %1335 = vmatprep.mubr.msk.bf16.mxu1 %vm1487_vm0, %v1486_v0  ;;  %v1410_v6 = vld [vmem:[#allocation2 + $0x10] sm:$0xff]   ;;  %v1411_v7 = vld [vmem:[#allocation2 + $0x8] sm:$0xff]   ;;  %v1412_v8 = vld [vmem:[#allocation2] sm:$0xff]  }
  0x1f   :  { %1268 = vmatpush3.bf16.msra.mxu0 %v1405_v1  ;;  %1391 = vmatpush3.bf16.msra.mxu1 %v1405_v1  ;;  %v1413_v9 = vld [vmem:[%s1782_s0] sm:$0xff]   ;;  %v1414_v10 = vld [vmem:[%s1782_s0 + $0x68] sm:$0xff]   ;;  %v1416_v12 = vld [vmem:[%s1782_s0 + $0x70] sm:$0xff]  }
  0x20   :  { %1269 = vmatprep.subr.bf16.mxu0 %v1486_v0  ;;  %1384 = vmatprep.subr.bf16.mxu1 %v1486_v0  ;;  %v1415_v11 = vld [vmem:[%s1782_s0 + $0x8] sm:$0xff]   ;;  %v1417_v13 = vld [vmem:[%s1782_s0 + $0x10] sm:$0xff]   ;;  %v1418_v14 = vld [vmem:[%s1782_s0 + $0x78] sm:$0xff]  }
  0x21   :  { %v1419_v15 = vld [vmem:[%s1782_s0 + $0x18] sm:$0xff]   ;;  %v1420_v16 = vld [vmem:[%s1782_s0 + $0x80] sm:$0xff]   ;;  %v1422_v18 = vld [vmem:[%s1782_s0 + $0x88] sm:$0xff]  }
  0x22   :  { %v1421_v17 = vld [vmem:[%s1782_s0 + $0x20] sm:$0xff]   ;;  %v1423_v19 = vld [vmem:[%s1782_s0 + $0x28] sm:$0xff]   ;;  %v1424_v20 = vld [vmem:[%s1782_s0 + $0x90] sm:$0xff]  }
  0x23   :  { %1270 = vmatpush3.bf16.msra.mxu0 %v1406_v2  ;;  %1392 = vmatpush3.bf16.msra.mxu1 %v1406_v2  ;;  %v1425_v21 = vld [vmem:[%s1782_s0 + $0x30] sm:$0xff]   ;;  %v1426_v22 = vld [vmem:[%s1782_s0 + $0x98] sm:$0xff]   ;;  %v1428_v24 = vld [vmem:[%s1782_s0 + $0xa0] sm:$0xff]  }
  0x24   :  { %1271 = vmatprep.subr.bf16.mxu0 %v1486_v0  ;;  %1385 = vmatprep.subr.bf16.mxu1 %v1486_v0  ;;  %v1427_v23 = vld [vmem:[%s1782_s0 + $0x38] sm:$0xff]   ;;  %v1429_v25 = vld [vmem:[%s1782_s0 + $0x40] sm:$0xff]   ;;  %v1430_v26 = vld [vmem:[%s1782_s0 + $0xa8] sm:$0xff]  }
  0x25   :  { %v1431_v27 = vld [vmem:[%s1782_s0 + $0x48] sm:$0xff]   ;;  %v1432_v28 = vld [vmem:[%s1782_s0 + $0xb0] sm:$0xff]   ;;  %v1434_v30 = vld [vmem:[%s1782_s0 + $0xb8] sm:$0xff]  }
  0x26   :  { %v1433_v29 = vld [vmem:[%s1782_s0 + $0x50] sm:$0xff]   ;;  %v1435_v31 = vld [vmem:[%s1782_s0 + $0x58] sm:$0xff]   ;;  %v1436_v32 = vld [vmem:[%s1782_s0 + $0xc0] sm:$0xff]  }
  0x27   :  { %1272 = vmatpush3.bf16.msra.mxu0 %v1407_v3  ;;  %1393 = vmatpush3.bf16.msra.mxu1 %v1407_v3  ;;  %v1437_v33 = vld [vmem:[%s1782_s0 + $0x60] sm:$0xff]  }
  0x28   :  { %1273 = vmatprep.subr.bf16.mxu0 %v1486_v0  ;;  %1386 = vmatprep.subr.bf16.mxu1 %v1486_v0  ;;  %v1655_v34 = vld [vmem:[#allocation4] ss:$0 sm:$0xff] }
  0x2b   :  { %1274 = vmatpush3.bf16.msra.mxu0 %v1408_v4  ;;  %1394 = vmatpush3.bf16.msra.mxu1 %v1408_v4 }
  0x2c   :  { %1275 = vmatprep.subr.bf16.mxu0 %v1486_v0  ;;  %1387 = vmatprep.subr.bf16.mxu1 %v1486_v0 }
  0x2f   :  { %1276 = vmatpush3.bf16.msra.mxu0 %v1409_v5  ;;  %1395 = vmatpush3.bf16.msra.mxu1 %v1409_v5 }
  0x30   :  { %1277 = vmatprep.subr.bf16.mxu0 %v1486_v0  ;;  %1388 = vmatprep.subr.bf16.mxu1 %v1486_v0 }
  0x33   :  { %1278 = vmatpush3.bf16.msra.mxu0 %v1410_v6  ;;  %1396 = vmatpush3.bf16.msra.mxu1 %v1410_v6 }
  0x34   :  { %1279 = vmatprep.subr.bf16.mxu0 %v1486_v0  ;;  %1389 = vmatprep.subr.bf16.mxu1 %v1486_v0 }
  0x37   :  { %1280 = vmatpush3.bf16.msra.mxu0 %v1411_v7  ;;  %1397 = vmatpush3.bf16.msra.mxu1 %v1411_v7 }
  0x38   :  { %1281 = vmatprep.subr.bf16.mxu0 %v1486_v0  ;;  %1390 = vmatprep.subr.bf16.mxu1 %v1486_v0 }
  0x3b   :  { %1282 = vmatpush3.bf16.msra.mxu0 %v1412_v8  ;;  %1398 = vmatpush3.bf16.msra.mxu1 %v1412_v8 }
  0x3e   :  { %1284 = vmatmul.mubr.bf16.vlgmr.msra.gmra.mxu0 %v1413_v9  ;;  %1336 = vmatmul.mubr.bf16.vlgmr.msra.gmra.mxu1 %v1414_v10 }
  0x3f   :  { %1287 = vmatprep.mubr.msk.bf16.mxu0 %vm1487_vm0, %v1486_v0  ;;  %1339 = vmatprep.mubr.msk.bf16.mxu1 %vm1487_vm0, %v1486_v0 }
  0x46   :  { %1288 = vmatmul.mubr.bf16.gmra.mxu0 %v1415_v11  ;;  %1340 = vmatmul.mubr.bf16.gmra.mxu1 %v1416_v12 }
  0x47   :  { %1291 = vmatprep.mubr.msk.bf16.mxu0 %vm1487_vm0, %v1486_v0  ;;  %1343 = vmatprep.mubr.msk.bf16.mxu1 %vm1487_vm0, %v1486_v0 }
  0x4e   :  { %1292 = vmatmul.mubr.bf16.gmra.mxu0 %v1417_v13  ;;  %1344 = vmatmul.mubr.bf16.gmra.mxu1 %v1418_v14 }
  0x4f   :  { %1295 = vmatprep.mubr.msk.bf16.mxu0 %vm1487_vm0, %v1486_v0  ;;  %1347 = vmatprep.mubr.msk.bf16.mxu1 %vm1487_vm0, %v1486_v0 }
  0x56   :  { %1296 = vmatmul.mubr.bf16.gmra.mxu0 %v1419_v15  ;;  %1348 = vmatmul.mubr.bf16.gmra.mxu1 %v1420_v16 }
  0x57   :  { %1299 = vmatprep.mubr.msk.bf16.mxu0 %vm1487_vm0, %v1486_v0  ;;  %1351 = vmatprep.mubr.msk.bf16.mxu1 %vm1487_vm0, %v1486_v0 }
  0x5e   :  { %1300 = vmatmul.mubr.bf16.gmra.mxu0 %v1421_v17  ;;  %1352 = vmatmul.mubr.bf16.gmra.mxu1 %v1422_v18 }
  0x5f   :  { %1303 = vmatprep.mubr.msk.bf16.mxu0 %vm1487_vm0, %v1486_v0  ;;  %1355 = vmatprep.mubr.msk.bf16.mxu1 %vm1487_vm0, %v1486_v0 }
  0x66   :  { %1304 = vmatmul.mubr.bf16.gmra.mxu0 %v1423_v19  ;;  %1356 = vmatmul.mubr.bf16.gmra.mxu1 %v1424_v20 }
  0x67   :  { %1307 = vmatprep.mubr.msk.bf16.mxu0 %vm1487_vm0, %v1486_v0  ;;  %1359 = vmatprep.mubr.msk.bf16.mxu1 %vm1487_vm0, %v1486_v0 }
  0x6e   :  { %1308 = vmatmul.mubr.bf16.gmra.mxu0 %v1425_v21  ;;  %1360 = vmatmul.mubr.bf16.gmra.mxu1 %v1426_v22 }
  0x6f   :  { %1311 = vmatprep.mubr.msk.bf16.mxu0 %vm1487_vm0, %v1486_v0  ;;  %1363 = vmatprep.mubr.msk.bf16.mxu1 %vm1487_vm0, %v1486_v0 }
  0x76   :  { %1312 = vmatmul.mubr.bf16.gmra.mxu0 %v1427_v23  ;;  %1364 = vmatmul.mubr.bf16.gmra.mxu1 %v1428_v24 }
  0x77   :  { %1315 = vmatprep.mubr.msk.bf16.mxu0 %vm1487_vm0, %v1486_v0  ;;  %1367 = vmatprep.mubr.msk.bf16.mxu1 %vm1487_vm0, %v1486_v0 }
  0x7e   :  { %1316 = vmatmul.mubr.bf16.gmra.mxu0 %v1429_v25  ;;  %1368 = vmatmul.mubr.bf16.gmra.mxu1 %v1430_v26 }
  0x7f   :  { %1319 = vmatprep.mubr.msk.bf16.mxu0 %vm1487_vm0, %v1486_v0  ;;  %1371 = vmatprep.mubr.msk.bf16.mxu1 %vm1487_vm0, %v1486_v0 }
  0x86   :  { %1320 = vmatmul.mubr.bf16.gmra.mxu0 %v1431_v27  ;;  %1372 = vmatmul.mubr.bf16.gmra.mxu1 %v1432_v28 }
  0x87   :  { %1323 = vmatprep.mubr.msk.bf16.mxu0 %vm1487_vm0, %v1486_v0  ;;  %1375 = vmatprep.mubr.msk.bf16.mxu1 %vm1487_vm0, %v1486_v0 }
  0x8e   :  { %1324 = vmatmul.mubr.bf16.gmra.mxu0 %v1433_v29  ;;  %1376 = vmatmul.mubr.bf16.gmra.mxu1 %v1434_v30 }
  0x8f   :  { %1327 = vmatprep.mubr.msk.bf16.mxu0 %vm1487_vm0, %v1486_v0  ;;  %1379 = vmatprep.mubr.msk.bf16.mxu1 %vm1487_vm0, %v1486_v0 }
  0x96   :  { %1328 = vmatmul.mubr.bf16.gmra.mxu0 %v1435_v31  ;;  %1380 = vmatmul.mubr.bf16.gmra.mxu1 %v1436_v32 }
  0x97   :  { %1331 = vmatprep.mubr.msk.bf16.mxu0 %vm1487_vm0, %v1486_v0 }
  0x9e   :  { %1332 = vmatmul.mubr.bf16.gmra.mxu0 %v1437_v33 }
  0xfe   :  { %v346_v35 = vpop.f32.mrf.mxu0  ;;  %v450_v36 = vpop.f32.mrf.mxu1 }
  0xff   :  { %v347_v37 = vadd.f32 %v1655_v34, %v346_v35  ;;  %v451_v38 = vadd.f32 %v1655_v34, %v450_v36 }
 0x100   :  { %v1285_v39 = vpop.f32.mrf.mxu0  ;;  %v1337_v40 = vpop.f32.mrf.mxu1 }
 0x101   :  { %vm571_vm1 = vcmp.gt.f32.partialorder %v451_v38, 0.0  ;;  %v621_v41 = vmul.f32 0.01, %v451_v38  ;;  %v595_v42 = vmul.f32 0.01, %v347_v37  ;;  %vm545_vm2 = vcmp.gt.f32.partialorder %v347_v37, 0.0 }
 0x102   :  { %v349_v43 = vpop.f32.mrf.mxu0  ;;  %v453_v44 = vpop.f32.mrf.mxu1 }
 0x103   :  { %v350_v45 = vadd.f32 %v1655_v34, %v349_v43  ;;  %v454_v46 = vadd.f32 %v1655_v34, %v453_v44  ;;  %v671_v47 = vsel %vm571_vm1, %v451_v38, %v621_v41  ;;  %v645_v52 = vsel %vm545_vm2, %v347_v37, %v595_v42 }
 0x104   :  { %v1286_v48 = vpop.f32.mrf.mxu0  ;;  %v1338_v49 = vpop.f32.mrf.mxu1 }
 0x105   :  { %vm546_vm3 = vcmp.gt.f32.partialorder %v350_v45, 0.0  ;;  %v596_v50 = vmul.f32 0.01, %v350_v45  ;;  %vm572_vm4 = vcmp.gt.f32.partialorder %v454_v46, 0.0  ;;  %v622_v51 = vmul.f32 0.01, %v454_v46 }
 0x106   :  { %v354_v53 = vpop.f32.mrf.mxu0  ;;  %v458_v54 = vpop.f32.mrf.mxu1 }
 0x107   :  { %v646_v55 = vsel %vm546_vm3, %v350_v45, %v596_v50  ;;  %v672_v56 = vsel %vm572_vm4, %v454_v46, %v622_v51  ;;  %v355_v57 = vadd.f32 %v1655_v34, %v354_v53  ;;  %v459_v58 = vadd.f32 %v1655_v34, %v458_v54 }
 0x108   :  { %v1088_v59 = vpack.c.bf16 %v646_v55, %v645_v52  ;;  %v1153_v60 = vpack.c.bf16 %v672_v56, %v671_v47  ;;  %v1289_v61 = vpop.f32.mrf.mxu0  ;;  %v1341_v62 = vpop.f32.mrf.mxu1 }
 0x109   :  { %vm573_vm5 = vcmp.gt.f32.partialorder %v459_v58, 0.0  ;;  %v623_v63 = vmul.f32 0.01, %v459_v58  ;;  %v597_v0 = vmul.f32 0.01, %v355_v57  ;;  %vm547_vm6 = vcmp.gt.f32.partialorder %v355_v57, 0.0 }
 0x10a   :  { %1089 = vst [vmem:[%s1785_s3] sm:$0xff] %v1088_v59   ;;  %1222 = vst [vmem:[%s1785_s3 + $0x68] sm:$0xff] %v1153_v60   ;;  %v357_v1 = vpop.f32.mrf.mxu0  ;;  %v461_v2 = vpop.f32.mrf.mxu1 }
 0x10b   :  { %v358_v3 = vadd.f32 %v1655_v34, %v357_v1  ;;  %v462_v4 = vadd.f32 %v1655_v34, %v461_v2  ;;  %v673_v5 = vsel %vm573_vm5, %v459_v58, %v623_v63  ;;  %v647_v10 = vsel %vm547_vm6, %v355_v57, %v597_v0 }
 0x10c   :  { %v1290_v6 = vpop.f32.mrf.mxu0  ;;  %v1342_v7 = vpop.f32.mrf.mxu1 }
 0x10d   :  { %vm548_vm7 = vcmp.gt.f32.partialorder %v358_v3, 0.0  ;;  %v598_v8 = vmul.f32 0.01, %v358_v3  ;;  %vm574_vm8 = vcmp.gt.f32.partialorder %v462_v4, 0.0  ;;  %v624_v9 = vmul.f32 0.01, %v462_v4 }
 0x10e   :  { %v362_v11 = vpop.f32.mrf.mxu0  ;;  %v466_v12 = vpop.f32.mrf.mxu1 }
 0x10f   :  { %v648_v13 = vsel %vm548_vm7, %v358_v3, %v598_v8  ;;  %v674_v14 = vsel %vm574_vm8, %v462_v4, %v624_v9  ;;  %v363_v15 = vadd.f32 %v1655_v34, %v362_v11  ;;  %v467_v16 = vadd.f32 %v1655_v34, %v466_v12 }
 0x110   :  { %v1093_v17 = vpack.c.bf16 %v648_v13, %v647_v10  ;;  %v1158_v18 = vpack.c.bf16 %v674_v14, %v673_v5  ;;  %v1293_v19 = vpop.f32.mrf.mxu0  ;;  %v1345_v20 = vpop.f32.mrf.mxu1 }
 0x111   :  { %vm575_vm9 = vcmp.gt.f32.partialorder %v467_v16, 0.0  ;;  %v625_v21 = vmul.f32 0.01, %v467_v16  ;;  %v599_v22 = vmul.f32 0.01, %v363_v15  ;;  %vm549_vm10 = vcmp.gt.f32.partialorder %v363_v15, 0.0 }
 0x112   :  { %1210 = vst [vmem:[%s1785_s3 + $0x8] sm:$0xff] %v1093_v17   ;;  %1223 = vst [vmem:[%s1785_s3 + $0x70] sm:$0xff] %v1158_v18   ;;  %v365_v23 = vpop.f32.mrf.mxu0  ;;  %v469_v24 = vpop.f32.mrf.mxu1 }
 0x113   :  { %v366_v25 = vadd.f32 %v1655_v34, %v365_v23  ;;  %v470_v26 = vadd.f32 %v1655_v34, %v469_v24  ;;  %v675_v27 = vsel %vm575_vm9, %v467_v16, %v625_v21  ;;  %v649_v32 = vsel %vm549_vm10, %v363_v15, %v599_v22 }
 0x114   :  { %v1294_v28 = vpop.f32.mrf.mxu0  ;;  %v1346_v29 = vpop.f32.mrf.mxu1 }
 0x115   :  { %vm550_vm11 = vcmp.gt.f32.partialorder %v366_v25, 0.0  ;;  %v600_v30 = vmul.f32 0.01, %v366_v25  ;;  %vm576_vm12 = vcmp.gt.f32.partialorder %v470_v26, 0.0  ;;  %v626_v31 = vmul.f32 0.01, %v470_v26 }
 0x116   :  { %v370_v33 = vpop.f32.mrf.mxu0  ;;  %v474_v35 = vpop.f32.mrf.mxu1 }
 0x117   :  { %v650_v36 = vsel %vm550_vm11, %v366_v25, %v600_v30  ;;  %v676_v37 = vsel %vm576_vm12, %v470_v26, %v626_v31  ;;  %v371_v38 = vadd.f32 %v1655_v34, %v370_v33  ;;  %v475_v39 = vadd.f32 %v1655_v34, %v474_v35 }
 0x118   :  { %v1098_v40 = vpack.c.bf16 %v650_v36, %v649_v32  ;;  %v1163_v41 = vpack.c.bf16 %v676_v37, %v675_v27  ;;  %v1297_v42 = vpop.f32.mrf.mxu0  ;;  %v1349_v43 = vpop.f32.mrf.mxu1 }
 0x119   :  { %vm577_vm13 = vcmp.gt.f32.partialorder %v475_v39, 0.0  ;;  %v627_v44 = vmul.f32 0.01, %v475_v39  ;;  %v601_v45 = vmul.f32 0.01, %v371_v38  ;;  %vm551_vm14 = vcmp.gt.f32.partialorder %v371_v38, 0.0 }
 0x11a   :  { %1211 = vst [vmem:[%s1785_s3 + $0x10] sm:$0xff] %v1098_v40   ;;  %1224 = vst [vmem:[%s1785_s3 + $0x78] sm:$0xff] %v1163_v41   ;;  %v373_v46 = vpop.f32.mrf.mxu0  ;;  %v477_v47 = vpop.f32.mrf.mxu1 }
 0x11b   :  { %v374_v48 = vadd.f32 %v1655_v34, %v373_v46  ;;  %v478_v49 = vadd.f32 %v1655_v34, %v477_v47  ;;  %v677_v50 = vsel %vm577_vm13, %v475_v39, %v627_v44  ;;  %v651_v55 = vsel %vm551_vm14, %v371_v38, %v601_v45 }
 0x11c   :  { %v1298_v51 = vpop.f32.mrf.mxu0  ;;  %v1350_v52 = vpop.f32.mrf.mxu1 }
 0x11d   :  { %vm552_vm15 = vcmp.gt.f32.partialorder %v374_v48, 0.0  ;;  %v602_v53 = vmul.f32 0.01, %v374_v48  ;;  %vm578_vm0 = vcmp.gt.f32.partialorder %v478_v49, 0.0  ;;  %v628_v54 = vmul.f32 0.01, %v478_v49 }
 0x11e   :  { %v378_v56 = vpop.f32.mrf.mxu0  ;;  %v482_v57 = vpop.f32.mrf.mxu1 }
 0x11f   :  { %v652_v58 = vsel %vm552_vm15, %v374_v48, %v602_v53  ;;  %v678_v59 = vsel %vm578_vm0, %v478_v49, %v628_v54  ;;  %v379_v60 = vadd.f32 %v1655_v34, %v378_v56  ;;  %v483_v61 = vadd.f32 %v1655_v34, %v482_v57 }
 0x120   :  { %v1103_v62 = vpack.c.bf16 %v652_v58, %v651_v55  ;;  %v1168_v63 = vpack.c.bf16 %v678_v59, %v677_v50  ;;  %v1301_v0 = vpop.f32.mrf.mxu0  ;;  %v1353_v1 = vpop.f32.mrf.mxu1 }
 0x121   :  { %vm579_vm1 = vcmp.gt.f32.partialorder %v483_v61, 0.0  ;;  %v629_v2 = vmul.f32 0.01, %v483_v61  ;;  %v603_v3 = vmul.f32 0.01, %v379_v60  ;;  %vm553_vm2 = vcmp.gt.f32.partialorder %v379_v60, 0.0 }
 0x122   :  { %1212 = vst [vmem:[%s1785_s3 + $0x18] sm:$0xff] %v1103_v62   ;;  %1225 = vst [vmem:[%s1785_s3 + $0x80] sm:$0xff] %v1168_v63   ;;  %v381_v4 = vpop.f32.mrf.mxu0  ;;  %v485_v5 = vpop.f32.mrf.mxu1 }
 0x123   :  { %v382_v6 = vadd.f32 %v1655_v34, %v381_v4  ;;  %v486_v7 = vadd.f32 %v1655_v34, %v485_v5  ;;  %v679_v8 = vsel %vm579_vm1, %v483_v61, %v629_v2  ;;  %v653_v13 = vsel %vm553_vm2, %v379_v60, %v603_v3 }
 0x124   :  { %v1302_v9 = vpop.f32.mrf.mxu0  ;;  %v1354_v10 = vpop.f32.mrf.mxu1 }
 0x125   :  { %vm554_vm3 = vcmp.gt.f32.partialorder %v382_v6, 0.0  ;;  %v604_v11 = vmul.f32 0.01, %v382_v6  ;;  %vm580_vm4 = vcmp.gt.f32.partialorder %v486_v7, 0.0  ;;  %v630_v12 = vmul.f32 0.01, %v486_v7 }
 0x126   :  { %v386_v14 = vpop.f32.mrf.mxu0  ;;  %v490_v15 = vpop.f32.mrf.mxu1 }
 0x127   :  { %v654_v16 = vsel %vm554_vm3, %v382_v6, %v604_v11  ;;  %v680_v17 = vsel %vm580_vm4, %v486_v7, %v630_v12  ;;  %v387_v18 = vadd.f32 %v1655_v34, %v386_v14  ;;  %v491_v19 = vadd.f32 %v1655_v34, %v490_v15 }
 0x128   :  { %v1108_v20 = vpack.c.bf16 %v654_v16, %v653_v13  ;;  %v1173_v21 = vpack.c.bf16 %v680_v17, %v679_v8  ;;  %v1305_v22 = vpop.f32.mrf.mxu0  ;;  %v1357_v23 = vpop.f32.mrf.mxu1 }
 0x129   :  { %vm581_vm5 = vcmp.gt.f32.partialorder %v491_v19, 0.0  ;;  %v631_v24 = vmul.f32 0.01, %v491_v19  ;;  %v605_v25 = vmul.f32 0.01, %v387_v18  ;;  %vm555_vm6 = vcmp.gt.f32.partialorder %v387_v18, 0.0 }
 0x12a   :  { %1213 = vst [vmem:[%s1785_s3 + $0x20] sm:$0xff] %v1108_v20   ;;  %1226 = vst [vmem:[%s1785_s3 + $0x88] sm:$0xff] %v1173_v21   ;;  %v389_v26 = vpop.f32.mrf.mxu0  ;;  %v493_v27 = vpop.f32.mrf.mxu1 }
 0x12b   :  { %v390_v28 = vadd.f32 %v1655_v34, %v389_v26  ;;  %v494_v29 = vadd.f32 %v1655_v34, %v493_v27  ;;  %v681_v30 = vsel %vm581_vm5, %v491_v19, %v631_v24  ;;  %v655_v36 = vsel %vm555_vm6, %v387_v18, %v605_v25 }
 0x12c   :  { %v1306_v31 = vpop.f32.mrf.mxu0  ;;  %v1358_v32 = vpop.f32.mrf.mxu1 }
 0x12d   :  { %vm556_vm7 = vcmp.gt.f32.partialorder %v390_v28, 0.0  ;;  %v606_v33 = vmul.f32 0.01, %v390_v28  ;;  %vm582_vm8 = vcmp.gt.f32.partialorder %v494_v29, 0.0  ;;  %v632_v35 = vmul.f32 0.01, %v494_v29 }
 0x12e   :  { %v394_v37 = vpop.f32.mrf.mxu0  ;;  %v498_v38 = vpop.f32.mrf.mxu1 }
 0x12f   :  { %v656_v39 = vsel %vm556_vm7, %v390_v28, %v606_v33  ;;  %v682_v40 = vsel %vm582_vm8, %v494_v29, %v632_v35  ;;  %v395_v41 = vadd.f32 %v1655_v34, %v394_v37  ;;  %v499_v42 = vadd.f32 %v1655_v34, %v498_v38 }
 0x130   :  { %v1113_v43 = vpack.c.bf16 %v656_v39, %v655_v36  ;;  %v1178_v44 = vpack.c.bf16 %v682_v40, %v681_v30  ;;  %v1309_v45 = vpop.f32.mrf.mxu0  ;;  %v1361_v46 = vpop.f32.mrf.mxu1 }
 0x131   :  { %vm583_vm9 = vcmp.gt.f32.partialorder %v499_v42, 0.0  ;;  %v633_v47 = vmul.f32 0.01, %v499_v42  ;;  %v607_v48 = vmul.f32 0.01, %v395_v41  ;;  %vm557_vm10 = vcmp.gt.f32.partialorder %v395_v41, 0.0 }
 0x132   :  { %1214 = vst [vmem:[%s1785_s3 + $0x28] sm:$0xff] %v1113_v43   ;;  %1227 = vst [vmem:[%s1785_s3 + $0x90] sm:$0xff] %v1178_v44   ;;  %v397_v49 = vpop.f32.mrf.mxu0  ;;  %v501_v50 = vpop.f32.mrf.mxu1 }
 0x133   :  { %v398_v51 = vadd.f32 %v1655_v34, %v397_v49  ;;  %v502_v52 = vadd.f32 %v1655_v34, %v501_v50  ;;  %v683_v53 = vsel %vm583_vm9, %v499_v42, %v633_v47  ;;  %v657_v58 = vsel %vm557_vm10, %v395_v41, %v607_v48 }
 0x134   :  { %v1310_v54 = vpop.f32.mrf.mxu0  ;;  %v1362_v55 = vpop.f32.mrf.mxu1 }
 0x135   :  { %vm558_vm11 = vcmp.gt.f32.partialorder %v398_v51, 0.0  ;;  %v608_v56 = vmul.f32 0.01, %v398_v51  ;;  %vm584_vm12 = vcmp.gt.f32.partialorder %v502_v52, 0.0  ;;  %v634_v57 = vmul.f32 0.01, %v502_v52 }
 0x136   :  { %v402_v59 = vpop.f32.mrf.mxu0  ;;  %v506_v60 = vpop.f32.mrf.mxu1 }
 0x137   :  { %v658_v61 = vsel %vm558_vm11, %v398_v51, %v608_v56  ;;  %v684_v62 = vsel %vm584_vm12, %v502_v52, %v634_v57  ;;  %v403_v63 = vadd.f32 %v1655_v34, %v402_v59  ;;  %v507_v0 = vadd.f32 %v1655_v34, %v506_v60 }
 0x138   :  { %v1118_v1 = vpack.c.bf16 %v658_v61, %v657_v58  ;;  %v1183_v2 = vpack.c.bf16 %v684_v62, %v683_v53  ;;  %v1313_v3 = vpop.f32.mrf.mxu0  ;;  %v1365_v4 = vpop.f32.mrf.mxu1 }
 0x139   :  { %vm585_vm13 = vcmp.gt.f32.partialorder %v507_v0, 0.0  ;;  %v635_v5 = vmul.f32 0.01, %v507_v0  ;;  %v609_v6 = vmul.f32 0.01, %v403_v63  ;;  %vm559_vm14 = vcmp.gt.f32.partialorder %v403_v63, 0.0 }
 0x13a   :  { %1215 = vst [vmem:[%s1785_s3 + $0x30] sm:$0xff] %v1118_v1   ;;  %1228 = vst [vmem:[%s1785_s3 + $0x98] sm:$0xff] %v1183_v2   ;;  %v405_v7 = vpop.f32.mrf.mxu0  ;;  %v509_v8 = vpop.f32.mrf.mxu1 }
 0x13b   :  { %v406_v9 = vadd.f32 %v1655_v34, %v405_v7  ;;  %v510_v10 = vadd.f32 %v1655_v34, %v509_v8  ;;  %v685_v11 = vsel %vm585_vm13, %v507_v0, %v635_v5  ;;  %v659_v16 = vsel %vm559_vm14, %v403_v63, %v609_v6 }
 0x13c   :  { %v1314_v12 = vpop.f32.mrf.mxu0  ;;  %v1366_v13 = vpop.f32.mrf.mxu1 }
 0x13d   :  { %vm560_vm15 = vcmp.gt.f32.partialorder %v406_v9, 0.0  ;;  %v610_v14 = vmul.f32 0.01, %v406_v9  ;;  %vm586_vm0 = vcmp.gt.f32.partialorder %v510_v10, 0.0  ;;  %v636_v15 = vmul.f32 0.01, %v510_v10 }
 0x13e   :  { %v410_v17 = vpop.f32.mrf.mxu0  ;;  %v514_v18 = vpop.f32.mrf.mxu1 }
 0x13f   :  { %v660_v19 = vsel %vm560_vm15, %v406_v9, %v610_v14  ;;  %v686_v20 = vsel %vm586_vm0, %v510_v10, %v636_v15  ;;  %v411_v21 = vadd.f32 %v1655_v34, %v410_v17  ;;  %v515_v22 = vadd.f32 %v1655_v34, %v514_v18 }
 0x140   :  { %v1123_v23 = vpack.c.bf16 %v660_v19, %v659_v16  ;;  %v1188_v24 = vpack.c.bf16 %v686_v20, %v685_v11  ;;  %v1317_v25 = vpop.f32.mrf.mxu0  ;;  %v1369_v26 = vpop.f32.mrf.mxu1 }
 0x141   :  { %vm587_vm1 = vcmp.gt.f32.partialorder %v515_v22, 0.0  ;;  %v637_v27 = vmul.f32 0.01, %v515_v22  ;;  %v611_v28 = vmul.f32 0.01, %v411_v21  ;;  %vm561_vm2 = vcmp.gt.f32.partialorder %v411_v21, 0.0 }
 0x142   :  { %1216 = vst [vmem:[%s1785_s3 + $0x38] sm:$0xff] %v1123_v23   ;;  %1229 = vst [vmem:[%s1785_s3 + $0xa0] sm:$0xff] %v1188_v24   ;;  %v413_v29 = vpop.f32.mrf.mxu0  ;;  %v517_v30 = vpop.f32.mrf.mxu1 }
 0x143   :  { %v414_v31 = vadd.f32 %v1655_v34, %v413_v29  ;;  %v518_v32 = vadd.f32 %v1655_v34, %v517_v30  ;;  %v687_v33 = vsel %vm587_vm1, %v515_v22, %v637_v27  ;;  %v661_v39 = vsel %vm561_vm2, %v411_v21, %v611_v28 }
 0x144   :  { %v1318_v35 = vpop.f32.mrf.mxu0  ;;  %v1370_v36 = vpop.f32.mrf.mxu1 }
 0x145   :  { %vm562_vm3 = vcmp.gt.f32.partialorder %v414_v31, 0.0  ;;  %v612_v37 = vmul.f32 0.01, %v414_v31  ;;  %vm588_vm4 = vcmp.gt.f32.partialorder %v518_v32, 0.0  ;;  %v638_v38 = vmul.f32 0.01, %v518_v32 }
 0x146   :  { %v418_v40 = vpop.f32.mrf.mxu0  ;;  %v522_v41 = vpop.f32.mrf.mxu1 }
 0x147   :  { %v662_v42 = vsel %vm562_vm3, %v414_v31, %v612_v37  ;;  %v688_v43 = vsel %vm588_vm4, %v518_v32, %v638_v38  ;;  %v419_v44 = vadd.f32 %v1655_v34, %v418_v40  ;;  %v523_v45 = vadd.f32 %v1655_v34, %v522_v41 }
 0x148   :  { %v1128_v46 = vpack.c.bf16 %v662_v42, %v661_v39  ;;  %v1193_v47 = vpack.c.bf16 %v688_v43, %v687_v33  ;;  %v1321_v48 = vpop.f32.mrf.mxu0  ;;  %v1373_v49 = vpop.f32.mrf.mxu1 }
 0x149   :  { %vm589_vm5 = vcmp.gt.f32.partialorder %v523_v45, 0.0  ;;  %v639_v50 = vmul.f32 0.01, %v523_v45  ;;  %v613_v51 = vmul.f32 0.01, %v419_v44  ;;  %vm563_vm6 = vcmp.gt.f32.partialorder %v419_v44, 0.0 }
 0x14a   :  { %1217 = vst [vmem:[%s1785_s3 + $0x40] sm:$0xff] %v1128_v46   ;;  %1230 = vst [vmem:[%s1785_s3 + $0xa8] sm:$0xff] %v1193_v47   ;;  %v421_v52 = vpop.f32.mrf.mxu0  ;;  %v525_v53 = vpop.f32.mrf.mxu1 }
 0x14b   :  { %v422_v54 = vadd.f32 %v1655_v34, %v421_v52  ;;  %v526_v55 = vadd.f32 %v1655_v34, %v525_v53  ;;  %v689_v56 = vsel %vm589_vm5, %v523_v45, %v639_v50  ;;  %v663_v61 = vsel %vm563_vm6, %v419_v44, %v613_v51 }
 0x14c   :  { %v1322_v57 = vpop.f32.mrf.mxu0  ;;  %v1374_v58 = vpop.f32.mrf.mxu1 }
 0x14d   :  { %vm564_vm7 = vcmp.gt.f32.partialorder %v422_v54, 0.0  ;;  %v614_v59 = vmul.f32 0.01, %v422_v54  ;;  %vm590_vm8 = vcmp.gt.f32.partialorder %v526_v55, 0.0  ;;  %v640_v60 = vmul.f32 0.01, %v526_v55 }
 0x14e   :  { %v426_v62 = vpop.f32.mrf.mxu0  ;;  %v530_v63 = vpop.f32.mrf.mxu1 }
 0x14f   :  { %v664_v0 = vsel %vm564_vm7, %v422_v54, %v614_v59  ;;  %v690_v1 = vsel %vm590_vm8, %v526_v55, %v640_v60  ;;  %v427_v2 = vadd.f32 %v1655_v34, %v426_v62  ;;  %v531_v3 = vadd.f32 %v1655_v34, %v530_v63 }
 0x150   :  { %v1133_v4 = vpack.c.bf16 %v664_v0, %v663_v61  ;;  %v1198_v5 = vpack.c.bf16 %v690_v1, %v689_v56  ;;  %v1325_v6 = vpop.f32.mrf.mxu0  ;;  %v1377_v7 = vpop.f32.mrf.mxu1 }
 0x151   :  { %vm591_vm9 = vcmp.gt.f32.partialorder %v531_v3, 0.0  ;;  %v641_v8 = vmul.f32 0.01, %v531_v3  ;;  %v615_v9 = vmul.f32 0.01, %v427_v2  ;;  %vm565_vm10 = vcmp.gt.f32.partialorder %v427_v2, 0.0 }
 0x152   :  { %1218 = vst [vmem:[%s1785_s3 + $0x48] sm:$0xff] %v1133_v4   ;;  %1231 = vst [vmem:[%s1785_s3 + $0xb0] sm:$0xff] %v1198_v5   ;;  %v429_v10 = vpop.f32.mrf.mxu0  ;;  %v533_v11 = vpop.f32.mrf.mxu1 }
 0x153   :  { %v430_v12 = vadd.f32 %v1655_v34, %v429_v10  ;;  %v534_v13 = vadd.f32 %v1655_v34, %v533_v11  ;;  %v691_v14 = vsel %vm591_vm9, %v531_v3, %v641_v8  ;;  %v665_v19 = vsel %vm565_vm10, %v427_v2, %v615_v9 }
 0x154   :  { %v1326_v15 = vpop.f32.mrf.mxu0  ;;  %v1378_v16 = vpop.f32.mrf.mxu1 }
 0x155   :  { %vm566_vm11 = vcmp.gt.f32.partialorder %v430_v12, 0.0  ;;  %v616_v17 = vmul.f32 0.01, %v430_v12  ;;  %vm592_vm12 = vcmp.gt.f32.partialorder %v534_v13, 0.0  ;;  %v642_v18 = vmul.f32 0.01, %v534_v13 }
 0x156   :  { %v434_v20 = vpop.f32.mrf.mxu0  ;;  %v538_v21 = vpop.f32.mrf.mxu1 }
 0x157   :  { %v666_v22 = vsel %vm566_vm11, %v430_v12, %v616_v17  ;;  %v692_v23 = vsel %vm592_vm12, %v534_v13, %v642_v18  ;;  %v435_v24 = vadd.f32 %v1655_v34, %v434_v20  ;;  %v539_v25 = vadd.f32 %v1655_v34, %v538_v21 }
 0x158   :  { %v1138_v26 = vpack.c.bf16 %v666_v22, %v665_v19  ;;  %v1203_v27 = vpack.c.bf16 %v692_v23, %v691_v14  ;;  %v1329_v28 = vpop.f32.mrf.mxu0  ;;  %v1381_v29 = vpop.f32.mrf.mxu1 }
 0x159   :  { %vm593_vm13 = vcmp.gt.f32.partialorder %v539_v25, 0.0  ;;  %v643_v30 = vmul.f32 0.01, %v539_v25  ;;  %v617_v33 = vmul.f32 0.01, %v435_v24  ;;  %vm567_vm14 = vcmp.gt.f32.partialorder %v435_v24, 0.0 }
 0x15a   :  { %1219 = vst [vmem:[%s1785_s3 + $0x50] sm:$0xff] %v1138_v26   ;;  %1232 = vst [vmem:[%s1785_s3 + $0xb8] sm:$0xff] %v1203_v27   ;;  %v437_v31 = vpop.f32.mrf.mxu0  ;;  %v541_v32 = vpop.f32.mrf.mxu1 }
 0x15b   :  { %v438_v35 = vadd.f32 %v1655_v34, %v437_v31  ;;  %v542_v36 = vadd.f32 %v1655_v34, %v541_v32  ;;  %v693_v37 = vsel %vm593_vm13, %v539_v25, %v643_v30  ;;  %v667_v43 = vsel %vm567_vm14, %v435_v24, %v617_v33 }
 0x15c   :  { %v1330_v38 = vpop.f32.mrf.mxu0  ;;  %v1382_v39 = vpop.f32.mrf.mxu1 }
 0x15d   :  { %vm568_vm15 = vcmp.gt.f32.partialorder %v438_v35, 0.0  ;;  %v618_v40 = vmul.f32 0.01, %v438_v35  ;;  %vm594_vm0 = vcmp.gt.f32.partialorder %v542_v36, 0.0  ;;  %v644_v41 = vmul.f32 0.01, %v542_v36 }
 0x15e   :  { %v442_v42 = vpop.f32.mrf.mxu0 }
 0x15f   :  { %v668_v44 = vsel %vm568_vm15, %v438_v35, %v618_v40  ;;  %v694_v45 = vsel %vm594_vm0, %v542_v36, %v644_v41  ;;  %v443_v46 = vadd.f32 %v1655_v34, %v442_v42 }
 0x160   :  { %v1143_v47 = vpack.c.bf16 %v668_v44, %v667_v43  ;;  %v1208_v48 = vpack.c.bf16 %v694_v45, %v693_v37  ;;  %v1333_v49 = vpop.f32.mrf.mxu0 }
 0x161   :  { %v619_v51 = vmul.f32 0.01, %v443_v46  ;;  %vm569_vm1 = vcmp.gt.f32.partialorder %v443_v46, 0.0 }
 0x162   :  { %1220 = vst [vmem:[%s1785_s3 + $0x58] sm:$0xff] %v1143_v47   ;;  %1233 = vst [vmem:[%s1785_s3 + $0xc0] sm:$0xff] %v1208_v48   ;;  %v445_v50 = vpop.f32.mrf.mxu0 }
 0x163   :  { %v446_v52 = vadd.f32 %v1655_v34, %v445_v50  ;;  %v669_v55 = vsel %vm569_vm1, %v443_v46, %v619_v51 }
 0x164   :  { %v1334_v53 = vpop.f32.mrf.mxu0 }
 0x165   :  { %vm570_vm2 = vcmp.gt.f32.partialorder %v446_v52, 0.0  ;;  %v620_v54 = vmul.f32 0.01, %v446_v52 }
 0x167   :  { %v670_v56 = vsel %vm570_vm2, %v446_v52, %v620_v54 }
 0x168   :  { %v1148_v57 = vpack.c.bf16 %v670_v56, %v669_v55 }
 0x16a   :  { %1221 = vst [vmem:[%s1785_s3 + $0x60] sm:$0xff] %v1148_v57  }
 0x16b   :  { %949 = vsyncpa [#allocation3], 1 }
 0x16c   :  { %950 = vsyncpa [#allocation5], 1 }

// kernel: discriminator_forward.6
= control target key start
LH: loop header
LB: loop body
LE: loop exit
PB: predicated region body
PF: predicated region fallthrough
CT: control target
= control target key end

     0   :  { %vm3081_vm0 = vmmov 0   ;;  %s3950_s1 = inlined_call_operand.vmem [shape: bf16[1664,128], index: 1, kind: input, shape index: {}]   ;;  %s3951_s0 = inlined_call_operand.vmem [shape: bf16[112,1664], index: 0, kind: input, shape index: {}]   ;;  %s3952_s2 = inlined_call_operand.vmem [shape: f32[1,128], index: 2, kind: input, shape index: {}]   ;;  %s3953_s3 = inlined_call_operand.vmem [shape: bf16[112,128], index: 3, kind: output, shape index: {}]  }
   0x1   :  { %v2843_v0 = vld [vmem:[%s3950_s1 + $0x78] sm:$0xff]   ;;  %v2845_v2 = vld [vmem:[%s3950_s1 + $0x70] sm:$0xff]   ;;  %v2847_v4 = vld [vmem:[%s3950_s1 + $0x68] sm:$0xff]  }
   0x2   :  { %v2844_v1 = vld [vmem:[%s3950_s1 + $0x38] sm:$0xff]   ;;  %2825 = vmatprep.subr.bf16.mxu1 %v2843_v0  ;;  %2418 = vmatprep.subr.bf16.mxu0 %v2843_v0  ;;  %v2846_v3 = vld [vmem:[%s3950_s1 + $0x30] sm:$0xff]   ;;  %v2848_v5 = vld [vmem:[%s3950_s1 + $0x28] sm:$0xff]  }
   0x3   :  { %2833 = vmatpush3.bf16.msra.mxu1 %v2844_v1  ;;  %2419 = vmatpush3.bf16.msra.mxu0 %v2844_v1  ;;  %v2849_v6 = vld [vmem:[%s3950_s1 + $0x60] sm:$0xff]   ;;  %v2851_v8 = vld [vmem:[%s3950_s1 + $0x58] sm:$0xff]   ;;  %v2853_v10 = vld [vmem:[%s3950_s1 + $0x50] sm:$0xff]  }
   0x4   :  { %2826 = vmatprep.subr.bf16.mxu1 %v2845_v2  ;;  %2420 = vmatprep.subr.bf16.mxu0 %v2845_v2  ;;  %v2850_v7 = vld [vmem:[%s3950_s1 + $0x20] sm:$0xff]   ;;  %v2852_v9 = vld [vmem:[%s3950_s1 + $0x18] sm:$0xff]   ;;  %v2854_v13 = vld [vmem:[%s3950_s1 + $0x10] sm:$0xff]  }
   0x5   :  { %v2861_v11 = vld [vmem:[%s3951_s0 + $0x1a4] ss:$52 sps:$4 sm:$0xff]   ;;  %v2855_v14 = vld [vmem:[%s3950_s1 + $0x48] sm:$0xff]   ;;  %v2859_v18 = vld [vmem:[%s3951_s0 + $0x1a0] ss:$52 sps:$4 sm:$0xff]  }
   0x6   :  { %v2864_v12 = vld [vmem:[%s3951_s0 + $0x4] ss:$52 sps:$4 sm:$0xff]   ;;  %1478 = vmatprep.mubr.bf16.mxu1 %v2861_v11  ;;  %v2856_v15 = vld [vmem:[%s3950_s1 + $0x8] sm:$0xff]   ;;  %v2862_v19 = vld [vmem:[%s3951_s0] ss:$52 sps:$4 sm:$0xff]  }
   0x7   :  { %2834 = vmatpush3.bf16.msra.mxu1 %v2846_v3  ;;  %2421 = vmatpush3.bf16.msra.mxu0 %v2846_v3  ;;  %v2857_v16 = vld [vmem:[%s3950_s1 + $0x40] sm:$0xff]   ;;  %v2865_v20 = vld [vmem:[%s3950_s1 + $0xf8] sm:$0xff]   ;;  %v2869_v24 = vld [vmem:[%s3950_s1 + $0xf0] sm:$0xff]  }
   0x8   :  { %2827 = vmatprep.subr.bf16.mxu1 %v2847_v4  ;;  %2422 = vmatprep.subr.bf16.mxu0 %v2847_v4  ;;  %v2858_v17 = vld [vmem:[%s3950_s1] sm:$0xff]   ;;  %v2867_v21 = vld [vmem:[%s3950_s1 + $0x178] sm:$0xff]   ;;  %v2871_v25 = vld [vmem:[%s3950_s1 + $0x170] sm:$0xff]  }
   0x9   :  { %1446 = vmatprep.mubr.bf16.mxu0 %v2864_v12  ;;  %v2866_v22 = vld [vmem:[%s3950_s1 + $0xb8] sm:$0xff]   ;;  %v2873_v26 = vld [vmem:[%s3951_s0 + $0x6c] ss:$52 sps:$4 sm:$0xff]   ;;  %v2870_v27 = vld [vmem:[%s3950_s1 + $0xb0] sm:$0xff]  }
   0xa   :  { %v2868_v23 = vld [vmem:[%s3950_s1 + $0x138] sm:$0xff]   ;;  %v2879_v28 = vld [vmem:[%s3951_s0 + $0x20c] ss:$52 sps:$4 sm:$0xff]   ;;  %v2872_v29 = vld [vmem:[%s3950_s1 + $0x130] sm:$0xff]  }
   0xb   :  { %2835 = vmatpush3.bf16.msra.mxu1 %v2848_v5  ;;  %2423 = vmatpush3.bf16.msra.mxu0 %v2848_v5  ;;  %v2875_v30 = vld [vmem:[%s3950_s1 + $0xe8] sm:$0xff]   ;;  %v2883_v36 = vld [vmem:[%s3950_s1 + $0xe0] sm:$0xff]   ;;  %v2889_v42 = vld [vmem:[%s3950_s1 + $0xd8] sm:$0xff]  }
   0xc   :  { %2828 = vmatprep.subr.bf16.mxu1 %v2849_v6  ;;  %2424 = vmatprep.subr.bf16.mxu0 %v2849_v6  ;;  %v2876_v31 = vld [vmem:[%s3951_s0 + $0x68] ss:$52 sps:$4 sm:$0xff]   ;;  %v2885_v37 = vld [vmem:[%s3950_s1 + $0x160] sm:$0xff]   ;;  %v2897_v48 = vld [vmem:[%s3950_s1 + $0xd0] sm:$0xff]  }
   0xd   :  { %v2878_v32 = vld [vmem:[%s3950_s1 + $0x168] sm:$0xff]   ;;  %v2884_v38 = vld [vmem:[%s3950_s1 + $0xa0] sm:$0xff]   ;;  %v2892_v44 = vld [vmem:[%s3950_s1 + $0x158] sm:$0xff]  }
   0xe   :  { %v2877_v33 = vld [vmem:[%s3950_s1 + $0xa8] sm:$0xff]   ;;  %v2886_v41 = vld [vmem:[%s3950_s1 + $0x120] sm:$0xff]   ;;  %v2891_v45 = vld [vmem:[%s3950_s1 + $0x98] sm:$0xff]  }
   0xf   :  { %2836 = vmatpush3.bf16.msra.mxu1 %v2850_v7  ;;  %2425 = vmatpush3.bf16.msra.mxu0 %v2850_v7  ;;  %v2882_v34 = vld [vmem:[%s3951_s0 + $0x208] ss:$52 sps:$4 sm:$0xff]   ;;  %v2890_v43 = vld [vmem:[%s3951_s0 + $0xd0] ss:$52 sps:$4 sm:$0xff]   ;;  %v2904_v54 = vld [vmem:[%s3951_s0 + $0x138] ss:$52 sps:$4 sm:$0xff]  }
  0x10   :  { %2829 = vmatprep.subr.bf16.mxu1 %v2851_v8  ;;  %2426 = vmatprep.subr.bf16.mxu0 %v2851_v8  ;;  %v2881_v35 = vld [vmem:[%s3950_s1 + $0x128] sm:$0xff]   ;;  %v2895_v46 = vld [vmem:[%s3950_s1 + $0x118] sm:$0xff]   ;;  %v2896_v47 = vld [vmem:[%s3951_s0 + $0x270] ss:$52 sps:$4 sm:$0xff]  }
  0x11   :  { %v2887_v39 = vld [vmem:[%s3951_s0 + $0xd4] ss:$52 sps:$4 sm:$0xff]   ;;  %v2901_v51 = vld [vmem:[%s3951_s0 + $0x13c] ss:$52 sps:$4 sm:$0xff]   ;;  %v2908_v58 = vld [vmem:[%s3950_s1 + $0xc0] sm:$0xff]  }
  0x12   :  { %v2893_v40 = vld [vmem:[%s3951_s0 + $0x274] ss:$52 sps:$4 sm:$0xff]   ;;  %v2910_v59 = vld [vmem:[%s3950_s1 + $0x140] sm:$0xff]   ;;  %v2918_v2 = vld [vmem:[%s3950_s1 + $0x1f8] sm:$0xff]  }
  0x13   :  { %2837 = vmatpush3.bf16.msra.mxu1 %v2852_v9  ;;  %2427 = vmatpush3.bf16.msra.mxu0 %v2852_v9  ;;  %v2899_v49 = vld [vmem:[%s3950_s1 + $0x150] sm:$0xff]   ;;  %v2903_v53 = vld [vmem:[%s3950_s1 + $0xc8] sm:$0xff]   ;;  %v2909_v60 = vld [vmem:[%s3950_s1 + $0x80] sm:$0xff]  }
  0x14   :  { %2830 = vmatprep.subr.bf16.mxu1 %v2853_v10  ;;  %2428 = vmatprep.subr.bf16.mxu0 %v2853_v10  ;;  %v2898_v50 = vld [vmem:[%s3950_s1 + $0x90] sm:$0xff]   ;;  %v2906_v55 = vld [vmem:[%s3950_s1 + $0x148] sm:$0xff]   ;;  %v2911_v62 = vld [vmem:[%s3950_s1 + $0x100] sm:$0xff]  }
  0x15   :  { %v2900_v52 = vld [vmem:[%s3950_s1 + $0x110] sm:$0xff]   ;;  %v2905_v56 = vld [vmem:[%s3950_s1 + $0x88] sm:$0xff]   ;;  %v2919_v3 = vld [vmem:[%s3950_s1 + $0x1b8] sm:$0xff]  }
  0x16   :  { %v2907_v57 = vld [vmem:[%s3950_s1 + $0x108] sm:$0xff]   ;;  %v2915_v1 = vld [vmem:[%s3951_s0 + $0x10] ss:$52 sps:$4 sm:$0xff]   ;;  %v2920_v4 = vld [vmem:[%s3950_s1 + $0x278] sm:$0xff]  }
  0x17   :  { %2838 = vmatpush3.bf16.msra.mxu1 %v2854_v13  ;;  %2429 = vmatpush3.bf16.msra.mxu0 %v2854_v13  ;;  %v2914_v61 = vld [vmem:[%s3951_s0 + $0xc] ss:$52 sps:$4 sm:$0xff]   ;;  %v2917_v63 = vld [vmem:[%s3951_s0 + $0x14] ss:$52 sps:$4 sm:$0xff]   ;;  %v2924_v7 = vld [vmem:[%s3950_s1 + $0x238] sm:$0xff]  }
  0x18   :  { %2831 = vmatprep.subr.bf16.mxu1 %v2855_v14  ;;  %2430 = vmatprep.subr.bf16.mxu0 %v2855_v14  ;;  %v2912_v0 = vld [vmem:[%s3951_s0 + $0x8] ss:$52 sps:$4 sm:$0xff]   ;;  %v2923_v6 = vld [vmem:[%s3950_s1 + $0x1f0] sm:$0xff]   ;;  %v2929_v11 = vld [vmem:[%s3951_s0 + $0x78] ss:$52 sps:$4 sm:$0xff]  }
  0x19   :  { %v2921_v5 = vld [vmem:[%s3951_s0 + $0x74] ss:$52 sps:$4 sm:$0xff]   ;;  %v2926_v8 = vld [vmem:[%s3951_s0 + $0x7c] ss:$52 sps:$4 sm:$0xff]  }
  0x1a   :  { %v2925_v9 = vld [vmem:[%s3951_s0 + $0x70] ss:$52 sps:$4 sm:$0xff]   ;;  %v2931_v13 = vld [vmem:[%s3950_s1 + $0x1e8] sm:$0xff]  }
  0x1b   :  { %2839 = vmatpush3.bf16.msra.mxu1 %v2856_v15  ;;  %2431 = vmatpush3.bf16.msra.mxu0 %v2856_v15  ;;  %v2928_v10 = vld [vmem:[%s3950_s1 + $0x1b0] sm:$0xff]  }
  0x1c   :  { %2832 = vmatprep.subr.bf16.mxu1 %v2857_v16  ;;  %2432 = vmatprep.subr.bf16.mxu0 %v2857_v16  ;;  %v2930_v12 = vld [vmem:[%s3950_s1 + $0x270] sm:$0xff]   ;;  %v2935_v16 = vld [vmem:[%s3950_s1 + $0x1a8] sm:$0xff]  }
  0x1d   :  { %v2932_v14 = vld [vmem:[%s3950_s1 + $0x230] sm:$0xff]  }
  0x1e   :  { %v2933_v15 = vld [vmem:[%s3951_s0 + $0xdc] ss:$52 sps:$4 sm:$0xff]  }
  0x1f   :  { %2840 = vmatpush3.bf16.msra.mxu1 %v2858_v17  ;;  %2433 = vmatpush3.bf16.msra.mxu0 %v2858_v17  ;;  %v2937_v17 = vld [vmem:[%s3951_s0 + $0xe4] ss:$52 sps:$4 sm:$0xff]  }
  0x20   :  { %2476 = vmatprep.subr.bf16.mxu1 %v2865_v20  ;;  %2534 = vmatprep.subr.bf16.mxu0 %v2867_v21  ;;  %v2940_v20 = vld [vmem:[%s3950_s1 + $0x268] sm:$0xff]   ;;  %v2941_v21 = vld [vmem:[%s3950_s1 + $0x1e0] sm:$0xff]  }
  0x22   :  { %1479 = vmatmul.mubr.bf16.vlgmr.msra.gmra.mxu1 %v2859_v18  ;;  %1447 = vmatmul.mubr.bf16.vlgmr.msra.gmra.mxu0 %v2862_v19  ;;  %v2936_v18 = vld [vmem:[%s3951_s0 + $0xd8] ss:$52 sps:$4 sm:$0xff]   ;;  %v2939_v19 = vld [vmem:[%s3951_s0 + $0xe0] ss:$52 sps:$4 sm:$0xff]  }
  0x23   :  { %2477 = vmatpush3.bf16.msra.mxu1 %v2866_v22  ;;  %2535 = vmatpush3.bf16.msra.mxu0 %v2868_v23  ;;  %v2942_v22 = vld [vmem:[%s3950_s1 + $0x228] sm:$0xff]   ;;  %v2943_v23 = vld [vmem:[%s3950_s1 + $0x1a0] sm:$0xff]  }
  0x24   :  { %2478 = vmatprep.subr.bf16.mxu1 %v2869_v24  ;;  %2536 = vmatprep.subr.bf16.mxu0 %v2871_v25  ;;  %v2944_v24 = vld [vmem:[%s3951_s0 + $0x144] ss:$52 sps:$4 sm:$0xff]   ;;  %v2947_v25 = vld [vmem:[%s3951_s0 + $0x14c] ss:$52 sps:$4 sm:$0xff]  }
  0x25   :  { %1454 = vmatprep.mubr.bf16.mxu0 %v2873_v26  ;;  %1486 = vmatprep.mubr.bf16.mxu1 %v2879_v28  ;;  %v2950_v26 = vld [vmem:[%s3950_s1 + $0x260] sm:$0xff]  }
  0x26   :  { %v2946_v28 = vld [vmem:[%s3951_s0 + $0x140] ss:$52 sps:$4 sm:$0xff]  }
  0x27   :  { %2479 = vmatpush3.bf16.msra.mxu1 %v2870_v27  ;;  %2537 = vmatpush3.bf16.msra.mxu0 %v2872_v29  ;;  %v2951_v27 = vld [vmem:[%s3950_s1 + $0x1d8] sm:$0xff]   ;;  %v2952_v29 = vld [vmem:[%s3950_s1 + $0x220] sm:$0xff]  }
  0x28   :  { %2480 = vmatprep.subr.bf16.mxu1 %v2875_v30  ;;  %2538 = vmatprep.subr.bf16.mxu0 %v2878_v32  ;;  %v2953_v30 = vld [vmem:[%s3950_s1 + $0x198] sm:$0xff]   ;;  %v2954_v32 = vld [vmem:[%s3951_s0 + $0x1ac] ss:$52 sps:$4 sm:$0xff]  }
  0x2a   :  { %1455 = vmatmul.mubr.bf16.gmra.mxu0 %v2876_v31  ;;  %1487 = vmatmul.mubr.bf16.gmra.mxu1 %v2882_v34  ;;  %v2949_v31 = vld [vmem:[%s3951_s0 + $0x148] ss:$52 sps:$4 sm:$0xff]  }
  0x2b   :  { %2481 = vmatpush3.bf16.msra.mxu1 %v2877_v33  ;;  %2539 = vmatpush3.bf16.msra.mxu0 %v2881_v35  ;;  %v2957_v33 = vld [vmem:[%s3951_s0 + $0x1b4] ss:$52 sps:$4 sm:$0xff]   ;;  %v2960_v34 = vld [vmem:[%s3950_s1 + $0x258] sm:$0xff]  }
  0x2c   :  { %2482 = vmatprep.subr.bf16.mxu1 %v2883_v36  ;;  %2540 = vmatprep.subr.bf16.mxu0 %v2885_v37  ;;  %v2961_v35 = vld [vmem:[%s3950_s1 + $0x1d0] sm:$0xff]   ;;  %v2962_v36 = vld [vmem:[%s3950_s1 + $0x218] sm:$0xff]  }
  0x2d   :  { %1462 = vmatprep.mubr.bf16.mxu0 %v2887_v39  ;;  %1494 = vmatprep.mubr.bf16.mxu1 %v2893_v40  ;;  %v2963_v37 = vld [vmem:[%s3950_s1 + $0x190] sm:$0xff]  }
  0x2e   :  { %v2959_v39 = vld [vmem:[%s3951_s0 + $0x1b0] ss:$52 sps:$4 sm:$0xff]   ;;  %v2964_v40 = vld [vmem:[%s3951_s0 + $0x214] ss:$52 sps:$4 sm:$0xff]  }
  0x2f   :  { %2483 = vmatpush3.bf16.msra.mxu1 %v2884_v38  ;;  %2541 = vmatpush3.bf16.msra.mxu0 %v2886_v41  ;;  %v2956_v38 = vld [vmem:[%s3951_s0 + $0x1a8] ss:$52 sps:$4 sm:$0xff]  }
  0x30   :  { %2484 = vmatprep.subr.bf16.mxu1 %v2889_v42  ;;  %2542 = vmatprep.subr.bf16.mxu0 %v2892_v44  ;;  %v2967_v41 = vld [vmem:[%s3951_s0 + $0x21c] ss:$52 sps:$4 sm:$0xff]  }
  0x31   :  { %v2970_v42 = vld [vmem:[%s3950_s1 + $0x250] sm:$0xff]  }
  0x32   :  { %1463 = vmatmul.mubr.bf16.gmra.mxu0 %v2890_v43  ;;  %1495 = vmatmul.mubr.bf16.gmra.mxu1 %v2896_v47  ;;  %v2971_v43 = vld [vmem:[%s3950_s1 + $0x1c8] sm:$0xff]   ;;  %v2972_v44 = vld [vmem:[%s3950_s1 + $0x210] sm:$0xff]  }
  0x33   :  { %2485 = vmatpush3.bf16.msra.mxu1 %v2891_v45  ;;  %2543 = vmatpush3.bf16.msra.mxu0 %v2895_v46  ;;  %v2973_v45 = vld [vmem:[%s3950_s1 + $0x188] sm:$0xff]   ;;  %v2966_v46 = vld [vmem:[%s3951_s0 + $0x210] ss:$52 sps:$4 sm:$0xff]  }
  0x34   :  { %2486 = vmatprep.subr.bf16.mxu1 %v2897_v48  ;;  %2544 = vmatprep.subr.bf16.mxu0 %v2899_v49  ;;  %v2969_v47 = vld [vmem:[%s3951_s0 + $0x218] ss:$52 sps:$4 sm:$0xff]   ;;  %v2974_v48 = vld [vmem:[%s3951_s0 + $0x27c] ss:$52 sps:$4 sm:$0xff]  }
  0x35   :  { %1470 = vmatprep.mubr.bf16.mxu0 %v2901_v51  ;;  %1535 = vmatprep.mubr.bf16.mxu1 %v2914_v61  ;;  %v2977_v49 = vld [vmem:[%s3951_s0 + $0x284] ss:$52 sps:$4 sm:$0xff]   ;;  %v3080_v61 = vmov 0.0  }
  0x36   :  { %v2981_v51 = vld [vmem:[%s3950_s1 + $0x1c0] sm:$0xff]  }
  0x37   :  { %2487 = vmatpush3.bf16.msra.mxu1 %v2898_v50  ;;  %2545 = vmatpush3.bf16.msra.mxu0 %v2900_v52  ;;  %v2979_v50 = vld [vmem:[%s3950_s1 + $0x248] sm:$0xff]  }
  0x38   :  { %2488 = vmatprep.subr.bf16.mxu1 %v2903_v53  ;;  %2546 = vmatprep.subr.bf16.mxu0 %v2906_v55  ;;  %v2982_v52 = vld [vmem:[%s3950_s1 + $0x208] sm:$0xff]   ;;  %v2983_v53 = vld [vmem:[%s3950_s1 + $0x180] sm:$0xff]  }
  0x39   :  { %v2976_v55 = vld [vmem:[%s3951_s0 + $0x278] ss:$52 sps:$4 sm:$0xff]  }
  0x3a   :  { %1471 = vmatmul.mubr.bf16.gmra.mxu0 %v2904_v54  ;;  %v2984_v54 = vld [vmem:[%s3950_s1 + $0x240] sm:$0xff]  }
  0x3b   :  { %2489 = vmatpush3.bf16.msra.mxu1 %v2905_v56  ;;  %2547 = vmatpush3.bf16.msra.mxu0 %v2907_v57  ;;  %v2985_v56 = vld [vmem:[%s3950_s1 + $0x200] sm:$0xff]  }
  0x3c   :  { %2490 = vmatprep.subr.bf16.mxu1 %v2908_v58  ;;  %2548 = vmatprep.subr.bf16.mxu0 %v2910_v59  ;;  %v2980_v57 = vld [vmem:[%s3951_s0 + $0x280] ss:$52 sps:$4 sm:$0xff]   ;;  %v2988_v58 = vld [vmem:[%s3951_s0 + $0x1c] ss:$52 sps:$4 sm:$0xff]   ;;  %v2991_v59 = vld [vmem:[%s3951_s0 + $0x24] ss:$52 sps:$4 sm:$0xff]  }
  0x3d   :  { %1624 = vmatprep.mubr.bf16.mxu0 %v2917_v63  ;;  %v2989_v63 = vld [vmem:[%s3951_s0 + $0x20] ss:$52 sps:$4 sm:$0xff]  }
  0x3f   :  { %2491 = vmatpush3.bf16.msra.mxu1 %v2909_v60  ;;  %2549 = vmatpush3.bf16.msra.mxu0 %v2911_v62  ;;  %v2992_v60 = vld [vmem:[%s3950_s1 + $0x2f8] sm:$0xff]  }
  0x40   :  { %2592 = vmatprep.subr.bf16.mxu1 %v2918_v2  ;;  %2650 = vmatprep.subr.bf16.mxu0 %v2920_v4  ;;  %v2986_v62 = vld [vmem:[%s3951_s0 + $0x18] ss:$52 sps:$4 sm:$0xff]   ;;  %v2996_v2 = vld [vmem:[%s3950_s1 + $0x2f0] sm:$0xff]  }
  0x41   :  { %v2999_v4 = vld [vmem:[%s3951_s0 + $0x8c] ss:$52 sps:$4 sm:$0xff]  }
  0x42   :  { %1536 = vmatmul.mubr.bf16.vlgmr.msra.gmra.mxu1 %v2912_v0  ;;  %1625 = vmatmul.mubr.bf16.vlgmr.msra.gmra.mxu0 %v2915_v1  ;;  %v2993_v0 = vld [vmem:[%s3950_s1 + $0x2b8] sm:$0xff]  }
  0x43   :  { %2593 = vmatpush3.bf16.msra.mxu1 %v2919_v3  ;;  %1543 = vmatprep.mubr.bf16.mxu1 %v2921_v5  ;;  %v2994_v1 = vld [vmem:[%s3951_s0 + $0x84] ss:$52 sps:$4 sm:$0xff]   ;;  %v3001_v5 = vld [vmem:[%s3950_s1 + $0x2b0] sm:$0xff]  }
  0x44   :  { %2594 = vmatprep.subr.bf16.mxu1 %v2923_v6  ;;  %2651 = vmatpush3.bf16.msra.mxu0 %v2924_v7  ;;  %v2997_v3 = vld [vmem:[%s3950_s1 + $0x338] sm:$0xff]   ;;  %v3003_v6 = vld [vmem:[%s3950_s1 + $0x2e8] sm:$0xff]   ;;  %v2998_v7 = vld [vmem:[%s3951_s0 + $0x80] ss:$52 sps:$4 sm:$0xff]  }
  0x45   :  { %1632 = vmatprep.mubr.bf16.mxu0 %v2926_v8  ;;  %2652 = vmatprep.subr.bf16.mxu0 %v2930_v12  ;;  %v3002_v8 = vld [vmem:[%s3951_s0 + $0x88] ss:$52 sps:$4 sm:$0xff]  }
  0x46   :  { %v3009_v12 = vld [vmem:[%s3951_s0 + $0xf4] ss:$52 sps:$4 sm:$0xff]  }
  0x47   :  { %2595 = vmatpush3.bf16.msra.mxu1 %v2928_v10  ;;  %v3005_v10 = vld [vmem:[%s3951_s0 + $0xec] ss:$52 sps:$4 sm:$0xff]  }
  0x48   :  { %2596 = vmatprep.subr.bf16.mxu1 %v2931_v13  ;;  %2653 = vmatpush3.bf16.msra.mxu0 %v2932_v14  ;;  %v3012_v13 = vld [vmem:[%s3950_s1 + $0x2e0] sm:$0xff]   ;;  %v3013_v14 = vld [vmem:[%s3950_s1 + $0x328] sm:$0xff]  }
  0x49   :  { %2654 = vmatprep.subr.bf16.mxu0 %v2940_v20  ;;  %v3022_v20 = vld [vmem:[%s3950_s1 + $0x320] sm:$0xff]  }
  0x4a   :  { %1544 = vmatmul.mubr.bf16.gmra.mxu1 %v2925_v9  ;;  %1633 = vmatmul.mubr.bf16.gmra.mxu0 %v2929_v11  ;;  %v3004_v9 = vld [vmem:[%s3950_s1 + $0x330] sm:$0xff]   ;;  %v3007_v11 = vld [vmem:[%s3950_s1 + $0x2a8] sm:$0xff]  }
  0x4b   :  { %1551 = vmatprep.mubr.bf16.mxu1 %v2933_v15  ;;  %2597 = vmatpush3.bf16.msra.mxu1 %v2935_v16  ;;  %v3014_v15 = vld [vmem:[%s3950_s1 + $0x2a0] sm:$0xff]   ;;  %v3008_v16 = vld [vmem:[%s3951_s0 + $0xe8] ss:$52 sps:$4 sm:$0xff]  }
  0x4c   :  { %1640 = vmatprep.mubr.bf16.mxu0 %v2937_v17  ;;  %2598 = vmatprep.subr.bf16.mxu1 %v2941_v21  ;;  %v3011_v17 = vld [vmem:[%s3951_s0 + $0xf0] ss:$52 sps:$4 sm:$0xff]  }
  0x4d   :  { %2655 = vmatpush3.bf16.msra.mxu0 %v2942_v22  ;;  %v3018_v21 = vld [vmem:[%s3951_s0 + $0x15c] ss:$52 sps:$4 sm:$0xff]  }
  0x4e   :  { %2656 = vmatprep.subr.bf16.mxu0 %v2950_v26  ;;  %v3023_v22 = vld [vmem:[%s3950_s1 + $0x298] sm:$0xff]  }
  0x4f   :  { %2599 = vmatpush3.bf16.msra.mxu1 %v2943_v23  ;;  %v3030_v23 = vld [vmem:[%s3950_s1 + $0x2d0] sm:$0xff]   ;;  %v3020_v26 = vld [vmem:[%s3951_s0 + $0x158] ss:$52 sps:$4 sm:$0xff]  }
  0x50   :  { %2600 = vmatprep.subr.bf16.mxu1 %v2951_v27  ;;  %v3032_v27 = vld [vmem:[%s3950_s1 + $0x290] sm:$0xff]  }
  0x51   :  { %2657 = vmatpush3.bf16.msra.mxu0 %v2952_v29  ;;  %v3039_v29 = vld [vmem:[%s3950_s1 + $0x2c8] sm:$0xff]  }
  0x52   :  { %1552 = vmatmul.mubr.bf16.gmra.mxu1 %v2936_v18  ;;  %1641 = vmatmul.mubr.bf16.gmra.mxu0 %v2939_v19  ;;  %v3021_v18 = vld [vmem:[%s3950_s1 + $0x2d8] sm:$0xff]   ;;  %v3015_v19 = vld [vmem:[%s3951_s0 + $0x154] ss:$52 sps:$4 sm:$0xff]  }
  0x53   :  { %1559 = vmatprep.mubr.bf16.mxu1 %v2944_v24  ;;  %1648 = vmatprep.mubr.bf16.mxu0 %v2947_v25  ;;  %v3031_v24 = vld [vmem:[%s3950_s1 + $0x318] sm:$0xff]   ;;  %v3017_v25 = vld [vmem:[%s3951_s0 + $0x150] ss:$52 sps:$4 sm:$0xff]  }
  0x54   :  { %2601 = vmatpush3.bf16.msra.mxu1 %v2953_v30  ;;  %2658 = vmatprep.subr.bf16.mxu0 %v2960_v34  ;;  %v3040_v30 = vld [vmem:[%s3950_s1 + $0x310] sm:$0xff]   ;;  %v3026_v34 = vld [vmem:[%s3951_s0 + $0x1b8] ss:$52 sps:$4 sm:$0xff]  }
  0x55   :  { %2602 = vmatprep.subr.bf16.mxu1 %v2961_v35  ;;  %2659 = vmatpush3.bf16.msra.mxu0 %v2962_v36  ;;  %v3049_v35 = vld [vmem:[%s3950_s1 + $0x308] sm:$0xff]   ;;  %v3050_v36 = vld [vmem:[%s3950_s1 + $0x280] sm:$0xff]  }
  0x56   :  { %2660 = vmatprep.subr.bf16.mxu0 %v2970_v42  ;;  %v3038_v42 = vld [vmem:[%s3951_s0 + $0x228] ss:$52 sps:$4 sm:$0xff]  }
  0x58   :  { %2603 = vmatpush3.bf16.msra.mxu1 %v2963_v37  ;;  %v3029_v37 = vld [vmem:[%s3951_s0 + $0x1c0] ss:$52 sps:$4 sm:$0xff]  }
  0x59   :  { %2604 = vmatprep.subr.bf16.mxu1 %v2971_v43  ;;  %2661 = vmatpush3.bf16.msra.mxu0 %v2972_v44  ;;  %v3042_v43 = vld [vmem:[%s3951_s0 + $0x28c] ss:$52 sps:$4 sm:$0xff]   ;;  %v3045_v44 = vld [vmem:[%s3951_s0 + $0x294] ss:$52 sps:$4 sm:$0xff]  }
  0x5a   :  { %1560 = vmatmul.mubr.bf16.gmra.mxu1 %v2946_v28  ;;  %1649 = vmatmul.mubr.bf16.gmra.mxu0 %v2949_v31  ;;  %v3024_v28 = vld [vmem:[%s3951_s0 + $0x1bc] ss:$52 sps:$4 sm:$0xff]   ;;  %v3027_v31 = vld [vmem:[%s3951_s0 + $0x1c4] ss:$52 sps:$4 sm:$0xff]  }
  0x5b   :  { %1567 = vmatprep.mubr.bf16.mxu1 %v2954_v32  ;;  %1656 = vmatprep.mubr.bf16.mxu0 %v2957_v33  ;;  %v3041_v32 = vld [vmem:[%s3950_s1 + $0x288] sm:$0xff]   ;;  %v3048_v33 = vld [vmem:[%s3950_s1 + $0x2c0] sm:$0xff]  }
  0x5c   :  { %2605 = vmatpush3.bf16.msra.mxu1 %v2973_v45  ;;  %2662 = vmatprep.subr.bf16.mxu0 %v2979_v50  ;;  %v3044_v45 = vld [vmem:[%s3951_s0 + $0x288] ss:$52 sps:$4 sm:$0xff]  }
  0x5d   :  { %2606 = vmatprep.subr.bf16.mxu1 %v2981_v51  ;;  %2663 = vmatpush3.bf16.msra.mxu0 %v2982_v52  ;;  %v3056_v50 = vld [vmem:[%s3951_s0 + $0x94] ss:$52 sps:$4 sm:$0xff]   ;;  %v3058_v51 = vld [vmem:[%s3951_s0 + $0x90] ss:$52 sps:$4 sm:$0xff]   ;;  %v3059_v52 = vld [vmem:[%s3951_s0 + $0x98] ss:$52 sps:$4 sm:$0xff]  }
  0x5e   :  { %2664 = vmatprep.subr.bf16.mxu0 %v2984_v54  ;;  %v3062_v54 = vld [vmem:[%s3951_s0 + $0xf8] ss:$52 sps:$4 sm:$0xff]  }
  0x60   :  { %2607 = vmatpush3.bf16.msra.mxu1 %v2983_v53  ;;  %v3060_v53 = vld [vmem:[%s3951_s0 + $0xfc] ss:$52 sps:$4 sm:$0xff]  }
  0x61   :  { %2665 = vmatpush3.bf16.msra.mxu0 %v2985_v56  ;;  %2708 = vmatprep.subr.bf16.mxu1 %v2992_v60  ;;  %v3064_v56 = vld [vmem:[%s3951_s0 + $0x164] ss:$52 sps:$4 sm:$0xff]   ;;  %v3070_v60 = vld [vmem:[%s3951_s0 + $0x1c8] ss:$52 sps:$4 sm:$0xff]  }
  0x62   :  { %1568 = vmatmul.mubr.bf16.gmra.mxu1 %v2956_v38  ;;  %1657 = vmatmul.mubr.bf16.gmra.mxu0 %v2959_v39  ;;  %v3033_v38 = vld [vmem:[%s3951_s0 + $0x224] ss:$52 sps:$4 sm:$0xff]   ;;  %v3036_v39 = vld [vmem:[%s3951_s0 + $0x22c] ss:$52 sps:$4 sm:$0xff]  }
  0x63   :  { %1575 = vmatprep.mubr.bf16.mxu1 %v2964_v40  ;;  %1664 = vmatprep.mubr.bf16.mxu0 %v2967_v41  ;;  %v3051_v40 = vld [vmem:[%s3950_s1 + $0x300] sm:$0xff]  }
  0x64   :  { %2781 = vmatprep.subr.bf16.mxu0 %v3080_v61  ;;  %v3035_v41 = vld [vmem:[%s3951_s0 + $0x220] ss:$52 sps:$4 sm:$0xff]  }
  0x6a   :  { %1576 = vmatmul.mubr.bf16.gmra.mxu1 %v2966_v46  ;;  %1665 = vmatmul.mubr.bf16.gmra.mxu0 %v2969_v47  ;;  %v3047_v46 = vld [vmem:[%s3951_s0 + $0x290] ss:$52 sps:$4 sm:$0xff]   ;;  %v3054_v47 = vld [vmem:[%s3951_s0 + $0x2c] ss:$52 sps:$4 sm:$0xff]  }
  0x6b   :  { %1583 = vmatprep.mubr.bf16.mxu1 %v2974_v48  ;;  %1672 = vmatprep.mubr.bf16.mxu0 %v2977_v49  ;;  %v3052_v48 = vld [vmem:[%s3951_s0 + $0x28] ss:$52 sps:$4 sm:$0xff]   ;;  %v3055_v49 = vld [vmem:[%s3951_s0 + $0x30] ss:$52 sps:$4 sm:$0xff]  }
  0x72   :  { %1584 = vmatmul.mubr.bf16.gmra.mxu1 %v2976_v55  ;;  %1673 = vmatmul.mubr.bf16.gmra.mxu0 %v2980_v57  ;;  %v3063_v55 = vld [vmem:[%s3951_s0 + $0x100] ss:$52 sps:$4 sm:$0xff]  }
  0x73   :  { %1713 = vmatprep.mubr.bf16.mxu1 %v2988_v58  ;;  %1802 = vmatprep.mubr.bf16.mxu0 %v2991_v59  ;;  %v3066_v57 = vld [vmem:[%s3951_s0 + $0x160] ss:$52 sps:$4 sm:$0xff]   ;;  %v3067_v58 = vld [vmem:[%s3951_s0 + $0x168] ss:$52 sps:$4 sm:$0xff]  }
  0x74   :  { %v3068_v59 = vld [vmem:[%s3951_s0 + $0x1cc] ss:$52 sps:$4 sm:$0xff]  }
  0x7a   :  { %1714 = vmatmul.mubr.bf16.vlgmr.msra.gmra.mxu1 %v2986_v62  ;;  %1803 = vmatmul.mubr.bf16.vlgmr.msra.gmra.mxu0 %v2989_v63  ;;  %v3071_v62 = vld [vmem:[%s3951_s0 + $0x1d0] ss:$52 sps:$4 sm:$0xff]   ;;  %v3072_v63 = vld [vmem:[%s3951_s0 + $0x234] ss:$52 sps:$4 sm:$0xff]  }
  0x7b   :  { %2709 = vmatpush3.bf16.msra.mxu1 %v2993_v0  ;;  %1721 = vmatprep.mubr.bf16.mxu1 %v2994_v1  ;;  %v3074_v0 = vld [vmem:[%s3951_s0 + $0x230] ss:$52 sps:$4 sm:$0xff]   ;;  %v3075_v1 = vld [vmem:[%s3951_s0 + $0x238] ss:$52 sps:$4 sm:$0xff]  }
  0x7c   :  { %2710 = vmatprep.subr.bf16.mxu1 %v2996_v2  ;;  %2782 = vmatpush3.bf16.msra.mxu0 %v2997_v3  ;;  %v3076_v2 = vld [vmem:[%s3951_s0 + $0x29c] ss:$52 sps:$4 sm:$0xff]   ;;  %v3078_v3 = vld [vmem:[%s3951_s0 + $0x298] ss:$52 sps:$4 sm:$0xff]  }
  0x7d   :  { %1810 = vmatprep.mubr.bf16.mxu0 %v2999_v4  ;;  %2783 = vmatprep.subr.bf16.mxu0 %v3080_v61  ;;  %v3079_v4 = vld [vmem:[%s3951_s0 + $0x2a0] ss:$52 sps:$4 sm:$0xff]  }
  0x7f   :  { %2711 = vmatpush3.bf16.msra.mxu1 %v3001_v5 }
  0x80   :  { %2712 = vmatprep.subr.bf16.mxu1 %v3003_v6  ;;  %2784 = vmatpush3.bf16.msra.mxu0 %v3004_v9 }
  0x81   :  { %2785 = vmatprep.subr.bf16.mxu0 %v3080_v61 }
  0x82   :  { %1722 = vmatmul.mubr.bf16.gmra.mxu1 %v2998_v7  ;;  %1811 = vmatmul.mubr.bf16.gmra.mxu0 %v3002_v8 }
  0x83   :  { %1729 = vmatprep.mubr.bf16.mxu1 %v3005_v10  ;;  %2713 = vmatpush3.bf16.msra.mxu1 %v3007_v11 }
  0x84   :  { %1818 = vmatprep.mubr.bf16.mxu0 %v3009_v12  ;;  %2714 = vmatprep.subr.bf16.mxu1 %v3012_v13 }
  0x85   :  { %2786 = vmatpush3.bf16.msra.mxu0 %v3013_v14 }
  0x86   :  { %2787 = vmatprep.subr.bf16.mxu0 %v3080_v61 }
  0x87   :  { %2715 = vmatpush3.bf16.msra.mxu1 %v3014_v15 }
  0x88   :  { %2716 = vmatprep.subr.bf16.mxu1 %v3021_v18 }
  0x89   :  { %2788 = vmatpush3.bf16.msra.mxu0 %v3022_v20 }
  0x8a   :  { %1730 = vmatmul.mubr.bf16.gmra.mxu1 %v3008_v16  ;;  %1819 = vmatmul.mubr.bf16.gmra.mxu0 %v3011_v17 }
  0x8b   :  { %1737 = vmatprep.mubr.bf16.mxu1 %v3015_v19  ;;  %1826 = vmatprep.mubr.bf16.mxu0 %v3018_v21 }
  0x8c   :  { %2717 = vmatpush3.bf16.msra.mxu1 %v3023_v22  ;;  %2789 = vmatprep.subr.bf16.mxu0 %v3080_v61 }
  0x8d   :  { %2718 = vmatprep.subr.bf16.mxu1 %v3030_v23  ;;  %2790 = vmatpush3.bf16.msra.mxu0 %v3031_v24 }
  0x8e   :  { %2791 = vmatprep.subr.bf16.mxu0 %v3080_v61 }
  0x90   :  { %2719 = vmatpush3.bf16.msra.mxu1 %v3032_v27 }
  0x91   :  { %2720 = vmatprep.subr.bf16.mxu1 %v3039_v29  ;;  %2792 = vmatpush3.bf16.msra.mxu0 %v3040_v30 }
  0x92   :  { %1738 = vmatmul.mubr.bf16.gmra.mxu1 %v3017_v25  ;;  %1827 = vmatmul.mubr.bf16.gmra.mxu0 %v3020_v26 }
  0x93   :  { %1745 = vmatprep.mubr.bf16.mxu1 %v3024_v28  ;;  %1834 = vmatprep.mubr.bf16.mxu0 %v3027_v31 }
  0x94   :  { %2721 = vmatpush3.bf16.msra.mxu1 %v3041_v32  ;;  %2793 = vmatprep.subr.bf16.mxu0 %v3080_v61 }
  0x95   :  { %2722 = vmatprep.subr.bf16.mxu1 %v3048_v33  ;;  %2794 = vmatpush3.bf16.msra.mxu0 %v3049_v35 }
  0x96   :  { %2795 = vmatprep.subr.bf16.mxu0 %v3080_v61 }
  0x98   :  { %2723 = vmatpush3.bf16.msra.mxu1 %v3050_v36 }
  0x99   :  { %2796 = vmatpush3.bf16.msra.mxu0 %v3051_v40 }
  0x9a   :  { %1746 = vmatmul.mubr.bf16.gmra.mxu1 %v3026_v34  ;;  %1835 = vmatmul.mubr.bf16.gmra.mxu0 %v3029_v37 }
  0x9b   :  { %1753 = vmatprep.mubr.bf16.mxu1 %v3033_v38  ;;  %1842 = vmatprep.mubr.bf16.mxu0 %v3036_v39 }
  0xa2   :  { %1754 = vmatmul.mubr.bf16.gmra.mxu1 %v3035_v41  ;;  %1843 = vmatmul.mubr.bf16.gmra.mxu0 %v3038_v42 }
  0xa3   :  { %1761 = vmatprep.mubr.bf16.mxu1 %v3042_v43  ;;  %1850 = vmatprep.mubr.bf16.mxu0 %v3045_v44 }
  0xaa   :  { %1762 = vmatmul.mubr.bf16.gmra.mxu1 %v3044_v45  ;;  %1851 = vmatmul.mubr.bf16.gmra.mxu0 %v3047_v46 }
  0xab   :  { %1891 = vmatprep.mubr.bf16.mxu1 %v3054_v47  ;;  %2797 = vmatprep.mubr.msk.bf16.mxu0 %vm3081_vm0, %v3080_v61 }
  0xb2   :  { %1892 = vmatmul.mubr.bf16.vlgmr.msra.gmra.mxu1 %v3052_v48  ;;  %2798 = vmatmul.mubr.bf16.vlgmr.msra.gmra.mxu0 %v3055_v49  ;;  %v3728_v48 = vld [vmem:[%s3952_s2] ss:$0 sm:$0xff] }
  0xb3   :  { %1899 = vmatprep.mubr.bf16.mxu1 %v3056_v50  ;;  %2801 = vmatprep.mubr.msk.bf16.mxu0 %vm3081_vm0, %v3080_v61 }
  0xba   :  { %1900 = vmatmul.mubr.bf16.gmra.mxu1 %v3058_v51  ;;  %2802 = vmatmul.mubr.bf16.gmra.mxu0 %v3059_v52 }
  0xbb   :  { %1907 = vmatprep.mubr.bf16.mxu1 %v3060_v53  ;;  %2805 = vmatprep.mubr.msk.bf16.mxu0 %vm3081_vm0, %v3080_v61 }
  0xc2   :  { %1908 = vmatmul.mubr.bf16.gmra.mxu1 %v3062_v54  ;;  %2806 = vmatmul.mubr.bf16.gmra.mxu0 %v3063_v55 }
  0xc3   :  { %1915 = vmatprep.mubr.bf16.mxu1 %v3064_v56  ;;  %2809 = vmatprep.mubr.msk.bf16.mxu0 %vm3081_vm0, %v3080_v61 }
  0xca   :  { %1916 = vmatmul.mubr.bf16.gmra.mxu1 %v3066_v57  ;;  %2810 = vmatmul.mubr.bf16.gmra.mxu0 %v3067_v58 }
  0xcb   :  { %1923 = vmatprep.mubr.bf16.mxu1 %v3068_v59  ;;  %2813 = vmatprep.mubr.msk.bf16.mxu0 %vm3081_vm0, %v3080_v61 }
  0xd2   :  { %1924 = vmatmul.mubr.bf16.gmra.mxu1 %v3070_v60  ;;  %2814 = vmatmul.mubr.bf16.gmra.mxu0 %v3071_v62 }
  0xd3   :  { %1931 = vmatprep.mubr.bf16.mxu1 %v3072_v63  ;;  %2817 = vmatprep.mubr.msk.bf16.mxu0 %vm3081_vm0, %v3080_v61 }
  0xda   :  { %1932 = vmatmul.mubr.bf16.gmra.mxu1 %v3074_v0  ;;  %2818 = vmatmul.mubr.bf16.gmra.mxu0 %v3075_v1 }
  0xdb   :  { %1939 = vmatprep.mubr.bf16.mxu1 %v3076_v2  ;;  %2821 = vmatprep.mubr.msk.bf16.mxu0 %vm3081_vm0, %v3080_v61 }
  0xe2   :  { %v2458_v5 = vpop.f32.mrf.mxu1  ;;  %1940 = vmatmul.mubr.bf16.gmra.mxu1 %v3078_v3  ;;  %v2434_v6 = vpop.f32.mrf.mxu0  ;;  %2822 = vmatmul.mubr.bf16.gmra.mxu0 %v3079_v4 }
  0xe4   :  { %v2459_v7 = vpop.f32.mrf.mxu1  ;;  %v2435_v8 = vpop.f32.mrf.mxu0 }
  0xe5   :  { %v3709_v9 = vadd.f32 %v2459_v7, %v2458_v5  ;;  %v2436_v10 = vadd.f32 %v2435_v8, %v2434_v6 }
  0xe6   :  { %v2461_v11 = vpop.f32.mrf.mxu1  ;;  %v2437_v12 = vpop.f32.mrf.mxu0 }
  0xe7   :  { %v1449_v51 = vadd.f32 %v2436_v10, %v3728_v48 }
  0xe8   :  { %v2462_v61 = vpop.f32.mrf.mxu1  ;;  %v2438_v13 = vpop.f32.mrf.mxu0 }
  0xe9   :  { %v3711_v14 = vadd.f32 %v2462_v61, %v2461_v11  ;;  %v2439_v15 = vadd.f32 %v2438_v13, %v2437_v12 }
  0xea   :  { %v2440_v16 = vpop.f32.mrf.mxu0  ;;  %v2464_v17 = vpop.f32.mrf.mxu1 }
  0xeb   :  { %v1452_v59 = vadd.f32 %v2439_v15, %v3728_v48 }
  0xec   :  { %v2441_v18 = vpop.f32.mrf.mxu0  ;;  %v2465_v19 = vpop.f32.mrf.mxu1 }
  0xed   :  { %v2442_v20 = vadd.f32 %v2441_v18, %v2440_v16  ;;  %v3713_v21 = vadd.f32 %v2465_v19, %v2464_v17 }
  0xee   :  { %v2443_v22 = vpop.f32.mrf.mxu0  ;;  %v2467_v23 = vpop.f32.mrf.mxu1 }
  0xef   :  { %v1457_v5 = vadd.f32 %v2442_v20, %v3728_v48 }
  0xf0   :  { %v2444_v24 = vpop.f32.mrf.mxu0  ;;  %v2468_v25 = vpop.f32.mrf.mxu1 }
  0xf1   :  { %v2445_v26 = vadd.f32 %v2444_v24, %v2443_v22  ;;  %v3715_v27 = vadd.f32 %v2468_v25, %v2467_v23 }
  0xf2   :  { %v2446_v28 = vpop.f32.mrf.mxu0  ;;  %v2470_v29 = vpop.f32.mrf.mxu1 }
  0xf3   :  { %v1460_v15 = vadd.f32 %v2445_v26, %v3728_v48 }
  0xf4   :  { %v2447_v30 = vpop.f32.mrf.mxu0  ;;  %v2471_v31 = vpop.f32.mrf.mxu1 }
  0xf5   :  { %v2448_v32 = vadd.f32 %v2447_v30, %v2446_v28  ;;  %v3717_v33 = vadd.f32 %v2471_v31, %v2470_v29 }
  0xf6   :  { %v2449_v34 = vpop.f32.mrf.mxu0  ;;  %v2473_v35 = vpop.f32.mrf.mxu1 }
  0xf7   :  { %v1465_v25 = vadd.f32 %v2448_v32, %v3728_v48 }
  0xf8   :  { %v2450_v36 = vpop.f32.mrf.mxu0  ;;  %v2474_v37 = vpop.f32.mrf.mxu1 }
  0xf9   :  { %v2451_v38 = vadd.f32 %v2450_v36, %v2449_v34  ;;  %v3719_v39 = vadd.f32 %v2474_v37, %v2473_v35 }
  0xfa   :  { %v2452_v40 = vpop.f32.mrf.mxu0 }
  0xfb   :  { %v1468_v37 = vadd.f32 %v2451_v38, %v3728_v48 }
  0xfc   :  { %v2453_v41 = vpop.f32.mrf.mxu0 }
  0xfd   :  { %v3721_v42 = vadd.f32 %v2453_v41, %v2452_v40 }
  0xfe   :  { %v2455_v43 = vpop.f32.mrf.mxu0 }
 0x100   :  { %v2456_v44 = vpop.f32.mrf.mxu0 }
 0x101   :  { %v3723_v45 = vadd.f32 %v2456_v44, %v2455_v43 }
 0x102   :  { %v2492_v46 = vpop.f32.mrf.mxu1  ;;  %v2550_v47 = vpop.f32.mrf.mxu0 }
 0x104   :  { %v2493_v49 = vpop.f32.mrf.mxu1  ;;  %v2551_v50 = vpop.f32.mrf.mxu0 }
 0x105   :  { %v2494_v52 = vadd.f32 %v2493_v49, %v2492_v46  ;;  %v2552_v53 = vadd.f32 %v2551_v50, %v2550_v47  ;;  %v1473_v50 = vadd.f32 %v3721_v42, %v3728_v48 }
 0x106   :  { %v2495_v54 = vpop.f32.mrf.mxu1  ;;  %v2553_v55 = vpop.f32.mrf.mxu0 }
 0x107   :  { %v1538_v56 = vadd.f32 %v2494_v52, %v1449_v51 }
 0x108   :  { %v2496_v57 = vpop.f32.mrf.mxu1  ;;  %v2554_v58 = vpop.f32.mrf.mxu0 }
 0x109   :  { %v3732_v60 = vadd.f32 %v2552_v53, %v1538_v56  ;;  %v2497_v62 = vadd.f32 %v2496_v57, %v2495_v54  ;;  %v2555_v63 = vadd.f32 %v2554_v58, %v2553_v55  ;;  %v1476_v58 = vadd.f32 %v3723_v45, %v3728_v48 }
 0x10a   :  { %v2498_v0 = vpop.f32.mrf.mxu1  ;;  %v2556_v1 = vpop.f32.mrf.mxu0 }
 0x10b   :  { %v1541_v2 = vadd.f32 %v2497_v62, %v1452_v59 }
 0x10c   :  { %v2499_v3 = vpop.f32.mrf.mxu1  ;;  %v2557_v4 = vpop.f32.mrf.mxu0 }
 0x10d   :  { %v3735_v6 = vadd.f32 %v2555_v63, %v1541_v2  ;;  %v2500_v7 = vadd.f32 %v2499_v3, %v2498_v0  ;;  %v2558_v8 = vadd.f32 %v2557_v4, %v2556_v1  ;;  %v1481_v4 = vadd.f32 %v3709_v9, %v3728_v48 }
 0x10e   :  { %v2501_v10 = vpop.f32.mrf.mxu1  ;;  %v2559_v11 = vpop.f32.mrf.mxu0 }
 0x10f   :  { %v1546_v12 = vadd.f32 %v2500_v7, %v1457_v5 }
 0x110   :  { %v2502_v61 = vpop.f32.mrf.mxu1  ;;  %v2560_v13 = vpop.f32.mrf.mxu0 }
 0x111   :  { %v3738_v16 = vadd.f32 %v2558_v8, %v1546_v12  ;;  %v2503_v17 = vadd.f32 %v2502_v61, %v2501_v10  ;;  %v2561_v18 = vadd.f32 %v2560_v13, %v2559_v11  ;;  %v1484_v13 = vadd.f32 %v3711_v14, %v3728_v48 }
 0x112   :  { %v2504_v19 = vpop.f32.mrf.mxu1  ;;  %v2562_v22 = vpop.f32.mrf.mxu0 }
 0x113   :  { %v1549_v23 = vadd.f32 %v2503_v17, %v1460_v15 }
 0x114   :  { %v2505_v24 = vpop.f32.mrf.mxu1  ;;  %v2563_v20 = vpop.f32.mrf.mxu0 }
 0x115   :  { %v3741_v28 = vadd.f32 %v2561_v18, %v1549_v23  ;;  %v2506_v29 = vadd.f32 %v2505_v24, %v2504_v19  ;;  %v2564_v30 = vadd.f32 %v2563_v20, %v2562_v22  ;;  %v1489_v20 = vadd.f32 %v3713_v21, %v3728_v48 }
 0x116   :  { %v2507_v31 = vpop.f32.mrf.mxu1  ;;  %v2565_v34 = vpop.f32.mrf.mxu0 }
 0x117   :  { %v1554_v35 = vadd.f32 %v2506_v29, %v1465_v25 }
 0x118   :  { %v2508_v36 = vpop.f32.mrf.mxu1  ;;  %v2566_v26 = vpop.f32.mrf.mxu0 }
 0x119   :  { %v3744_v40 = vadd.f32 %v2564_v30, %v1554_v35  ;;  %v2509_v41 = vadd.f32 %v2508_v36, %v2507_v31  ;;  %v2567_v43 = vadd.f32 %v2566_v26, %v2565_v34  ;;  %v1492_v26 = vadd.f32 %v3715_v27, %v3728_v48 }
 0x11a   :  { %v2510_v44 = vpop.f32.mrf.mxu1  ;;  %v2568_v46 = vpop.f32.mrf.mxu0 }
 0x11b   :  { %v1557_v47 = vadd.f32 %v2509_v41, %v1468_v37 }
 0x11c   :  { %v2511_v49 = vpop.f32.mrf.mxu1  ;;  %v2569_v32 = vpop.f32.mrf.mxu0 }
 0x11d   :  { %v3748_v51 = vadd.f32 %v2567_v43, %v1557_v47  ;;  %v2512_v52 = vadd.f32 %v2511_v49, %v2510_v44  ;;  %v2570_v53 = vadd.f32 %v2569_v32, %v2568_v46  ;;  %v1497_v32 = vadd.f32 %v3717_v33, %v3728_v48 }
 0x11e   :  { %v2513_v54 = vpop.f32.mrf.mxu1  ;;  %v2571_v55 = vpop.f32.mrf.mxu0 }
 0x11f   :  { %v1562_v56 = vadd.f32 %v2512_v52, %v1473_v50 }
 0x120   :  { %v2514_v38 = vpop.f32.mrf.mxu1  ;;  %v2572_v57 = vpop.f32.mrf.mxu0 }
 0x121   :  { %v3752_v59 = vadd.f32 %v2570_v53, %v1562_v56  ;;  %v2515_v62 = vadd.f32 %v2514_v38, %v2513_v54  ;;  %v2573_v63 = vadd.f32 %v2572_v57, %v2571_v55  ;;  %v1500_v57 = vadd.f32 %v3719_v39, %v3728_v48 }
 0x122   :  { %v2516_v0 = vpop.f32.mrf.mxu1  ;;  %v2574_v1 = vpop.f32.mrf.mxu0 }
 0x123   :  { %v1565_v2 = vadd.f32 %v2515_v62, %v1476_v58 }
 0x124   :  { %v2517_v42 = vpop.f32.mrf.mxu1  ;;  %v2575_v3 = vpop.f32.mrf.mxu0 }
 0x125   :  { %v3756_v5 = vadd.f32 %v2573_v63, %v1565_v2  ;;  %v2518_v7 = vadd.f32 %v2517_v42, %v2516_v0  ;;  %v2576_v8 = vadd.f32 %v2575_v3, %v2574_v1 }
 0x126   :  { %v2519_v10 = vpop.f32.mrf.mxu1  ;;  %v2577_v11 = vpop.f32.mrf.mxu0 }
 0x127   :  { %v1570_v12 = vadd.f32 %v2518_v7, %v1481_v4 }
 0x128   :  { %v2520_v45 = vpop.f32.mrf.mxu1  ;;  %v2578_v61 = vpop.f32.mrf.mxu0 }
 0x129   :  { %v3760_v15 = vadd.f32 %v2576_v8, %v1570_v12  ;;  %v2521_v17 = vadd.f32 %v2520_v45, %v2519_v10  ;;  %v2579_v18 = vadd.f32 %v2578_v61, %v2577_v11 }
 0x12a   :  { %v2522_v19 = vpop.f32.mrf.mxu1  ;;  %v2580_v22 = vpop.f32.mrf.mxu0 }
 0x12b   :  { %v1573_v23 = vadd.f32 %v2521_v17, %v1484_v13 }
 0x12c   :  { %v2523_v9 = vpop.f32.mrf.mxu1  ;;  %v2581_v24 = vpop.f32.mrf.mxu0 }
 0x12d   :  { %v3764_v25 = vadd.f32 %v2579_v18, %v1573_v23  ;;  %v2524_v29 = vadd.f32 %v2523_v9, %v2522_v19  ;;  %v2582_v30 = vadd.f32 %v2581_v24, %v2580_v22 }
 0x12e   :  { %v2525_v31 = vpop.f32.mrf.mxu1  ;;  %v2583_v34 = vpop.f32.mrf.mxu0 }
 0x12f   :  { %v1578_v35 = vadd.f32 %v2524_v29, %v1489_v20 }
 0x130   :  { %v2526_v14 = vpop.f32.mrf.mxu1  ;;  %v2584_v36 = vpop.f32.mrf.mxu0 }
 0x131   :  { %v3768_v37 = vadd.f32 %v2582_v30, %v1578_v35  ;;  %v2527_v41 = vadd.f32 %v2526_v14, %v2525_v31  ;;  %v2585_v43 = vadd.f32 %v2584_v36, %v2583_v34 }
 0x132   :  { %v2528_v44 = vpop.f32.mrf.mxu1  ;;  %v2586_v46 = vpop.f32.mrf.mxu0 }
 0x133   :  { %3954 = vst [vmem:[#allocation2_spill] sm:$0xff] %v3768_v37  ;;  %v1581_v47 = vadd.f32 %v2527_v41, %v1492_v26 }
 0x134   :  { %v2529_v21 = vpop.f32.mrf.mxu1  ;;  %v2587_v49 = vpop.f32.mrf.mxu0 }
 0x135   :  { %v3772_v50 = vadd.f32 %v2585_v43, %v1581_v47  ;;  %v2530_v52 = vadd.f32 %v2529_v21, %v2528_v44  ;;  %v2588_v53 = vadd.f32 %v2587_v49, %v2586_v46 }
 0x136   :  { %v2531_v54 = vpop.f32.mrf.mxu1  ;;  %v2589_v55 = vpop.f32.mrf.mxu0 }
 0x137   :  { %3955 = vst [vmem:[#allocation3_spill] sm:$0xff] %v3772_v50  ;;  %v1586_v56 = vadd.f32 %v2530_v52, %v1497_v32 }
 0x138   :  { %v2532_v27 = vpop.f32.mrf.mxu1  ;;  %v2590_v38 = vpop.f32.mrf.mxu0 }
 0x139   :  { %v3776_v58 = vadd.f32 %v2588_v53, %v1586_v56  ;;  %v2533_v62 = vadd.f32 %v2532_v27, %v2531_v54  ;;  %v2591_v63 = vadd.f32 %v2590_v38, %v2589_v55 }
 0x13a   :  { %v2608_v0 = vpop.f32.mrf.mxu1  ;;  %v2666_v1 = vpop.f32.mrf.mxu0 }
 0x13b   :  { %3956 = vst [vmem:[#allocation4_spill] sm:$0xff] %v3776_v58  ;;  %v1589_v2 = vadd.f32 %v2533_v62, %v1500_v57 }
 0x13c   :  { %v2609_v33 = vpop.f32.mrf.mxu1  ;;  %v2667_v42 = vpop.f32.mrf.mxu0 }
 0x13d   :  { %v3778_v3 = vadd.f32 %v2591_v63, %v1589_v2  ;;  %v2610_v50 = vadd.f32 %v2609_v33, %v2608_v0 }
 0x13e   :  { %v2611_v4 = vpop.f32.mrf.mxu1  ;;  %v3780_v7 = vpop.f32.mrf.mxu0 }
 0x13f   :  { %3957 = vst [vmem:[#allocation5_spill] sm:$0xff] %v3778_v3 }
 0x140   :  { %v2612_v8 = vpop.f32.mrf.mxu1  ;;  %v2670_v10 = vpop.f32.mrf.mxu0 }
 0x142   :  { %v2614_v11 = vpop.f32.mrf.mxu1  ;;  %v3782_v12 = vpop.f32.mrf.mxu0 }
 0x144   :  { %v2615_v39 = vpop.f32.mrf.mxu1  ;;  %v3784_v48 = vpop.f32.mrf.mxu0 }
 0x145   :  { %v2616_v0 = vadd.f32 %v2615_v39, %v2614_v11 }
 0x146   :  { %v2617_v45 = vpop.f32.mrf.mxu1  ;;  %v3786_v61 = vpop.f32.mrf.mxu0 }
 0x148   :  { %v2618_v13 = vpop.f32.mrf.mxu1  ;;  %v3788_v17 = vpop.f32.mrf.mxu0 }
 0x14a   :  { %v3790_v18 = vpop.f32.mrf.mxu1  ;;  %v3792_v19 = vpop.f32.mrf.mxu0 }
 0x14c   :  { %v3794_v22 = vpop.f32.mrf.mxu1  ;;  %v3796_v23 = vpop.f32.mrf.mxu0 }
 0x14e   :  { %v3798_v9 = vpop.f32.mrf.mxu1  ;;  %v3800_v24 = vpop.f32.mrf.mxu0 }
 0x150   :  { %v3802_v20 = vpop.f32.mrf.mxu1  ;;  %v3804_v29 = vpop.f32.mrf.mxu0 }
 0x152   :  { %v3806_v30 = vpop.f32.mrf.mxu1  ;;  %v3808_v31 = vpop.f32.mrf.mxu0 }
 0x154   :  { %v3810_v34 = vpop.f32.mrf.mxu1  ;;  %v3812_v35 = vpop.f32.mrf.mxu0 }
 0x156   :  { %v3814_v14 = vpop.f32.mrf.mxu1  ;;  %v3816_v36 = vpop.f32.mrf.mxu0 }
 0x158   :  { %v3818_v26 = vpop.f32.mrf.mxu1  ;;  %v3820_v41 = vpop.f32.mrf.mxu0 }
 0x15a   :  { %v3822_v43 = vpop.f32.mrf.mxu1  ;;  %v3824_v44 = vpop.f32.mrf.mxu0 }
 0x15c   :  { %v3826_v46 = vpop.f32.mrf.mxu1  ;;  %v3828_v47 = vpop.f32.mrf.mxu0 }
 0x15e   :  { %v3830_v21 = vpop.f32.mrf.mxu1  ;;  %v3832_v49 = vpop.f32.mrf.mxu0 }
 0x15f   :  { %3958 = vst [vmem:[#allocation6_spill] sm:$0xff] %v3832_v49 }
 0x160   :  { %v3834_v32 = vpop.f32.mrf.mxu1  ;;  %v3836_v52 = vpop.f32.mrf.mxu0 }
 0x161   :  { %3959 = vst [vmem:[#allocation7_spill] sm:$0xff] %v3836_v52 }
 0x162   :  { %v3838_v53 = vpop.f32.mrf.mxu1  ;;  %v3840_v54 = vpop.f32.mrf.mxu0 }
 0x163   :  { %3960 = vst [vmem:[#allocation8_spill] sm:$0xff] %v3838_v53  ;;  %3961 = vst [vmem:[#allocation9_spill] sm:$0xff] %v3840_v54 }
 0x164   :  { %v3842_v55 = vpop.f32.mrf.mxu1  ;;  %v3844_v56 = vpop.f32.mrf.mxu0 }
 0x165   :  { %3962 = vst [vmem:[#allocation10_spill] sm:$0xff] %v3842_v55  ;;  %3963 = vst [vmem:[#allocation11_spill] sm:$0xff] %v3844_v56  ;;  %v2619_v55 = vadd.f32 %v2618_v13, %v2617_v45 }
 0x166   :  { %v3846_v27 = vpop.f32.mrf.mxu1  ;;  %v3848_v38 = vpop.f32.mrf.mxu0 }
 0x167   :  { %3964 = vst [vmem:[#allocation12_spill] sm:$0xff] %v3846_v27  ;;  %3965 = vst [vmem:[#allocation13_spill] sm:$0xff] %v3848_v38  ;;  %v2613_v27 = vadd.f32 %v2612_v8, %v2611_v4 }
 0x168   :  { %v3850_v57 = vpop.f32.mrf.mxu1  ;;  %v3852_v62 = vpop.f32.mrf.mxu0 }
 0x169   :  { %3966 = vst [vmem:[#allocation14_spill] sm:$0xff] %v3850_v57  ;;  %3967 = vst [vmem:[#allocation15_spill] sm:$0xff] %v3852_v62  ;;  %v1716_v62 = vadd.f32 %v2610_v50, %v3732_v60  ;;  %v2668_v57 = vadd.f32 %v2667_v42, %v2666_v1  ;;  %v1724_v60 = vadd.f32 %v2616_v0, %v3738_v16 }
 0x16a   :  { %v3854_v63 = vpop.f32.mrf.mxu1  ;;  %v3856_v2 = vpop.f32.mrf.mxu0  ;;  %v2674_v50 = vadd.f32 %v3784_v48, %v3782_v12  ;;  %v2677_v16 = vadd.f32 %v3788_v17, %v3786_v61 }
 0x16b   :  { %3968 = vst [vmem:[#allocation16_spill] sm:$0xff] %v3854_v63  ;;  %3969 = vst [vmem:[#allocation17_spill] sm:$0xff] %v3856_v2  ;;  %v1719_v2 = vadd.f32 %v2613_v27, %v3735_v6 }
 0x16c   :  { %v3858_v3 = vpop.f32.mrf.mxu1  ;;  %v3860_v58 = vpop.f32.mrf.mxu0  ;;  %v1813_v39 = vadd.f32 %v2674_v50, %v1724_v60 }
 0x16d   :  { %3970 = vst [vmem:[#allocation18_spill] sm:$0xff] %v3858_v3  ;;  %3971 = vst [vmem:[#allocation19_spill] sm:$0xff] %v3860_v58  ;;  %v1805_v58 = vadd.f32 %v2668_v57, %v1716_v62 }
 0x16e   :  { %v3862_v54 = vpop.f32.mrf.mxu1  ;;  %v3864_v56 = vpop.f32.mrf.mxu0 }
 0x16f   :  { %3972 = vst [vmem:[#allocation20_spill] sm:$0xff] %v3862_v54  ;;  %3973 = vst [vmem:[#allocation21_spill] sm:$0xff] %v3864_v56  ;;  %v2671_v54 = vadd.f32 %v2670_v10, %v3780_v7  ;;  %v2622_v7 = vadd.f32 %v3794_v22, %v3790_v18  ;;  %v2680_v18 = vadd.f32 %v3796_v23, %v3792_v19 }
 0x170   :  { %v3866_v37 = vpop.f32.mrf.mxu1  ;;  %v3868_v38 = vpop.f32.mrf.mxu0  ;;  %v2625_v22 = vadd.f32 %v3802_v20, %v3798_v9 }
 0x171   :  { %3974 = vst [vmem:[#allocation22_spill] sm:$0xff] %v3866_v37  ;;  %3975 = vst [vmem:[#allocation23_spill] sm:$0xff] %v3868_v38  ;;  %v1808_v37 = vadd.f32 %v2671_v54, %v1719_v2 }
 0x172   :  { %v2724_v63 = vpop.f32.mrf.mxu1  ;;  %v1982_v52 = vpop.f32.mrf.mxu0  ;;  %v1735_v0 = vadd.f32 %v2625_v22, %v3748_v51 }
 0x174   :  { %v2725_v3 = vpop.f32.mrf.mxu1  ;;  %v2799_v49 = vpop.f32.mrf.mxu0 }
 0x175   :  { %v2726_v33 = vadd.f32 %v2725_v3, %v2724_v63  ;;  %v1727_v3 = vadd.f32 %v2619_v55, %v3741_v28  ;;  %v1732_v28 = vadd.f32 %v2622_v7, %v3744_v40  ;;  %v2628_v40 = vadd.f32 %v3810_v34, %v3806_v30 }
 0x176   :  { %v2727_v56 = vpop.f32.mrf.mxu1  ;;  %v1985_v4 = vpop.f32.mrf.mxu0 }
 0x177   :  { %v1894_v8 = vadd.f32 %v2726_v33, %v1805_v58  ;;  %v1816_v54 = vadd.f32 %v2677_v16, %v1727_v3  ;;  %v1821_v9 = vadd.f32 %v2680_v18, %v1732_v28  ;;  %v1740_v34 = vadd.f32 %v2628_v40, %v3752_v59  ;;  %v3978_v40 = vld [vmem:[#allocation6_spill] sm:$0xff] }
 0x178   :  { %v2728_v38 = vpop.f32.mrf.mxu1  ;;  %v2800_v53 = vpop.f32.mrf.mxu0  ;;  %v2634_v59 = vadd.f32 %v3826_v46, %v3822_v43  ;;  %v2637_v28 = vadd.f32 %v3834_v32, %v3830_v21 }
 0x179   :  { %v1983_v6 = vadd.f32 %v1982_v52, %v1894_v8  ;;  %v2729_v1 = vadd.f32 %v2728_v38, %v2727_v56  ;;  %v2683_v8 = vadd.f32 %v3804_v29, %v3800_v24 }
 0x17a   :  { %v2730_v42 = vpop.f32.mrf.mxu1  ;;  %v1990_v49 = vpop.f32.mrf.mxu0  ;;  %v1748_v46 = vadd.f32 %v2634_v59, %v3760_v15  ;;  %v3977_v15 = vld [vmem:[#allocation10_spill] sm:$0xff]  ;;  %v3986_v59 = vld [vmem:[#allocation16_spill] sm:$0xff] }
 0x17b   :  { %v1897_v11 = vadd.f32 %v2729_v1, %v1808_v37  ;;  %v2051_v45 = vmul.f32 0.01, %v1983_v6  ;;  %vm2037_vm1 = vcmp.gt.f32.partialorder %v1983_v6, 0.0  ;;  %v1824_v30 = vadd.f32 %v2683_v8, %v1735_v0  ;;  %v3980_v8 = vld [vmem:[#allocation2_spill] sm:$0xff] }
 0x17c   :  { %v2731_v58 = vpop.f32.mrf.mxu1  ;;  %v2803_v10 = vpop.f32.mrf.mxu0  ;;  %v2686_v1 = vadd.f32 %v3812_v35, %v3808_v31 }
 0x17d   :  { %v1986_v13 = vadd.f32 %v1985_v4, %v1897_v11  ;;  %v2732_v53 = vadd.f32 %v2731_v58, %v2730_v42  ;;  %v2065_v27 = vsel %vm2037_vm1, %v1983_v6, %v2051_v45  ;;  %v2631_v42 = vadd.f32 %v3818_v26, %v3814_v14 }
 0x17e   :  { %v2733_v12 = vpop.f32.mrf.mxu1  ;;  %v1993_v48 = vpop.f32.mrf.mxu0  ;;  %v1829_v14 = vadd.f32 %v2686_v1, %v1740_v34  ;;  %v3984_v34 = vld [vmem:[#allocation14_spill] sm:$0xff] }
 0x17f   :  { %vm2038_vm2 = vcmp.gt.f32.partialorder %v1986_v13, 0.0  ;;  %v2052_v52 = vmul.f32 0.01, %v1986_v13  ;;  %v1902_v37 = vadd.f32 %v2732_v53, %v1813_v39 }
 0x180   :  { %v2734_v55 = vpop.f32.mrf.mxu1  ;;  %v2804_v56 = vpop.f32.mrf.mxu0 }
 0x181   :  { %v2066_v38 = vsel %vm2038_vm2, %v1986_v13, %v2052_v52  ;;  %v1991_v61 = vadd.f32 %v1990_v49, %v1902_v37  ;;  %v2735_v17 = vadd.f32 %v2734_v55, %v2733_v12  ;;  %v1743_v13 = vadd.f32 %v2631_v42, %v3756_v5 }
 0x182   :  { %v2380_v57 = vpack.c.bf16 %v2066_v38, %v2065_v27  ;;  %v2736_v62 = vpop.f32.mrf.mxu1  ;;  %v1998_v63 = vpop.f32.mrf.mxu0  ;;  %v2689_v12 = vadd.f32 %v3820_v41, %v3816_v36 }
 0x183   :  { %v1905_v2 = vadd.f32 %v2735_v17, %v1816_v54  ;;  %v2053_v20 = vmul.f32 0.01, %v1991_v61  ;;  %vm2039_vm3 = vcmp.gt.f32.partialorder %v1991_v61, 0.0  ;;  %v2692_v54 = vadd.f32 %v3828_v47, %v3824_v44 }
 0x184   :  { %2381 = vst [vmem:[%s3953_s3] sm:$0xff] %v2380_v57   ;;  %v2737_v19 = vpop.f32.mrf.mxu1  ;;  %v2807_v23 = vpop.f32.mrf.mxu0  ;;  %v1832_v43 = vadd.f32 %v2689_v12, %v1743_v13  ;;  %v1751_v57 = vadd.f32 %v2637_v28, %v3764_v25 }
 0x185   :  { %v1994_v33 = vadd.f32 %v1993_v48, %v1905_v2  ;;  %v2738_v4 = vadd.f32 %v2737_v19, %v2736_v62  ;;  %v2067_v3 = vsel %vm2039_vm3, %v1991_v61, %v2053_v20  ;;  %v3976_v62 = vld [vmem:[#allocation8_spill] sm:$0xff]  ;;  %v1837_v21 = vadd.f32 %v2692_v54, %v1748_v46  ;;  %v3979_v19 = vld [vmem:[#allocation7_spill] sm:$0xff] }
 0x186   :  { %v2739_v60 = vpop.f32.mrf.mxu1  ;;  %v2001_v50 = vpop.f32.mrf.mxu0  ;;  %v2695_v23 = vadd.f32 %v3979_v19, %v3978_v40 }
 0x187   :  { %vm2040_vm4 = vcmp.gt.f32.partialorder %v1994_v33, 0.0  ;;  %v2054_v51 = vmul.f32 0.01, %v1994_v33  ;;  %v1910_v6 = vadd.f32 %v2738_v4, %v1821_v9 }
 0x188   :  { %v2740_v49 = vpop.f32.mrf.mxu1  ;;  %v2808_v11 = vpop.f32.mrf.mxu0  ;;  %v1840_v4 = vadd.f32 %v2695_v23, %v1751_v57 }
 0x189   :  { %v2068_v7 = vsel %vm2040_vm4, %v1994_v33, %v2054_v51  ;;  %v1999_v24 = vadd.f32 %v1998_v63, %v1910_v6  ;;  %v2741_v29 = vadd.f32 %v2740_v49, %v2739_v60  ;;  %v2640_v63 = vadd.f32 %v3977_v15, %v3976_v62  ;;  %v3982_v51 = vld [vmem:[#allocation11_spill] sm:$0xff] }
 0x18a   :  { %v2385_v58 = vpack.c.bf16 %v2068_v7, %v2067_v3  ;;  %v2742_v10 = vpop.f32.mrf.mxu1  ;;  %v2006_v39 = vpop.f32.mrf.mxu0 }
 0x18b   :  { %v1913_v45 = vadd.f32 %v2741_v29, %v1824_v30  ;;  %v2055_v26 = vmul.f32 0.01, %v1999_v24  ;;  %vm2041_vm5 = vcmp.gt.f32.partialorder %v1999_v24, 0.0  ;;  %v1756_v60 = vadd.f32 %v2640_v63, %v3980_v8  ;;  %v3983_v30 = vld [vmem:[#allocation12_spill] sm:$0xff]  ;;  %v3997_v8 = vld [vmem:[#allocation23_spill] sm:$0xff] }
 0x18c   :  { %2412 = vst [vmem:[%s3953_s3 + $0x8] sm:$0xff] %v2385_v58   ;;  %v2743_v31 = vpop.f32.mrf.mxu1  ;;  %v2811_v35 = vpop.f32.mrf.mxu0  ;;  %v2643_v1 = vadd.f32 %v3984_v34, %v3983_v30 }
 0x18d   :  { %v2002_v53 = vadd.f32 %v2001_v50, %v1913_v45  ;;  %v2744_v16 = vadd.f32 %v2743_v31, %v2742_v10  ;;  %v2069_v55 = vsel %vm2041_vm5, %v1999_v24, %v2055_v26  ;;  %v3981_v50 = vld [vmem:[#allocation9_spill] sm:$0xff]  ;;  %v3985_v45 = vld [vmem:[#allocation3_spill] sm:$0xff]  ;;  %v3987_v31 = vld [vmem:[#allocation18_spill] sm:$0xff] }
 0x18e   :  { %v2745_v48 = vpop.f32.mrf.mxu1  ;;  %v2009_v52 = vpop.f32.mrf.mxu0  ;;  %v2698_v6 = vadd.f32 %v3982_v51, %v3981_v50  ;;  %v1759_v13 = vadd.f32 %v2643_v1, %v3985_v45  ;;  %v2646_v35 = vadd.f32 %v3987_v31, %v3986_v59 }
 0x18f   :  { %vm2042_vm6 = vcmp.gt.f32.partialorder %v2002_v53, 0.0  ;;  %v2056_v5 = vmul.f32 0.01, %v2002_v53  ;;  %v1918_v37 = vadd.f32 %v2744_v16, %v1829_v14 }
 0x190   :  { %v2746_v18 = vpop.f32.mrf.mxu1  ;;  %v2812_v22 = vpop.f32.mrf.mxu0 }
 0x191   :  { %v2070_v56 = vsel %vm2042_vm6, %v2002_v53, %v2056_v5  ;;  %v2007_v36 = vadd.f32 %v2006_v39, %v1918_v37  ;;  %v2747_v41 = vadd.f32 %v2746_v18, %v2745_v48  ;;  %v1845_v53 = vadd.f32 %v2698_v6, %v1756_v60  ;;  %v3989_v5 = vld [vmem:[#allocation15_spill] sm:$0xff]  ;;  %v3990_v22 = vld [vmem:[#allocation4_spill] sm:$0xff] }
 0x192   :  { %v2390_v27 = vpack.c.bf16 %v2070_v56, %v2069_v55  ;;  %v2748_v38 = vpop.f32.mrf.mxu1  ;;  %v2014_v61 = vpop.f32.mrf.mxu0  ;;  %v1764_v55 = vadd.f32 %v2646_v35, %v3990_v22  ;;  %v3991_v56 = vld [vmem:[#allocation17_spill] sm:$0xff] }
 0x193   :  { %v1921_v17 = vadd.f32 %v2747_v41, %v1832_v43  ;;  %v2057_v32 = vmul.f32 0.01, %v2007_v36  ;;  %vm2043_vm7 = vcmp.gt.f32.partialorder %v2007_v36, 0.0 }
 0x194   :  { %2413 = vst [vmem:[%s3953_s3 + $0x10] sm:$0xff] %v2390_v27   ;;  %v2749_v44 = vpop.f32.mrf.mxu1  ;;  %v2815_v47 = vpop.f32.mrf.mxu0  ;;  %v3993_v27 = vld [vmem:[#allocation20_spill] sm:$0xff] }
 0x195   :  { %v2010_v2 = vadd.f32 %v2009_v52, %v1921_v17  ;;  %v2750_v0 = vadd.f32 %v2749_v44, %v2748_v38  ;;  %v2071_v11 = vsel %vm2043_vm7, %v2007_v36, %v2057_v32  ;;  %v3988_v52 = vld [vmem:[#allocation13_spill] sm:$0xff]  ;;  %v3992_v36 = vld [vmem:[#allocation19_spill] sm:$0xff]  ;;  %v3994_v38 = vld [vmem:[#allocation22_spill] sm:$0xff] }
 0x196   :  { %v2751_v9 = vpop.f32.mrf.mxu1  ;;  %v2017_v20 = vpop.f32.mrf.mxu0  ;;  %v2701_v37 = vadd.f32 %v3989_v5, %v3988_v52  ;;  %v2704_v41 = vadd.f32 %v3992_v36, %v3991_v56 }
 0x197   :  { %vm2044_vm8 = vcmp.gt.f32.partialorder %v2010_v2, 0.0  ;;  %v2058_v25 = vmul.f32 0.01, %v2010_v2  ;;  %v1926_v33 = vadd.f32 %v2750_v0, %v1837_v21  ;;  %v3995_v0 = vld [vmem:[#allocation5_spill] sm:$0xff] }
 0x198   :  { %v2752_v42 = vpop.f32.mrf.mxu1  ;;  %v2816_v49 = vpop.f32.mrf.mxu0  ;;  %v1848_v18 = vadd.f32 %v2701_v37, %v1759_v13 }
 0x199   :  { %v2072_v3 = vsel %vm2044_vm8, %v2010_v2, %v2058_v25  ;;  %v2015_v7 = vadd.f32 %v2014_v61, %v1926_v33  ;;  %v2753_v24 = vadd.f32 %v2752_v42, %v2751_v9  ;;  %v2649_v61 = vadd.f32 %v3994_v38, %v3993_v27 }
 0x19a   :  { %v2395_v29 = vpack.c.bf16 %v2072_v3, %v2071_v11  ;;  %v2754_v58 = vpop.f32.mrf.mxu1  ;;  %v2022_v10 = vpop.f32.mrf.mxu0  ;;  %v1853_v9 = vadd.f32 %v2704_v41, %v1764_v55 }
 0x19b   :  { %v1929_v39 = vadd.f32 %v2753_v24, %v1840_v4  ;;  %v2059_v16 = vmul.f32 0.01, %v2015_v7  ;;  %vm2045_vm9 = vcmp.gt.f32.partialorder %v2015_v7, 0.0  ;;  %v1767_v40 = vadd.f32 %v2649_v61, %v3995_v0  ;;  %v3996_v4 = vld [vmem:[#allocation21_spill] sm:$0xff] }
 0x19c   :  { %2414 = vst [vmem:[%s3953_s3 + $0x18] sm:$0xff] %v2395_v29   ;;  %v2755_v14 = vpop.f32.mrf.mxu1  ;;  %v2819_v26 = vpop.f32.mrf.mxu0  ;;  %v2707_v60 = vadd.f32 %v3997_v8, %v3996_v4 }
 0x19d   :  { %v2018_v12 = vadd.f32 %v2017_v20, %v1929_v39  ;;  %v2756_v48 = vadd.f32 %v2755_v14, %v2754_v58  ;;  %v2073_v62 = vsel %vm2045_vm9, %v2015_v7, %v2059_v16 }
 0x19e   :  { %v2757_v43 = vpop.f32.mrf.mxu1  ;;  %v2025_v46 = vpop.f32.mrf.mxu0  ;;  %v1856_v34 = vadd.f32 %v2707_v60, %v1767_v40 }
 0x19f   :  { %vm2046_vm10 = vcmp.gt.f32.partialorder %v2018_v12, 0.0  ;;  %v2060_v54 = vmul.f32 0.01, %v2018_v12  ;;  %v1934_v28 = vadd.f32 %v2756_v48, %v1845_v53 }
 0x1a0   :  { %v2758_v17 = vpop.f32.mrf.mxu1  ;;  %v2820_v57 = vpop.f32.mrf.mxu0 }
 0x1a1   :  { %v2074_v15 = vsel %vm2046_vm10, %v2018_v12, %v2060_v54  ;;  %v2023_v63 = vadd.f32 %v2022_v10, %v1934_v28  ;;  %v2759_v44 = vadd.f32 %v2758_v17, %v2757_v43 }
 0x1a2   :  { %v2400_v47 = vpack.c.bf16 %v2074_v15, %v2073_v62  ;;  %v2760_v21 = vpop.f32.mrf.mxu1  ;;  %v2030_v32 = vpop.f32.mrf.mxu0 }
 0x1a3   :  { %v1937_v2 = vadd.f32 %v2759_v44, %v1848_v18  ;;  %v2061_v20 = vmul.f32 0.01, %v2023_v63  ;;  %vm2047_vm11 = vcmp.gt.f32.partialorder %v2023_v63, 0.0 }
 0x1a4   :  { %2415 = vst [vmem:[%s3953_s3 + $0x20] sm:$0xff] %v2400_v47   ;;  %v2761_v19 = vpop.f32.mrf.mxu1  ;;  %v2823_v23 = vpop.f32.mrf.mxu0 }
 0x1a5   :  { %v2026_v25 = vadd.f32 %v2025_v46, %v1937_v2  ;;  %v2762_v33 = vadd.f32 %v2761_v19, %v2760_v21  ;;  %v2075_v49 = vsel %vm2047_vm11, %v2023_v63, %v2061_v20 }
 0x1a6   :  { %v2763_v50 = vpop.f32.mrf.mxu1  ;;  %v2033_v51 = vpop.f32.mrf.mxu0 }
 0x1a7   :  { %vm2048_vm12 = vcmp.gt.f32.partialorder %v2026_v25, 0.0  ;;  %v2062_v6 = vmul.f32 0.01, %v2026_v25  ;;  %v1942_v30 = vadd.f32 %v2762_v33, %v1853_v9 }
 0x1a8   :  { %v2764_v1 = vpop.f32.mrf.mxu1  ;;  %v2824_v42 = vpop.f32.mrf.mxu0 }
 0x1a9   :  { %v2076_v11 = vsel %vm2048_vm12, %v2026_v25, %v2062_v6  ;;  %v2031_v3 = vadd.f32 %v2030_v32, %v1942_v30  ;;  %v2765_v7 = vadd.f32 %v2764_v1, %v2763_v50 }
 0x1aa   :  { %v2405_v24 = vpack.c.bf16 %v2076_v11, %v2075_v49 }
 0x1ab   :  { %v1945_v29 = vadd.f32 %v2765_v7, %v1856_v34  ;;  %v2063_v58 = vmul.f32 0.01, %v2031_v3  ;;  %vm2049_vm13 = vcmp.gt.f32.partialorder %v2031_v3, 0.0 }
 0x1ac   :  { %2416 = vst [vmem:[%s3953_s3 + $0x28] sm:$0xff] %v2405_v24  }
 0x1ad   :  { %v2034_v10 = vadd.f32 %v2033_v51, %v1945_v29  ;;  %v2077_v45 = vsel %vm2049_vm13, %v2031_v3, %v2063_v58 }
 0x1af   :  { %vm2050_vm14 = vcmp.gt.f32.partialorder %v2034_v10, 0.0  ;;  %v2064_v39 = vmul.f32 0.01, %v2034_v10 }
 0x1b1   :  { %v2078_v13 = vsel %vm2050_vm14, %v2034_v10, %v2064_v39 }
 0x1b2   :  { %v2410_v59 = vpack.c.bf16 %v2078_v13, %v2077_v45 }
 0x1b4   :  { %2417 = vst [vmem:[%s3953_s3 + $0x30] sm:$0xff] %v2410_v59  }

// kernel: discriminator_forward.4
= control target key start
LH: loop header
LB: loop body
LE: loop exit
PB: predicated region body
PF: predicated region fallthrough
CT: control target
= control target key end

     0   :  { %v454_v1 = vmov 0.0   ;;  %vm455_vm0 = vmmov 0   ;;  %s563_s1 = inlined_call_operand.vmem [shape: bf16[384,128], index: 1, kind: input, shape index: {}]   ;;  %s564_s0 = inlined_call_operand.vmem [shape: bf16[16,384], index: 0, kind: input, shape index: {}]   ;;  %s565_s2 = inlined_call_operand.vmem [shape: f32[1,128], index: 2, kind: input, shape index: {}]   ;;  %s566_s3 = inlined_call_operand.vmem [shape: bf16[16,128], index: 3, kind: output, shape index: {}]  }
   0x1   :  { %v426_v0 = vld [vmem:[%s563_s1 + $0x78] sm:$0xff]   ;;  %404 = vmatprep.subr.bf16.mxu1 %v454_v1  ;;  %420 = vmatprep.mubr.msk.bf16.mxu1 %vm455_vm0, %v454_v1  ;;  %v429_v4 = vld [vmem:[%s563_s1 + $0x70] sm:$0xff]   ;;  %v432_v7 = vld [vmem:[%s563_s1 + $0x68] sm:$0xff]  }
   0x2   :  { %v427_v2 = vld [vmem:[%s563_s1 + $0x38] sm:$0xff]   ;;  %373 = vmatprep.subr.bf16.mxu0 %v426_v0  ;;  %v430_v5 = vld [vmem:[%s563_s1 + $0x30] sm:$0xff]   ;;  %v433_v8 = vld [vmem:[%s563_s1 + $0x28] sm:$0xff]  }
   0x3   :  { %v428_v3 = vld [vmem:[%s563_s1 + $0xb8] sm:$0xff]   ;;  %374 = vmatpush3.bf16.msra.mxu0 %v427_v2  ;;  %v431_v6 = vld [vmem:[%s563_s1 + $0xb0] sm:$0xff]   ;;  %v434_v9 = vld [vmem:[%s563_s1 + $0xa8] sm:$0xff]  }
   0x4   :  { %405 = vmatpush3.bf16.msra.mxu1 %v428_v3  ;;  %375 = vmatprep.subr.bf16.mxu0 %v429_v4  ;;  %v435_v10 = vld [vmem:[%s563_s1 + $0x60] sm:$0xff]   ;;  %v438_v13 = vld [vmem:[%s563_s1 + $0x58] sm:$0xff]   ;;  %v441_v16 = vld [vmem:[%s563_s1 + $0x50] sm:$0xff]  }
   0x5   :  { %406 = vmatprep.subr.bf16.mxu1 %v454_v1  ;;  %v436_v11 = vld [vmem:[%s563_s1 + $0x20] sm:$0xff]   ;;  %v439_v14 = vld [vmem:[%s563_s1 + $0x18] sm:$0xff]   ;;  %v442_v17 = vld [vmem:[%s563_s1 + $0x10] sm:$0xff]  }
   0x6   :  { %v437_v12 = vld [vmem:[%s563_s1 + $0xa0] sm:$0xff]   ;;  %v440_v15 = vld [vmem:[%s563_s1 + $0x98] sm:$0xff]   ;;  %v443_v18 = vld [vmem:[%s563_s1 + $0x90] sm:$0xff]  }
   0x7   :  { %376 = vmatpush3.bf16.msra.mxu0 %v430_v5  ;;  %v444_v19 = vld [vmem:[%s563_s1 + $0x48] sm:$0xff]   ;;  %v447_v22 = vld [vmem:[%s563_s1 + $0x40] sm:$0xff]  }
   0x8   :  { %407 = vmatpush3.bf16.msra.mxu1 %v431_v6  ;;  %377 = vmatprep.subr.bf16.mxu0 %v432_v7  ;;  %v445_v20 = vld [vmem:[%s563_s1 + $0x8] sm:$0xff]   ;;  %v452_v23 = vld [vmem:[%s564_s0 + $0x4] ss:$12 sps:$4 sm:$0xff]   ;;  %v336_v30 = vld [vmem:[%s565_s2] ss:$0 sm:$0xff] }
   0x9   :  { %408 = vmatprep.subr.bf16.mxu1 %v454_v1  ;;  %v446_v21 = vld [vmem:[%s563_s1 + $0x88] sm:$0xff]   ;;  %v448_v24 = vld [vmem:[%s563_s1] sm:$0xff]   ;;  %266 = vmatprep.mubr.bf16.mxu0 %v452_v23 }
   0xa   :  { %v449_v25 = vld [vmem:[%s563_s1 + $0x80] sm:$0xff]   ;;  %v453_v27 = vld [vmem:[%s564_s0 + $0x8] ss:$12 sps:$4 sm:$0xff]  }
   0xb   :  { %378 = vmatpush3.bf16.msra.mxu0 %v433_v8  ;;  %v450_v26 = vld [vmem:[%s564_s0] ss:$12 sps:$4 sm:$0xff]  }
   0xc   :  { %409 = vmatpush3.bf16.msra.mxu1 %v434_v9  ;;  %379 = vmatprep.subr.bf16.mxu0 %v435_v10 }
   0xd   :  { %410 = vmatprep.subr.bf16.mxu1 %v454_v1 }
   0xf   :  { %380 = vmatpush3.bf16.msra.mxu0 %v436_v11 }
  0x10   :  { %411 = vmatpush3.bf16.msra.mxu1 %v437_v12  ;;  %381 = vmatprep.subr.bf16.mxu0 %v438_v13 }
  0x11   :  { %412 = vmatprep.subr.bf16.mxu1 %v454_v1 }
  0x13   :  { %382 = vmatpush3.bf16.msra.mxu0 %v439_v14 }
  0x14   :  { %413 = vmatpush3.bf16.msra.mxu1 %v440_v15  ;;  %383 = vmatprep.subr.bf16.mxu0 %v441_v16 }
  0x15   :  { %414 = vmatprep.subr.bf16.mxu1 %v454_v1 }
  0x17   :  { %384 = vmatpush3.bf16.msra.mxu0 %v442_v17 }
  0x18   :  { %415 = vmatpush3.bf16.msra.mxu1 %v443_v18  ;;  %385 = vmatprep.subr.bf16.mxu0 %v444_v19 }
  0x19   :  { %416 = vmatprep.subr.bf16.mxu1 %v454_v1 }
  0x1b   :  { %386 = vmatpush3.bf16.msra.mxu0 %v445_v20 }
  0x1c   :  { %417 = vmatpush3.bf16.msra.mxu1 %v446_v21  ;;  %387 = vmatprep.subr.bf16.mxu0 %v447_v22 }
  0x1d   :  { %418 = vmatprep.subr.bf16.mxu1 %v454_v1 }
  0x1f   :  { %388 = vmatpush3.bf16.msra.mxu0 %v448_v24 }
  0x20   :  { %419 = vmatpush3.bf16.msra.mxu1 %v449_v25 }
  0x22   :  { %267 = vmatmul.mubr.bf16.vlgmr.msra.gmra.mxu0 %v450_v26 }
  0x23   :  { %421 = vmatmul.mubr.bf16.vlgmr.msra.gmra.mxu1 %v453_v27 }
  0xe2   :  { %v389_v28 = vpop.f32.mrf.mxu0 }
  0xe3   :  { %v309_v29 = vpop.f32.mrf.mxu1 }
  0xe4   :  { %v390_v31 = vpop.f32.mrf.mxu0 }
  0xe5   :  { %v391_v32 = vadd.f32 %v390_v31, %v389_v28  ;;  %v422_v33 = vpop.f32.mrf.mxu1 }
  0xe6   :  { %v392_v34 = vpop.f32.mrf.mxu0 }
  0xe7   :  { %v269_v35 = vadd.f32 %v391_v32, %v336_v30  ;;  %v312_v36 = vpop.f32.mrf.mxu1 }
  0xe8   :  { %v393_v37 = vpop.f32.mrf.mxu0 }
  0xe9   :  { %v310_v38 = vadd.f32 %v309_v29, %v269_v35  ;;  %v394_v39 = vadd.f32 %v393_v37, %v392_v34  ;;  %v423_v40 = vpop.f32.mrf.mxu1 }
  0xeb   :  { %v272_v41 = vadd.f32 %v394_v39, %v336_v30  ;;  %v318_v42 = vmul.f32 0.2, %v310_v38  ;;  %vm316_vm1 = vcmp.gt.f32.partialorder %v310_v38, 0.0 }
  0xed   :  { %v313_v43 = vadd.f32 %v312_v36, %v272_v41  ;;  %v320_v45 = vsel %vm316_vm1, %v310_v38, %v318_v42 }
  0xef   :  { %vm317_vm2 = vcmp.gt.f32.partialorder %v313_v43, 0.0  ;;  %v319_v44 = vmul.f32 0.2, %v313_v43 }
  0xf1   :  { %v321_v46 = vsel %vm317_vm2, %v313_v43, %v319_v44 }
  0xf2   :  { %v371_v47 = vpack.c.bf16 %v321_v46, %v320_v45 }
  0xf4   :  { %372 = vst [vmem:[%s566_s3] sm:$0xff] %v371_v47  }

// kernel: discriminator_forward.7
= control target key start
LH: loop header
LB: loop body
LE: loop exit
PB: predicated region body
PF: predicated region fallthrough
CT: control target
= control target key end

     0   :  { %12 = vsyncpa [#allocation5], 0  ;;  %s13668_s0 = inlined_call_operand.vmem [shape: bf16[16,7168], index: 0, kind: input, shape index: {}]   ;;  %s13669_s1 = inlined_call_operand.hbm [shape: bf16[7168,1024], index: 1, kind: input, shape index: {}]   ;;  %s13670_s2 = inlined_call_operand.vmem [shape: f32[1,1024], index: 2, kind: input, shape index: {}]   ;;  %s13671_s3 = inlined_call_operand.vmem [shape: bf16[1024,512], index: 3, kind: input, shape index: {}]   ;;  %s13672_s4 = inlined_call_operand.vmem [shape: f32[1,512], index: 4, kind: input, shape index: {}]   ;;  %s13673_s5 = inlined_call_operand.vmem [shape: bf16[512,128], index: 5, kind: input, shape index: {}]   ;;  %s13674_s6 = inlined_call_operand.vmem [shape: f32[1,128], index: 6, kind: input, shape index: {}]   ;;  %s13675_s7 = inlined_call_operand.vmem [shape: f32[16,128], index: 7, kind: output, shape index: {}]  }
   0x1   :  { %14 = vsyncpa [#allocation5 + $0x1], 0  ;;  %s11571_s24 = smov 0   ;;  %s11573_s25 = smov 0  }
   0x2   :  { %s11575_s26 = smov 0   ;;  %s11577_s27 = smov 0  }
   0x3   :  { %s11579_s28 = smov 0   ;;  %s11581_s29 = smov 0  }
   0x4 LB: > { %s9645_s30 = sadd.s32 4294967295, %s11525_s29   ;;  %s29_s8 = sadd.s32 1, %s11521_s28  ;;  %s11525_s29 = sphi %s11581_s29, %s20_s29   ;;  %s11521_s28 = sphi %s11579_s28, %s13682_s28   ;;  %s11517_s27 = sphi %s11577_s27, %s13681_s27   ;;  %s11513_s26 = sphi %s11575_s26, %s13680_s26   ;;  %s11509_s25 = sphi %s11573_s25, %s13679_s25   ;;  %s11505_s24 = sphi %s11571_s24, %s13678_s24  }
   0x5   : > { %p30_p0 = scmp.ge.s32.totalorder %s29_s8, 4  ;;  %s41_s9 = sadd.s32 1, %s11513_s26 }
   0x6   : > { %p48_p1 = scmp.ne.s32.totalorder %s11513_s26, %s11509_s25  ;;  %p49_p2 = scmp.eq.s32.totalorder %s11525_s29, 0 }
   0x7   : > { %s13684_s8 = smov (%p30_p0, %s29_s8), 0  ;;  %p80_p4 = scmp.ne.s32.totalorder %s11509_s25, %s11505_s24 }
   0x8   : > { %p11607_p3 = por %p49_p2, %p48_p1  ;;  %s37_s11 = ssub.s32 %s11521_s28, %s13684_s8 }
   0x9   : > { %p81_p5 = scmp.eq.s32.totalorder %s9645_s30, 0  ;;  %p39_p6 = scmp.eq.s32.totalorder %s37_s11, 0 }
   0xa   : > { %p9647_p8 = scmp.ge.s32.totalorder %s11525_s29, 4 }
   0xb   : > { %p11614_p7 = por %p81_p5, %p80_p4 }
   0xc   : > { %s11619_s13 = scalar_select %p39_p6, %s11513_s26, %s41_s9  }
   0xd   : > { %246 = sbr.rel (%p9647_p8) target bundleno = 47 (0x2f), region = 36 }
  0x12   : > { %249 = sbr.rel (!%p11607_p3) target bundleno = 30 (0x1e), region = 40  ;;  %s251_s14 = sand.u32 (%p11607_p3), 1, %s11513_s26  }
  0x13   : > { %s10857_s15 = smul.u32 (%p11607_p3), 56, %s11521_s28 }
  0x14   : > { %s10905_s16 = smul.u32 (%p11607_p3), 112, %s251_s14 }
  0x15   : > { %s259_s19 = scalar_lea.vmem (%p11607_p3), %s13668_s0, %s10857_s15 }
  0x16   : > { %v272_v0 = vld [vmem:[%s259_s19] sm:$0xff] (%p11607_p3)  ;;  %v274_v1 = vld [vmem:[%s259_s19 + $0x8] sm:$0xff] (%p11607_p3)  ;;  %v276_v2 = vld [vmem:[%s259_s19 + $0x10] sm:$0xff] (%p11607_p3)  ;;  %s253_s20 = scalar_lea.vmem (%p11607_p3), [#allocation3], %s10905_s16 }
  0x17   : > { %273 = vst [vmem:[%s253_s20] sm:$0xff] %v272_v0  ;;  %275 = vst [vmem:[%s253_s20 + $0x8] sm:$0xff] %v274_v1  ;;  %v278_v3 = vld [vmem:[%s259_s19 + $0x18] sm:$0xff]  ;;  %v280_v4 = vld [vmem:[%s259_s19 + $0x20] sm:$0xff] }
  0x18   : > { %277 = vst [vmem:[%s253_s20 + $0x10] sm:$0xff] %v276_v2  ;;  %v282_v5 = vld [vmem:[%s259_s19 + $0x28] sm:$0xff]  ;;  %279 = vst [vmem:[%s253_s20 + $0x18] sm:$0xff] %v278_v3  ;;  %v284_v6 = vld [vmem:[%s259_s19 + $0x30] sm:$0xff] }
  0x19   : > { %281 = vst [vmem:[%s253_s20 + $0x20] sm:$0xff] %v280_v4  ;;  %283 = vst [vmem:[%s253_s20 + $0x28] sm:$0xff] %v282_v5  ;;  %v286_v7 = vld [vmem:[%s259_s19 + $0xe0] sm:$0xff]  ;;  %v288_v8 = vld [vmem:[%s259_s19 + $0xe8] sm:$0xff] }
  0x1a   : > { %285 = vst [vmem:[%s253_s20 + $0x30] sm:$0xff] %v284_v6  ;;  %287 = vst [vmem:[%s253_s20 + $0x38] sm:$0xff] %v286_v7  ;;  %v290_v9 = vld [vmem:[%s259_s19 + $0xf0] sm:$0xff]  ;;  %v292_v10 = vld [vmem:[%s259_s19 + $0xf8] sm:$0xff] }
  0x1b   : > { %289 = vst [vmem:[%s253_s20 + $0x40] sm:$0xff] %v288_v8  ;;  %v294_v11 = vld [vmem:[%s259_s19 + $0x100] sm:$0xff]  ;;  %291 = vst [vmem:[%s253_s20 + $0x48] sm:$0xff] %v290_v9  ;;  %v296_v12 = vld [vmem:[%s259_s19 + $0x108] sm:$0xff] }
  0x1c   : > { %293 = vst [vmem:[%s253_s20 + $0x50] sm:$0xff] %v292_v10  ;;  %295 = vst [vmem:[%s253_s20 + $0x58] sm:$0xff] %v294_v11  ;;  %v298_v13 = vld [vmem:[%s259_s19 + $0x110] sm:$0xff] }
  0x1d   : > { %297 = vst [vmem:[%s253_s20 + $0x60] sm:$0xff] %v296_v12  ;;  %299 = vst [vmem:[%s253_s20 + $0x68] sm:$0xff] %v298_v13 }
  0x1e PF: > { %s306_s21 = sand.u32 1, %s11513_s26   ;;  %s10860_s22 = smul.u32 114688, %s11521_s28 }
  0x1f   : > { %s10906_s23 = smul.u32 7168, %s306_s21  ;;  %s307_s15 = scalar_lea.sflag [#allocation5], %s306_s21 }
  0x20   : > { %s317_s9 = scalar_lea.hbm %s13669_s1, %s10860_s22  ;;  %s11527_s17 = smov [#allocation4]  }
  0x21   : > { %s310_s11 = scalar_lea.vmem [#allocation4], %s10906_s23  ;;  %s11465_s18 = sshll.u32 %s11527_s17, 4  ;;  %s11466_s18 = int_to_ptr.vmem [resolvable:$false] %s11465_s18 }
  0x22   : > { %s318_s14 = sshll.u32 %s310_s11, 4  ;;  %s11467_s19 = scalar_lea.vmem %s11466_s18, 229376  ;;  %s319_s14 = int_to_ptr.vmem [resolvable:$true] %s318_s14 }
  0x23   : > { %s11461_s16 = scalar_lea.vmem %s319_s14, 114688  ;;  %p11468_p12 = scmp.lt.s32.totalorder %s319_s14, %s11466_s18 }
  0x24   : > { %p11462_p9 = scmp.ne.s32.totalorder %s319_s14, %s11461_s16  ;;  %p11469_p13 = scmp.lt.s32.totalorder %s11467_s19, %s11461_s16 }
  0x26   : > { %p11463_p10 = pnand %p11462_p9, %p11607_p3  ;;  %p11470_p0 = por %p11469_p13, %p11468_p12 }
  0x28   : > { %p11464_p11 = pneg %p11463_p10 }
  0x2a   : > { %p11471_p1 = pnand %p11470_p0, %p11464_p11 }
  0x2c   : > { %11474 = shalt.err (!%p11471_p1)
}
  0x2d   : > { %s11528_s20 = smov 512   ;;  %s11529_s22 = smov 32  }
  0x2e   : > { %10909 = dma.hbm_to_vmem [thread:$0]  (%p11607_p3), %s317_s9, 114688, %s319_s14, %s307_s15, %s11528_s20, %s11528_s20, %s11529_s22  }
  0x2f PF: > { %p9651_p2 = scmp.ge.s32.totalorder %s11525_s29, 1  ;;  %p326_p4 = scmp.lt.s32.totalorder %s11525_s29, 5 }
  0x31   : > { %p327_p5 = pnand %p9651_p2, %p326_p4 }
  0x32   : > { %s333_s21 = sand.u32 (!%p327_p5), 1, %s11509_s25  }
  0x33   : > { %330 = sbr.rel (%p327_p5) target bundleno = 1896 (0x768), region = 67  ;;  %s340_s11 = scalar_lea.sflag (!%p327_p5), [#allocation5], %s333_s21 }
  0x34   : > { %s10907_s23 = smul.u32 (!%p327_p5), 112, %s333_s21 }
  0x35   : > { %s10908_s24 = smul.u32 (!%p327_p5), 7168, %s333_s21 }
  0x36   : > { %s11641_s30 = scalar_lea.vmem (!%p327_p5), [#allocation3], %s10907_s23 }
  0x37   : > { %s11643_s16 = scalar_lea.vmem (!%p327_p5), [#allocation4], %s10908_s24 }
  0x38   : > { %11500 = dma.done.wait (%p11614_p7), %s340_s11, 114688  }
  0x39   : > { %11502 = vsyncadd (%p11614_p7), %s340_s11, 4294852608  ;;  %p9652_p3 = scmp.ne.s32.totalorder %s11517_s27, 0 }
  0x3b   : > { %391 = sbr.rel (%p9652_p3) target bundleno = 73 (0x49), region = 79 }
  0x40   : > { %v11530_v14 = vmov 0.0  }
  0x41   : > { %392 = vst [vmem:[#allocation2 + $0x30] sm:$0xff] %v11530_v14  ;;  %393 = vst [vmem:[#allocation2] sm:$0xff] %v11530_v14 }
  0x42   : > { %394 = vst [vmem:[#allocation2 + $0x58] sm:$0xff] %v11530_v14  ;;  %395 = vst [vmem:[#allocation2 + $0x18] sm:$0xff] %v11530_v14 }
  0x43   : > { %396 = vst [vmem:[#allocation2 + $0x50] sm:$0xff] %v11530_v14  ;;  %397 = vst [vmem:[#allocation2 + $0x68] sm:$0xff] %v11530_v14 }
  0x44   : > { %398 = vst [vmem:[#allocation2 + $0x8] sm:$0xff] %v11530_v14  ;;  %399 = vst [vmem:[#allocation2 + $0x48] sm:$0xff] %v11530_v14 }
  0x45   : > { %400 = vst [vmem:[#allocation2 + $0x40] sm:$0xff] %v11530_v14  ;;  %401 = vst [vmem:[#allocation2 + $0x20] sm:$0xff] %v11530_v14 }
  0x46   : > { %402 = vst [vmem:[#allocation2 + $0x10] sm:$0xff] %v11530_v14  ;;  %403 = vst [vmem:[#allocation2 + $0x38] sm:$0xff] %v11530_v14 }
  0x47   : > { %404 = vst [vmem:[#allocation2 + $0x60] sm:$0xff] %v11530_v14  ;;  %405 = vst [vmem:[#allocation2 + $0x70] sm:$0xff] %v11530_v14 }
  0x48   : > { %406 = vst [vmem:[#allocation2 + $0x78] sm:$0xff] %v11530_v14  ;;  %407 = vst [vmem:[#allocation2 + $0x28] sm:$0xff] %v11530_v14 }
  0x49 PF: > { %v494_v15 = vld [vmem:[%s11643_s16 + $0x1c0] sm:$0xff]  ;;  %p10563_p6 = scmp.ne.s32.totalorder %s11517_s27, 3 }
  0x4a   : > { %v498_v16 = vld [vmem:[%s11643_s16 + $0x1e0] sm:$0xff] }
  0x4b   : > { %v622_v17 = vld [vmem:[%s11643_s16 + $0x5c0] sm:$0xff]  ;;  %v9724_v18 = vcombine.high %v494_v15, %v498_v16  ;;  %v9723_v20 = vcombine.low %v494_v15, %v498_v16 }
  0x4c   : > { %v626_v19 = vld [vmem:[%s11643_s16 + $0x5e0] sm:$0xff] }
  0x4d   : > { %v486_v21 = vld [vmem:[%s11643_s16 + $0x180] sm:$0xff]  ;;  %v9852_v23 = vcombine.high %v622_v17, %v626_v19  ;;  %v9851_v24 = vcombine.low %v622_v17, %v626_v19  ;;  %5884 = vmatprep.subr.bf16.mxu0 %v9724_v18 }
  0x4e   : > { %v490_v22 = vld [vmem:[%s11643_s16 + $0x1a0] sm:$0xff]  ;;  %5885 = vmatpush1.bf16.msra.mxu0 %v9723_v20 }
  0x4f   : > { %v9716_v25 = vcombine.high %v486_v21, %v490_v22  ;;  %v614_v26 = vld [vmem:[%s11643_s16 + $0x580] sm:$0xff]  ;;  %5927 = vmatprep.subr.bf16.mxu1 %v9852_v23  ;;  %v9715_v33 = vcombine.low %v486_v21, %v490_v22 }
  0x50   : > { %v618_v27 = vld [vmem:[%s11643_s16 + $0x5a0] sm:$0xff]  ;;  %5928 = vmatpush1.bf16.msra.mxu1 %v9851_v24 }
  0x51   : > { %v478_v28 = vld [vmem:[%s11643_s16 + $0x140] sm:$0xff]  ;;  %v9844_v29 = vcombine.high %v614_v26, %v618_v27  ;;  %5886 = vmatprep.subr.bf16.mxu0 %v9716_v25  ;;  %v9843_v34 = vcombine.low %v614_v26, %v618_v27 }
  0x52   : > { %v482_v30 = vld [vmem:[%s11643_s16 + $0x160] sm:$0xff]  ;;  %5887 = vmatpush1.bf16.msra.mxu0 %v9715_v33 }
  0x53   : > { %v606_v31 = vld [vmem:[%s11643_s16 + $0x540] sm:$0xff]  ;;  %v9708_v35 = vcombine.high %v478_v28, %v482_v30  ;;  %5929 = vmatprep.subr.bf16.mxu1 %v9844_v29  ;;  %v9707_v41 = vcombine.low %v478_v28, %v482_v30 }
  0x54   : > { %v610_v32 = vld [vmem:[%s11643_s16 + $0x560] sm:$0xff]  ;;  %5930 = vmatpush1.bf16.msra.mxu1 %v9843_v34 }
  0x55   : > { %v9836_v36 = vcombine.high %v606_v31, %v610_v32  ;;  %v470_v37 = vld [vmem:[%s11643_s16 + $0x100] sm:$0xff]  ;;  %5888 = vmatprep.subr.bf16.mxu0 %v9708_v35  ;;  %v9835_v42 = vcombine.low %v606_v31, %v610_v32 }
  0x56   : > { %v474_v38 = vld [vmem:[%s11643_s16 + $0x120] sm:$0xff]  ;;  %5889 = vmatpush1.bf16.msra.mxu0 %v9707_v41 }
  0x57   : > { %v598_v39 = vld [vmem:[%s11643_s16 + $0x500] sm:$0xff]  ;;  %v9700_v43 = vcombine.high %v470_v37, %v474_v38  ;;  %5931 = vmatprep.subr.bf16.mxu1 %v9836_v36  ;;  %v9699_v49 = vcombine.low %v470_v37, %v474_v38 }
  0x58   : > { %v602_v40 = vld [vmem:[%s11643_s16 + $0x520] sm:$0xff]  ;;  %5932 = vmatpush1.bf16.msra.mxu1 %v9835_v42 }
  0x59   : > { %v9828_v44 = vcombine.high %v598_v39, %v602_v40  ;;  %v462_v45 = vld [vmem:[%s11643_s16 + $0xc0] sm:$0xff]  ;;  %5890 = vmatprep.subr.bf16.mxu0 %v9700_v43  ;;  %v9827_v50 = vcombine.low %v598_v39, %v602_v40 }
  0x5a   : > { %v466_v46 = vld [vmem:[%s11643_s16 + $0xe0] sm:$0xff]  ;;  %5891 = vmatpush1.bf16.msra.mxu0 %v9699_v49 }
  0x5b   : > { %v590_v47 = vld [vmem:[%s11643_s16 + $0x4c0] sm:$0xff]  ;;  %v9692_v51 = vcombine.high %v462_v45, %v466_v46  ;;  %5933 = vmatprep.subr.bf16.mxu1 %v9828_v44  ;;  %v9691_v57 = vcombine.low %v462_v45, %v466_v46 }
  0x5c   : > { %v594_v48 = vld [vmem:[%s11643_s16 + $0x4e0] sm:$0xff]  ;;  %5934 = vmatpush1.bf16.msra.mxu1 %v9827_v50 }
  0x5d   : > { %v9820_v52 = vcombine.high %v590_v47, %v594_v48  ;;  %v454_v53 = vld [vmem:[%s11643_s16 + $0x80] sm:$0xff]  ;;  %5892 = vmatprep.subr.bf16.mxu0 %v9692_v51  ;;  %v9819_v58 = vcombine.low %v590_v47, %v594_v48 }
  0x5e   : > { %v458_v54 = vld [vmem:[%s11643_s16 + $0xa0] sm:$0xff]  ;;  %5893 = vmatpush1.bf16.msra.mxu0 %v9691_v57 }
  0x5f   : > { %v582_v55 = vld [vmem:[%s11643_s16 + $0x480] sm:$0xff]  ;;  %v9684_v59 = vcombine.high %v454_v53, %v458_v54  ;;  %5935 = vmatprep.subr.bf16.mxu1 %v9820_v52  ;;  %v9683_v1 = vcombine.low %v454_v53, %v458_v54 }
  0x60   : > { %v586_v56 = vld [vmem:[%s11643_s16 + $0x4a0] sm:$0xff]  ;;  %5936 = vmatpush1.bf16.msra.mxu1 %v9819_v58 }
  0x61   : > { %v9812_v60 = vcombine.high %v582_v55, %v586_v56  ;;  %v446_v61 = vld [vmem:[%s11643_s16 + $0x40] sm:$0xff]  ;;  %5894 = vmatprep.subr.bf16.mxu0 %v9684_v59  ;;  %v9811_v3 = vcombine.low %v582_v55, %v586_v56 }
  0x62   : > { %v450_v62 = vld [vmem:[%s11643_s16 + $0x60] sm:$0xff]  ;;  %5895 = vmatpush1.bf16.msra.mxu0 %v9683_v1 }
  0x63   : > { %v574_v63 = vld [vmem:[%s11643_s16 + $0x440] sm:$0xff]  ;;  %v9676_v4 = vcombine.high %v446_v61, %v450_v62  ;;  %5937 = vmatprep.subr.bf16.mxu1 %v9812_v60  ;;  %v9675_v11 = vcombine.low %v446_v61, %v450_v62 }
  0x64   : > { %v578_v0 = vld [vmem:[%s11643_s16 + $0x460] sm:$0xff]  ;;  %5938 = vmatpush1.bf16.msra.mxu1 %v9811_v3 }
  0x65   : > { %v438_v2 = vld [vmem:[%s11643_s16] sm:$0xff]  ;;  %v9804_v6 = vcombine.high %v574_v63, %v578_v0  ;;  %5896 = vmatprep.subr.bf16.mxu0 %v9676_v4  ;;  %v9803_v12 = vcombine.low %v574_v63, %v578_v0 }
  0x66   : > { %v442_v5 = vld [vmem:[%s11643_s16 + $0x20] sm:$0xff]  ;;  %5897 = vmatpush1.bf16.msra.mxu0 %v9675_v11 }
  0x67   : > { %v10962_v7 = vld [vmem:[%s11641_s30 + $0x4] ss:$56 sps:$4 sm:$0xff]   ;;  %v9668_v13 = vcombine.high %v438_v2, %v442_v5  ;;  %5939 = vmatprep.subr.bf16.mxu1 %v9804_v6  ;;  %v9667_v19 = vcombine.low %v438_v2, %v442_v5 }
  0x68   : > { %v566_v8 = vld [vmem:[%s11643_s16 + $0x400] sm:$0xff]  ;;  %5916 = vmatprep.mubr.bf16.mxu0 %v10962_v7  ;;  %5940 = vmatpush1.bf16.msra.mxu1 %v9803_v12 }
  0x69   : > { %v570_v9 = vld [vmem:[%s11643_s16 + $0x420] sm:$0xff]  ;;  %5898 = vmatprep.subr.bf16.mxu0 %v9668_v13 }
  0x6a   : > { %v10964_v10 = vld [vmem:[%s11641_s30 + $0xc] ss:$56 sps:$4 sm:$0xff]   ;;  %v9796_v14 = vcombine.high %v566_v8, %v570_v9  ;;  %v9795_v20 = vcombine.low %v566_v8, %v570_v9  ;;  %5899 = vmatpush1.bf16.msra.mxu0 %v9667_v19 }
  0x6b   : > { %v558_v15 = vld [vmem:[%s11643_s16 + $0x3c0] sm:$0xff]  ;;  %5959 = vmatprep.mubr.bf16.mxu1 %v10964_v10 }
  0x6c   : > { %v562_v16 = vld [vmem:[%s11643_s16 + $0x3e0] sm:$0xff]  ;;  %5941 = vmatprep.subr.bf16.mxu1 %v9796_v14 }
  0x6d   : > { %v686_v17 = vld [vmem:[%s11643_s16 + $0x7c0] sm:$0xff]  ;;  %v9788_v21 = vcombine.high %v558_v15, %v562_v16  ;;  %v9787_v27 = vcombine.low %v558_v15, %v562_v16  ;;  %5942 = vmatpush1.bf16.msra.mxu1 %v9795_v20 }
  0x6e   : > { %v690_v18 = vld [vmem:[%s11643_s16 + $0x7e0] sm:$0xff] }
  0x6f   : > { %v9916_v22 = vcombine.high %v686_v17, %v690_v18  ;;  %v550_v23 = vld [vmem:[%s11643_s16 + $0x380] sm:$0xff]  ;;  %5900 = vmatprep.subr.bf16.mxu0 %v9788_v21  ;;  %v9915_v28 = vcombine.low %v686_v17, %v690_v18 }
  0x70   : > { %v554_v24 = vld [vmem:[%s11643_s16 + $0x3a0] sm:$0xff]  ;;  %5901 = vmatpush2.bf16.msra.mxu0 %v9787_v27 }
  0x71   : > { %v678_v25 = vld [vmem:[%s11643_s16 + $0x780] sm:$0xff]  ;;  %v9780_v29 = vcombine.high %v550_v23, %v554_v24  ;;  %5943 = vmatprep.subr.bf16.mxu1 %v9916_v22  ;;  %v9779_v35 = vcombine.low %v550_v23, %v554_v24 }
  0x72   : > { %v682_v26 = vld [vmem:[%s11643_s16 + $0x7a0] sm:$0xff]  ;;  %5944 = vmatpush2.bf16.msra.mxu1 %v9915_v28 }
  0x73   : > { %v9908_v30 = vcombine.high %v678_v25, %v682_v26  ;;  %v542_v31 = vld [vmem:[%s11643_s16 + $0x340] sm:$0xff]  ;;  %5902 = vmatprep.subr.bf16.mxu0 %v9780_v29  ;;  %v9907_v36 = vcombine.low %v678_v25, %v682_v26 }
  0x74   : > { %v546_v32 = vld [vmem:[%s11643_s16 + $0x360] sm:$0xff]  ;;  %5903 = vmatpush2.bf16.msra.mxu0 %v9779_v35 }
  0x75   : > { %v670_v33 = vld [vmem:[%s11643_s16 + $0x740] sm:$0xff]  ;;  %v9772_v37 = vcombine.high %v542_v31, %v546_v32  ;;  %5945 = vmatprep.subr.bf16.mxu1 %v9908_v30  ;;  %v9771_v43 = vcombine.low %v542_v31, %v546_v32 }
  0x76   : > { %v674_v34 = vld [vmem:[%s11643_s16 + $0x760] sm:$0xff]  ;;  %5946 = vmatpush2.bf16.msra.mxu1 %v9907_v36 }
  0x77   : > { %v9900_v38 = vcombine.high %v670_v33, %v674_v34  ;;  %v534_v39 = vld [vmem:[%s11643_s16 + $0x300] sm:$0xff]  ;;  %5904 = vmatprep.subr.bf16.mxu0 %v9772_v37  ;;  %v9899_v44 = vcombine.low %v670_v33, %v674_v34 }
  0x78   : > { %v538_v40 = vld [vmem:[%s11643_s16 + $0x320] sm:$0xff]  ;;  %5905 = vmatpush2.bf16.msra.mxu0 %v9771_v43 }
  0x79   : > { %v662_v41 = vld [vmem:[%s11643_s16 + $0x700] sm:$0xff]  ;;  %v9764_v45 = vcombine.high %v534_v39, %v538_v40  ;;  %5947 = vmatprep.subr.bf16.mxu1 %v9900_v38  ;;  %v9763_v51 = vcombine.low %v534_v39, %v538_v40 }
  0x7a   : > { %v666_v42 = vld [vmem:[%s11643_s16 + $0x720] sm:$0xff]  ;;  %5948 = vmatpush2.bf16.msra.mxu1 %v9899_v44 }
  0x7b   : > { %v9892_v46 = vcombine.high %v662_v41, %v666_v42  ;;  %v526_v47 = vld [vmem:[%s11643_s16 + $0x2c0] sm:$0xff]  ;;  %5906 = vmatprep.subr.bf16.mxu0 %v9764_v45  ;;  %v9891_v52 = vcombine.low %v662_v41, %v666_v42 }
  0x7c   : > { %v530_v48 = vld [vmem:[%s11643_s16 + $0x2e0] sm:$0xff]  ;;  %5907 = vmatpush2.bf16.msra.mxu0 %v9763_v51 }
  0x7d   : > { %v654_v49 = vld [vmem:[%s11643_s16 + $0x6c0] sm:$0xff]  ;;  %v9756_v53 = vcombine.high %v526_v47, %v530_v48  ;;  %5949 = vmatprep.subr.bf16.mxu1 %v9892_v46  ;;  %v9755_v59 = vcombine.low %v526_v47, %v530_v48 }
  0x7e   : > { %v658_v50 = vld [vmem:[%s11643_s16 + $0x6e0] sm:$0xff]  ;;  %5950 = vmatpush2.bf16.msra.mxu1 %v9891_v52 }
  0x7f   : > { %v518_v54 = vld [vmem:[%s11643_s16 + $0x280] sm:$0xff]  ;;  %v9884_v55 = vcombine.high %v654_v49, %v658_v50  ;;  %5908 = vmatprep.subr.bf16.mxu0 %v9756_v53  ;;  %v9883_v60 = vcombine.low %v654_v49, %v658_v50 }
  0x80   : > { %v522_v56 = vld [vmem:[%s11643_s16 + $0x2a0] sm:$0xff]  ;;  %5909 = vmatpush2.bf16.msra.mxu0 %v9755_v59 }
  0x81   : > { %v646_v57 = vld [vmem:[%s11643_s16 + $0x680] sm:$0xff]  ;;  %v9748_v61 = vcombine.high %v518_v54, %v522_v56  ;;  %5951 = vmatprep.subr.bf16.mxu1 %v9884_v55  ;;  %v9747_v3 = vcombine.low %v518_v54, %v522_v56 }
  0x82   : > { %v650_v58 = vld [vmem:[%s11643_s16 + $0x6a0] sm:$0xff]  ;;  %5952 = vmatpush2.bf16.msra.mxu1 %v9883_v60 }
  0x83   : > { %v9876_v62 = vcombine.high %v646_v57, %v650_v58  ;;  %v510_v63 = vld [vmem:[%s11643_s16 + $0x240] sm:$0xff]  ;;  %5910 = vmatprep.subr.bf16.mxu0 %v9748_v61  ;;  %v9875_v4 = vcombine.low %v646_v57, %v650_v58 }
  0x84   : > { %v514_v0 = vld [vmem:[%s11643_s16 + $0x260] sm:$0xff]  ;;  %5911 = vmatpush2.bf16.msra.mxu0 %v9747_v3 }
  0x85   : > { %v638_v1 = vld [vmem:[%s11643_s16 + $0x640] sm:$0xff]  ;;  %v9740_v5 = vcombine.high %v510_v63, %v514_v0  ;;  %5953 = vmatprep.subr.bf16.mxu1 %v9876_v62  ;;  %v9739_v11 = vcombine.low %v510_v63, %v514_v0 }
  0x86   : > { %v642_v2 = vld [vmem:[%s11643_s16 + $0x660] sm:$0xff]  ;;  %5954 = vmatpush2.bf16.msra.mxu1 %v9875_v4 }
  0x87   : > { %v9868_v6 = vcombine.high %v638_v1, %v642_v2  ;;  %v502_v7 = vld [vmem:[%s11643_s16 + $0x200] sm:$0xff]  ;;  %5912 = vmatprep.subr.bf16.mxu0 %v9740_v5  ;;  %v9867_v12 = vcombine.low %v638_v1, %v642_v2 }
  0x88   : > { %v506_v8 = vld [vmem:[%s11643_s16 + $0x220] sm:$0xff]  ;;  %5913 = vmatpush2.bf16.msra.mxu0 %v9739_v11 }
  0x89   : > { %v630_v9 = vld [vmem:[%s11643_s16 + $0x600] sm:$0xff]  ;;  %v9732_v13 = vcombine.high %v502_v7, %v506_v8  ;;  %5955 = vmatprep.subr.bf16.mxu1 %v9868_v6  ;;  %v9731_v19 = vcombine.low %v502_v7, %v506_v8 }
  0x8a   : > { %v634_v10 = vld [vmem:[%s11643_s16 + $0x620] sm:$0xff]  ;;  %5956 = vmatpush2.bf16.msra.mxu1 %v9867_v12 }
  0x8b   : > { %v9860_v14 = vcombine.high %v630_v9, %v634_v10  ;;  %v750_v15 = vld [vmem:[%s11643_s16 + $0x9c0] sm:$0xff]  ;;  %5914 = vmatprep.subr.bf16.mxu0 %v9732_v13  ;;  %v9859_v20 = vcombine.low %v630_v9, %v634_v10 }
  0x8c   : > { %v754_v16 = vld [vmem:[%s11643_s16 + $0x9e0] sm:$0xff]  ;;  %5915 = vmatpush2.bf16.msra.mxu0 %v9731_v19 }
  0x8d   : > { %v878_v17 = vld [vmem:[%s11643_s16 + $0xdc0] sm:$0xff]  ;;  %v9980_v21 = vcombine.high %v750_v15, %v754_v16  ;;  %5957 = vmatprep.subr.bf16.mxu1 %v9860_v14  ;;  %v9979_v29 = vcombine.low %v750_v15, %v754_v16 }
  0x8e   : > { %v882_v18 = vld [vmem:[%s11643_s16 + $0xde0] sm:$0xff]  ;;  %5958 = vmatpush2.bf16.msra.mxu1 %v9859_v20 }
  0x8f   : > { %v10108_v22 = vcombine.high %v878_v17, %v882_v18  ;;  %v742_v23 = vld [vmem:[%s11643_s16 + $0x980] sm:$0xff]  ;;  %5970 = vmatprep.subr.bf16.mxu0 %v9980_v21  ;;  %v10107_v30 = vcombine.low %v878_v17, %v882_v18 }
  0x90   : > { %v746_v24 = vld [vmem:[%s11643_s16 + $0x9a0] sm:$0xff] }
  0x91   : > { %v10966_v25 = vld [vmem:[%s11641_s30] ss:$56 sps:$4 sm:$0xff]   ;;  %v9972_v31 = vcombine.high %v742_v23, %v746_v24  ;;  %6013 = vmatprep.subr.bf16.mxu1 %v10108_v22  ;;  %v10968_v35 = vld [vmem:[%s11641_s30 + $0x14] ss:$56 sps:$4 sm:$0xff]   ;;  %v9971_v39 = vcombine.low %v742_v23, %v746_v24 }
  0x92   : > { %v870_v26 = vld [vmem:[%s11643_s16 + $0xd80] sm:$0xff]  ;;  %5917 = vmatmul.mubr.bf16.vlgmr.msra.gmra.mxu0 %v10966_v25 }
  0x93   : > { %v874_v27 = vld [vmem:[%s11643_s16 + $0xda0] sm:$0xff]  ;;  %5971 = vmatpush1.bf16.msra.mxu0 %v9979_v29  ;;  %6002 = vmatprep.mubr.bf16.mxu0 %v10968_v35 }
  0x94   : > { %v10967_v28 = vld [vmem:[%s11641_s30 + $0x8] ss:$56 sps:$4 sm:$0xff]   ;;  %v10100_v32 = vcombine.high %v870_v26, %v874_v27  ;;  %v10970_v38 = vld [vmem:[%s11641_s30 + $0x1c] ss:$56 sps:$4 sm:$0xff]   ;;  %5972 = vmatprep.subr.bf16.mxu0 %v9972_v31  ;;  %v10099_v40 = vcombine.low %v870_v26, %v874_v27 }
  0x95   : > { %v734_v33 = vld [vmem:[%s11643_s16 + $0x940] sm:$0xff]  ;;  %5960 = vmatmul.mubr.bf16.vlgmr.msra.gmra.mxu1 %v10967_v28 }
  0x96   : > { %v738_v34 = vld [vmem:[%s11643_s16 + $0x960] sm:$0xff]  ;;  %6014 = vmatpush1.bf16.msra.mxu1 %v10107_v30  ;;  %6045 = vmatprep.mubr.bf16.mxu1 %v10970_v38 }
  0x97   : > { %v862_v36 = vld [vmem:[%s11643_s16 + $0xd40] sm:$0xff]  ;;  %v9964_v41 = vcombine.high %v734_v33, %v738_v34  ;;  %6015 = vmatprep.subr.bf16.mxu1 %v10100_v32  ;;  %5973 = vmatpush1.bf16.msra.mxu0 %v9971_v39  ;;  %v9963_v47 = vcombine.low %v734_v33, %v738_v34 }
  0x98   : > { %v866_v37 = vld [vmem:[%s11643_s16 + $0xd60] sm:$0xff] }
  0x99   : > { %v726_v42 = vld [vmem:[%s11643_s16 + $0x900] sm:$0xff]  ;;  %v10092_v43 = vcombine.high %v862_v36, %v866_v37  ;;  %5974 = vmatprep.subr.bf16.mxu0 %v9964_v41  ;;  %v10091_v48 = vcombine.low %v862_v36, %v866_v37 }
  0x9a   : > { %v730_v44 = vld [vmem:[%s11643_s16 + $0x920] sm:$0xff]  ;;  %6016 = vmatpush1.bf16.msra.mxu1 %v10099_v40 }
  0x9b   : > { %v854_v45 = vld [vmem:[%s11643_s16 + $0xd00] sm:$0xff]  ;;  %v9956_v49 = vcombine.high %v726_v42, %v730_v44  ;;  %6017 = vmatprep.subr.bf16.mxu1 %v10092_v43  ;;  %5975 = vmatpush1.bf16.msra.mxu0 %v9963_v47  ;;  %v9955_v55 = vcombine.low %v726_v42, %v730_v44 }
  0x9c   : > { %v858_v46 = vld [vmem:[%s11643_s16 + $0xd20] sm:$0xff] }
  0x9d   : > { %v10084_v50 = vcombine.high %v854_v45, %v858_v46  ;;  %v718_v51 = vld [vmem:[%s11643_s16 + $0x8c0] sm:$0xff]  ;;  %5976 = vmatprep.subr.bf16.mxu0 %v9956_v49  ;;  %v10083_v56 = vcombine.low %v854_v45, %v858_v46 }
  0x9e   : > { %v722_v52 = vld [vmem:[%s11643_s16 + $0x8e0] sm:$0xff]  ;;  %6018 = vmatpush1.bf16.msra.mxu1 %v10091_v48 }
  0x9f   : > { %v846_v53 = vld [vmem:[%s11643_s16 + $0xcc0] sm:$0xff]  ;;  %v9948_v57 = vcombine.high %v718_v51, %v722_v52  ;;  %6019 = vmatprep.subr.bf16.mxu1 %v10084_v50  ;;  %5977 = vmatpush1.bf16.msra.mxu0 %v9955_v55  ;;  %v9947_v63 = vcombine.low %v718_v51, %v722_v52 }
  0xa0   : > { %v850_v54 = vld [vmem:[%s11643_s16 + $0xce0] sm:$0xff] }
  0xa1   : > { %v10076_v58 = vcombine.high %v846_v53, %v850_v54  ;;  %v710_v59 = vld [vmem:[%s11643_s16 + $0x880] sm:$0xff]  ;;  %5978 = vmatprep.subr.bf16.mxu0 %v9948_v57  ;;  %v10075_v0 = vcombine.low %v846_v53, %v850_v54 }
  0xa2   : > { %v714_v60 = vld [vmem:[%s11643_s16 + $0x8a0] sm:$0xff]  ;;  %6020 = vmatpush1.bf16.msra.mxu1 %v10083_v56 }
  0xa3   : > { %v838_v61 = vld [vmem:[%s11643_s16 + $0xc80] sm:$0xff]  ;;  %v9940_v1 = vcombine.high %v710_v59, %v714_v60  ;;  %6021 = vmatprep.subr.bf16.mxu1 %v10076_v58  ;;  %5979 = vmatpush1.bf16.msra.mxu0 %v9947_v63  ;;  %v9939_v7 = vcombine.low %v710_v59, %v714_v60 }
  0xa4   : > { %v842_v62 = vld [vmem:[%s11643_s16 + $0xca0] sm:$0xff] }
  0xa5   : > { %v10068_v2 = vcombine.high %v838_v61, %v842_v62  ;;  %v702_v3 = vld [vmem:[%s11643_s16 + $0x840] sm:$0xff]  ;;  %5980 = vmatprep.subr.bf16.mxu0 %v9940_v1  ;;  %v10067_v8 = vcombine.low %v838_v61, %v842_v62 }
  0xa6   : > { %v706_v4 = vld [vmem:[%s11643_s16 + $0x860] sm:$0xff]  ;;  %6022 = vmatpush1.bf16.msra.mxu1 %v10075_v0 }
  0xa7   : > { %v830_v5 = vld [vmem:[%s11643_s16 + $0xc40] sm:$0xff]  ;;  %v9932_v9 = vcombine.high %v702_v3, %v706_v4  ;;  %6023 = vmatprep.subr.bf16.mxu1 %v10068_v2  ;;  %5981 = vmatpush1.bf16.msra.mxu0 %v9939_v7  ;;  %v9931_v15 = vcombine.low %v702_v3, %v706_v4 }
  0xa8   : > { %v834_v6 = vld [vmem:[%s11643_s16 + $0xc60] sm:$0xff] }
  0xa9   : > { %v10060_v10 = vcombine.high %v830_v5, %v834_v6  ;;  %v694_v11 = vld [vmem:[%s11643_s16 + $0x800] sm:$0xff]  ;;  %5982 = vmatprep.subr.bf16.mxu0 %v9932_v9  ;;  %v10059_v16 = vcombine.low %v830_v5, %v834_v6 }
  0xaa   : > { %v698_v12 = vld [vmem:[%s11643_s16 + $0x820] sm:$0xff]  ;;  %6024 = vmatpush1.bf16.msra.mxu1 %v10067_v8 }
  0xab   : > { %v822_v13 = vld [vmem:[%s11643_s16 + $0xc00] sm:$0xff]  ;;  %v9924_v17 = vcombine.high %v694_v11, %v698_v12  ;;  %6025 = vmatprep.subr.bf16.mxu1 %v10060_v10  ;;  %5983 = vmatpush1.bf16.msra.mxu0 %v9931_v15  ;;  %v9923_v23 = vcombine.low %v694_v11, %v698_v12 }
  0xac   : > { %v826_v14 = vld [vmem:[%s11643_s16 + $0xc20] sm:$0xff] }
  0xad   : > { %v10052_v18 = vcombine.high %v822_v13, %v826_v14  ;;  %v814_v19 = vld [vmem:[%s11643_s16 + $0xbc0] sm:$0xff]  ;;  %5984 = vmatprep.subr.bf16.mxu0 %v9924_v17  ;;  %v10051_v24 = vcombine.low %v822_v13, %v826_v14 }
  0xae   : > { %v818_v20 = vld [vmem:[%s11643_s16 + $0xbe0] sm:$0xff]  ;;  %6026 = vmatpush1.bf16.msra.mxu1 %v10059_v16 }
  0xaf   : > { %v942_v21 = vld [vmem:[%s11643_s16 + $0xfc0] sm:$0xff]  ;;  %v10044_v25 = vcombine.high %v814_v19, %v818_v20  ;;  %6027 = vmatprep.subr.bf16.mxu1 %v10052_v18  ;;  %5985 = vmatpush1.bf16.msra.mxu0 %v9923_v23  ;;  %v10043_v31 = vcombine.low %v814_v19, %v818_v20 }
  0xb0   : > { %v946_v22 = vld [vmem:[%s11643_s16 + $0xfe0] sm:$0xff] }
  0xb1   : > { %v10172_v26 = vcombine.high %v942_v21, %v946_v22  ;;  %v806_v27 = vld [vmem:[%s11643_s16 + $0xb80] sm:$0xff]  ;;  %5986 = vmatprep.subr.bf16.mxu0 %v10044_v25  ;;  %v10171_v32 = vcombine.low %v942_v21, %v946_v22 }
  0xb2   : > { %v810_v28 = vld [vmem:[%s11643_s16 + $0xba0] sm:$0xff]  ;;  %6028 = vmatpush1.bf16.msra.mxu1 %v10051_v24 }
  0xb3   : > { %v934_v29 = vld [vmem:[%s11643_s16 + $0xf80] sm:$0xff]  ;;  %v10036_v33 = vcombine.high %v806_v27, %v810_v28  ;;  %6029 = vmatprep.subr.bf16.mxu1 %v10172_v26  ;;  %5987 = vmatpush2.bf16.msra.mxu0 %v10043_v31  ;;  %v10035_v39 = vcombine.low %v806_v27, %v810_v28 }
  0xb4   : > { %v938_v30 = vld [vmem:[%s11643_s16 + $0xfa0] sm:$0xff] }
  0xb5   : > { %v10164_v34 = vcombine.high %v934_v29, %v938_v30  ;;  %v798_v35 = vld [vmem:[%s11643_s16 + $0xb40] sm:$0xff]  ;;  %5988 = vmatprep.subr.bf16.mxu0 %v10036_v33  ;;  %v10163_v40 = vcombine.low %v934_v29, %v938_v30 }
  0xb6   : > { %v802_v36 = vld [vmem:[%s11643_s16 + $0xb60] sm:$0xff]  ;;  %6030 = vmatpush2.bf16.msra.mxu1 %v10171_v32 }
  0xb7   : > { %v926_v37 = vld [vmem:[%s11643_s16 + $0xf40] sm:$0xff]  ;;  %v10028_v41 = vcombine.high %v798_v35, %v802_v36  ;;  %6031 = vmatprep.subr.bf16.mxu1 %v10164_v34  ;;  %5989 = vmatpush2.bf16.msra.mxu0 %v10035_v39  ;;  %v10027_v47 = vcombine.low %v798_v35, %v802_v36 }
  0xb8   : > { %v930_v38 = vld [vmem:[%s11643_s16 + $0xf60] sm:$0xff] }
  0xb9   : > { %v10156_v42 = vcombine.high %v926_v37, %v930_v38  ;;  %v790_v43 = vld [vmem:[%s11643_s16 + $0xb00] sm:$0xff]  ;;  %5990 = vmatprep.subr.bf16.mxu0 %v10028_v41  ;;  %v10155_v48 = vcombine.low %v926_v37, %v930_v38 }
  0xba   : > { %v794_v44 = vld [vmem:[%s11643_s16 + $0xb20] sm:$0xff]  ;;  %6032 = vmatpush2.bf16.msra.mxu1 %v10163_v40 }
  0xbb   : > { %v918_v45 = vld [vmem:[%s11643_s16 + $0xf00] sm:$0xff]  ;;  %v10020_v49 = vcombine.high %v790_v43, %v794_v44  ;;  %6033 = vmatprep.subr.bf16.mxu1 %v10156_v42  ;;  %5991 = vmatpush2.bf16.msra.mxu0 %v10027_v47  ;;  %v10019_v55 = vcombine.low %v790_v43, %v794_v44 }
  0xbc   : > { %v922_v46 = vld [vmem:[%s11643_s16 + $0xf20] sm:$0xff] }
  0xbd   : > { %v10148_v50 = vcombine.high %v918_v45, %v922_v46  ;;  %v782_v51 = vld [vmem:[%s11643_s16 + $0xac0] sm:$0xff]  ;;  %5992 = vmatprep.subr.bf16.mxu0 %v10020_v49  ;;  %v10147_v56 = vcombine.low %v918_v45, %v922_v46 }
  0xbe   : > { %v786_v52 = vld [vmem:[%s11643_s16 + $0xae0] sm:$0xff]  ;;  %6034 = vmatpush2.bf16.msra.mxu1 %v10155_v48 }
  0xbf   : > { %v910_v53 = vld [vmem:[%s11643_s16 + $0xec0] sm:$0xff]  ;;  %v10012_v57 = vcombine.high %v782_v51, %v786_v52  ;;  %6035 = vmatprep.subr.bf16.mxu1 %v10148_v50  ;;  %5993 = vmatpush2.bf16.msra.mxu0 %v10019_v55  ;;  %v10011_v63 = vcombine.low %v782_v51, %v786_v52 }
  0xc0   : > { %v914_v54 = vld [vmem:[%s11643_s16 + $0xee0] sm:$0xff] }
  0xc1   : > { %v10140_v58 = vcombine.high %v910_v53, %v914_v54  ;;  %v774_v59 = vld [vmem:[%s11643_s16 + $0xa80] sm:$0xff]  ;;  %5994 = vmatprep.subr.bf16.mxu0 %v10012_v57  ;;  %v10139_v0 = vcombine.low %v910_v53, %v914_v54 }
  0xc2   : > { %v778_v60 = vld [vmem:[%s11643_s16 + $0xaa0] sm:$0xff]  ;;  %6036 = vmatpush2.bf16.msra.mxu1 %v10147_v56 }
  0xc3   : > { %v902_v61 = vld [vmem:[%s11643_s16 + $0xe80] sm:$0xff]  ;;  %v10004_v1 = vcombine.high %v774_v59, %v778_v60  ;;  %6037 = vmatprep.subr.bf16.mxu1 %v10140_v58  ;;  %5995 = vmatpush2.bf16.msra.mxu0 %v10011_v63  ;;  %v10003_v7 = vcombine.low %v774_v59, %v778_v60 }
  0xc4   : > { %v906_v62 = vld [vmem:[%s11643_s16 + $0xea0] sm:$0xff] }
  0xc5   : > { %v10132_v2 = vcombine.high %v902_v61, %v906_v62  ;;  %v766_v3 = vld [vmem:[%s11643_s16 + $0xa40] sm:$0xff]  ;;  %5996 = vmatprep.subr.bf16.mxu0 %v10004_v1  ;;  %v10131_v8 = vcombine.low %v902_v61, %v906_v62 }
  0xc6   : > { %v770_v4 = vld [vmem:[%s11643_s16 + $0xa60] sm:$0xff]  ;;  %6038 = vmatpush2.bf16.msra.mxu1 %v10139_v0 }
  0xc7   : > { %v894_v5 = vld [vmem:[%s11643_s16 + $0xe40] sm:$0xff]  ;;  %v9996_v9 = vcombine.high %v766_v3, %v770_v4  ;;  %6039 = vmatprep.subr.bf16.mxu1 %v10132_v2  ;;  %5997 = vmatpush2.bf16.msra.mxu0 %v10003_v7  ;;  %v9995_v15 = vcombine.low %v766_v3, %v770_v4 }
  0xc8   : > { %v898_v6 = vld [vmem:[%s11643_s16 + $0xe60] sm:$0xff] }
  0xc9   : > { %v10124_v10 = vcombine.high %v894_v5, %v898_v6  ;;  %v758_v11 = vld [vmem:[%s11643_s16 + $0xa00] sm:$0xff]  ;;  %5998 = vmatprep.subr.bf16.mxu0 %v9996_v9  ;;  %v10123_v16 = vcombine.low %v894_v5, %v898_v6 }
  0xca   : > { %v762_v12 = vld [vmem:[%s11643_s16 + $0xa20] sm:$0xff]  ;;  %6040 = vmatpush2.bf16.msra.mxu1 %v10131_v8 }
  0xcb   : > { %v886_v13 = vld [vmem:[%s11643_s16 + $0xe00] sm:$0xff]  ;;  %v9988_v17 = vcombine.high %v758_v11, %v762_v12  ;;  %6041 = vmatprep.subr.bf16.mxu1 %v10124_v10  ;;  %5999 = vmatpush2.bf16.msra.mxu0 %v9995_v15  ;;  %v9987_v23 = vcombine.low %v758_v11, %v762_v12 }
  0xcc   : > { %v890_v14 = vld [vmem:[%s11643_s16 + $0xe20] sm:$0xff] }
  0xcd   : > { %v10116_v18 = vcombine.high %v886_v13, %v890_v14  ;;  %v1006_v19 = vld [vmem:[%s11643_s16 + $0x11c0] sm:$0xff]  ;;  %6000 = vmatprep.subr.bf16.mxu0 %v9988_v17  ;;  %v10115_v24 = vcombine.low %v886_v13, %v890_v14 }
  0xce   : > { %v1010_v20 = vld [vmem:[%s11643_s16 + $0x11e0] sm:$0xff]  ;;  %6042 = vmatpush2.bf16.msra.mxu1 %v10123_v16 }
  0xcf   : > { %v1134_v21 = vld [vmem:[%s11643_s16 + $0x15c0] sm:$0xff]  ;;  %v10236_v25 = vcombine.high %v1006_v19, %v1010_v20  ;;  %6043 = vmatprep.subr.bf16.mxu1 %v10116_v18  ;;  %6001 = vmatpush2.bf16.msra.mxu0 %v9987_v23  ;;  %v10235_v33 = vcombine.low %v1006_v19, %v1010_v20 }
  0xd0   : > { %v1138_v22 = vld [vmem:[%s11643_s16 + $0x15e0] sm:$0xff] }
  0xd1   : > { %v10364_v26 = vcombine.high %v1134_v21, %v1138_v22  ;;  %v998_v27 = vld [vmem:[%s11643_s16 + $0x1180] sm:$0xff]  ;;  %6056 = vmatprep.subr.bf16.mxu0 %v10236_v25  ;;  %v10363_v34 = vcombine.low %v1134_v21, %v1138_v22 }
  0xd2   : > { %v1002_v28 = vld [vmem:[%s11643_s16 + $0x11a0] sm:$0xff]  ;;  %6044 = vmatpush2.bf16.msra.mxu1 %v10115_v24 }
  0xd3   : > { %v10972_v29 = vld [vmem:[%s11641_s30 + $0x10] ss:$56 sps:$4 sm:$0xff]   ;;  %v10228_v35 = vcombine.high %v998_v27, %v1002_v28  ;;  %6099 = vmatprep.subr.bf16.mxu1 %v10364_v26  ;;  %v10974_v39 = vld [vmem:[%s11641_s30 + $0x24] ss:$56 sps:$4 sm:$0xff]   ;;  %v10227_v43 = vcombine.low %v998_v27, %v1002_v28 }
  0xd4   : > { %v1126_v30 = vld [vmem:[%s11643_s16 + $0x1580] sm:$0xff]  ;;  %6003 = vmatmul.mubr.bf16.vlgmr.msra.gmra.mxu0 %v10972_v29 }
  0xd5   : > { %v1130_v31 = vld [vmem:[%s11643_s16 + $0x15a0] sm:$0xff]  ;;  %6057 = vmatpush1.bf16.msra.mxu0 %v10235_v33  ;;  %6088 = vmatprep.mubr.bf16.mxu0 %v10974_v39 }
  0xd6   : > { %v10973_v32 = vld [vmem:[%s11641_s30 + $0x18] ss:$56 sps:$4 sm:$0xff]   ;;  %v10356_v36 = vcombine.high %v1126_v30, %v1130_v31  ;;  %v10976_v42 = vld [vmem:[%s11641_s30 + $0x2c] ss:$56 sps:$4 sm:$0xff]   ;;  %6058 = vmatprep.subr.bf16.mxu0 %v10228_v35  ;;  %v10355_v44 = vcombine.low %v1126_v30, %v1130_v31 }
  0xd7   : > { %v990_v37 = vld [vmem:[%s11643_s16 + $0x1140] sm:$0xff]  ;;  %6046 = vmatmul.mubr.bf16.vlgmr.msra.gmra.mxu1 %v10973_v32 }
  0xd8   : > { %v994_v38 = vld [vmem:[%s11643_s16 + $0x1160] sm:$0xff]  ;;  %6100 = vmatpush1.bf16.msra.mxu1 %v10363_v34  ;;  %6131 = vmatprep.mubr.bf16.mxu1 %v10976_v42 }
  0xd9   : > { %v1118_v40 = vld [vmem:[%s11643_s16 + $0x1540] sm:$0xff]  ;;  %v10220_v45 = vcombine.high %v990_v37, %v994_v38  ;;  %6101 = vmatprep.subr.bf16.mxu1 %v10356_v36  ;;  %6059 = vmatpush1.bf16.msra.mxu0 %v10227_v43  ;;  %v10219_v51 = vcombine.low %v990_v37, %v994_v38 }
  0xda   : > { %v1122_v41 = vld [vmem:[%s11643_s16 + $0x1560] sm:$0xff] }
  0xdb   : > { %v10348_v46 = vcombine.high %v1118_v40, %v1122_v41  ;;  %v982_v47 = vld [vmem:[%s11643_s16 + $0x1100] sm:$0xff]  ;;  %6060 = vmatprep.subr.bf16.mxu0 %v10220_v45  ;;  %v10347_v52 = vcombine.low %v1118_v40, %v1122_v41 }
  0xdc   : > { %v986_v48 = vld [vmem:[%s11643_s16 + $0x1120] sm:$0xff]  ;;  %6102 = vmatpush1.bf16.msra.mxu1 %v10355_v44 }
  0xdd   : > { %v1110_v49 = vld [vmem:[%s11643_s16 + $0x1500] sm:$0xff]  ;;  %v10212_v53 = vcombine.high %v982_v47, %v986_v48  ;;  %6103 = vmatprep.subr.bf16.mxu1 %v10348_v46  ;;  %6061 = vmatpush1.bf16.msra.mxu0 %v10219_v51  ;;  %v10211_v59 = vcombine.low %v982_v47, %v986_v48 }
  0xde   : > { %v1114_v50 = vld [vmem:[%s11643_s16 + $0x1520] sm:$0xff] }
  0xdf   : > { %v10340_v54 = vcombine.high %v1110_v49, %v1114_v50  ;;  %v974_v55 = vld [vmem:[%s11643_s16 + $0x10c0] sm:$0xff]  ;;  %6062 = vmatprep.subr.bf16.mxu0 %v10212_v53  ;;  %v10339_v60 = vcombine.low %v1110_v49, %v1114_v50 }
  0xe0   : > { %v978_v56 = vld [vmem:[%s11643_s16 + $0x10e0] sm:$0xff]  ;;  %6104 = vmatpush1.bf16.msra.mxu1 %v10347_v52 }
  0xe1   : > { %v1102_v57 = vld [vmem:[%s11643_s16 + $0x14c0] sm:$0xff]  ;;  %v10204_v61 = vcombine.high %v974_v55, %v978_v56  ;;  %6105 = vmatprep.subr.bf16.mxu1 %v10340_v54  ;;  %6063 = vmatpush1.bf16.msra.mxu0 %v10211_v59  ;;  %v10203_v3 = vcombine.low %v974_v55, %v978_v56 }
  0xe2   : > { %v1106_v58 = vld [vmem:[%s11643_s16 + $0x14e0] sm:$0xff] }
  0xe3   : > { %v10332_v62 = vcombine.high %v1102_v57, %v1106_v58  ;;  %v966_v63 = vld [vmem:[%s11643_s16 + $0x1080] sm:$0xff]  ;;  %6064 = vmatprep.subr.bf16.mxu0 %v10204_v61  ;;  %v10331_v4 = vcombine.low %v1102_v57, %v1106_v58 }
  0xe4   : > { %v970_v0 = vld [vmem:[%s11643_s16 + $0x10a0] sm:$0xff]  ;;  %6106 = vmatpush1.bf16.msra.mxu1 %v10339_v60 }
  0xe5   : > { %v1094_v1 = vld [vmem:[%s11643_s16 + $0x1480] sm:$0xff]  ;;  %v10196_v5 = vcombine.high %v966_v63, %v970_v0  ;;  %6107 = vmatprep.subr.bf16.mxu1 %v10332_v62  ;;  %6065 = vmatpush1.bf16.msra.mxu0 %v10203_v3  ;;  %v10195_v11 = vcombine.low %v966_v63, %v970_v0 }
  0xe6   : > { %v1098_v2 = vld [vmem:[%s11643_s16 + $0x14a0] sm:$0xff] }
  0xe7   : > { %v10324_v6 = vcombine.high %v1094_v1, %v1098_v2  ;;  %v958_v7 = vld [vmem:[%s11643_s16 + $0x1040] sm:$0xff]  ;;  %6066 = vmatprep.subr.bf16.mxu0 %v10196_v5  ;;  %v10323_v12 = vcombine.low %v1094_v1, %v1098_v2 }
  0xe8   : > { %v962_v8 = vld [vmem:[%s11643_s16 + $0x1060] sm:$0xff]  ;;  %6108 = vmatpush1.bf16.msra.mxu1 %v10331_v4 }
  0xe9   : > { %v1086_v9 = vld [vmem:[%s11643_s16 + $0x1440] sm:$0xff]  ;;  %v10188_v13 = vcombine.high %v958_v7, %v962_v8  ;;  %6109 = vmatprep.subr.bf16.mxu1 %v10324_v6  ;;  %6067 = vmatpush1.bf16.msra.mxu0 %v10195_v11  ;;  %v10187_v19 = vcombine.low %v958_v7, %v962_v8 }
  0xea   : > { %v1090_v10 = vld [vmem:[%s11643_s16 + $0x1460] sm:$0xff] }
  0xeb   : > { %v10316_v14 = vcombine.high %v1086_v9, %v1090_v10  ;;  %v950_v15 = vld [vmem:[%s11643_s16 + $0x1000] sm:$0xff]  ;;  %6068 = vmatprep.subr.bf16.mxu0 %v10188_v13  ;;  %v10315_v20 = vcombine.low %v1086_v9, %v1090_v10 }
  0xec   : > { %v954_v16 = vld [vmem:[%s11643_s16 + $0x1020] sm:$0xff]  ;;  %6110 = vmatpush1.bf16.msra.mxu1 %v10323_v12 }
  0xed   : > { %v1078_v17 = vld [vmem:[%s11643_s16 + $0x1400] sm:$0xff]  ;;  %v10180_v21 = vcombine.high %v950_v15, %v954_v16  ;;  %6111 = vmatprep.subr.bf16.mxu1 %v10316_v14  ;;  %6069 = vmatpush1.bf16.msra.mxu0 %v10187_v19  ;;  %v10179_v27 = vcombine.low %v950_v15, %v954_v16 }
  0xee   : > { %v1082_v18 = vld [vmem:[%s11643_s16 + $0x1420] sm:$0xff] }
  0xef   : > { %v10308_v22 = vcombine.high %v1078_v17, %v1082_v18  ;;  %v1070_v23 = vld [vmem:[%s11643_s16 + $0x13c0] sm:$0xff]  ;;  %6070 = vmatprep.subr.bf16.mxu0 %v10180_v21  ;;  %v10307_v28 = vcombine.low %v1078_v17, %v1082_v18 }
  0xf0   : > { %v1074_v24 = vld [vmem:[%s11643_s16 + $0x13e0] sm:$0xff]  ;;  %6112 = vmatpush1.bf16.msra.mxu1 %v10315_v20 }
  0xf1   : > { %v1198_v25 = vld [vmem:[%s11643_s16 + $0x17c0] sm:$0xff]  ;;  %v10300_v29 = vcombine.high %v1070_v23, %v1074_v24  ;;  %6113 = vmatprep.subr.bf16.mxu1 %v10308_v22  ;;  %6071 = vmatpush1.bf16.msra.mxu0 %v10179_v27  ;;  %v10299_v35 = vcombine.low %v1070_v23, %v1074_v24 }
  0xf2   : > { %v1202_v26 = vld [vmem:[%s11643_s16 + $0x17e0] sm:$0xff] }
  0xf3   : > { %v10428_v30 = vcombine.high %v1198_v25, %v1202_v26  ;;  %v1062_v31 = vld [vmem:[%s11643_s16 + $0x1380] sm:$0xff]  ;;  %6072 = vmatprep.subr.bf16.mxu0 %v10300_v29  ;;  %v10427_v36 = vcombine.low %v1198_v25, %v1202_v26  ;;  %v495_v25 = vld [vmem:[%s11643_s16 + $0x1c8] sm:$0xff] }
  0xf4   : > { %v1066_v32 = vld [vmem:[%s11643_s16 + $0x13a0] sm:$0xff]  ;;  %6114 = vmatpush1.bf16.msra.mxu1 %v10307_v28  ;;  %v499_v26 = vld [vmem:[%s11643_s16 + $0x1e8] sm:$0xff] }
  0xf5   : > { %v1190_v33 = vld [vmem:[%s11643_s16 + $0x1780] sm:$0xff]  ;;  %v10292_v37 = vcombine.high %v1062_v31, %v1066_v32  ;;  %6115 = vmatprep.subr.bf16.mxu1 %v10428_v30  ;;  %6073 = vmatpush2.bf16.msra.mxu0 %v10299_v35  ;;  %v10291_v43 = vcombine.low %v1062_v31, %v1066_v32  ;;  %v9726_v30 = vcombine.high %v495_v25, %v499_v26  ;;  %v491_v35 = vld [vmem:[%s11643_s16 + $0x1a8] sm:$0xff] }
  0xf6   : > { %v1194_v34 = vld [vmem:[%s11643_s16 + $0x17a0] sm:$0xff] }
  0xf7   : > { %v10420_v38 = vcombine.high %v1190_v33, %v1194_v34  ;;  %v1054_v39 = vld [vmem:[%s11643_s16 + $0x1340] sm:$0xff]  ;;  %6074 = vmatprep.subr.bf16.mxu0 %v10292_v37  ;;  %v10419_v44 = vcombine.low %v1190_v33, %v1194_v34  ;;  %v487_v34 = vld [vmem:[%s11643_s16 + $0x188] sm:$0xff] }
  0xf8   : > { %v1058_v40 = vld [vmem:[%s11643_s16 + $0x1360] sm:$0xff]  ;;  %6116 = vmatpush2.bf16.msra.mxu1 %v10427_v36 }
  0xf9   : > { %v1182_v41 = vld [vmem:[%s11643_s16 + $0x1740] sm:$0xff]  ;;  %v10284_v45 = vcombine.high %v1054_v39, %v1058_v40  ;;  %6117 = vmatprep.subr.bf16.mxu1 %v10420_v38  ;;  %6075 = vmatpush2.bf16.msra.mxu0 %v10291_v43  ;;  %v10283_v51 = vcombine.low %v1054_v39, %v1058_v40  ;;  %v9725_v38 = vcombine.low %v495_v25, %v499_v26 }
  0xfa   : > { %v1186_v42 = vld [vmem:[%s11643_s16 + $0x1760] sm:$0xff]  ;;  %v9718_v40 = vcombine.high %v487_v34, %v491_v35 }
  0xfb   : > { %v10412_v46 = vcombine.high %v1182_v41, %v1186_v42  ;;  %v1046_v47 = vld [vmem:[%s11643_s16 + $0x1300] sm:$0xff]  ;;  %6076 = vmatprep.subr.bf16.mxu0 %v10284_v45  ;;  %v10411_v52 = vcombine.low %v1182_v41, %v1186_v42  ;;  %v483_v45 = vld [vmem:[%s11643_s16 + $0x168] sm:$0xff] }
  0xfc   : > { %v1050_v48 = vld [vmem:[%s11643_s16 + $0x1320] sm:$0xff]  ;;  %6118 = vmatpush2.bf16.msra.mxu1 %v10419_v44  ;;  %v479_v44 = vld [vmem:[%s11643_s16 + $0x148] sm:$0xff] }
  0xfd   : > { %v1174_v49 = vld [vmem:[%s11643_s16 + $0x1700] sm:$0xff]  ;;  %v10276_v53 = vcombine.high %v1046_v47, %v1050_v48  ;;  %6119 = vmatprep.subr.bf16.mxu1 %v10412_v46  ;;  %6077 = vmatpush2.bf16.msra.mxu0 %v10283_v51  ;;  %v10275_v59 = vcombine.low %v1046_v47, %v1050_v48  ;;  %v9717_v47 = vcombine.low %v487_v34, %v491_v35 }
  0xfe   : > { %v1178_v50 = vld [vmem:[%s11643_s16 + $0x1720] sm:$0xff] }
  0xff   : > { %v10404_v54 = vcombine.high %v1174_v49, %v1178_v50  ;;  %v1038_v55 = vld [vmem:[%s11643_s16 + $0x12c0] sm:$0xff]  ;;  %6078 = vmatprep.subr.bf16.mxu0 %v10276_v53  ;;  %v10403_v60 = vcombine.low %v1174_v49, %v1178_v50  ;;  %v9710_v49 = vcombine.high %v479_v44, %v483_v45  ;;  %v475_v53 = vld [vmem:[%s11643_s16 + $0x128] sm:$0xff] }
 0x100   : > { %v1042_v56 = vld [vmem:[%s11643_s16 + $0x12e0] sm:$0xff]  ;;  %6120 = vmatpush2.bf16.msra.mxu1 %v10411_v52  ;;  %v471_v52 = vld [vmem:[%s11643_s16 + $0x108] sm:$0xff] }
 0x101   : > { %v1166_v57 = vld [vmem:[%s11643_s16 + $0x16c0] sm:$0xff]  ;;  %v10268_v61 = vcombine.high %v1038_v55, %v1042_v56  ;;  %6121 = vmatprep.subr.bf16.mxu1 %v10404_v54  ;;  %6079 = vmatpush2.bf16.msra.mxu0 %v10275_v59  ;;  %v10267_v3 = vcombine.low %v1038_v55, %v1042_v56  ;;  %v9709_v56 = vcombine.low %v479_v44, %v483_v45  ;;  %v543_v45 = vld [vmem:[%s11643_s16 + $0x348] sm:$0xff] }
 0x102   : > { %v1170_v58 = vld [vmem:[%s11643_s16 + $0x16e0] sm:$0xff] }
 0x103   : > { %v10396_v62 = vcombine.high %v1166_v57, %v1170_v58  ;;  %v1030_v63 = vld [vmem:[%s11643_s16 + $0x1280] sm:$0xff]  ;;  %6080 = vmatprep.subr.bf16.mxu0 %v10268_v61  ;;  %v10395_v4 = vcombine.low %v1166_v57, %v1170_v58  ;;  %v9702_v58 = vcombine.high %v471_v52, %v475_v53  ;;  %v463_v61 = vld [vmem:[%s11643_s16 + $0xc8] sm:$0xff] }
 0x104   : > { %v1034_v0 = vld [vmem:[%s11643_s16 + $0x12a0] sm:$0xff]  ;;  %6122 = vmatpush2.bf16.msra.mxu1 %v10403_v60 }
 0x105   : > { %v1158_v1 = vld [vmem:[%s11643_s16 + $0x1680] sm:$0xff]  ;;  %v10260_v5 = vcombine.high %v1030_v63, %v1034_v0  ;;  %6123 = vmatprep.subr.bf16.mxu1 %v10396_v62  ;;  %6081 = vmatpush2.bf16.msra.mxu0 %v10267_v3  ;;  %v10259_v11 = vcombine.low %v1030_v63, %v1034_v0  ;;  %v467_v62 = vld [vmem:[%s11643_s16 + $0xe8] sm:$0xff]  ;;  %v9701_v0 = vcombine.low %v471_v52, %v475_v53 }
 0x106   : > { %v1162_v2 = vld [vmem:[%s11643_s16 + $0x16a0] sm:$0xff]  ;;  %v535_v53 = vld [vmem:[%s11643_s16 + $0x308] sm:$0xff] }
 0x107   : > { %v10388_v6 = vcombine.high %v1158_v1, %v1162_v2  ;;  %v1022_v7 = vld [vmem:[%s11643_s16 + $0x1240] sm:$0xff]  ;;  %6082 = vmatprep.subr.bf16.mxu0 %v10260_v5  ;;  %v10387_v12 = vcombine.low %v1158_v1, %v1162_v2  ;;  %v9694_v2 = vcombine.high %v463_v61, %v467_v62  ;;  %v455_v5 = vld [vmem:[%s11643_s16 + $0x88] sm:$0xff] }
 0x108   : > { %v1026_v8 = vld [vmem:[%s11643_s16 + $0x1260] sm:$0xff]  ;;  %6124 = vmatpush2.bf16.msra.mxu1 %v10395_v4 }
 0x109   : > { %v1150_v9 = vld [vmem:[%s11643_s16 + $0x1640] sm:$0xff]  ;;  %v10252_v13 = vcombine.high %v1022_v7, %v1026_v8  ;;  %6125 = vmatprep.subr.bf16.mxu1 %v10388_v6  ;;  %6083 = vmatpush2.bf16.msra.mxu0 %v10259_v11  ;;  %v10251_v19 = vcombine.low %v1022_v7, %v1026_v8  ;;  %v459_v6 = vld [vmem:[%s11643_s16 + $0xa8] sm:$0xff]  ;;  %v9693_v8 = vcombine.low %v463_v61, %v467_v62 }
 0x10a   : > { %v1154_v10 = vld [vmem:[%s11643_s16 + $0x1660] sm:$0xff]  ;;  %v527_v61 = vld [vmem:[%s11643_s16 + $0x2c8] sm:$0xff] }
 0x10b   : > { %v10380_v14 = vcombine.high %v1150_v9, %v1154_v10  ;;  %v1014_v15 = vld [vmem:[%s11643_s16 + $0x1200] sm:$0xff]  ;;  %6084 = vmatprep.subr.bf16.mxu0 %v10252_v13  ;;  %v10379_v20 = vcombine.low %v1150_v9, %v1154_v10  ;;  %v9686_v10 = vcombine.high %v455_v5, %v459_v6  ;;  %v447_v13 = vld [vmem:[%s11643_s16 + $0x48] sm:$0xff] }
 0x10c   : > { %v1018_v16 = vld [vmem:[%s11643_s16 + $0x1220] sm:$0xff]  ;;  %6126 = vmatpush2.bf16.msra.mxu1 %v10387_v12  ;;  %v531_v62 = vld [vmem:[%s11643_s16 + $0x2e8] sm:$0xff] }
 0x10d   : > { %v1142_v17 = vld [vmem:[%s11643_s16 + $0x1600] sm:$0xff]  ;;  %v10244_v21 = vcombine.high %v1014_v15, %v1018_v16  ;;  %6127 = vmatprep.subr.bf16.mxu1 %v10380_v14  ;;  %6085 = vmatpush2.bf16.msra.mxu0 %v10251_v19  ;;  %v10243_v27 = vcombine.low %v1014_v15, %v1018_v16  ;;  %v451_v14 = vld [vmem:[%s11643_s16 + $0x68] sm:$0xff]  ;;  %v9685_v16 = vcombine.low %v455_v5, %v459_v6 }
 0x10e   : > { %v1146_v18 = vld [vmem:[%s11643_s16 + $0x1620] sm:$0xff]  ;;  %v519_v5 = vld [vmem:[%s11643_s16 + $0x288] sm:$0xff] }
 0x10f   : > { %v10372_v22 = vcombine.high %v1142_v17, %v1146_v18  ;;  %v1262_v23 = vld [vmem:[%s11643_s16 + $0x19c0] sm:$0xff]  ;;  %6086 = vmatprep.subr.bf16.mxu0 %v10244_v21  ;;  %v10371_v28 = vcombine.low %v1142_v17, %v1146_v18  ;;  %v9678_v18 = vcombine.high %v447_v13, %v451_v14  ;;  %v439_v21 = vld [vmem:[%s11643_s16 + $0x8] sm:$0xff] }
 0x110   : > { %v1266_v24 = vld [vmem:[%s11643_s16 + $0x19e0] sm:$0xff]  ;;  %6128 = vmatpush2.bf16.msra.mxu1 %v10379_v20  ;;  %v523_v6 = vld [vmem:[%s11643_s16 + $0x2a8] sm:$0xff] }
 0x111   : > { %v10492_v29 = vcombine.high %v1262_v23, %v1266_v24  ;;  %6129 = vmatprep.subr.bf16.mxu1 %v10372_v22  ;;  %v1254_v31 = vld [vmem:[%s11643_s16 + $0x1980] sm:$0xff]  ;;  %6087 = vmatpush2.bf16.msra.mxu0 %v10243_v27  ;;  %v10491_v37 = vcombine.low %v1262_v23, %v1266_v24  ;;  %v443_v22 = vld [vmem:[%s11643_s16 + $0x28] sm:$0xff]  ;;  %v9677_v24 = vcombine.low %v447_v13, %v451_v14 }
 0x112   : > { %v1258_v32 = vld [vmem:[%s11643_s16 + $0x19a0] sm:$0xff]  ;;  %v9670_v26 = vcombine.high %v439_v21, %v443_v22  ;;  %v511_v13 = vld [vmem:[%s11643_s16 + $0x248] sm:$0xff] }
 0x113   : > { %v10978_v33 = vld [vmem:[%s11641_s30 + $0x20] ss:$56 sps:$4 sm:$0xff]   ;;  %6142 = vmatprep.subr.bf16.mxu0 %v10492_v29  ;;  %v10484_v39 = vcombine.high %v1254_v31, %v1258_v32  ;;  %v10980_v43 = vld [vmem:[%s11641_s30 + $0x34] ss:$56 sps:$4 sm:$0xff]   ;;  %v10483_v46 = vcombine.low %v1254_v31, %v1258_v32  ;;  %v10983_v54 = vld [vmem:[%s11641_s30 + $0x4] ss:$56 sps:$4 sm:$0xff]   ;;  %v9669_v32 = vcombine.low %v439_v21, %v443_v22 }
 0x114   : > { %v10979_v36 = vld [vmem:[%s11641_s30 + $0x28] ss:$56 sps:$4 sm:$0xff]   ;;  %6130 = vmatpush2.bf16.msra.mxu1 %v10371_v28  ;;  %6089 = vmatmul.mubr.bf16.vlgmr.msra.gmra.mxu0 %v10978_v33 }
 0x115   : > { %6185 = vmatprep.subr.bf16.mxu1 %v9726_v30  ;;  %v1246_v41 = vld [vmem:[%s11643_s16 + $0x1940] sm:$0xff]  ;;  %6143 = vmatpush1.bf16.msra.mxu0 %v10491_v37  ;;  %v559_v29 = vld [vmem:[%s11643_s16 + $0x3c8] sm:$0xff] }
 0x116   : > { %v1250_v42 = vld [vmem:[%s11643_s16 + $0x1960] sm:$0xff]  ;;  %6144 = vmatprep.subr.bf16.mxu0 %v10484_v39  ;;  %6174 = vmatprep.mubr.bf16.mxu0 %v10980_v43  ;;  %v563_v30 = vld [vmem:[%s11643_s16 + $0x3e8] sm:$0xff] }
 0x117   : > { %6132 = vmatmul.mubr.bf16.vlgmr.msra.gmra.mxu1 %v10979_v36  ;;  %v10476_v48 = vcombine.high %v1246_v41, %v1250_v42  ;;  %v1238_v50 = vld [vmem:[%s11643_s16 + $0x1900] sm:$0xff]  ;;  %v10475_v55 = vcombine.low %v1246_v41, %v1250_v42  ;;  %v9790_v34 = vcombine.high %v559_v29, %v563_v30  ;;  %v551_v37 = vld [vmem:[%s11643_s16 + $0x388] sm:$0xff] }
 0x118   : > { %6186 = vmatpush1.bf16.msra.mxu1 %v9725_v38  ;;  %v1242_v51 = vld [vmem:[%s11643_s16 + $0x1920] sm:$0xff]  ;;  %6217 = vmatprep.mubr.bf16.mxu1 %v10983_v54  ;;  %v555_v38 = vld [vmem:[%s11643_s16 + $0x3a8] sm:$0xff] }
 0x119   : > { %6187 = vmatprep.subr.bf16.mxu1 %v9718_v40  ;;  %6145 = vmatpush1.bf16.msra.mxu0 %v10483_v46  ;;  %v10468_v57 = vcombine.high %v1238_v50, %v1242_v51  ;;  %v1230_v59 = vld [vmem:[%s11643_s16 + $0x18c0] sm:$0xff]  ;;  %v10467_v63 = vcombine.low %v1238_v50, %v1242_v51  ;;  %v9789_v40 = vcombine.low %v559_v29, %v563_v30  ;;  %v547_v46 = vld [vmem:[%s11643_s16 + $0x368] sm:$0xff] }
 0x11a   : > { %6146 = vmatprep.subr.bf16.mxu0 %v10476_v48  ;;  %v1234_v60 = vld [vmem:[%s11643_s16 + $0x18e0] sm:$0xff]  ;;  %v9782_v42 = vcombine.high %v551_v37, %v555_v38  ;;  %v9781_v48 = vcombine.low %v551_v37, %v555_v38  ;;  %v9774_v50 = vcombine.high %v543_v45, %v547_v46  ;;  %v539_v54 = vld [vmem:[%s11643_s16 + $0x328] sm:$0xff] }
 0x11b   : > { %v10460_v1 = vcombine.high %v1230_v59, %v1234_v60  ;;  %v1222_v3 = vld [vmem:[%s11643_s16 + $0x1880] sm:$0xff]  ;;  %v10459_v7 = vcombine.low %v1230_v59, %v1234_v60  ;;  %v515_v14 = vld [vmem:[%s11643_s16 + $0x268] sm:$0xff] }
 0x11c   : > { %6188 = vmatpush1.bf16.msra.mxu1 %v9717_v47  ;;  %v1226_v4 = vld [vmem:[%s11643_s16 + $0x18a0] sm:$0xff]  ;;  %v503_v21 = vld [vmem:[%s11643_s16 + $0x208] sm:$0xff] }
 0x11d   : > { %6189 = vmatprep.subr.bf16.mxu1 %v9710_v49  ;;  %6147 = vmatpush1.bf16.msra.mxu0 %v10475_v55  ;;  %v10452_v9 = vcombine.high %v1222_v3, %v1226_v4  ;;  %v1214_v11 = vld [vmem:[%s11643_s16 + $0x1840] sm:$0xff]  ;;  %v10451_v15 = vcombine.low %v1222_v3, %v1226_v4  ;;  %v507_v22 = vld [vmem:[%s11643_s16 + $0x228] sm:$0xff] }
 0x11e   : > { %6148 = vmatprep.subr.bf16.mxu0 %v10468_v57  ;;  %v1218_v12 = vld [vmem:[%s11643_s16 + $0x1860] sm:$0xff]  ;;  %v751_v29 = vld [vmem:[%s11643_s16 + $0x9c8] sm:$0xff] }
 0x11f   : > { %v10444_v17 = vcombine.high %v1214_v11, %v1218_v12  ;;  %v1206_v19 = vld [vmem:[%s11643_s16 + $0x1800] sm:$0xff]  ;;  %v10443_v23 = vcombine.low %v1214_v11, %v1218_v12  ;;  %v755_v30 = vld [vmem:[%s11643_s16 + $0x9e8] sm:$0xff] }
 0x120   : > { %6190 = vmatpush1.bf16.msra.mxu1 %v9709_v56  ;;  %v1210_v20 = vld [vmem:[%s11643_s16 + $0x1820] sm:$0xff]  ;;  %v9773_v56 = vcombine.low %v543_v45, %v547_v46  ;;  %v743_v38 = vld [vmem:[%s11643_s16 + $0x988] sm:$0xff] }
 0x121   : > { %6191 = vmatprep.subr.bf16.mxu1 %v9702_v58  ;;  %6149 = vmatpush1.bf16.msra.mxu0 %v10467_v63  ;;  %v10436_v25 = vcombine.high %v1206_v19, %v1210_v20  ;;  %v1326_v27 = vld [vmem:[%s11643_s16 + $0x1bc0] sm:$0xff]  ;;  %v10435_v31 = vcombine.low %v1206_v19, %v1210_v20  ;;  %v9766_v58 = vcombine.high %v535_v53, %v539_v54  ;;  %v611_v45 = vld [vmem:[%s11643_s16 + $0x568] sm:$0xff] }
 0x122   : > { %6150 = vmatprep.subr.bf16.mxu0 %v10460_v1  ;;  %v1330_v28 = vld [vmem:[%s11643_s16 + $0x1be0] sm:$0xff]  ;;  %v735_v46 = vld [vmem:[%s11643_s16 + $0x948] sm:$0xff] }
 0x123   : > { %v10556_v33 = vcombine.high %v1326_v27, %v1330_v28  ;;  %v1318_v35 = vld [vmem:[%s11643_s16 + $0x1b80] sm:$0xff]  ;;  %v10555_v39 = vcombine.low %v1326_v27, %v1330_v28  ;;  %v623_v27 = vld [vmem:[%s11643_s16 + $0x5c8] sm:$0xff] }
 0x124   : > { %6192 = vmatpush1.bf16.msra.mxu1 %v9701_v0  ;;  %v1322_v36 = vld [vmem:[%s11643_s16 + $0x1ba0] sm:$0xff]  ;;  %v9765_v0 = vcombine.low %v535_v53, %v539_v54  ;;  %v627_v28 = vld [vmem:[%s11643_s16 + $0x5e8] sm:$0xff] }
 0x125   : > { %6193 = vmatprep.subr.bf16.mxu1 %v9694_v2  ;;  %6151 = vmatpush1.bf16.msra.mxu0 %v10459_v7  ;;  %v10548_v41 = vcombine.high %v1318_v35, %v1322_v36  ;;  %v1310_v43 = vld [vmem:[%s11643_s16 + $0x1b40] sm:$0xff]  ;;  %v10547_v47 = vcombine.low %v1318_v35, %v1322_v36  ;;  %v9758_v2 = vcombine.high %v527_v61, %v531_v62  ;;  %v615_v35 = vld [vmem:[%s11643_s16 + $0x588] sm:$0xff] }
 0x126   : > { %6152 = vmatprep.subr.bf16.mxu0 %v10452_v9  ;;  %v1314_v44 = vld [vmem:[%s11643_s16 + $0x1b60] sm:$0xff]  ;;  %v619_v36 = vld [vmem:[%s11643_s16 + $0x5a8] sm:$0xff] }
 0x127   : > { %v10540_v49 = vcombine.high %v1310_v43, %v1314_v44  ;;  %v1302_v51 = vld [vmem:[%s11643_s16 + $0x1b00] sm:$0xff]  ;;  %v10539_v55 = vcombine.low %v1310_v43, %v1314_v44  ;;  %v607_v44 = vld [vmem:[%s11643_s16 + $0x548] sm:$0xff] }
 0x128   : > { %6194 = vmatpush1.bf16.msra.mxu1 %v9693_v8  ;;  %v1306_v52 = vld [vmem:[%s11643_s16 + $0x1b20] sm:$0xff]  ;;  %v9757_v8 = vcombine.low %v527_v61, %v531_v62  ;;  %v599_v53 = vld [vmem:[%s11643_s16 + $0x508] sm:$0xff] }
 0x129   : > { %6195 = vmatprep.subr.bf16.mxu1 %v9686_v10  ;;  %6153 = vmatpush1.bf16.msra.mxu0 %v10451_v15  ;;  %v10532_v57 = vcombine.high %v1302_v51, %v1306_v52  ;;  %v1294_v59 = vld [vmem:[%s11643_s16 + $0x1ac0] sm:$0xff]  ;;  %v10531_v63 = vcombine.low %v1302_v51, %v1306_v52  ;;  %v9750_v10 = vcombine.high %v519_v5, %v523_v6  ;;  %v603_v54 = vld [vmem:[%s11643_s16 + $0x528] sm:$0xff] }
 0x12a   : > { %6154 = vmatprep.subr.bf16.mxu0 %v10444_v17  ;;  %v1298_v60 = vld [vmem:[%s11643_s16 + $0x1ae0] sm:$0xff]  ;;  %v9838_v51 = vcombine.high %v607_v44, %v611_v45  ;;  %v9830_v61 = vcombine.high %v599_v53, %v603_v54 }
 0x12b   : > { %v10524_v1 = vcombine.high %v1294_v59, %v1298_v60  ;;  %v1286_v3 = vld [vmem:[%s11643_s16 + $0x1a80] sm:$0xff]  ;;  %v10523_v7 = vcombine.low %v1294_v59, %v1298_v60  ;;  %v9837_v59 = vcombine.low %v607_v44, %v611_v45 }
 0x12c   : > { %6196 = vmatpush1.bf16.msra.mxu1 %v9685_v16  ;;  %v1290_v4 = vld [vmem:[%s11643_s16 + $0x1aa0] sm:$0xff]  ;;  %v9749_v16 = vcombine.low %v519_v5, %v523_v6 }
 0x12d   : > { %6197 = vmatprep.subr.bf16.mxu1 %v9678_v18  ;;  %6155 = vmatpush1.bf16.msra.mxu0 %v10443_v23  ;;  %v10516_v9 = vcombine.high %v1286_v3, %v1290_v4  ;;  %v1278_v11 = vld [vmem:[%s11643_s16 + $0x1a40] sm:$0xff]  ;;  %v10515_v15 = vcombine.low %v1286_v3, %v1290_v4  ;;  %v9742_v18 = vcombine.high %v511_v13, %v515_v14 }
 0x12e   : > { %6156 = vmatprep.subr.bf16.mxu0 %v10436_v25  ;;  %v1282_v12 = vld [vmem:[%s11643_s16 + $0x1a60] sm:$0xff]  ;;  %v9829_v3 = vcombine.low %v599_v53, %v603_v54 }
 0x12f   : > { %v10508_v17 = vcombine.high %v1278_v11, %v1282_v12  ;;  %v1270_v19 = vld [vmem:[%s11643_s16 + $0x1a00] sm:$0xff]  ;;  %v10507_v23 = vcombine.low %v1278_v11, %v1282_v12 }
 0x130   : > { %6198 = vmatpush1.bf16.msra.mxu1 %v9677_v24  ;;  %v1274_v20 = vld [vmem:[%s11643_s16 + $0x1a20] sm:$0xff]  ;;  %v9741_v24 = vcombine.low %v511_v13, %v515_v14 }
 0x131   : > { %6199 = vmatprep.subr.bf16.mxu1 %v9670_v26  ;;  %6157 = vmatpush1.bf16.msra.mxu0 %v10435_v31  ;;  %v10500_v25 = vcombine.high %v1270_v19, %v1274_v20  ;;  %v9734_v26 = vcombine.high %v503_v21, %v507_v22  ;;  %v10499_v31 = vcombine.low %v1270_v19, %v1274_v20  ;;  %v10982_v37 = vld [vmem:[%s11641_s30 + $0x30] ss:$56 sps:$4 sm:$0xff]  }
 0x132   : > { %6158 = vmatprep.subr.bf16.mxu0 %v10556_v33  ;;  %v9854_v33 = vcombine.high %v623_v27, %v627_v28 }
 0x134   : > { %6200 = vmatpush1.bf16.msra.mxu1 %v9669_v32  ;;  %v9733_v32 = vcombine.low %v503_v21, %v507_v22 }
 0x135   : > { %6201 = vmatprep.subr.bf16.mxu1 %v9790_v34  ;;  %6159 = vmatpush2.bf16.msra.mxu0 %v10555_v39  ;;  %v9982_v34 = vcombine.high %v751_v29, %v755_v30  ;;  %v747_v39 = vld [vmem:[%s11643_s16 + $0x9a8] sm:$0xff] }
 0x136   : > { %6160 = vmatprep.subr.bf16.mxu0 %v10548_v41  ;;  %v9981_v41 = vcombine.low %v751_v29, %v755_v30  ;;  %v9974_v43 = vcombine.high %v743_v38, %v747_v39 }
 0x138   : > { %6202 = vmatpush2.bf16.msra.mxu1 %v9789_v40  ;;  %v9853_v40 = vcombine.low %v623_v27, %v627_v28 }
 0x139   : > { %6203 = vmatprep.subr.bf16.mxu1 %v9782_v42  ;;  %6161 = vmatpush2.bf16.msra.mxu0 %v10547_v47  ;;  %v9846_v42 = vcombine.high %v615_v35, %v619_v36  ;;  %v739_v47 = vld [vmem:[%s11643_s16 + $0x968] sm:$0xff] }
 0x13a   : > { %6162 = vmatprep.subr.bf16.mxu0 %v10540_v49  ;;  %v9845_v49 = vcombine.low %v615_v35, %v619_v36  ;;  %v9966_v52 = vcombine.high %v735_v46, %v739_v47  ;;  %v9965_v60 = vcombine.low %v735_v46, %v739_v47  ;;  %v671_v47 = vld [vmem:[%s11643_s16 + $0x748] sm:$0xff] }
 0x13c   : > { %6204 = vmatpush2.bf16.msra.mxu1 %v9781_v48  ;;  %v10984_v48 = vld [vmem:[%s11641_s30] ss:$56 sps:$4 sm:$0xff]  }
 0x13d   : > { %6205 = vmatprep.subr.bf16.mxu1 %v9774_v50  ;;  %6163 = vmatpush2.bf16.msra.mxu0 %v10539_v55  ;;  %v9973_v50 = vcombine.low %v743_v38, %v747_v39  ;;  %v10985_v55 = vld [vmem:[%s11641_s30 + $0xc] ss:$56 sps:$4 sm:$0xff]  }
 0x13e   : > { %6164 = vmatprep.subr.bf16.mxu0 %v10532_v57  ;;  %v731_v57 = vld [vmem:[%s11643_s16 + $0x928] sm:$0xff] }
 0x13f   : > { %v679_v39 = vld [vmem:[%s11643_s16 + $0x788] sm:$0xff] }
 0x140   : > { %6206 = vmatpush2.bf16.msra.mxu1 %v9773_v56  ;;  %v727_v56 = vld [vmem:[%s11643_s16 + $0x908] sm:$0xff] }
 0x141   : > { %6207 = vmatprep.subr.bf16.mxu1 %v9766_v58  ;;  %6165 = vmatpush2.bf16.msra.mxu0 %v10531_v63  ;;  %v10986_v58 = vld [vmem:[%s11641_s30 + $0x14] ss:$56 sps:$4 sm:$0xff]   ;;  %v9958_v62 = vcombine.high %v727_v56, %v731_v57  ;;  %v9957_v4 = vcombine.low %v727_v56, %v731_v57 }
 0x142   : > { %6166 = vmatprep.subr.bf16.mxu0 %v10524_v1  ;;  %v591_v63 = vld [vmem:[%s11643_s16 + $0x4c8] sm:$0xff] }
 0x143   : > { %v719_v1 = vld [vmem:[%s11643_s16 + $0x8c8] sm:$0xff] }
 0x144   : > { %6208 = vmatpush2.bf16.msra.mxu1 %v9765_v0  ;;  %v595_v0 = vld [vmem:[%s11643_s16 + $0x4e8] sm:$0xff] }
 0x145   : > { %6209 = vmatprep.subr.bf16.mxu1 %v9758_v2  ;;  %6167 = vmatpush2.bf16.msra.mxu0 %v10523_v7  ;;  %v723_v2 = vld [vmem:[%s11643_s16 + $0x8e8] sm:$0xff]  ;;  %v9822_v5 = vcombine.high %v591_v63, %v595_v0  ;;  %v9821_v11 = vcombine.low %v591_v63, %v595_v0 }
 0x146   : > { %6168 = vmatprep.subr.bf16.mxu0 %v10516_v9  ;;  %v9950_v6 = vcombine.high %v719_v1, %v723_v2  ;;  %v583_v7 = vld [vmem:[%s11643_s16 + $0x488] sm:$0xff]  ;;  %v9949_v12 = vcombine.low %v719_v1, %v723_v2 }
 0x147   : > { %v711_v9 = vld [vmem:[%s11643_s16 + $0x888] sm:$0xff] }
 0x148   : > { %6210 = vmatpush2.bf16.msra.mxu1 %v9757_v8  ;;  %v587_v8 = vld [vmem:[%s11643_s16 + $0x4a8] sm:$0xff] }
 0x149   : > { %6211 = vmatprep.subr.bf16.mxu1 %v9750_v10  ;;  %6169 = vmatpush2.bf16.msra.mxu0 %v10515_v15  ;;  %v715_v10 = vld [vmem:[%s11643_s16 + $0x8a8] sm:$0xff]  ;;  %v9814_v13 = vcombine.high %v583_v7, %v587_v8  ;;  %v9813_v19 = vcombine.low %v583_v7, %v587_v8 }
 0x14a   : > { %6170 = vmatprep.subr.bf16.mxu0 %v10508_v17  ;;  %v9942_v14 = vcombine.high %v711_v9, %v715_v10  ;;  %v575_v15 = vld [vmem:[%s11643_s16 + $0x448] sm:$0xff]  ;;  %v9941_v20 = vcombine.low %v711_v9, %v715_v10 }
 0x14b   : > { %v703_v17 = vld [vmem:[%s11643_s16 + $0x848] sm:$0xff] }
 0x14c   : > { %6212 = vmatpush2.bf16.msra.mxu1 %v9749_v16  ;;  %v579_v16 = vld [vmem:[%s11643_s16 + $0x468] sm:$0xff] }
 0x14d   : > { %6213 = vmatprep.subr.bf16.mxu1 %v9742_v18  ;;  %6171 = vmatpush2.bf16.msra.mxu0 %v10507_v23  ;;  %v707_v18 = vld [vmem:[%s11643_s16 + $0x868] sm:$0xff]  ;;  %v9806_v21 = vcombine.high %v575_v15, %v579_v16  ;;  %v9805_v27 = vcombine.low %v575_v15, %v579_v16 }
 0x14e   : > { %6172 = vmatprep.subr.bf16.mxu0 %v10500_v25  ;;  %v9934_v22 = vcombine.high %v703_v17, %v707_v18  ;;  %v567_v23 = vld [vmem:[%s11643_s16 + $0x408] sm:$0xff]  ;;  %v9933_v28 = vcombine.low %v703_v17, %v707_v18 }
 0x14f   : > { %v695_v25 = vld [vmem:[%s11643_s16 + $0x808] sm:$0xff] }
 0x150   : > { %6214 = vmatpush2.bf16.msra.mxu1 %v9741_v24  ;;  %v571_v24 = vld [vmem:[%s11643_s16 + $0x428] sm:$0xff] }
 0x151   : > { %6215 = vmatprep.subr.bf16.mxu1 %v9734_v26  ;;  %6173 = vmatpush2.bf16.msra.mxu0 %v10499_v31  ;;  %v699_v26 = vld [vmem:[%s11643_s16 + $0x828] sm:$0xff]  ;;  %v9798_v29 = vcombine.high %v567_v23, %v571_v24  ;;  %v9797_v35 = vcombine.low %v567_v23, %v571_v24 }
 0x152   : > { %6228 = vmatprep.subr.bf16.mxu0 %v9854_v33  ;;  %v9926_v30 = vcombine.high %v695_v25, %v699_v26  ;;  %v687_v31 = vld [vmem:[%s11643_s16 + $0x7c8] sm:$0xff]  ;;  %v9925_v36 = vcombine.low %v695_v25, %v699_v26 }
 0x153   : > { %v815_v33 = vld [vmem:[%s11643_s16 + $0xbc8] sm:$0xff] }
 0x154   : > { %6216 = vmatpush2.bf16.msra.mxu1 %v9733_v32  ;;  %6175 = vmatmul.mubr.bf16.vlgmr.msra.gmra.mxu0 %v10982_v37  ;;  %v691_v32 = vld [vmem:[%s11643_s16 + $0x7e8] sm:$0xff] }
 0x155   : > { %6271 = vmatprep.subr.bf16.mxu1 %v9982_v34  ;;  %6229 = vmatpush1.bf16.msra.mxu0 %v9853_v40  ;;  %v819_v34 = vld [vmem:[%s11643_s16 + $0xbe8] sm:$0xff]  ;;  %v9918_v37 = vcombine.high %v687_v31, %v691_v32 }
 0x156   : > { %6230 = vmatprep.subr.bf16.mxu0 %v9846_v42  ;;  %6260 = vmatprep.mubr.bf16.mxu0 %v10985_v55  ;;  %v10046_v38 = vcombine.high %v815_v33, %v819_v34  ;;  %v683_v40 = vld [vmem:[%s11643_s16 + $0x7a8] sm:$0xff]  ;;  %v10045_v44 = vcombine.low %v815_v33, %v819_v34 }
 0x157   : > { %6218 = vmatmul.mubr.bf16.vlgmr.msra.gmra.mxu1 %v10984_v48  ;;  %v811_v42 = vld [vmem:[%s11643_s16 + $0xba8] sm:$0xff]  ;;  %v9910_v45 = vcombine.high %v679_v39, %v683_v40 }
 0x158   : > { %6272 = vmatpush1.bf16.msra.mxu1 %v9981_v41  ;;  %6303 = vmatprep.mubr.bf16.mxu1 %v10986_v58  ;;  %v807_v41 = vld [vmem:[%s11643_s16 + $0xb88] sm:$0xff] }
 0x159   : > { %6273 = vmatprep.subr.bf16.mxu1 %v9974_v43  ;;  %6231 = vmatpush1.bf16.msra.mxu0 %v9845_v49  ;;  %v9917_v43 = vcombine.low %v687_v31, %v691_v32  ;;  %v10038_v46 = vcombine.high %v807_v41, %v811_v42  ;;  %v675_v48 = vld [vmem:[%s11643_s16 + $0x768] sm:$0xff] }
 0x15a   : > { %6232 = vmatprep.subr.bf16.mxu0 %v9838_v51  ;;  %v799_v49 = vld [vmem:[%s11643_s16 + $0xb48] sm:$0xff]  ;;  %v9909_v51 = vcombine.low %v679_v39, %v683_v40  ;;  %v9902_v53 = vcombine.high %v671_v47, %v675_v48 }
 0x15b   : > { %v663_v55 = vld [vmem:[%s11643_s16 + $0x708] sm:$0xff] }
 0x15c   : > { %6274 = vmatpush1.bf16.msra.mxu1 %v9973_v50  ;;  %v803_v50 = vld [vmem:[%s11643_s16 + $0xb68] sm:$0xff] }
 0x15d   : > { %6275 = vmatprep.subr.bf16.mxu1 %v9966_v52  ;;  %6233 = vmatpush1.bf16.msra.mxu0 %v9837_v59  ;;  %v10037_v52 = vcombine.low %v807_v41, %v811_v42  ;;  %v10030_v54 = vcombine.high %v799_v49, %v803_v50  ;;  %v667_v56 = vld [vmem:[%s11643_s16 + $0x728] sm:$0xff]  ;;  %v9901_v59 = vcombine.low %v671_v47, %v675_v48 }
 0x15e   : > { %6234 = vmatprep.subr.bf16.mxu0 %v9830_v61  ;;  %v791_v57 = vld [vmem:[%s11643_s16 + $0xb08] sm:$0xff]  ;;  %v9894_v61 = vcombine.high %v663_v55, %v667_v56 }
 0x15f   : > { %v795_v58 = vld [vmem:[%s11643_s16 + $0xb28] sm:$0xff] }
 0x160   : > { %6276 = vmatpush1.bf16.msra.mxu1 %v9965_v60  ;;  %v10029_v60 = vcombine.low %v799_v49, %v803_v50  ;;  %v655_v63 = vld [vmem:[%s11643_s16 + $0x6c8] sm:$0xff] }
 0x161   : > { %6277 = vmatprep.subr.bf16.mxu1 %v9958_v62  ;;  %6235 = vmatpush1.bf16.msra.mxu0 %v9829_v3  ;;  %v10022_v62 = vcombine.high %v791_v57, %v795_v58  ;;  %v659_v0 = vld [vmem:[%s11643_s16 + $0x6e8] sm:$0xff]  ;;  %v9893_v3 = vcombine.low %v663_v55, %v667_v56 }
 0x162   : > { %6236 = vmatprep.subr.bf16.mxu0 %v9822_v5  ;;  %v783_v1 = vld [vmem:[%s11643_s16 + $0xac8] sm:$0xff]  ;;  %v9886_v5 = vcombine.high %v655_v63, %v659_v0 }
 0x163   : > { %v787_v2 = vld [vmem:[%s11643_s16 + $0xae8] sm:$0xff] }
 0x164   : > { %6278 = vmatpush1.bf16.msra.mxu1 %v9957_v4  ;;  %v10021_v4 = vcombine.low %v791_v57, %v795_v58  ;;  %v647_v7 = vld [vmem:[%s11643_s16 + $0x688] sm:$0xff] }
 0x165   : > { %6279 = vmatprep.subr.bf16.mxu1 %v9950_v6  ;;  %6237 = vmatpush1.bf16.msra.mxu0 %v9821_v11  ;;  %v10014_v6 = vcombine.high %v783_v1, %v787_v2  ;;  %v651_v8 = vld [vmem:[%s11643_s16 + $0x6a8] sm:$0xff]  ;;  %v9885_v11 = vcombine.low %v655_v63, %v659_v0 }
 0x166   : > { %6238 = vmatprep.subr.bf16.mxu0 %v9814_v13  ;;  %v775_v9 = vld [vmem:[%s11643_s16 + $0xa88] sm:$0xff]  ;;  %v9878_v13 = vcombine.high %v647_v7, %v651_v8 }
 0x167   : > { %v779_v10 = vld [vmem:[%s11643_s16 + $0xaa8] sm:$0xff] }
 0x168   : > { %6280 = vmatpush1.bf16.msra.mxu1 %v9949_v12  ;;  %v10013_v12 = vcombine.low %v783_v1, %v787_v2  ;;  %v639_v15 = vld [vmem:[%s11643_s16 + $0x648] sm:$0xff] }
 0x169   : > { %6281 = vmatprep.subr.bf16.mxu1 %v9942_v14  ;;  %6239 = vmatpush1.bf16.msra.mxu0 %v9813_v19  ;;  %v10006_v14 = vcombine.high %v775_v9, %v779_v10  ;;  %v643_v16 = vld [vmem:[%s11643_s16 + $0x668] sm:$0xff]  ;;  %v9877_v19 = vcombine.low %v647_v7, %v651_v8 }
 0x16a   : > { %6240 = vmatprep.subr.bf16.mxu0 %v9806_v21  ;;  %v767_v17 = vld [vmem:[%s11643_s16 + $0xa48] sm:$0xff]  ;;  %v9870_v21 = vcombine.high %v639_v15, %v643_v16 }
 0x16b   : > { %v771_v18 = vld [vmem:[%s11643_s16 + $0xa68] sm:$0xff] }
 0x16c   : > { %6282 = vmatpush1.bf16.msra.mxu1 %v9941_v20  ;;  %v10005_v20 = vcombine.low %v775_v9, %v779_v10  ;;  %v631_v23 = vld [vmem:[%s11643_s16 + $0x608] sm:$0xff] }
 0x16d   : > { %6283 = vmatprep.subr.bf16.mxu1 %v9934_v22  ;;  %6241 = vmatpush1.bf16.msra.mxu0 %v9805_v27  ;;  %v9998_v22 = vcombine.high %v767_v17, %v771_v18  ;;  %v635_v24 = vld [vmem:[%s11643_s16 + $0x628] sm:$0xff]  ;;  %v9869_v27 = vcombine.low %v639_v15, %v643_v16 }
 0x16e   : > { %6242 = vmatprep.subr.bf16.mxu0 %v9798_v29  ;;  %v759_v25 = vld [vmem:[%s11643_s16 + $0xa08] sm:$0xff]  ;;  %v9862_v29 = vcombine.high %v631_v23, %v635_v24 }
 0x16f   : > { %v763_v26 = vld [vmem:[%s11643_s16 + $0xa28] sm:$0xff] }
 0x170   : > { %6284 = vmatpush1.bf16.msra.mxu1 %v9933_v28  ;;  %v9997_v28 = vcombine.low %v767_v17, %v771_v18  ;;  %v879_v31 = vld [vmem:[%s11643_s16 + $0xdc8] sm:$0xff] }
 0x171   : > { %6285 = vmatprep.subr.bf16.mxu1 %v9926_v30  ;;  %6243 = vmatpush1.bf16.msra.mxu0 %v9797_v35  ;;  %v9990_v30 = vcombine.high %v759_v25, %v763_v26  ;;  %v883_v32 = vld [vmem:[%s11643_s16 + $0xde8] sm:$0xff]  ;;  %v9861_v35 = vcombine.low %v631_v23, %v635_v24 }
 0x172   : > { %6244 = vmatprep.subr.bf16.mxu0 %v9918_v37  ;;  %v1007_v33 = vld [vmem:[%s11643_s16 + $0x11c8] sm:$0xff]  ;;  %v10110_v37 = vcombine.high %v879_v31, %v883_v32 }
 0x173   : > { %v1011_v34 = vld [vmem:[%s11643_s16 + $0x11e8] sm:$0xff] }
 0x174   : > { %6286 = vmatpush1.bf16.msra.mxu1 %v9925_v36  ;;  %v9989_v36 = vcombine.low %v759_v25, %v763_v26  ;;  %v871_v39 = vld [vmem:[%s11643_s16 + $0xd88] sm:$0xff] }
 0x175   : > { %6287 = vmatprep.subr.bf16.mxu1 %v10046_v38  ;;  %6245 = vmatpush2.bf16.msra.mxu0 %v9917_v43  ;;  %v10238_v38 = vcombine.high %v1007_v33, %v1011_v34  ;;  %v875_v40 = vld [vmem:[%s11643_s16 + $0xda8] sm:$0xff]  ;;  %v10109_v43 = vcombine.low %v879_v31, %v883_v32 }
 0x176   : > { %6246 = vmatprep.subr.bf16.mxu0 %v9910_v45  ;;  %v999_v41 = vld [vmem:[%s11643_s16 + $0x1188] sm:$0xff]  ;;  %v10102_v45 = vcombine.high %v871_v39, %v875_v40 }
 0x177   : > { %v1003_v42 = vld [vmem:[%s11643_s16 + $0x11a8] sm:$0xff] }
 0x178   : > { %6288 = vmatpush2.bf16.msra.mxu1 %v10045_v44  ;;  %v10237_v44 = vcombine.low %v1007_v33, %v1011_v34  ;;  %v863_v47 = vld [vmem:[%s11643_s16 + $0xd48] sm:$0xff] }
 0x179   : > { %6289 = vmatprep.subr.bf16.mxu1 %v10038_v46  ;;  %6247 = vmatpush2.bf16.msra.mxu0 %v9909_v51  ;;  %v10230_v46 = vcombine.high %v999_v41, %v1003_v42  ;;  %v867_v48 = vld [vmem:[%s11643_s16 + $0xd68] sm:$0xff] }
 0x17a   : > { %6248 = vmatprep.subr.bf16.mxu0 %v9902_v53  ;;  %v10987_v49 = vld [vmem:[%s11641_s30 + $0x8] ss:$56 sps:$4 sm:$0xff]   ;;  %v10101_v53 = vcombine.low %v871_v39, %v875_v40  ;;  %v10094_v55 = vcombine.high %v863_v47, %v867_v48  ;;  %v10093_v63 = vcombine.low %v863_v47, %v867_v48 }
 0x17b   : > { %v991_v50 = vld [vmem:[%s11643_s16 + $0x1148] sm:$0xff] }
 0x17c   : > { %6290 = vmatpush2.bf16.msra.mxu1 %v10037_v52  ;;  %v995_v51 = vld [vmem:[%s11643_s16 + $0x1168] sm:$0xff] }
 0x17d   : > { %6291 = vmatprep.subr.bf16.mxu1 %v10030_v54  ;;  %6249 = vmatpush2.bf16.msra.mxu0 %v9901_v59  ;;  %v10988_v52 = vld [vmem:[%s11641_s30 + $0x10] ss:$56 sps:$4 sm:$0xff]   ;;  %v10229_v54 = vcombine.low %v999_v41, %v1003_v42  ;;  %v10222_v56 = vcombine.high %v991_v50, %v995_v51  ;;  %v10989_v59 = vld [vmem:[%s11641_s30 + $0x1c] ss:$56 sps:$4 sm:$0xff]   ;;  %v10221_v0 = vcombine.low %v991_v50, %v995_v51 }
 0x17e   : > { %6250 = vmatprep.subr.bf16.mxu0 %v9894_v61  ;;  %v855_v57 = vld [vmem:[%s11643_s16 + $0xd08] sm:$0xff] }
 0x17f   : > { %v859_v58 = vld [vmem:[%s11643_s16 + $0xd28] sm:$0xff] }
 0x180   : > { %6292 = vmatpush2.bf16.msra.mxu1 %v10029_v60  ;;  %v983_v60 = vld [vmem:[%s11643_s16 + $0x1108] sm:$0xff]  ;;  %v10086_v1 = vcombine.high %v855_v57, %v859_v58  ;;  %v10085_v7 = vcombine.low %v855_v57, %v859_v58 }
 0x181   : > { %6293 = vmatprep.subr.bf16.mxu1 %v10022_v62  ;;  %6251 = vmatpush2.bf16.msra.mxu0 %v9893_v3  ;;  %v987_v61 = vld [vmem:[%s11643_s16 + $0x1128] sm:$0xff] }
 0x182   : > { %6252 = vmatprep.subr.bf16.mxu0 %v9886_v5  ;;  %v10990_v62 = vld [vmem:[%s11641_s30 + $0x24] ss:$56 sps:$4 sm:$0xff]   ;;  %v10214_v2 = vcombine.high %v983_v60, %v987_v61  ;;  %v10213_v8 = vcombine.low %v983_v60, %v987_v61 }
 0x183   : > { %v847_v3 = vld [vmem:[%s11643_s16 + $0xcc8] sm:$0xff] }
 0x184   : > { %6294 = vmatpush2.bf16.msra.mxu1 %v10021_v4  ;;  %v851_v4 = vld [vmem:[%s11643_s16 + $0xce8] sm:$0xff] }
 0x185   : > { %6295 = vmatprep.subr.bf16.mxu1 %v10014_v6  ;;  %6253 = vmatpush2.bf16.msra.mxu0 %v9885_v11  ;;  %v975_v5 = vld [vmem:[%s11643_s16 + $0x10c8] sm:$0xff]  ;;  %v10078_v9 = vcombine.high %v847_v3, %v851_v4  ;;  %v10077_v15 = vcombine.low %v847_v3, %v851_v4 }
 0x186   : > { %6254 = vmatprep.subr.bf16.mxu0 %v9878_v13  ;;  %v979_v6 = vld [vmem:[%s11643_s16 + $0x10e8] sm:$0xff] }
 0x187   : > { %v10206_v10 = vcombine.high %v975_v5, %v979_v6  ;;  %v839_v11 = vld [vmem:[%s11643_s16 + $0xc88] sm:$0xff]  ;;  %v10205_v16 = vcombine.low %v975_v5, %v979_v6 }
 0x188   : > { %6296 = vmatpush2.bf16.msra.mxu1 %v10013_v12  ;;  %v843_v12 = vld [vmem:[%s11643_s16 + $0xca8] sm:$0xff] }
 0x189   : > { %6297 = vmatprep.subr.bf16.mxu1 %v10006_v14  ;;  %6255 = vmatpush2.bf16.msra.mxu0 %v9877_v19  ;;  %v967_v13 = vld [vmem:[%s11643_s16 + $0x1088] sm:$0xff]  ;;  %v10070_v17 = vcombine.high %v839_v11, %v843_v12  ;;  %v10069_v23 = vcombine.low %v839_v11, %v843_v12 }
 0x18a   : > { %6256 = vmatprep.subr.bf16.mxu0 %v9870_v21  ;;  %v971_v14 = vld [vmem:[%s11643_s16 + $0x10a8] sm:$0xff] }
 0x18b   : > { %v10198_v18 = vcombine.high %v967_v13, %v971_v14  ;;  %v831_v19 = vld [vmem:[%s11643_s16 + $0xc48] sm:$0xff]  ;;  %v10197_v24 = vcombine.low %v967_v13, %v971_v14 }
 0x18c   : > { %6298 = vmatpush2.bf16.msra.mxu1 %v10005_v20  ;;  %v835_v20 = vld [vmem:[%s11643_s16 + $0xc68] sm:$0xff] }
 0x18d   : > { %6299 = vmatprep.subr.bf16.mxu1 %v9998_v22  ;;  %6257 = vmatpush2.bf16.msra.mxu0 %v9869_v27  ;;  %v959_v21 = vld [vmem:[%s11643_s16 + $0x1048] sm:$0xff]  ;;  %v10062_v25 = vcombine.high %v831_v19, %v835_v20  ;;  %v10061_v31 = vcombine.low %v831_v19, %v835_v20 }
 0x18e   : > { %6258 = vmatprep.subr.bf16.mxu0 %v9862_v29  ;;  %v963_v22 = vld [vmem:[%s11643_s16 + $0x1068] sm:$0xff] }
 0x18f   : > { %v10190_v26 = vcombine.high %v959_v21, %v963_v22  ;;  %v823_v27 = vld [vmem:[%s11643_s16 + $0xc08] sm:$0xff]  ;;  %v10189_v32 = vcombine.low %v959_v21, %v963_v22 }
 0x190   : > { %6300 = vmatpush2.bf16.msra.mxu1 %v9997_v28  ;;  %v827_v28 = vld [vmem:[%s11643_s16 + $0xc28] sm:$0xff] }
 0x191   : > { %6301 = vmatprep.subr.bf16.mxu1 %v9990_v30  ;;  %6259 = vmatpush2.bf16.msra.mxu0 %v9861_v35  ;;  %v951_v29 = vld [vmem:[%s11643_s16 + $0x1008] sm:$0xff]  ;;  %v10054_v33 = vcombine.high %v823_v27, %v827_v28  ;;  %v10053_v39 = vcombine.low %v823_v27, %v827_v28 }
 0x192   : > { %6314 = vmatprep.subr.bf16.mxu0 %v10110_v37  ;;  %v955_v30 = vld [vmem:[%s11643_s16 + $0x1028] sm:$0xff] }
 0x193   : > { %v10182_v34 = vcombine.high %v951_v29, %v955_v30  ;;  %v943_v35 = vld [vmem:[%s11643_s16 + $0xfc8] sm:$0xff]  ;;  %v10181_v40 = vcombine.low %v951_v29, %v955_v30 }
 0x194   : > { %6302 = vmatpush2.bf16.msra.mxu1 %v9989_v36  ;;  %6261 = vmatmul.mubr.bf16.vlgmr.msra.gmra.mxu0 %v10987_v49  ;;  %v947_v36 = vld [vmem:[%s11643_s16 + $0xfe8] sm:$0xff] }
 0x195   : > { %6357 = vmatprep.subr.bf16.mxu1 %v10238_v38  ;;  %6315 = vmatpush1.bf16.msra.mxu0 %v10109_v43  ;;  %v1071_v37 = vld [vmem:[%s11643_s16 + $0x13c8] sm:$0xff]  ;;  %v10174_v41 = vcombine.high %v943_v35, %v947_v36  ;;  %v10173_v47 = vcombine.low %v943_v35, %v947_v36 }
 0x196   : > { %6316 = vmatprep.subr.bf16.mxu0 %v10102_v45  ;;  %6346 = vmatprep.mubr.bf16.mxu0 %v10989_v59  ;;  %v1075_v38 = vld [vmem:[%s11643_s16 + $0x13e8] sm:$0xff] }
 0x197   : > { %6304 = vmatmul.mubr.bf16.vlgmr.msra.gmra.mxu1 %v10988_v52  ;;  %v10302_v42 = vcombine.high %v1071_v37, %v1075_v38  ;;  %v935_v43 = vld [vmem:[%s11643_s16 + $0xf88] sm:$0xff]  ;;  %v10301_v48 = vcombine.low %v1071_v37, %v1075_v38 }
 0x198   : > { %6358 = vmatpush1.bf16.msra.mxu1 %v10237_v44  ;;  %6389 = vmatprep.mubr.bf16.mxu1 %v10990_v62  ;;  %v939_v44 = vld [vmem:[%s11643_s16 + $0xfa8] sm:$0xff] }
 0x199   : > { %6359 = vmatprep.subr.bf16.mxu1 %v10230_v46  ;;  %6317 = vmatpush1.bf16.msra.mxu0 %v10101_v53  ;;  %v1063_v45 = vld [vmem:[%s11643_s16 + $0x1388] sm:$0xff]  ;;  %v10166_v49 = vcombine.high %v935_v43, %v939_v44 }
 0x19a   : > { %6318 = vmatprep.subr.bf16.mxu0 %v10094_v55  ;;  %v1067_v46 = vld [vmem:[%s11643_s16 + $0x13a8] sm:$0xff]  ;;  %v10165_v55 = vcombine.low %v935_v43, %v939_v44 }
 0x19b   : > { %v10294_v50 = vcombine.high %v1063_v45, %v1067_v46  ;;  %v927_v51 = vld [vmem:[%s11643_s16 + $0xf48] sm:$0xff] }
 0x19c   : > { %6360 = vmatpush1.bf16.msra.mxu1 %v10229_v54  ;;  %v931_v52 = vld [vmem:[%s11643_s16 + $0xf68] sm:$0xff] }
 0x19d   : > { %6361 = vmatprep.subr.bf16.mxu1 %v10222_v56  ;;  %6319 = vmatpush1.bf16.msra.mxu0 %v10093_v63  ;;  %v1055_v53 = vld [vmem:[%s11643_s16 + $0x1348] sm:$0xff]  ;;  %v10293_v56 = vcombine.low %v1063_v45, %v1067_v46  ;;  %v10158_v57 = vcombine.high %v927_v51, %v931_v52  ;;  %v10157_v63 = vcombine.low %v927_v51, %v931_v52 }
 0x19e   : > { %6320 = vmatprep.subr.bf16.mxu0 %v10086_v1  ;;  %v1059_v54 = vld [vmem:[%s11643_s16 + $0x1368] sm:$0xff] }
 0x19f   : > { %v10286_v58 = vcombine.high %v1055_v53, %v1059_v54  ;;  %v919_v59 = vld [vmem:[%s11643_s16 + $0xf08] sm:$0xff] }
 0x1a0   : > { %6362 = vmatpush1.bf16.msra.mxu1 %v10221_v0  ;;  %v923_v60 = vld [vmem:[%s11643_s16 + $0xf28] sm:$0xff]  ;;  %v10285_v0 = vcombine.low %v1055_v53, %v1059_v54 }
 0x1a1   : > { %6363 = vmatprep.subr.bf16.mxu1 %v10214_v2  ;;  %6321 = vmatpush1.bf16.msra.mxu0 %v10085_v7  ;;  %v1047_v61 = vld [vmem:[%s11643_s16 + $0x1308] sm:$0xff]  ;;  %v10150_v1 = vcombine.high %v919_v59, %v923_v60  ;;  %v10149_v7 = vcombine.low %v919_v59, %v923_v60 }
 0x1a2   : > { %6322 = vmatprep.subr.bf16.mxu0 %v10078_v9  ;;  %v1051_v62 = vld [vmem:[%s11643_s16 + $0x1328] sm:$0xff] }
 0x1a3   : > { %v10278_v2 = vcombine.high %v1047_v61, %v1051_v62  ;;  %v911_v3 = vld [vmem:[%s11643_s16 + $0xec8] sm:$0xff] }
 0x1a4   : > { %6364 = vmatpush1.bf16.msra.mxu1 %v10213_v8  ;;  %v915_v4 = vld [vmem:[%s11643_s16 + $0xee8] sm:$0xff]  ;;  %v10277_v8 = vcombine.low %v1047_v61, %v1051_v62 }
 0x1a5   : > { %6365 = vmatprep.subr.bf16.mxu1 %v10206_v10  ;;  %6323 = vmatpush1.bf16.msra.mxu0 %v10077_v15  ;;  %v1039_v5 = vld [vmem:[%s11643_s16 + $0x12c8] sm:$0xff]  ;;  %v10142_v9 = vcombine.high %v911_v3, %v915_v4  ;;  %v10141_v15 = vcombine.low %v911_v3, %v915_v4 }
 0x1a6   : > { %6324 = vmatprep.subr.bf16.mxu0 %v10070_v17  ;;  %v1043_v6 = vld [vmem:[%s11643_s16 + $0x12e8] sm:$0xff] }
 0x1a7   : > { %v10270_v10 = vcombine.high %v1039_v5, %v1043_v6  ;;  %v903_v11 = vld [vmem:[%s11643_s16 + $0xe88] sm:$0xff] }
 0x1a8   : > { %6366 = vmatpush1.bf16.msra.mxu1 %v10205_v16  ;;  %v907_v12 = vld [vmem:[%s11643_s16 + $0xea8] sm:$0xff]  ;;  %v10269_v16 = vcombine.low %v1039_v5, %v1043_v6 }
 0x1a9   : > { %6367 = vmatprep.subr.bf16.mxu1 %v10198_v18  ;;  %6325 = vmatpush1.bf16.msra.mxu0 %v10069_v23  ;;  %v1031_v13 = vld [vmem:[%s11643_s16 + $0x1288] sm:$0xff]  ;;  %v10134_v17 = vcombine.high %v903_v11, %v907_v12  ;;  %v10133_v23 = vcombine.low %v903_v11, %v907_v12 }
 0x1aa   : > { %6326 = vmatprep.subr.bf16.mxu0 %v10062_v25  ;;  %v1035_v14 = vld [vmem:[%s11643_s16 + $0x12a8] sm:$0xff] }
 0x1ab   : > { %v10262_v18 = vcombine.high %v1031_v13, %v1035_v14  ;;  %v895_v19 = vld [vmem:[%s11643_s16 + $0xe48] sm:$0xff] }
 0x1ac   : > { %6368 = vmatpush1.bf16.msra.mxu1 %v10197_v24  ;;  %v899_v20 = vld [vmem:[%s11643_s16 + $0xe68] sm:$0xff]  ;;  %v10261_v24 = vcombine.low %v1031_v13, %v1035_v14 }
 0x1ad   : > { %6369 = vmatprep.subr.bf16.mxu1 %v10190_v26  ;;  %6327 = vmatpush1.bf16.msra.mxu0 %v10061_v31  ;;  %v1023_v21 = vld [vmem:[%s11643_s16 + $0x1248] sm:$0xff]  ;;  %v10126_v25 = vcombine.high %v895_v19, %v899_v20  ;;  %v10125_v31 = vcombine.low %v895_v19, %v899_v20 }
 0x1ae   : > { %6328 = vmatprep.subr.bf16.mxu0 %v10054_v33  ;;  %v1027_v22 = vld [vmem:[%s11643_s16 + $0x1268] sm:$0xff] }
 0x1af   : > { %v10254_v26 = vcombine.high %v1023_v21, %v1027_v22  ;;  %v887_v27 = vld [vmem:[%s11643_s16 + $0xe08] sm:$0xff] }
 0x1b0   : > { %6370 = vmatpush1.bf16.msra.mxu1 %v10189_v32  ;;  %v891_v28 = vld [vmem:[%s11643_s16 + $0xe28] sm:$0xff]  ;;  %v10253_v32 = vcombine.low %v1023_v21, %v1027_v22 }
 0x1b1   : > { %6371 = vmatprep.subr.bf16.mxu1 %v10182_v34  ;;  %6329 = vmatpush1.bf16.msra.mxu0 %v10053_v39  ;;  %v1015_v29 = vld [vmem:[%s11643_s16 + $0x1208] sm:$0xff]  ;;  %v10118_v33 = vcombine.high %v887_v27, %v891_v28  ;;  %v10117_v39 = vcombine.low %v887_v27, %v891_v28 }
 0x1b2   : > { %6330 = vmatprep.subr.bf16.mxu0 %v10174_v41  ;;  %v1019_v30 = vld [vmem:[%s11643_s16 + $0x1228] sm:$0xff] }
 0x1b3   : > { %v10246_v34 = vcombine.high %v1015_v29, %v1019_v30  ;;  %v1135_v35 = vld [vmem:[%s11643_s16 + $0x15c8] sm:$0xff] }
 0x1b4   : > { %6372 = vmatpush1.bf16.msra.mxu1 %v10181_v40  ;;  %v1139_v36 = vld [vmem:[%s11643_s16 + $0x15e8] sm:$0xff]  ;;  %v10245_v40 = vcombine.low %v1015_v29, %v1019_v30 }
 0x1b5   : > { %6373 = vmatprep.subr.bf16.mxu1 %v10302_v42  ;;  %6331 = vmatpush2.bf16.msra.mxu0 %v10173_v47  ;;  %v1263_v37 = vld [vmem:[%s11643_s16 + $0x19c8] sm:$0xff]  ;;  %v10366_v41 = vcombine.high %v1135_v35, %v1139_v36  ;;  %v10365_v47 = vcombine.low %v1135_v35, %v1139_v36  ;;  %v12092_v36 = vpop.f32.mrf.mxu0 }
 0x1b6   : > { %6332 = vmatprep.subr.bf16.mxu0 %v10166_v49  ;;  %v1267_v38 = vld [vmem:[%s11643_s16 + $0x19e8] sm:$0xff] }
 0x1b7   : > { %v10494_v42 = vcombine.high %v1263_v37, %v1267_v38  ;;  %v1127_v43 = vld [vmem:[%s11643_s16 + $0x1588] sm:$0xff] }
 0x1b8   : > { %6374 = vmatpush2.bf16.msra.mxu1 %v10301_v48  ;;  %v1131_v44 = vld [vmem:[%s11643_s16 + $0x15a8] sm:$0xff]  ;;  %v10493_v48 = vcombine.low %v1263_v37, %v1267_v38 }
 0x1b9   : > { %6375 = vmatprep.subr.bf16.mxu1 %v10294_v50  ;;  %6333 = vmatpush2.bf16.msra.mxu0 %v10165_v55  ;;  %v1255_v45 = vld [vmem:[%s11643_s16 + $0x1988] sm:$0xff]  ;;  %v10358_v49 = vcombine.high %v1127_v43, %v1131_v44 }
 0x1ba   : > { %6334 = vmatprep.subr.bf16.mxu0 %v10158_v57  ;;  %v1259_v46 = vld [vmem:[%s11643_s16 + $0x19a8] sm:$0xff]  ;;  %v10357_v57 = vcombine.low %v1127_v43, %v1131_v44 }
 0x1bb   : > { %v10486_v50 = vcombine.high %v1255_v45, %v1259_v46  ;;  %v1119_v51 = vld [vmem:[%s11643_s16 + $0x1548] sm:$0xff] }
 0x1bc   : > { %6376 = vmatpush2.bf16.msra.mxu1 %v10293_v56  ;;  %v1123_v52 = vld [vmem:[%s11643_s16 + $0x1568] sm:$0xff] }
 0x1bd   : > { %6377 = vmatprep.subr.bf16.mxu1 %v10286_v58  ;;  %6335 = vmatpush2.bf16.msra.mxu0 %v10157_v63  ;;  %v10991_v53 = vld [vmem:[%s11641_s30 + $0x18] ss:$56 sps:$4 sm:$0xff]   ;;  %v10485_v58 = vcombine.low %v1255_v45, %v1259_v46  ;;  %v10350_v59 = vcombine.high %v1119_v51, %v1123_v52  ;;  %v10993_v63 = vld [vmem:[%s11641_s30 + $0x2c] ss:$56 sps:$4 sm:$0xff]   ;;  %v10349_v3 = vcombine.low %v1119_v51, %v1123_v52  ;;  %v12098_v45 = vpop.f32.mrf.mxu0  ;;  %v12102_v51 = vpop.f32.mrf.mxu1 }
 0x1be   : > { %6336 = vmatprep.subr.bf16.mxu0 %v10150_v1  ;;  %v1247_v54 = vld [vmem:[%s11643_s16 + $0x1948] sm:$0xff] }
 0x1bf   : > { %v1251_v55 = vld [vmem:[%s11643_s16 + $0x1968] sm:$0xff] }
 0x1c0   : > { %6378 = vmatpush2.bf16.msra.mxu1 %v10285_v0  ;;  %v10992_v56 = vld [vmem:[%s11641_s30 + $0x20] ss:$56 sps:$4 sm:$0xff]   ;;  %v10478_v60 = vcombine.high %v1247_v54, %v1251_v55  ;;  %v10477_v4 = vcombine.low %v1247_v54, %v1251_v55  ;;  %v12106_v55 = vpop.f32.mrf.mxu0 }
 0x1c1   : > { %6379 = vmatprep.subr.bf16.mxu1 %v10278_v2  ;;  %6337 = vmatpush2.bf16.msra.mxu0 %v10149_v7  ;;  %v1111_v61 = vld [vmem:[%s11643_s16 + $0x1508] sm:$0xff] }
 0x1c2   : > { %6338 = vmatprep.subr.bf16.mxu0 %v10142_v9  ;;  %v1115_v62 = vld [vmem:[%s11643_s16 + $0x1528] sm:$0xff] }
 0x1c3   : > { %v1239_v0 = vld [vmem:[%s11643_s16 + $0x1908] sm:$0xff]  ;;  %v10342_v5 = vcombine.high %v1111_v61, %v1115_v62  ;;  %v10341_v11 = vcombine.low %v1111_v61, %v1115_v62  ;;  %v12110_v61 = vpop.f32.mrf.mxu1 }
 0x1c4   : > { %6380 = vmatpush2.bf16.msra.mxu1 %v10277_v8  ;;  %v1243_v1 = vld [vmem:[%s11643_s16 + $0x1928] sm:$0xff] }
 0x1c5   : > { %6381 = vmatprep.subr.bf16.mxu1 %v10270_v10  ;;  %6339 = vmatpush2.bf16.msra.mxu0 %v10141_v15  ;;  %v10994_v2 = vld [vmem:[%s11641_s30 + $0x34] ss:$56 sps:$4 sm:$0xff]   ;;  %v10470_v6 = vcombine.high %v1239_v0, %v1243_v1  ;;  %v10469_v12 = vcombine.low %v1239_v0, %v1243_v1  ;;  %v12114_v1 = vpop.f32.mrf.mxu0 }
 0x1c6   : > { %6340 = vmatprep.subr.bf16.mxu0 %v10134_v17  ;;  %v1103_v7 = vld [vmem:[%s11643_s16 + $0x14c8] sm:$0xff] }
 0x1c7   : > { %v1107_v8 = vld [vmem:[%s11643_s16 + $0x14e8] sm:$0xff] }
 0x1c8   : > { %6382 = vmatpush2.bf16.msra.mxu1 %v10269_v16  ;;  %v1231_v9 = vld [vmem:[%s11643_s16 + $0x18c8] sm:$0xff]  ;;  %v10334_v13 = vcombine.high %v1103_v7, %v1107_v8  ;;  %v10333_v19 = vcombine.low %v1103_v7, %v1107_v8  ;;  %v12118_v7 = vpop.f32.mrf.mxu1  ;;  %v6004_v8 = vpop.f32.mrf.mxu0 }
 0x1c9   : > { %6383 = vmatprep.subr.bf16.mxu1 %v10262_v18  ;;  %6341 = vmatpush2.bf16.msra.mxu0 %v10133_v23  ;;  %v1235_v10 = vld [vmem:[%s11643_s16 + $0x18e8] sm:$0xff] }
 0x1ca   : > { %6342 = vmatprep.subr.bf16.mxu0 %v10126_v25  ;;  %v10462_v14 = vcombine.high %v1231_v9, %v1235_v10  ;;  %v1095_v15 = vld [vmem:[%s11643_s16 + $0x1488] sm:$0xff]  ;;  %v10461_v20 = vcombine.low %v1231_v9, %v1235_v10 }
 0x1cb   : > { %v1099_v16 = vld [vmem:[%s11643_s16 + $0x14a8] sm:$0xff] }
 0x1cc   : > { %6384 = vmatpush2.bf16.msra.mxu1 %v10261_v24  ;;  %v1223_v17 = vld [vmem:[%s11643_s16 + $0x1888] sm:$0xff]  ;;  %v10326_v21 = vcombine.high %v1095_v15, %v1099_v16  ;;  %v10325_v27 = vcombine.low %v1095_v15, %v1099_v16 }
 0x1cd   : > { %6385 = vmatprep.subr.bf16.mxu1 %v10254_v26  ;;  %6343 = vmatpush2.bf16.msra.mxu0 %v10125_v31  ;;  %v1227_v18 = vld [vmem:[%s11643_s16 + $0x18a8] sm:$0xff] }
 0x1ce   : > { %6344 = vmatprep.subr.bf16.mxu0 %v10118_v33  ;;  %v10454_v22 = vcombine.high %v1223_v17, %v1227_v18  ;;  %v1087_v23 = vld [vmem:[%s11643_s16 + $0x1448] sm:$0xff]  ;;  %v10453_v28 = vcombine.low %v1223_v17, %v1227_v18  ;;  %v12124_v17 = vpop.f32.mrf.mxu1  ;;  %v6006_v18 = vpop.f32.mrf.mxu0 }
 0x1cf   : > { %v1091_v24 = vld [vmem:[%s11643_s16 + $0x1468] sm:$0xff] }
 0x1d0   : > { %6386 = vmatpush2.bf16.msra.mxu1 %v10253_v32  ;;  %v1215_v25 = vld [vmem:[%s11643_s16 + $0x1848] sm:$0xff]  ;;  %v10318_v29 = vcombine.high %v1087_v23, %v1091_v24  ;;  %v10317_v35 = vcombine.low %v1087_v23, %v1091_v24 }
 0x1d1   : > { %6387 = vmatprep.subr.bf16.mxu1 %v10246_v34  ;;  %6345 = vmatpush2.bf16.msra.mxu0 %v10117_v39  ;;  %v1219_v26 = vld [vmem:[%s11643_s16 + $0x1868] sm:$0xff] }
 0x1d2   : > { %6400 = vmatprep.subr.bf16.mxu0 %v10366_v41  ;;  %v10446_v30 = vcombine.high %v1215_v25, %v1219_v26  ;;  %v1079_v31 = vld [vmem:[%s11643_s16 + $0x1408] sm:$0xff]  ;;  %v10445_v37 = vcombine.low %v1215_v25, %v1219_v26 }
 0x1d3   : > { %v1083_v32 = vld [vmem:[%s11643_s16 + $0x1428] sm:$0xff] }
 0x1d4   : > { %6388 = vmatpush2.bf16.msra.mxu1 %v10245_v40  ;;  %6347 = vmatmul.mubr.bf16.vlgmr.msra.gmra.mxu0 %v10991_v53  ;;  %v1207_v33 = vld [vmem:[%s11643_s16 + $0x1808] sm:$0xff]  ;;  %v10310_v38 = vcombine.high %v1079_v31, %v1083_v32  ;;  %v10309_v44 = vcombine.low %v1079_v31, %v1083_v32 }
 0x1d5   : > { %6443 = vmatprep.subr.bf16.mxu1 %v10494_v42  ;;  %6401 = vmatpush1.bf16.msra.mxu0 %v10365_v47  ;;  %v1211_v34 = vld [vmem:[%s11643_s16 + $0x1828] sm:$0xff] }
 0x1d6   : > { %6402 = vmatprep.subr.bf16.mxu0 %v10358_v49  ;;  %6432 = vmatprep.mubr.bf16.mxu0 %v10993_v63  ;;  %v10438_v39 = vcombine.high %v1207_v33, %v1211_v34  ;;  %v1199_v40 = vld [vmem:[%s11643_s16 + $0x17c8] sm:$0xff]  ;;  %v10437_v46 = vcombine.low %v1207_v33, %v1211_v34 }
 0x1d7   : > { %6390 = vmatmul.mubr.bf16.vlgmr.msra.gmra.mxu1 %v10992_v56  ;;  %v1203_v41 = vld [vmem:[%s11643_s16 + $0x17e8] sm:$0xff] }
 0x1d8   : > { %6444 = vmatpush1.bf16.msra.mxu1 %v10493_v48  ;;  %6475 = vmatprep.mubr.bf16.mxu1 %v10994_v2  ;;  %v1327_v42 = vld [vmem:[%s11643_s16 + $0x1bc8] sm:$0xff]  ;;  %v10430_v47 = vcombine.high %v1199_v40, %v1203_v41  ;;  %v10429_v54 = vcombine.low %v1199_v40, %v1203_v41 }
 0x1d9   : > { %6445 = vmatprep.subr.bf16.mxu1 %v10486_v50  ;;  %6403 = vmatpush1.bf16.msra.mxu0 %v10357_v57  ;;  %v1331_v43 = vld [vmem:[%s11643_s16 + $0x1be8] sm:$0xff] }
 0x1da   : > { %6404 = vmatprep.subr.bf16.mxu0 %v10350_v59  ;;  %v10558_v48 = vcombine.high %v1327_v42, %v1331_v43  ;;  %v1191_v49 = vld [vmem:[%s11643_s16 + $0x1788] sm:$0xff]  ;;  %v10557_v56 = vcombine.low %v1327_v42, %v1331_v43 }
 0x1db   : > { %v1195_v50 = vld [vmem:[%s11643_s16 + $0x17a8] sm:$0xff] }
 0x1dc   : > { %6446 = vmatpush1.bf16.msra.mxu1 %v10485_v58  ;;  %v1319_v52 = vld [vmem:[%s11643_s16 + $0x1b88] sm:$0xff]  ;;  %v10422_v57 = vcombine.high %v1191_v49, %v1195_v50  ;;  %v10421_v0 = vcombine.low %v1191_v49, %v1195_v50 }
 0x1dd   : > { %6447 = vmatprep.subr.bf16.mxu1 %v10478_v60  ;;  %6405 = vmatpush1.bf16.msra.mxu0 %v10349_v3  ;;  %v1323_v53 = vld [vmem:[%s11643_s16 + $0x1ba8] sm:$0xff] }
 0x1de   : > { %6406 = vmatprep.subr.bf16.mxu0 %v10342_v5  ;;  %v10550_v58 = vcombine.high %v1319_v52, %v1323_v53  ;;  %v1183_v59 = vld [vmem:[%s11643_s16 + $0x1748] sm:$0xff]  ;;  %v10549_v2 = vcombine.low %v1319_v52, %v1323_v53 }
 0x1df   : > { %v1187_v60 = vld [vmem:[%s11643_s16 + $0x1768] sm:$0xff] }
 0x1e0   : > { %6448 = vmatpush1.bf16.msra.mxu1 %v10477_v4  ;;  %v1311_v62 = vld [vmem:[%s11643_s16 + $0x1b48] sm:$0xff]  ;;  %v10414_v3 = vcombine.high %v1183_v59, %v1187_v60 }
 0x1e1   : > { %6449 = vmatprep.subr.bf16.mxu1 %v10470_v6  ;;  %6407 = vmatpush1.bf16.msra.mxu0 %v10341_v11  ;;  %v1315_v63 = vld [vmem:[%s11643_s16 + $0x1b68] sm:$0xff]  ;;  %v10413_v11 = vcombine.low %v1183_v59, %v1187_v60 }
 0x1e2   : > { %6408 = vmatprep.subr.bf16.mxu0 %v10334_v13  ;;  %v10542_v4 = vcombine.high %v1311_v62, %v1315_v63  ;;  %v1175_v5 = vld [vmem:[%s11643_s16 + $0x1708] sm:$0xff] }
 0x1e3   : > { %v1179_v6 = vld [vmem:[%s11643_s16 + $0x1728] sm:$0xff] }
 0x1e4   : > { %6450 = vmatpush1.bf16.msra.mxu1 %v10469_v12  ;;  %v1303_v9 = vld [vmem:[%s11643_s16 + $0x1b08] sm:$0xff]  ;;  %v10541_v12 = vcombine.low %v1311_v62, %v1315_v63  ;;  %v10406_v13 = vcombine.high %v1175_v5, %v1179_v6  ;;  %v5966_v62 = vadd.f32 %v12118_v7, %v12106_v55 }
 0x1e5   : > { %6451 = vmatprep.subr.bf16.mxu1 %v10462_v14  ;;  %6409 = vmatpush1.bf16.msra.mxu0 %v10333_v19  ;;  %v1307_v10 = vld [vmem:[%s11643_s16 + $0x1b28] sm:$0xff] }
 0x1e6   : > { %6410 = vmatprep.subr.bf16.mxu0 %v10326_v21  ;;  %v10534_v14 = vcombine.high %v1303_v9, %v1307_v10  ;;  %v1167_v15 = vld [vmem:[%s11643_s16 + $0x16c8] sm:$0xff]  ;;  %v10405_v21 = vcombine.low %v1175_v5, %v1179_v6  ;;  %v10533_v23 = vcombine.low %v1303_v9, %v1307_v10  ;;  %v5968_v5 = vadd.f32 %v12124_v17, %v12114_v1  ;;  %v492_v1 = vld [vmem:[%s11643_s16 + $0x1b0] sm:$0xff] }
 0x1e7   : > { %v1171_v16 = vld [vmem:[%s11643_s16 + $0x16e8] sm:$0xff]  ;;  %v616_v17 = vld [vmem:[%s11643_s16 + $0x590] sm:$0xff] }
 0x1e8   : > { %6452 = vmatpush1.bf16.msra.mxu1 %v10461_v20  ;;  %v1295_v19 = vld [vmem:[%s11643_s16 + $0x1ac8] sm:$0xff]  ;;  %v10398_v24 = vcombine.high %v1167_v15, %v1171_v16  ;;  %v10397_v31 = vcombine.low %v1167_v15, %v1171_v16  ;;  %v488_v15 = vld [vmem:[%s11643_s16 + $0x190] sm:$0xff] }
 0x1e9   : > { %6453 = vmatprep.subr.bf16.mxu1 %v10454_v22  ;;  %6411 = vmatpush1.bf16.msra.mxu0 %v10325_v27  ;;  %v1299_v20 = vld [vmem:[%s11643_s16 + $0x1ae8] sm:$0xff]  ;;  %v6047_v22 = vpop.f32.mrf.mxu1 }
 0x1ea   : > { %6412 = vmatprep.subr.bf16.mxu0 %v10318_v29  ;;  %v10526_v25 = vcombine.high %v1295_v19, %v1299_v20  ;;  %v1159_v26 = vld [vmem:[%s11643_s16 + $0x1688] sm:$0xff]  ;;  %v10525_v33 = vcombine.low %v1295_v19, %v1299_v20 }
 0x1eb   : > { %v1163_v27 = vld [vmem:[%s11643_s16 + $0x16a8] sm:$0xff]  ;;  %v6049_v32 = vpop.f32.mrf.mxu1 }
 0x1ec   : > { %6454 = vmatpush1.bf16.msra.mxu1 %v10453_v28  ;;  %v6008_v28 = vpop.f32.mrf.mxu0  ;;  %v1287_v29 = vld [vmem:[%s11643_s16 + $0x1a88] sm:$0xff]  ;;  %v10390_v34 = vcombine.high %v1159_v26, %v1163_v27  ;;  %v10389_v42 = vcombine.low %v1159_v26, %v1163_v27 }
 0x1ed   : > { %6455 = vmatprep.subr.bf16.mxu1 %v10446_v30  ;;  %6413 = vmatpush1.bf16.msra.mxu0 %v10317_v35  ;;  %v1291_v30 = vld [vmem:[%s11643_s16 + $0x1aa8] sm:$0xff]  ;;  %v6051_v43 = vpop.f32.mrf.mxu1 }
 0x1ee   : > { %6414 = vmatprep.subr.bf16.mxu0 %v10310_v38  ;;  %v10518_v35 = vcombine.high %v1287_v29, %v1291_v30  ;;  %v1155_v38 = vld [vmem:[%s11643_s16 + $0x1668] sm:$0xff] }
 0x1ef   : > { %v1279_v40 = vld [vmem:[%s11643_s16 + $0x1a48] sm:$0xff]  ;;  %v6053_v59 = vpop.f32.mrf.mxu1 }
 0x1f0   : > { %6456 = vmatpush1.bf16.msra.mxu1 %v10445_v37  ;;  %v1151_v37 = vld [vmem:[%s11643_s16 + $0x1648] sm:$0xff] }
 0x1f1   : > { %6457 = vmatprep.subr.bf16.mxu1 %v10438_v39  ;;  %6415 = vmatpush1.bf16.msra.mxu0 %v10309_v44  ;;  %v6010_v39 = vpop.f32.mrf.mxu0  ;;  %v1283_v41 = vld [vmem:[%s11643_s16 + $0x1a68] sm:$0xff] }
 0x1f2   : > { %6416 = vmatprep.subr.bf16.mxu0 %v10430_v47  ;;  %v10382_v47 = vcombine.high %v1151_v37, %v1155_v38  ;;  %v10510_v49 = vcombine.high %v1279_v40, %v1283_v41  ;;  %v1143_v50 = vld [vmem:[%s11643_s16 + $0x1608] sm:$0xff] }
 0x1f3   : > { %v6090_v44 = vpop.f32.mrf.mxu0  ;;  %v1147_v52 = vld [vmem:[%s11643_s16 + $0x1628] sm:$0xff] }
 0x1f4   : > { %6458 = vmatpush1.bf16.msra.mxu1 %v10437_v46  ;;  %v10517_v46 = vcombine.low %v1287_v29, %v1291_v30  ;;  %v1271_v53 = vld [vmem:[%s11643_s16 + $0x1a08] sm:$0xff]  ;;  %v10373_v9 = vcombine.low %v1143_v50, %v1147_v52  ;;  %v484_v30 = vld [vmem:[%s11643_s16 + $0x170] sm:$0xff] }
 0x1f5   : > { %6459 = vmatprep.subr.bf16.mxu1 %v10558_v48  ;;  %6417 = vmatpush2.bf16.msra.mxu0 %v10429_v54  ;;  %v5962_v48 = vadd.f32 %v12102_v51, %v12092_v36  ;;  %v1275_v54 = vld [vmem:[%s11643_s16 + $0x1a28] sm:$0xff]  ;;  %v6092_v60 = vpop.f32.mrf.mxu0  ;;  %v10509_v36 = vcombine.low %v1279_v40, %v1283_v41  ;;  %v10374_v51 = vcombine.high %v1143_v50, %v1147_v52 }
 0x1f6   : > { %6418 = vmatprep.subr.bf16.mxu0 %v10422_v57  ;;  %v10501_v7 = vcombine.low %v1271_v53, %v1275_v54 }
 0x1f7   : > { %v6005_v57 = vadd.f32 %v6004_v8, %v5962_v48  ;;  %v6009_v8 = vadd.f32 %v6008_v28, %v5966_v62  ;;  %v6094_v55 = vpop.f32.mrf.mxu0 }
 0x1f8   : > { %6460 = vmatpush2.bf16.msra.mxu1 %v10557_v56  ;;  %v5964_v56 = vadd.f32 %v12110_v61, %v12098_v45  ;;  %v6133_v45 = vpop.f32.mrf.mxu1  ;;  %v624_v61 = vld [vmem:[%s11643_s16 + $0x5d0] sm:$0xff] }
 0x1f9   : > { %6461 = vmatprep.subr.bf16.mxu1 %v10550_v58  ;;  %6419 = vmatpush2.bf16.msra.mxu0 %v10421_v0  ;;  %v10381_v58 = vcombine.low %v1151_v37, %v1155_v38  ;;  %v10502_v0 = vcombine.high %v1271_v53, %v1275_v54  ;;  %v6048_v6 = vadd.f32 %v6047_v22, %v6005_v57  ;;  %v6096_v22 = vpop.f32.mrf.mxu0  ;;  %v10995_v37 = vld [vmem:[%s11641_s30 + $0x28] ss:$56 sps:$4 sm:$0xff]  }
 0x1fa   : > { %6420 = vmatprep.subr.bf16.mxu0 %v10414_v3  ;;  %v6007_v63 = vadd.f32 %v6006_v18, %v5964_v56  ;;  %v500_v3 = vld [vmem:[%s11643_s16 + $0x1f0] sm:$0xff]  ;;  %v6135_v16 = vpop.f32.mrf.mxu1  ;;  %v6052_v19 = vadd.f32 %v6051_v43, %v6009_v8  ;;  %v9719_v38 = vcombine.low %v488_v15, %v492_v1  ;;  %v409_v43 = vld [vmem:[#allocation2] sm:$0xff] }
 0x1fb   : > { %v620_v18 = vld [vmem:[%s11643_s16 + $0x5b0] sm:$0xff] }
 0x1fc   : > { %6462 = vmatpush2.bf16.msra.mxu1 %v10549_v2  ;;  %v496_v2 = vld [vmem:[%s11643_s16 + $0x1d0] sm:$0xff]  ;;  %v6095_v28 = vadd.f32 %v6094_v55, %v6052_v19  ;;  %v9848_v29 = vcombine.high %v616_v17, %v620_v18 }
 0x1fd   : > { %6463 = vmatprep.subr.bf16.mxu1 %v10542_v4  ;;  %6421 = vmatpush2.bf16.msra.mxu0 %v10413_v11  ;;  %v628_v4 = vld [vmem:[%s11643_s16 + $0x5f0] sm:$0xff]  ;;  %v9728_v10 = vcombine.high %v496_v2, %v500_v3  ;;  %v6050_v11 = vadd.f32 %v6049_v32, %v6007_v63 }
 0x1fe   : > { %6422 = vmatprep.subr.bf16.mxu0 %v10406_v13  ;;  %v6091_v13 = vadd.f32 %v6090_v44, %v6048_v6  ;;  %v612_v32 = vld [vmem:[%s11643_s16 + $0x570] sm:$0xff] }
 0x1ff   : > { %v6093_v20 = vadd.f32 %v6092_v60, %v6050_v11  ;;  %v472_v53 = vld [vmem:[%s11643_s16 + $0x110] sm:$0xff] }
 0x200   : > { %6464 = vmatpush2.bf16.msra.mxu1 %v10541_v12  ;;  %v6011_v12 = vadd.f32 %v6010_v39, %v5968_v5  ;;  %v6134_v27 = vadd.f32 %v6133_v45, %v6091_v13  ;;  %v476_v54 = vld [vmem:[%s11643_s16 + $0x130] sm:$0xff] }
 0x201   : > { %6465 = vmatprep.subr.bf16.mxu1 %v10534_v14  ;;  %6423 = vmatpush2.bf16.msra.mxu0 %v10405_v21  ;;  %v9856_v14 = vcombine.high %v624_v61, %v628_v4  ;;  %v9727_v21 = vcombine.low %v496_v2, %v500_v3  ;;  %v6136_v39 = vadd.f32 %v6135_v16, %v6093_v20  ;;  %v10997_v56 = vld [vmem:[%s11641_s30 + $0x4] ss:$56 sps:$4 sm:$0xff]  }
 0x202   : > { %6424 = vmatprep.subr.bf16.mxu0 %v10398_v24  ;;  %v9720_v24 = vcombine.high %v488_v15, %v492_v1  ;;  %v6054_v26 = vadd.f32 %v6053_v59, %v6011_v12  ;;  %v600_v60 = vld [vmem:[%s11643_s16 + $0x510] sm:$0xff]  ;;  %v417_v3 = vld [vmem:[#allocation2 + $0x20] sm:$0xff]  ;;  %v9703_v12 = vcombine.low %v472_v53, %v476_v54 }
 0x203   : > { %v468_v55 = vld [vmem:[%s11643_s16 + $0xf0] sm:$0xff] }
 0x204   : > { %6466 = vmatpush2.bf16.msra.mxu1 %v10533_v23  ;;  %v9855_v23 = vcombine.low %v624_v61, %v628_v4  ;;  %v6097_v40 = vadd.f32 %v6096_v22, %v6054_v26  ;;  %v9704_v4 = vcombine.high %v472_v53, %v476_v54  ;;  %v456_v1 = vld [vmem:[%s11643_s16 + $0x90] sm:$0xff] }
 0x205   : > { %6467 = vmatprep.subr.bf16.mxu1 %v10526_v25  ;;  %6425 = vmatpush2.bf16.msra.mxu0 %v10397_v31  ;;  %v12157_v25 = vld [vmem:[%s11643_s16 + $0x150] sm:$0xff] }
 0x206   : > { %6426 = vmatprep.subr.bf16.mxu0 %v10390_v34  ;;  %v608_v31 = vld [vmem:[%s11643_s16 + $0x550] sm:$0xff]  ;;  %v9711_v2 = vcombine.low %v12157_v25, %v484_v30 }
 0x207   : > { %v408_v34 = vld [vmem:[#allocation2 + $0x30] sm:$0xff]  ;;  %v9840_v48 = vcombine.high %v608_v31, %v612_v32  ;;  %v9839_v61 = vcombine.low %v608_v31, %v612_v32 }
 0x208   : > { %6468 = vmatpush2.bf16.msra.mxu1 %v10525_v33  ;;  %v6137_v33 = vpop.f32.mrf.mxu1  ;;  %v460_v16 = vld [vmem:[%s11643_s16 + $0xb0] sm:$0xff] }
 0x209   : > { %6469 = vmatprep.subr.bf16.mxu1 %v10518_v35  ;;  %6427 = vmatpush2.bf16.msra.mxu0 %v10389_v42  ;;  %v10996_v42 = vld [vmem:[%s11641_s30 + $0x30] ss:$56 sps:$4 sm:$0xff]  }
 0x20a   : > { %6428 = vmatprep.subr.bf16.mxu0 %v10382_v47  ;;  %v9712_v47 = vcombine.high %v12157_v25, %v484_v30  ;;  %v6139_v57 = vpop.f32.mrf.mxu1  ;;  %v576_v25 = vld [vmem:[%s11643_s16 + $0x450] sm:$0xff] }
 0x20b   : > { %v6140_v62 = vadd.f32 %v6139_v57, %v6097_v40  ;;  %v580_v26 = vld [vmem:[%s11643_s16 + $0x470] sm:$0xff] }
 0x20c   : > { %6470 = vmatpush2.bf16.msra.mxu1 %v10517_v46  ;;  %v9847_v46 = vcombine.low %v616_v17, %v620_v18  ;;  %v584_v17 = vld [vmem:[%s11643_s16 + $0x490] sm:$0xff]  ;;  %v9808_v30 = vcombine.high %v576_v25, %v580_v26 }
 0x20d   : > { %6471 = vmatprep.subr.bf16.mxu1 %v10510_v49  ;;  %6429 = vmatpush2.bf16.msra.mxu0 %v10381_v58  ;;  %v6138_v49 = vadd.f32 %v6137_v33, %v6095_v28  ;;  %v416_v58 = vld [vmem:[#allocation2 + $0x40] sm:$0xff]  ;;  %v588_v18 = vld [vmem:[%s11643_s16 + $0x4b0] sm:$0xff] }
 0x20e   : > { %6430 = vmatprep.subr.bf16.mxu0 %v10374_v51  ;;  %v10998_v51 = vld [vmem:[%s11641_s30 + $0xc] ss:$56 sps:$4 sm:$0xff]   ;;  %v9816_v22 = vcombine.high %v584_v17, %v588_v18  ;;  %v9815_v28 = vcombine.low %v584_v17, %v588_v18 }
 0x20f   : > { %v440_v31 = vld [vmem:[%s11643_s16 + $0x10] sm:$0xff] }
 0x210   : > { %6472 = vmatpush2.bf16.msra.mxu1 %v10509_v36  ;;  %v604_v36 = vld [vmem:[%s11643_s16 + $0x530] sm:$0xff] }
 0x211   : > { %6473 = vmatprep.subr.bf16.mxu1 %v10502_v0  ;;  %6431 = vmatpush2.bf16.msra.mxu0 %v10373_v9  ;;  %v9832_v8 = vcombine.high %v600_v60, %v604_v36  ;;  %v464_v9 = vld [vmem:[%s11643_s16 + $0xd0] sm:$0xff]  ;;  %v9831_v13 = vcombine.low %v600_v60, %v604_v36 }
 0x212   : > { %6486 = vmatprep.subr.bf16.mxu0 %v9728_v10  ;;  %v596_v10 = vld [vmem:[%s11643_s16 + $0x4f0] sm:$0xff]  ;;  %v9695_v19 = vcombine.low %v464_v9, %v468_v55 }
 0x213   : > { %v444_v32 = vld [vmem:[%s11643_s16 + $0x30] sm:$0xff] }
 0x214   : > { %6474 = vmatpush2.bf16.msra.mxu1 %v10501_v7  ;;  %v6176_v35 = vpop.f32.mrf.mxu0  ;;  %6433 = vmatmul.mubr.bf16.vlgmr.msra.gmra.mxu0 %v10995_v37  ;;  %v592_v7 = vld [vmem:[%s11643_s16 + $0x4d0] sm:$0xff]  ;;  %v9807_v37 = vcombine.low %v576_v25, %v580_v26 }
 0x215   : > { %6529 = vmatprep.subr.bf16.mxu1 %v9856_v14  ;;  %v6177_v41 = vadd.f32 %v6176_v35, %v6134_v27  ;;  %6487 = vmatpush1.bf16.msra.mxu0 %v9727_v21  ;;  %v9696_v14 = vcombine.high %v464_v9, %v468_v55  ;;  %v9824_v15 = vcombine.high %v592_v7, %v596_v10  ;;  %v568_v33 = vld [vmem:[%s11643_s16 + $0x410] sm:$0xff] }
 0x216   : > { %v6178_v44 = vpop.f32.mrf.mxu0  ;;  %6488 = vmatprep.subr.bf16.mxu0 %v9720_v24  ;;  %6518 = vmatprep.mubr.bf16.mxu0 %v10997_v56  ;;  %v9823_v20 = vcombine.low %v592_v7, %v596_v10  ;;  %v9688_v21 = vcombine.high %v456_v1, %v460_v16  ;;  %v452_v24 = vld [vmem:[%s11643_s16 + $0x70] sm:$0xff]  ;;  %v9687_v27 = vcombine.low %v456_v1, %v460_v16 }
 0x217   : > { %6476 = vmatmul.mubr.bf16.vlgmr.msra.gmra.mxu1 %v10996_v42  ;;  %v7088_v50 = vadd.f32 %v6177_v41, %v408_v34  ;;  %v6179_v52 = vadd.f32 %v6178_v44, %v6136_v39  ;;  %v572_v34 = vld [vmem:[%s11643_s16 + $0x430] sm:$0xff]  ;;  %v9671_v44 = vcombine.low %v440_v31, %v444_v32 }
 0x218   : > { %6530 = vmatpush1.bf16.msra.mxu1 %v9855_v23  ;;  %v6180_v59 = vpop.f32.mrf.mxu0  ;;  %6561 = vmatprep.mubr.bf16.mxu1 %v10998_v51  ;;  %v448_v23 = vld [vmem:[%s11643_s16 + $0x50] sm:$0xff]  ;;  %v9800_v39 = vcombine.high %v568_v33, %v572_v34 }
 0x219   : > { %6531 = vmatprep.subr.bf16.mxu1 %v9848_v29  ;;  %7104 = vst [vmem:[#allocation2 + $0x30] sm:$0xff] %v7088_v50  ;;  %v7089_v63 = vadd.f32 %v6179_v52, %v409_v43  ;;  %v6181_v0 = vadd.f32 %v6180_v59, %v6138_v49  ;;  %6489 = vmatpush1.bf16.msra.mxu0 %v9719_v38  ;;  %v560_v40 = vld [vmem:[%s11643_s16 + $0x3d0] sm:$0xff] }
 0x21a   : > { %v6182_v45 = vpop.f32.mrf.mxu0  ;;  %6490 = vmatprep.subr.bf16.mxu0 %v9712_v47  ;;  %v9680_v29 = vcombine.high %v448_v23, %v452_v24  ;;  %v9679_v35 = vcombine.low %v448_v23, %v452_v24  ;;  %v9672_v38 = vcombine.high %v440_v31, %v444_v32  ;;  %v564_v41 = vld [vmem:[%s11643_s16 + $0x3f0] sm:$0xff] }
 0x21b   : > { %7105 = vst [vmem:[#allocation2] sm:$0xff] %v7089_v63  ;;  %v7096_v5 = vadd.f32 %v6181_v0, %v416_v58  ;;  %v6183_v6 = vadd.f32 %v6182_v45, %v6140_v62  ;;  %v688_v42 = vld [vmem:[%s11643_s16 + $0x7d0] sm:$0xff]  ;;  %v9792_v47 = vcombine.high %v560_v40, %v564_v41  ;;  %v9791_v54 = vcombine.low %v560_v40, %v564_v41 }
 0x21c   : > { %6532 = vmatpush1.bf16.msra.mxu1 %v9847_v46  ;;  %v692_v43 = vld [vmem:[%s11643_s16 + $0x7f0] sm:$0xff]  ;;  %v9799_v46 = vcombine.low %v568_v33, %v572_v34 }
 0x21d   : > { %6533 = vmatprep.subr.bf16.mxu1 %v9840_v48  ;;  %7112 = vst [vmem:[#allocation2 + $0x40] sm:$0xff] %v7096_v5  ;;  %v7097_v11 = vadd.f32 %v6183_v6, %v417_v3  ;;  %6491 = vmatpush1.bf16.msra.mxu0 %v9711_v2  ;;  %v9920_v48 = vcombine.high %v688_v42, %v692_v43  ;;  %v552_v49 = vld [vmem:[%s11643_s16 + $0x390] sm:$0xff] }
 0x21e   : > { %6492 = vmatprep.subr.bf16.mxu0 %v9704_v4  ;;  %v556_v50 = vld [vmem:[%s11643_s16 + $0x3b0] sm:$0xff]  ;;  %v9919_v56 = vcombine.low %v688_v42, %v692_v43 }
 0x21f   : > { %7113 = vst [vmem:[#allocation2 + $0x20] sm:$0xff] %v7097_v11  ;;  %v680_v52 = vld [vmem:[%s11643_s16 + $0x790] sm:$0xff]  ;;  %v9784_v57 = vcombine.high %v552_v49, %v556_v50  ;;  %v9783_v62 = vcombine.low %v552_v49, %v556_v50 }
 0x220   : > { %6534 = vmatpush1.bf16.msra.mxu1 %v9839_v61  ;;  %v684_v53 = vld [vmem:[%s11643_s16 + $0x7b0] sm:$0xff] }
 0x221   : > { %6535 = vmatprep.subr.bf16.mxu1 %v9832_v8  ;;  %6493 = vmatpush1.bf16.msra.mxu0 %v9703_v12  ;;  %v9912_v58 = vcombine.high %v680_v52, %v684_v53  ;;  %v544_v59 = vld [vmem:[%s11643_s16 + $0x350] sm:$0xff]  ;;  %v9911_v63 = vcombine.low %v680_v52, %v684_v53 }
 0x222   : > { %6494 = vmatprep.subr.bf16.mxu0 %v9696_v14  ;;  %v548_v60 = vld [vmem:[%s11643_s16 + $0x370] sm:$0xff] }
 0x223   : > { %v672_v36 = vld [vmem:[%s11643_s16 + $0x750] sm:$0xff]  ;;  %v9776_v0 = vcombine.high %v544_v59, %v548_v60  ;;  %v9775_v5 = vcombine.low %v544_v59, %v548_v60 }
 0x224   : > { %6536 = vmatpush1.bf16.msra.mxu1 %v9831_v13  ;;  %v676_v51 = vld [vmem:[%s11643_s16 + $0x770] sm:$0xff] }
 0x225   : > { %6537 = vmatprep.subr.bf16.mxu1 %v9824_v15  ;;  %6495 = vmatpush1.bf16.msra.mxu0 %v9695_v19  ;;  %v9904_v2 = vcombine.high %v672_v36, %v676_v51  ;;  %v536_v3 = vld [vmem:[%s11643_s16 + $0x310] sm:$0xff]  ;;  %v9903_v6 = vcombine.low %v672_v36, %v676_v51 }
 0x226   : > { %6496 = vmatprep.subr.bf16.mxu0 %v9688_v21  ;;  %v540_v45 = vld [vmem:[%s11643_s16 + $0x330] sm:$0xff] }
 0x227   : > { %v664_v61 = vld [vmem:[%s11643_s16 + $0x710] sm:$0xff]  ;;  %v9768_v8 = vcombine.high %v536_v3, %v540_v45  ;;  %v9767_v12 = vcombine.low %v536_v3, %v540_v45 }
 0x228   : > { %6538 = vmatpush1.bf16.msra.mxu1 %v9823_v20  ;;  %v668_v4 = vld [vmem:[%s11643_s16 + $0x730] sm:$0xff] }
 0x229   : > { %6539 = vmatprep.subr.bf16.mxu1 %v9816_v22  ;;  %6497 = vmatpush1.bf16.msra.mxu0 %v9687_v27  ;;  %v9896_v9 = vcombine.high %v664_v61, %v668_v4  ;;  %v528_v55 = vld [vmem:[%s11643_s16 + $0x2d0] sm:$0xff]  ;;  %v9895_v13 = vcombine.low %v664_v61, %v668_v4 }
 0x22a   : > { %6498 = vmatprep.subr.bf16.mxu0 %v9680_v29  ;;  %v532_v7 = vld [vmem:[%s11643_s16 + $0x2f0] sm:$0xff] }
 0x22b   : > { %v656_v10 = vld [vmem:[%s11643_s16 + $0x6d0] sm:$0xff]  ;;  %v9760_v14 = vcombine.high %v528_v55, %v532_v7  ;;  %v9759_v19 = vcombine.low %v528_v55, %v532_v7 }
 0x22c   : > { %6540 = vmatpush1.bf16.msra.mxu1 %v9815_v28  ;;  %v660_v11 = vld [vmem:[%s11643_s16 + $0x6f0] sm:$0xff] }
 0x22d   : > { %6541 = vmatprep.subr.bf16.mxu1 %v9808_v30  ;;  %6499 = vmatpush1.bf16.msra.mxu0 %v9679_v35  ;;  %v9888_v15 = vcombine.high %v656_v10, %v660_v11  ;;  %v520_v1 = vld [vmem:[%s11643_s16 + $0x290] sm:$0xff]  ;;  %v9887_v20 = vcombine.low %v656_v10, %v660_v11 }
 0x22e   : > { %6500 = vmatprep.subr.bf16.mxu0 %v9672_v38  ;;  %v524_v16 = vld [vmem:[%s11643_s16 + $0x2b0] sm:$0xff] }
 0x22f   : > { %v648_v17 = vld [vmem:[%s11643_s16 + $0x690] sm:$0xff]  ;;  %v9752_v21 = vcombine.high %v520_v1, %v524_v16  ;;  %v9751_v27 = vcombine.low %v520_v1, %v524_v16 }
 0x230   : > { %6542 = vmatpush1.bf16.msra.mxu1 %v9807_v37  ;;  %v652_v18 = vld [vmem:[%s11643_s16 + $0x6b0] sm:$0xff] }
 0x231   : > { %6543 = vmatprep.subr.bf16.mxu1 %v9800_v39  ;;  %6501 = vmatpush1.bf16.msra.mxu0 %v9671_v44  ;;  %v9880_v22 = vcombine.high %v648_v17, %v652_v18  ;;  %v512_v23 = vld [vmem:[%s11643_s16 + $0x250] sm:$0xff]  ;;  %v9879_v28 = vcombine.low %v648_v17, %v652_v18 }
 0x232   : > { %6502 = vmatprep.subr.bf16.mxu0 %v9792_v47  ;;  %v516_v24 = vld [vmem:[%s11643_s16 + $0x270] sm:$0xff] }
 0x233   : > { %v640_v25 = vld [vmem:[%s11643_s16 + $0x650] sm:$0xff]  ;;  %v9744_v29 = vcombine.high %v512_v23, %v516_v24  ;;  %v9743_v35 = vcombine.low %v512_v23, %v516_v24 }
 0x234   : > { %6544 = vmatpush1.bf16.msra.mxu1 %v9799_v46  ;;  %v644_v26 = vld [vmem:[%s11643_s16 + $0x670] sm:$0xff] }
 0x235   : > { %6545 = vmatprep.subr.bf16.mxu1 %v9920_v48  ;;  %6503 = vmatpush2.bf16.msra.mxu0 %v9791_v54  ;;  %v9872_v30 = vcombine.high %v640_v25, %v644_v26  ;;  %v504_v31 = vld [vmem:[%s11643_s16 + $0x210] sm:$0xff]  ;;  %v9871_v37 = vcombine.low %v640_v25, %v644_v26 }
 0x236   : > { %6504 = vmatprep.subr.bf16.mxu0 %v9784_v57  ;;  %v508_v32 = vld [vmem:[%s11643_s16 + $0x230] sm:$0xff] }
 0x237   : > { %v632_v33 = vld [vmem:[%s11643_s16 + $0x610] sm:$0xff]  ;;  %v9736_v38 = vcombine.high %v504_v31, %v508_v32  ;;  %v9735_v44 = vcombine.low %v504_v31, %v508_v32 }
 0x238   : > { %6546 = vmatpush2.bf16.msra.mxu1 %v9919_v56  ;;  %v636_v34 = vld [vmem:[%s11643_s16 + $0x630] sm:$0xff] }
 0x239   : > { %6547 = vmatprep.subr.bf16.mxu1 %v9912_v58  ;;  %6505 = vmatpush2.bf16.msra.mxu0 %v9783_v62  ;;  %v9864_v39 = vcombine.high %v632_v33, %v636_v34  ;;  %v752_v40 = vld [vmem:[%s11643_s16 + $0x9d0] sm:$0xff]  ;;  %v9863_v46 = vcombine.low %v632_v33, %v636_v34 }
 0x23a   : > { %6506 = vmatprep.subr.bf16.mxu0 %v9776_v0  ;;  %v756_v41 = vld [vmem:[%s11643_s16 + $0x9f0] sm:$0xff] }
 0x23b   : > { %v880_v42 = vld [vmem:[%s11643_s16 + $0xdd0] sm:$0xff]  ;;  %v9984_v47 = vcombine.high %v752_v40, %v756_v41  ;;  %v9983_v54 = vcombine.low %v752_v40, %v756_v41 }
 0x23c   : > { %6548 = vmatpush2.bf16.msra.mxu1 %v9911_v63  ;;  %v884_v43 = vld [vmem:[%s11643_s16 + $0xdf0] sm:$0xff] }
 0x23d   : > { %6549 = vmatprep.subr.bf16.mxu1 %v9904_v2  ;;  %6507 = vmatpush2.bf16.msra.mxu0 %v9775_v5  ;;  %v10112_v48 = vcombine.high %v880_v42, %v884_v43  ;;  %v744_v49 = vld [vmem:[%s11643_s16 + $0x990] sm:$0xff]  ;;  %v10111_v56 = vcombine.low %v880_v42, %v884_v43 }
 0x23e   : > { %6508 = vmatprep.subr.bf16.mxu0 %v9768_v8  ;;  %v748_v50 = vld [vmem:[%s11643_s16 + $0x9b0] sm:$0xff] }
 0x23f   : > { %v872_v52 = vld [vmem:[%s11643_s16 + $0xd90] sm:$0xff]  ;;  %v9976_v57 = vcombine.high %v744_v49, %v748_v50  ;;  %v9975_v0 = vcombine.low %v744_v49, %v748_v50 }
 0x240   : > { %6550 = vmatpush2.bf16.msra.mxu1 %v9903_v6  ;;  %v876_v53 = vld [vmem:[%s11643_s16 + $0xdb0] sm:$0xff] }
 0x241   : > { %6551 = vmatprep.subr.bf16.mxu1 %v9896_v9  ;;  %6509 = vmatpush2.bf16.msra.mxu0 %v9767_v12  ;;  %v10104_v58 = vcombine.high %v872_v52, %v876_v53  ;;  %v736_v59 = vld [vmem:[%s11643_s16 + $0x950] sm:$0xff]  ;;  %v10103_v2 = vcombine.low %v872_v52, %v876_v53 }
 0x242   : > { %6510 = vmatprep.subr.bf16.mxu0 %v9760_v14  ;;  %v740_v60 = vld [vmem:[%s11643_s16 + $0x970] sm:$0xff] }
 0x243   : > { %v10999_v36 = vld [vmem:[%s11641_s30] ss:$56 sps:$4 sm:$0xff]   ;;  %v9968_v3 = vcombine.high %v736_v59, %v740_v60  ;;  %v11001_v5 = vld [vmem:[%s11641_s30 + $0x14] ss:$56 sps:$4 sm:$0xff]   ;;  %v9967_v55 = vcombine.low %v736_v59, %v740_v60 }
 0x244   : > { %6552 = vmatpush2.bf16.msra.mxu1 %v9895_v13  ;;  %v864_v51 = vld [vmem:[%s11643_s16 + $0xd50] sm:$0xff] }
 0x245   : > { %6553 = vmatprep.subr.bf16.mxu1 %v9888_v15  ;;  %6511 = vmatpush2.bf16.msra.mxu0 %v9759_v19  ;;  %v868_v62 = vld [vmem:[%s11643_s16 + $0xd70] sm:$0xff] }
 0x246   : > { %6512 = vmatprep.subr.bf16.mxu0 %v9752_v21  ;;  %v11000_v63 = vld [vmem:[%s11641_s30 + $0x8] ss:$56 sps:$4 sm:$0xff]   ;;  %v10096_v45 = vcombine.high %v864_v51, %v868_v62  ;;  %v11002_v9 = vld [vmem:[%s11641_s30 + $0x1c] ss:$56 sps:$4 sm:$0xff]   ;;  %v10095_v7 = vcombine.low %v864_v51, %v868_v62 }
 0x247   : > { %v728_v61 = vld [vmem:[%s11643_s16 + $0x910] sm:$0xff] }
 0x248   : > { %6554 = vmatpush2.bf16.msra.mxu1 %v9887_v20  ;;  %v732_v4 = vld [vmem:[%s11643_s16 + $0x930] sm:$0xff] }
 0x249   : > { %6555 = vmatprep.subr.bf16.mxu1 %v9880_v22  ;;  %6513 = vmatpush2.bf16.msra.mxu0 %v9751_v27  ;;  %v856_v6 = vld [vmem:[%s11643_s16 + $0xd10] sm:$0xff]  ;;  %v9960_v10 = vcombine.high %v728_v61, %v732_v4  ;;  %v9959_v1 = vcombine.low %v728_v61, %v732_v4 }
 0x24a   : > { %6514 = vmatprep.subr.bf16.mxu0 %v9744_v29  ;;  %v860_v8 = vld [vmem:[%s11643_s16 + $0xd30] sm:$0xff] }
 0x24b   : > { %v10088_v11 = vcombine.high %v856_v6, %v860_v8  ;;  %v720_v12 = vld [vmem:[%s11643_s16 + $0x8d0] sm:$0xff]  ;;  %v10087_v16 = vcombine.low %v856_v6, %v860_v8 }
 0x24c   : > { %6556 = vmatpush2.bf16.msra.mxu1 %v9879_v28  ;;  %v724_v13 = vld [vmem:[%s11643_s16 + $0x8f0] sm:$0xff] }
 0x24d   : > { %6557 = vmatprep.subr.bf16.mxu1 %v9872_v30  ;;  %6515 = vmatpush2.bf16.msra.mxu0 %v9743_v35  ;;  %v848_v14 = vld [vmem:[%s11643_s16 + $0xcd0] sm:$0xff]  ;;  %v9952_v17 = vcombine.high %v720_v12, %v724_v13  ;;  %v9951_v23 = vcombine.low %v720_v12, %v724_v13 }
 0x24e   : > { %6516 = vmatprep.subr.bf16.mxu0 %v9736_v38  ;;  %v852_v15 = vld [vmem:[%s11643_s16 + $0xcf0] sm:$0xff] }
 0x24f   : > { %v10080_v18 = vcombine.high %v848_v14, %v852_v15  ;;  %v712_v19 = vld [vmem:[%s11643_s16 + $0x890] sm:$0xff]  ;;  %v10079_v24 = vcombine.low %v848_v14, %v852_v15 }
 0x250   : > { %6558 = vmatpush2.bf16.msra.mxu1 %v9871_v37  ;;  %v716_v20 = vld [vmem:[%s11643_s16 + $0x8b0] sm:$0xff] }
 0x251   : > { %6559 = vmatprep.subr.bf16.mxu1 %v9864_v39  ;;  %6517 = vmatpush2.bf16.msra.mxu0 %v9735_v44  ;;  %v840_v21 = vld [vmem:[%s11643_s16 + $0xc90] sm:$0xff]  ;;  %v9944_v25 = vcombine.high %v712_v19, %v716_v20  ;;  %v9943_v31 = vcombine.low %v712_v19, %v716_v20 }
 0x252   : > { %6572 = vmatprep.subr.bf16.mxu0 %v9984_v47  ;;  %v844_v22 = vld [vmem:[%s11643_s16 + $0xcb0] sm:$0xff] }
 0x253   : > { %v10072_v26 = vcombine.high %v840_v21, %v844_v22  ;;  %v704_v27 = vld [vmem:[%s11643_s16 + $0x850] sm:$0xff]  ;;  %v10071_v32 = vcombine.low %v840_v21, %v844_v22 }
 0x254   : > { %6560 = vmatpush2.bf16.msra.mxu1 %v9863_v46  ;;  %6519 = vmatmul.mubr.bf16.vlgmr.msra.gmra.mxu0 %v10999_v36  ;;  %v708_v28 = vld [vmem:[%s11643_s16 + $0x870] sm:$0xff] }
 0x255   : > { %6615 = vmatprep.subr.bf16.mxu1 %v10112_v48  ;;  %6573 = vmatpush1.bf16.msra.mxu0 %v9983_v54  ;;  %v832_v29 = vld [vmem:[%s11643_s16 + $0xc50] sm:$0xff]  ;;  %v9936_v33 = vcombine.high %v704_v27, %v708_v28  ;;  %v9935_v40 = vcombine.low %v704_v27, %v708_v28 }
 0x256   : > { %6574 = vmatprep.subr.bf16.mxu0 %v9976_v57  ;;  %6604 = vmatprep.mubr.bf16.mxu0 %v11001_v5  ;;  %v836_v30 = vld [vmem:[%s11643_s16 + $0xc70] sm:$0xff] }
 0x257   : > { %6562 = vmatmul.mubr.bf16.vlgmr.msra.gmra.mxu1 %v11000_v63  ;;  %v10064_v34 = vcombine.high %v832_v29, %v836_v30  ;;  %v696_v35 = vld [vmem:[%s11643_s16 + $0x810] sm:$0xff]  ;;  %v10063_v41 = vcombine.low %v832_v29, %v836_v30 }
 0x258   : > { %6616 = vmatpush1.bf16.msra.mxu1 %v10111_v56  ;;  %6647 = vmatprep.mubr.bf16.mxu1 %v11002_v9  ;;  %v700_v37 = vld [vmem:[%s11643_s16 + $0x830] sm:$0xff] }
 0x259   : > { %6617 = vmatprep.subr.bf16.mxu1 %v10104_v58  ;;  %6575 = vmatpush1.bf16.msra.mxu0 %v9975_v0  ;;  %v824_v38 = vld [vmem:[%s11643_s16 + $0xc10] sm:$0xff]  ;;  %v9928_v42 = vcombine.high %v696_v35, %v700_v37  ;;  %v9927_v49 = vcombine.low %v696_v35, %v700_v37 }
 0x25a   : > { %6576 = vmatprep.subr.bf16.mxu0 %v9968_v3  ;;  %v828_v39 = vld [vmem:[%s11643_s16 + $0xc30] sm:$0xff] }
 0x25b   : > { %v10056_v43 = vcombine.high %v824_v38, %v828_v39  ;;  %v816_v44 = vld [vmem:[%s11643_s16 + $0xbd0] sm:$0xff]  ;;  %v10055_v50 = vcombine.low %v824_v38, %v828_v39 }
 0x25c   : > { %6618 = vmatpush1.bf16.msra.mxu1 %v10103_v2  ;;  %v820_v46 = vld [vmem:[%s11643_s16 + $0xbf0] sm:$0xff] }
 0x25d   : > { %6619 = vmatprep.subr.bf16.mxu1 %v10096_v45  ;;  %6577 = vmatpush1.bf16.msra.mxu0 %v9967_v55  ;;  %v944_v47 = vld [vmem:[%s11643_s16 + $0xfd0] sm:$0xff]  ;;  %v10048_v52 = vcombine.high %v816_v44, %v820_v46  ;;  %v10047_v59 = vcombine.low %v816_v44, %v820_v46 }
 0x25e   : > { %6578 = vmatprep.subr.bf16.mxu0 %v9960_v10  ;;  %v948_v48 = vld [vmem:[%s11643_s16 + $0xff0] sm:$0xff] }
 0x25f   : > { %v10176_v53 = vcombine.high %v944_v47, %v948_v48  ;;  %v808_v54 = vld [vmem:[%s11643_s16 + $0xb90] sm:$0xff]  ;;  %v10175_v60 = vcombine.low %v944_v47, %v948_v48 }
 0x260   : > { %6620 = vmatpush1.bf16.msra.mxu1 %v10095_v7  ;;  %v812_v56 = vld [vmem:[%s11643_s16 + $0xbb0] sm:$0xff] }
 0x261   : > { %6621 = vmatprep.subr.bf16.mxu1 %v10088_v11  ;;  %6579 = vmatpush1.bf16.msra.mxu0 %v9959_v1  ;;  %v936_v57 = vld [vmem:[%s11643_s16 + $0xf90] sm:$0xff]  ;;  %v10040_v36 = vcombine.high %v808_v54, %v812_v56  ;;  %v10039_v3 = vcombine.low %v808_v54, %v812_v56 }
 0x262   : > { %6580 = vmatprep.subr.bf16.mxu0 %v9952_v17  ;;  %v940_v58 = vld [vmem:[%s11643_s16 + $0xfb0] sm:$0xff] }
 0x263   : > { %v10168_v51 = vcombine.high %v936_v57, %v940_v58  ;;  %v800_v62 = vld [vmem:[%s11643_s16 + $0xb50] sm:$0xff]  ;;  %v10167_v45 = vcombine.low %v936_v57, %v940_v58 }
 0x264   : > { %6622 = vmatpush1.bf16.msra.mxu1 %v10087_v16  ;;  %v804_v63 = vld [vmem:[%s11643_s16 + $0xb70] sm:$0xff] }
 0x265   : > { %6623 = vmatprep.subr.bf16.mxu1 %v10080_v18  ;;  %6581 = vmatpush1.bf16.msra.mxu0 %v9951_v23  ;;  %v928_v0 = vld [vmem:[%s11643_s16 + $0xf50] sm:$0xff]  ;;  %v10032_v61 = vcombine.high %v800_v62, %v804_v63  ;;  %v10031_v55 = vcombine.low %v800_v62, %v804_v63 }
 0x266   : > { %6582 = vmatprep.subr.bf16.mxu0 %v9944_v25  ;;  %v932_v2 = vld [vmem:[%s11643_s16 + $0xf70] sm:$0xff] }
 0x267   : > { %v10160_v4 = vcombine.high %v928_v0, %v932_v2  ;;  %v792_v5 = vld [vmem:[%s11643_s16 + $0xb10] sm:$0xff]  ;;  %v10159_v7 = vcombine.low %v928_v0, %v932_v2 }
 0x268   : > { %6624 = vmatpush1.bf16.msra.mxu1 %v10079_v24  ;;  %v796_v6 = vld [vmem:[%s11643_s16 + $0xb30] sm:$0xff] }
 0x269   : > { %6625 = vmatprep.subr.bf16.mxu1 %v10072_v26  ;;  %6583 = vmatpush1.bf16.msra.mxu0 %v9943_v31  ;;  %v920_v8 = vld [vmem:[%s11643_s16 + $0xf10] sm:$0xff]  ;;  %v10024_v10 = vcombine.high %v792_v5, %v796_v6  ;;  %v10023_v1 = vcombine.low %v792_v5, %v796_v6 }
 0x26a   : > { %6584 = vmatprep.subr.bf16.mxu0 %v9936_v33  ;;  %v924_v9 = vld [vmem:[%s11643_s16 + $0xf30] sm:$0xff] }
 0x26b   : > { %v10152_v11 = vcombine.high %v920_v8, %v924_v9  ;;  %v784_v12 = vld [vmem:[%s11643_s16 + $0xad0] sm:$0xff]  ;;  %v10151_v16 = vcombine.low %v920_v8, %v924_v9 }
 0x26c   : > { %6626 = vmatpush1.bf16.msra.mxu1 %v10071_v32  ;;  %v788_v13 = vld [vmem:[%s11643_s16 + $0xaf0] sm:$0xff] }
 0x26d   : > { %6627 = vmatprep.subr.bf16.mxu1 %v10064_v34  ;;  %6585 = vmatpush1.bf16.msra.mxu0 %v9935_v40  ;;  %v912_v14 = vld [vmem:[%s11643_s16 + $0xed0] sm:$0xff]  ;;  %v10016_v17 = vcombine.high %v784_v12, %v788_v13  ;;  %v10015_v23 = vcombine.low %v784_v12, %v788_v13 }
 0x26e   : > { %6586 = vmatprep.subr.bf16.mxu0 %v9928_v42  ;;  %v916_v15 = vld [vmem:[%s11643_s16 + $0xef0] sm:$0xff] }
 0x26f   : > { %v10144_v18 = vcombine.high %v912_v14, %v916_v15  ;;  %v776_v19 = vld [vmem:[%s11643_s16 + $0xa90] sm:$0xff]  ;;  %v10143_v24 = vcombine.low %v912_v14, %v916_v15 }
 0x270   : > { %6628 = vmatpush1.bf16.msra.mxu1 %v10063_v41  ;;  %v780_v20 = vld [vmem:[%s11643_s16 + $0xab0] sm:$0xff] }
 0x271   : > { %6629 = vmatprep.subr.bf16.mxu1 %v10056_v43  ;;  %6587 = vmatpush1.bf16.msra.mxu0 %v9927_v49  ;;  %v904_v21 = vld [vmem:[%s11643_s16 + $0xe90] sm:$0xff]  ;;  %v10008_v25 = vcombine.high %v776_v19, %v780_v20  ;;  %v10007_v31 = vcombine.low %v776_v19, %v780_v20 }
 0x272   : > { %6588 = vmatprep.subr.bf16.mxu0 %v10048_v52  ;;  %v908_v22 = vld [vmem:[%s11643_s16 + $0xeb0] sm:$0xff] }
 0x273   : > { %v10136_v26 = vcombine.high %v904_v21, %v908_v22  ;;  %v768_v27 = vld [vmem:[%s11643_s16 + $0xa50] sm:$0xff]  ;;  %v10135_v32 = vcombine.low %v904_v21, %v908_v22 }
 0x274   : > { %6630 = vmatpush1.bf16.msra.mxu1 %v10055_v50  ;;  %v772_v28 = vld [vmem:[%s11643_s16 + $0xa70] sm:$0xff] }
 0x275   : > { %6631 = vmatprep.subr.bf16.mxu1 %v10176_v53  ;;  %6589 = vmatpush2.bf16.msra.mxu0 %v10047_v59  ;;  %v896_v29 = vld [vmem:[%s11643_s16 + $0xe50] sm:$0xff]  ;;  %v10000_v33 = vcombine.high %v768_v27, %v772_v28  ;;  %v9999_v40 = vcombine.low %v768_v27, %v772_v28 }
 0x276   : > { %6590 = vmatprep.subr.bf16.mxu0 %v10040_v36  ;;  %v900_v30 = vld [vmem:[%s11643_s16 + $0xe70] sm:$0xff] }
 0x277   : > { %v10128_v34 = vcombine.high %v896_v29, %v900_v30  ;;  %v760_v35 = vld [vmem:[%s11643_s16 + $0xa10] sm:$0xff]  ;;  %v10127_v41 = vcombine.low %v896_v29, %v900_v30 }
 0x278   : > { %6632 = vmatpush2.bf16.msra.mxu1 %v10175_v60  ;;  %v764_v37 = vld [vmem:[%s11643_s16 + $0xa30] sm:$0xff] }
 0x279   : > { %6633 = vmatprep.subr.bf16.mxu1 %v10168_v51  ;;  %6591 = vmatpush2.bf16.msra.mxu0 %v10039_v3  ;;  %v888_v38 = vld [vmem:[%s11643_s16 + $0xe10] sm:$0xff]  ;;  %v9992_v42 = vcombine.high %v760_v35, %v764_v37  ;;  %v9991_v49 = vcombine.low %v760_v35, %v764_v37 }
 0x27a   : > { %6592 = vmatprep.subr.bf16.mxu0 %v10032_v61  ;;  %v892_v39 = vld [vmem:[%s11643_s16 + $0xe30] sm:$0xff] }
 0x27b   : > { %v10120_v43 = vcombine.high %v888_v38, %v892_v39  ;;  %v1008_v44 = vld [vmem:[%s11643_s16 + $0x11d0] sm:$0xff]  ;;  %v10119_v50 = vcombine.low %v888_v38, %v892_v39 }
 0x27c   : > { %6634 = vmatpush2.bf16.msra.mxu1 %v10167_v45  ;;  %v1012_v46 = vld [vmem:[%s11643_s16 + $0x11f0] sm:$0xff] }
 0x27d   : > { %6635 = vmatprep.subr.bf16.mxu1 %v10160_v4  ;;  %6593 = vmatpush2.bf16.msra.mxu0 %v10031_v55  ;;  %v1136_v47 = vld [vmem:[%s11643_s16 + $0x15d0] sm:$0xff]  ;;  %v10240_v52 = vcombine.high %v1008_v44, %v1012_v46  ;;  %v10239_v59 = vcombine.low %v1008_v44, %v1012_v46 }
 0x27e   : > { %6594 = vmatprep.subr.bf16.mxu0 %v10024_v10  ;;  %v1140_v48 = vld [vmem:[%s11643_s16 + $0x15f0] sm:$0xff] }
 0x27f   : > { %v10368_v53 = vcombine.high %v1136_v47, %v1140_v48  ;;  %v1000_v54 = vld [vmem:[%s11643_s16 + $0x1190] sm:$0xff]  ;;  %v10367_v60 = vcombine.low %v1136_v47, %v1140_v48  ;;  %v12324_v48 = vpop.f32.mrf.mxu1 }
 0x280   : > { %6636 = vmatpush2.bf16.msra.mxu1 %v10159_v7  ;;  %v1004_v56 = vld [vmem:[%s11643_s16 + $0x11b0] sm:$0xff] }
 0x281   : > { %6637 = vmatprep.subr.bf16.mxu1 %v10152_v11  ;;  %6595 = vmatpush2.bf16.msra.mxu0 %v10023_v1  ;;  %v1128_v57 = vld [vmem:[%s11643_s16 + $0x1590] sm:$0xff]  ;;  %v10232_v36 = vcombine.high %v1000_v54, %v1004_v56  ;;  %v10231_v61 = vcombine.low %v1000_v54, %v1004_v56 }
 0x282   : > { %6596 = vmatprep.subr.bf16.mxu0 %v10016_v17  ;;  %v1132_v58 = vld [vmem:[%s11643_s16 + $0x15b0] sm:$0xff] }
 0x283   : > { %v10360_v51 = vcombine.high %v1128_v57, %v1132_v58  ;;  %v992_v62 = vld [vmem:[%s11643_s16 + $0x1150] sm:$0xff]  ;;  %v10359_v4 = vcombine.low %v1128_v57, %v1132_v58 }
 0x284   : > { %6638 = vmatpush2.bf16.msra.mxu1 %v10151_v16  ;;  %v996_v63 = vld [vmem:[%s11643_s16 + $0x1170] sm:$0xff] }
 0x285   : > { %6639 = vmatprep.subr.bf16.mxu1 %v10144_v18  ;;  %6597 = vmatpush2.bf16.msra.mxu0 %v10015_v23  ;;  %v11003_v0 = vld [vmem:[%s11641_s30 + $0x10] ss:$56 sps:$4 sm:$0xff]   ;;  %v10224_v5 = vcombine.high %v992_v62, %v996_v63  ;;  %v11005_v55 = vld [vmem:[%s11641_s30 + $0x24] ss:$56 sps:$4 sm:$0xff]   ;;  %v10223_v12 = vcombine.low %v992_v62, %v996_v63 }
 0x286   : > { %6598 = vmatprep.subr.bf16.mxu0 %v10008_v25  ;;  %v1120_v2 = vld [vmem:[%s11643_s16 + $0x1550] sm:$0xff] }
 0x287   : > { %v1124_v3 = vld [vmem:[%s11643_s16 + $0x1570] sm:$0xff] }
 0x288   : > { %6640 = vmatpush2.bf16.msra.mxu1 %v10143_v24  ;;  %v11004_v45 = vld [vmem:[%s11641_s30 + $0x18] ss:$56 sps:$4 sm:$0xff]   ;;  %v10352_v6 = vcombine.high %v1120_v2, %v1124_v3  ;;  %v11006_v11 = vld [vmem:[%s11641_s30 + $0x2c] ss:$56 sps:$4 sm:$0xff]   ;;  %v10351_v13 = vcombine.low %v1120_v2, %v1124_v3 }
 0x289   : > { %6641 = vmatprep.subr.bf16.mxu1 %v10136_v26  ;;  %6599 = vmatpush2.bf16.msra.mxu0 %v10007_v31  ;;  %v984_v8 = vld [vmem:[%s11643_s16 + $0x1110] sm:$0xff] }
 0x28a   : > { %6600 = vmatprep.subr.bf16.mxu0 %v10000_v33  ;;  %v988_v9 = vld [vmem:[%s11643_s16 + $0x1130] sm:$0xff] }
 0x28b   : > { %v1112_v7 = vld [vmem:[%s11643_s16 + $0x1510] sm:$0xff]  ;;  %v10216_v14 = vcombine.high %v984_v8, %v988_v9  ;;  %v10215_v19 = vcombine.low %v984_v8, %v988_v9 }
 0x28c   : > { %6642 = vmatpush2.bf16.msra.mxu1 %v10135_v32  ;;  %v1116_v10 = vld [vmem:[%s11643_s16 + $0x1530] sm:$0xff] }
 0x28d   : > { %6643 = vmatprep.subr.bf16.mxu1 %v10128_v34  ;;  %6601 = vmatpush2.bf16.msra.mxu0 %v9999_v40  ;;  %v10344_v15 = vcombine.high %v1112_v7, %v1116_v10  ;;  %v976_v1 = vld [vmem:[%s11643_s16 + $0x10d0] sm:$0xff]  ;;  %v10343_v20 = vcombine.low %v1112_v7, %v1116_v10 }
 0x28e   : > { %6602 = vmatprep.subr.bf16.mxu0 %v9992_v42  ;;  %v980_v16 = vld [vmem:[%s11643_s16 + $0x10f0] sm:$0xff] }
 0x28f   : > { %v1104_v17 = vld [vmem:[%s11643_s16 + $0x14d0] sm:$0xff]  ;;  %v10208_v21 = vcombine.high %v976_v1, %v980_v16  ;;  %v10207_v27 = vcombine.low %v976_v1, %v980_v16 }
 0x290   : > { %6644 = vmatpush2.bf16.msra.mxu1 %v10127_v41  ;;  %v1108_v18 = vld [vmem:[%s11643_s16 + $0x14f0] sm:$0xff] }
 0x291   : > { %6645 = vmatprep.subr.bf16.mxu1 %v10120_v43  ;;  %6603 = vmatpush2.bf16.msra.mxu0 %v9991_v49  ;;  %v10336_v22 = vcombine.high %v1104_v17, %v1108_v18  ;;  %v968_v23 = vld [vmem:[%s11643_s16 + $0x1090] sm:$0xff]  ;;  %v10335_v28 = vcombine.low %v1104_v17, %v1108_v18 }
 0x292   : > { %6658 = vmatprep.subr.bf16.mxu0 %v10240_v52  ;;  %v972_v24 = vld [vmem:[%s11643_s16 + $0x10b0] sm:$0xff] }
 0x293   : > { %v1096_v25 = vld [vmem:[%s11643_s16 + $0x1490] sm:$0xff]  ;;  %v10200_v29 = vcombine.high %v968_v23, %v972_v24  ;;  %v10199_v35 = vcombine.low %v968_v23, %v972_v24 }
 0x294   : > { %6646 = vmatpush2.bf16.msra.mxu1 %v10119_v50  ;;  %6605 = vmatmul.mubr.bf16.vlgmr.msra.gmra.mxu0 %v11003_v0  ;;  %v1100_v26 = vld [vmem:[%s11643_s16 + $0x14b0] sm:$0xff] }
 0x295   : > { %6701 = vmatprep.subr.bf16.mxu1 %v10368_v53  ;;  %6659 = vmatpush1.bf16.msra.mxu0 %v10239_v59  ;;  %v10328_v30 = vcombine.high %v1096_v25, %v1100_v26  ;;  %v960_v31 = vld [vmem:[%s11643_s16 + $0x1050] sm:$0xff]  ;;  %v10327_v37 = vcombine.low %v1096_v25, %v1100_v26  ;;  %v12330_v59 = vpop.f32.mrf.mxu1 }
 0x296   : > { %6660 = vmatprep.subr.bf16.mxu0 %v10232_v36  ;;  %6690 = vmatprep.mubr.bf16.mxu0 %v11005_v55  ;;  %v964_v32 = vld [vmem:[%s11643_s16 + $0x1070] sm:$0xff] }
 0x297   : > { %6648 = vmatmul.mubr.bf16.vlgmr.msra.gmra.mxu1 %v11004_v45  ;;  %v1088_v33 = vld [vmem:[%s11643_s16 + $0x1450] sm:$0xff]  ;;  %v10192_v38 = vcombine.high %v960_v31, %v964_v32  ;;  %v10191_v44 = vcombine.low %v960_v31, %v964_v32  ;;  %v12336_v45 = vpop.f32.mrf.mxu1 }
 0x298   : > { %6702 = vmatpush1.bf16.msra.mxu1 %v10367_v60  ;;  %6733 = vmatprep.mubr.bf16.mxu1 %v11006_v11  ;;  %v1092_v34 = vld [vmem:[%s11643_s16 + $0x1470] sm:$0xff] }
 0x299   : > { %6703 = vmatprep.subr.bf16.mxu1 %v10360_v51  ;;  %6661 = vmatpush1.bf16.msra.mxu0 %v10231_v61  ;;  %v10320_v39 = vcombine.high %v1088_v33, %v1092_v34  ;;  %v952_v40 = vld [vmem:[%s11643_s16 + $0x1010] sm:$0xff]  ;;  %v10319_v46 = vcombine.low %v1088_v33, %v1092_v34  ;;  %v12342_v10 = vpop.f32.mrf.mxu1 }
 0x29a   : > { %6662 = vmatprep.subr.bf16.mxu0 %v10224_v5  ;;  %v956_v41 = vld [vmem:[%s11643_s16 + $0x1030] sm:$0xff] }
 0x29b   : > { %v1080_v42 = vld [vmem:[%s11643_s16 + $0x1410] sm:$0xff]  ;;  %v10184_v47 = vcombine.high %v952_v40, %v956_v41  ;;  %v10183_v56 = vcombine.low %v952_v40, %v956_v41  ;;  %v12348_v16 = vpop.f32.mrf.mxu1 }
 0x29c   : > { %6704 = vmatpush1.bf16.msra.mxu1 %v10359_v4  ;;  %v1084_v43 = vld [vmem:[%s11643_s16 + $0x1430] sm:$0xff] }
 0x29d   : > { %6705 = vmatprep.subr.bf16.mxu1 %v10352_v6  ;;  %6663 = vmatpush1.bf16.msra.mxu0 %v10223_v12  ;;  %v10312_v49 = vcombine.high %v1080_v42, %v1084_v43  ;;  %v1072_v50 = vld [vmem:[%s11643_s16 + $0x13d0] sm:$0xff]  ;;  %v10311_v57 = vcombine.low %v1080_v42, %v1084_v43  ;;  %v12354_v26 = vpop.f32.mrf.mxu1 }
 0x29e   : > { %6664 = vmatprep.subr.bf16.mxu0 %v10216_v14  ;;  %v1076_v52 = vld [vmem:[%s11643_s16 + $0x13f0] sm:$0xff]  ;;  %v6262_v14 = vpop.f32.mrf.mxu0 }
 0x29f   : > { %v1200_v53 = vld [vmem:[%s11643_s16 + $0x17d0] sm:$0xff]  ;;  %v10304_v58 = vcombine.high %v1072_v50, %v1076_v52  ;;  %v10303_v0 = vcombine.low %v1072_v50, %v1076_v52 }
 0x2a0   : > { %6706 = vmatpush1.bf16.msra.mxu1 %v10351_v13  ;;  %v1204_v54 = vld [vmem:[%s11643_s16 + $0x17f0] sm:$0xff]  ;;  %v6264_v23 = vpop.f32.mrf.mxu0 }
 0x2a1   : > { %6707 = vmatprep.subr.bf16.mxu1 %v10344_v15  ;;  %6665 = vmatpush1.bf16.msra.mxu0 %v10215_v19  ;;  %v10432_v60 = vcombine.high %v1200_v53, %v1204_v54  ;;  %v1064_v36 = vld [vmem:[%s11643_s16 + $0x1390] sm:$0xff]  ;;  %v10431_v2 = vcombine.low %v1200_v53, %v1204_v54 }
 0x2a2   : > { %6666 = vmatprep.subr.bf16.mxu0 %v10208_v21  ;;  %v1068_v51 = vld [vmem:[%s11643_s16 + $0x13b0] sm:$0xff]  ;;  %v6266_v33 = vpop.f32.mrf.mxu0 }
 0x2a3   : > { %v1192_v62 = vld [vmem:[%s11643_s16 + $0x1790] sm:$0xff]  ;;  %v10296_v3 = vcombine.high %v1064_v36, %v1068_v51  ;;  %v10295_v9 = vcombine.low %v1064_v36, %v1068_v51 }
 0x2a4   : > { %6708 = vmatpush1.bf16.msra.mxu1 %v10343_v20  ;;  %v1196_v63 = vld [vmem:[%s11643_s16 + $0x17b0] sm:$0xff] }
 0x2a5   : > { %6709 = vmatprep.subr.bf16.mxu1 %v10336_v22  ;;  %6667 = vmatpush1.bf16.msra.mxu0 %v10207_v27  ;;  %v10424_v61 = vcombine.high %v1192_v62, %v1196_v63  ;;  %v1056_v4 = vld [vmem:[%s11643_s16 + $0x1350] sm:$0xff]  ;;  %v10423_v55 = vcombine.low %v1192_v62, %v1196_v63  ;;  %v6263_v62 = vadd.f32 %v6262_v14, %v12324_v48 }
 0x2a6   : > { %6668 = vmatprep.subr.bf16.mxu0 %v10200_v29  ;;  %v1060_v5 = vld [vmem:[%s11643_s16 + $0x1370] sm:$0xff]  ;;  %v6267_v48 = vadd.f32 %v6266_v33, %v12336_v45  ;;  %v12392_v33 = vld [vmem:[%s11643_s16 + $0x158] sm:$0xff] }
 0x2a7   : > { %v1184_v6 = vld [vmem:[%s11643_s16 + $0x1750] sm:$0xff]  ;;  %v10288_v7 = vcombine.high %v1056_v4, %v1060_v5  ;;  %v10287_v17 = vcombine.low %v1056_v4, %v1060_v5 }
 0x2a8   : > { %6710 = vmatpush1.bf16.msra.mxu1 %v10335_v28  ;;  %v1188_v8 = vld [vmem:[%s11643_s16 + $0x1770] sm:$0xff] }
 0x2a9   : > { %6711 = vmatprep.subr.bf16.mxu1 %v10328_v30  ;;  %6669 = vmatpush1.bf16.msra.mxu0 %v10199_v35  ;;  %v10416_v11 = vcombine.high %v1184_v6, %v1188_v8  ;;  %v1048_v12 = vld [vmem:[%s11643_s16 + $0x1310] sm:$0xff]  ;;  %v10415_v18 = vcombine.low %v1184_v6, %v1188_v8 }
 0x2aa   : > { %6670 = vmatprep.subr.bf16.mxu0 %v10192_v38  ;;  %v1052_v13 = vld [vmem:[%s11643_s16 + $0x1330] sm:$0xff] }
 0x2ab   : > { %v1176_v15 = vld [vmem:[%s11643_s16 + $0x1710] sm:$0xff]  ;;  %v10280_v19 = vcombine.high %v1048_v12, %v1052_v13  ;;  %v10279_v27 = vcombine.low %v1048_v12, %v1052_v13 }
 0x2ac   : > { %6712 = vmatpush1.bf16.msra.mxu1 %v10327_v37  ;;  %v1180_v1 = vld [vmem:[%s11643_s16 + $0x1730] sm:$0xff]  ;;  %v12360_v37 = vpop.f32.mrf.mxu1 }
 0x2ad   : > { %6713 = vmatprep.subr.bf16.mxu1 %v10320_v39  ;;  %6671 = vmatpush1.bf16.msra.mxu0 %v10191_v44  ;;  %v10408_v20 = vcombine.high %v1176_v15, %v1180_v1  ;;  %v1040_v21 = vld [vmem:[%s11643_s16 + $0x12d0] sm:$0xff]  ;;  %v10407_v28 = vcombine.low %v1176_v15, %v1180_v1  ;;  %v6268_v44 = vpop.f32.mrf.mxu0 }
 0x2ae   : > { %6672 = vmatprep.subr.bf16.mxu0 %v10184_v47  ;;  %v1044_v22 = vld [vmem:[%s11643_s16 + $0x12f0] sm:$0xff]  ;;  %v6269_v15 = vadd.f32 %v6268_v44, %v12342_v10  ;;  %v410_v44 = vld [vmem:[#allocation2 + $0x58] sm:$0xff] }
 0x2af   : > { %v1168_v24 = vld [vmem:[%s11643_s16 + $0x16d0] sm:$0xff]  ;;  %v10272_v29 = vcombine.high %v1040_v21, %v1044_v22  ;;  %v10271_v38 = vcombine.low %v1040_v21, %v1044_v22  ;;  %v6348_v52 = vpop.f32.mrf.mxu0  ;;  %v6310_v21 = vadd.f32 %v12360_v37, %v6267_v48 }
 0x2b0   : > { %6714 = vmatpush1.bf16.msra.mxu1 %v10319_v46  ;;  %v1172_v25 = vld [vmem:[%s11643_s16 + $0x16f0] sm:$0xff] }
 0x2b1   : > { %6715 = vmatprep.subr.bf16.mxu1 %v10312_v49  ;;  %6673 = vmatpush1.bf16.msra.mxu0 %v10183_v56  ;;  %v10400_v30 = vcombine.high %v1168_v24, %v1172_v25  ;;  %v1032_v31 = vld [vmem:[%s11643_s16 + $0x1290] sm:$0xff]  ;;  %v10399_v39 = vcombine.low %v1168_v24, %v1172_v25  ;;  %v6311_v49 = vpop.f32.mrf.mxu1 }
 0x2b2   : > { %6674 = vmatprep.subr.bf16.mxu0 %v10304_v58  ;;  %v1036_v32 = vld [vmem:[%s11643_s16 + $0x12b0] sm:$0xff] }
 0x2b3   : > { %v1160_v34 = vld [vmem:[%s11643_s16 + $0x1690] sm:$0xff]  ;;  %v10264_v40 = vcombine.high %v1032_v31, %v1036_v32  ;;  %v10263_v50 = vcombine.low %v1032_v31, %v1036_v32  ;;  %v6391_v56 = vpop.f32.mrf.mxu1 }
 0x2b4   : > { %6716 = vmatpush1.bf16.msra.mxu1 %v10311_v57  ;;  %v1164_v35 = vld [vmem:[%s11643_s16 + $0x16b0] sm:$0xff] }
 0x2b5   : > { %6717 = vmatprep.subr.bf16.mxu1 %v10432_v60  ;;  %6675 = vmatpush2.bf16.msra.mxu0 %v10303_v0  ;;  %v10392_v41 = vcombine.high %v1160_v34, %v1164_v35  ;;  %v1024_v42 = vld [vmem:[%s11643_s16 + $0x1250] sm:$0xff]  ;;  %v10391_v53 = vcombine.low %v1160_v34, %v1164_v35  ;;  %v6350_v0 = vpop.f32.mrf.mxu0  ;;  %v6393_v4 = vpop.f32.mrf.mxu1  ;;  %v12395_v34 = vld [vmem:[%s11643_s16 + $0x178] sm:$0xff] }
 0x2b6   : > { %6676 = vmatprep.subr.bf16.mxu0 %v10296_v3  ;;  %v1028_v43 = vld [vmem:[%s11643_s16 + $0x1270] sm:$0xff] }
 0x2b7   : > { %v1152_v46 = vld [vmem:[%s11643_s16 + $0x1650] sm:$0xff]  ;;  %v10256_v54 = vcombine.high %v1024_v42, %v1028_v43  ;;  %v10255_v63 = vcombine.low %v1024_v42, %v1028_v43  ;;  %v6352_v12 = vpop.f32.mrf.mxu0 }
 0x2b8   : > { %6718 = vmatpush2.bf16.msra.mxu1 %v10431_v2  ;;  %v1156_v47 = vld [vmem:[%s11643_s16 + $0x1670] sm:$0xff] }
 0x2b9   : > { %6719 = vmatprep.subr.bf16.mxu1 %v10424_v61  ;;  %6677 = vmatpush2.bf16.msra.mxu0 %v10295_v9  ;;  %v10384_v57 = vcombine.high %v1152_v46, %v1156_v47  ;;  %v1016_v58 = vld [vmem:[%s11643_s16 + $0x1210] sm:$0xff]  ;;  %v10383_v2 = vcombine.low %v1152_v46, %v1156_v47  ;;  %v6265_v61 = vadd.f32 %v6264_v23, %v12330_v59  ;;  %v497_v9 = vld [vmem:[%s11643_s16 + $0x1d8] sm:$0xff]  ;;  %v6354_v24 = vpop.f32.mrf.mxu0 }
 0x2ba   : > { %6678 = vmatprep.subr.bf16.mxu0 %v10288_v7  ;;  %v1020_v60 = vld [vmem:[%s11643_s16 + $0x1230] sm:$0xff]  ;;  %v6306_v7 = vadd.f32 %v12348_v16, %v6263_v62 }
 0x2bb   : > { %v1144_v36 = vld [vmem:[%s11643_s16 + $0x1610] sm:$0xff]  ;;  %v10248_v3 = vcombine.high %v1016_v58, %v1020_v60  ;;  %v6308_v14 = vadd.f32 %v12354_v26, %v6265_v61 }
 0x2bc   : > { %6720 = vmatpush2.bf16.msra.mxu1 %v10423_v55  ;;  %v1148_v51 = vld [vmem:[%s11643_s16 + $0x1630] sm:$0xff]  ;;  %v501_v55 = vld [vmem:[%s11643_s16 + $0x1f8] sm:$0xff]  ;;  %v6349_v1 = vadd.f32 %v6348_v52, %v6306_v7 }
 0x2bd   : > { %6721 = vmatprep.subr.bf16.mxu1 %v10416_v11  ;;  %6679 = vmatpush2.bf16.msra.mxu0 %v10287_v17  ;;  %v10376_v5 = vcombine.high %v1144_v36, %v1148_v51  ;;  %v1264_v6 = vld [vmem:[%s11643_s16 + $0x19d0] sm:$0xff]  ;;  %v10247_v11 = vcombine.low %v1016_v58, %v1020_v60  ;;  %v10375_v59 = vcombine.low %v1144_v36, %v1148_v51  ;;  %v6395_v17 = vpop.f32.mrf.mxu1  ;;  %v411_v36 = vld [vmem:[#allocation2 + $0x18] sm:$0xff] }
 0x2be   : > { %6680 = vmatprep.subr.bf16.mxu0 %v10280_v19  ;;  %v1268_v8 = vld [vmem:[%s11643_s16 + $0x19f0] sm:$0xff]  ;;  %v9730_v16 = vcombine.high %v497_v9, %v501_v55  ;;  %v489_v19 = vld [vmem:[%s11643_s16 + $0x198] sm:$0xff]  ;;  %v6351_v22 = vadd.f32 %v6350_v0, %v6308_v14  ;;  %v9729_v10 = vcombine.low %v497_v9, %v501_v55  ;;  %v9713_v55 = vcombine.low %v12392_v33, %v12395_v34 }
 0x2bf   : > { %v10496_v13 = vcombine.high %v1264_v6, %v1268_v8  ;;  %v1260_v45 = vld [vmem:[%s11643_s16 + $0x19b0] sm:$0xff]  ;;  %v10495_v23 = vcombine.low %v1264_v6, %v1268_v8  ;;  %v477_v0 = vld [vmem:[%s11643_s16 + $0x138] sm:$0xff] }
 0x2c0   : > { %6722 = vmatpush2.bf16.msra.mxu1 %v10415_v18  ;;  %v1256_v18 = vld [vmem:[%s11643_s16 + $0x1990] sm:$0xff] }
 0x2c1   : > { %6723 = vmatprep.subr.bf16.mxu1 %v10408_v20  ;;  %6681 = vmatpush2.bf16.msra.mxu0 %v10279_v27  ;;  %v493_v20 = vld [vmem:[%s11643_s16 + $0x1b8] sm:$0xff]  ;;  %v10488_v25 = vcombine.high %v1256_v18, %v1260_v45  ;;  %v12386_v26 = vld [vmem:[%s11643_s16 + $0x1950] sm:$0xff]  ;;  %v6312_v27 = vadd.f32 %v6311_v49, %v6269_v15 }
 0x2c2   : > { %6682 = vmatprep.subr.bf16.mxu0 %v10272_v29  ;;  %v6353_v29 = vadd.f32 %v6352_v12, %v6310_v21  ;;  %v9722_v31 = vcombine.high %v489_v19, %v493_v20  ;;  %v12389_v32 = vld [vmem:[%s11643_s16 + $0x1970] sm:$0xff]  ;;  %v9721_v47 = vcombine.low %v489_v19, %v493_v20  ;;  %v419_v15 = vld [vmem:[#allocation2 + $0x38] sm:$0xff] }
 0x2c3   : > { %v11007_v37 = vld [vmem:[%s11641_s30 + $0x20] ss:$56 sps:$4 sm:$0xff]   ;;  %v10480_v49 = vcombine.high %v12386_v26, %v12389_v32  ;;  %v11009_v60 = vld [vmem:[%s11641_s30 + $0x34] ss:$56 sps:$4 sm:$0xff]   ;;  %v10479_v62 = vcombine.low %v12386_v26, %v12389_v32 }
 0x2c4   : > { %6724 = vmatpush2.bf16.msra.mxu1 %v10407_v28  ;;  %v6392_v28 = vadd.f32 %v6391_v56, %v6349_v1  ;;  %v11008_v43 = vld [vmem:[%s11641_s30 + $0x28] ss:$56 sps:$4 sm:$0xff]   ;;  %v6396_v52 = vadd.f32 %v6395_v17, %v6353_v29 }
 0x2c5   : > { %6725 = vmatprep.subr.bf16.mxu1 %v10400_v30  ;;  %6683 = vmatpush2.bf16.msra.mxu0 %v10271_v38  ;;  %v6397_v30 = vpop.f32.mrf.mxu1  ;;  %v10487_v38 = vcombine.low %v1256_v18, %v1260_v45  ;;  %v1244_v58 = vld [vmem:[%s11643_s16 + $0x1930] sm:$0xff]  ;;  %v465_v17 = vld [vmem:[%s11643_s16 + $0xd8] sm:$0xff] }
 0x2c6   : > { %6684 = vmatprep.subr.bf16.mxu0 %v10264_v40  ;;  %v6355_v40 = vadd.f32 %v6354_v24, %v6312_v27  ;;  %v418_v8 = vld [vmem:[#allocation2 + $0x10] sm:$0xff]  ;;  %v461_v26 = vld [vmem:[%s11643_s16 + $0xb8] sm:$0xff] }
 0x2c7   : > { %v1236_v14 = vld [vmem:[%s11643_s16 + $0x18f0] sm:$0xff] }
 0x2c8   : > { %6726 = vmatpush2.bf16.msra.mxu1 %v10399_v39  ;;  %v6394_v39 = vadd.f32 %v6393_v4, %v6351_v22  ;;  %v1224_v24 = vld [vmem:[%s11643_s16 + $0x1890] sm:$0xff] }
 0x2c9   : > { %6727 = vmatprep.subr.bf16.mxu1 %v10392_v41  ;;  %6685 = vmatpush2.bf16.msra.mxu0 %v10263_v50  ;;  %v9714_v50 = vcombine.high %v12392_v33, %v12395_v34  ;;  %v1220_v32 = vld [vmem:[%s11643_s16 + $0x1870] sm:$0xff]  ;;  %v449_v33 = vld [vmem:[%s11643_s16 + $0x58] sm:$0xff] }
 0x2ca   : > { %6686 = vmatprep.subr.bf16.mxu0 %v10256_v54  ;;  %v453_v34 = vld [vmem:[%s11643_s16 + $0x78] sm:$0xff] }
 0x2cc   : > { %6728 = vmatpush2.bf16.msra.mxu1 %v10391_v53 }
 0x2cd   : > { %6729 = vmatprep.subr.bf16.mxu1 %v10384_v57  ;;  %6687 = vmatpush2.bf16.msra.mxu0 %v10255_v63  ;;  %v1240_v57 = vld [vmem:[%s11643_s16 + $0x1910] sm:$0xff]  ;;  %v473_v63 = vld [vmem:[%s11643_s16 + $0x118] sm:$0xff] }
 0x2ce   : > { %6688 = vmatprep.subr.bf16.mxu0 %v10248_v3  ;;  %v6398_v3 = vadd.f32 %v6397_v30, %v6355_v40  ;;  %v10472_v7 = vcombine.high %v1240_v57, %v1244_v58  ;;  %v10471_v19 = vcombine.low %v1240_v57, %v1244_v58  ;;  %v9705_v20 = vcombine.low %v473_v63, %v477_v0  ;;  %v1208_v40 = vld [vmem:[%s11643_s16 + $0x1810] sm:$0xff] }
 0x2d0   : > { %6730 = vmatpush2.bf16.msra.mxu1 %v10383_v2  ;;  %v11010_v2 = vld [vmem:[%s11641_s30 + $0x4] ss:$56 sps:$4 sm:$0xff]  }
 0x2d1   : > { %6731 = vmatprep.subr.bf16.mxu1 %v10376_v5  ;;  %6689 = vmatpush2.bf16.msra.mxu0 %v10247_v11 }
 0x2d2   : > { %6744 = vmatprep.subr.bf16.mxu0 %v10496_v13  ;;  %v1232_v13 = vld [vmem:[%s11643_s16 + $0x18d0] sm:$0xff] }
 0x2d3   : > { %v10464_v21 = vcombine.high %v1232_v13, %v1236_v14  ;;  %v10463_v27 = vcombine.low %v1232_v13, %v1236_v14  ;;  %v541_v13 = vld [vmem:[%s11643_s16 + $0x338] sm:$0xff] }
 0x2d4   : > { %6732 = vmatpush2.bf16.msra.mxu1 %v10375_v59  ;;  %v6434_v35 = vpop.f32.mrf.mxu0  ;;  %6691 = vmatmul.mubr.bf16.vlgmr.msra.gmra.mxu0 %v11007_v37  ;;  %v9706_v59 = vcombine.high %v473_v63, %v477_v0  ;;  %v557_v63 = vld [vmem:[%s11643_s16 + $0x3b8] sm:$0xff] }
 0x2d5   : > { %6787 = vmatprep.subr.bf16.mxu1 %v9730_v16  ;;  %v6435_v41 = vadd.f32 %v6434_v35, %v6392_v28  ;;  %6745 = vmatpush1.bf16.msra.mxu0 %v10495_v23  ;;  %v469_v16 = vld [vmem:[%s11643_s16 + $0xf8] sm:$0xff] }
 0x2d6   : > { %v6436_v46 = vpop.f32.mrf.mxu0  ;;  %6746 = vmatprep.subr.bf16.mxu0 %v10488_v25  ;;  %6776 = vmatprep.mubr.bf16.mxu0 %v11009_v60  ;;  %v9698_v23 = vcombine.high %v465_v17, %v469_v16  ;;  %v457_v25 = vld [vmem:[%s11643_s16 + $0x98] sm:$0xff]  ;;  %v9697_v28 = vcombine.low %v465_v17, %v469_v16  ;;  %v1296_v16 = vld [vmem:[%s11643_s16 + $0x1ad0] sm:$0xff] }
 0x2d7   : > { %v6477_v42 = vpop.f32.mrf.mxu1  ;;  %6734 = vmatmul.mubr.bf16.vlgmr.msra.gmra.mxu1 %v11008_v43  ;;  %v6437_v54 = vadd.f32 %v6436_v46, %v6394_v39  ;;  %v9690_v30 = vcombine.high %v457_v25, %v461_v26  ;;  %v9689_v37 = vcombine.low %v457_v25, %v461_v26  ;;  %v9682_v39 = vcombine.high %v449_v33, %v453_v34  ;;  %v445_v43 = vld [vmem:[%s11643_s16 + $0x38] sm:$0xff] }
 0x2d8   : > { %6788 = vmatpush1.bf16.msra.mxu1 %v9729_v10  ;;  %v6478_v53 = vadd.f32 %v6477_v42, %v6435_v41  ;;  %v6438_v51 = vpop.f32.mrf.mxu0  ;;  %6819 = vmatprep.mubr.bf16.mxu1 %v11010_v2  ;;  %v1228_v10 = vld [vmem:[%s11643_s16 + $0x18b0] sm:$0xff]  ;;  %v441_v42 = vld [vmem:[%s11643_s16 + $0x18] sm:$0xff]  ;;  %v9681_v46 = vcombine.low %v449_v33, %v453_v34 }
 0x2d9   : > { %v6479_v56 = vpop.f32.mrf.mxu1  ;;  %6789 = vmatprep.subr.bf16.mxu1 %v9722_v31  ;;  %v6439_v5 = vadd.f32 %v6438_v51, %v6396_v52  ;;  %6747 = vmatpush1.bf16.msra.mxu0 %v10487_v38  ;;  %v10456_v29 = vcombine.high %v1224_v24, %v1228_v10  ;;  %v1216_v31 = vld [vmem:[%s11643_s16 + $0x1850] sm:$0xff]  ;;  %v10455_v35 = vcombine.low %v1224_v24, %v1228_v10  ;;  %v521_v25 = vld [vmem:[%s11643_s16 + $0x298] sm:$0xff] }
 0x2da   : > { %v7090_v61 = vadd.f32 %v6478_v53, %v410_v44  ;;  %v6480_v4 = vadd.f32 %v6479_v56, %v6437_v54  ;;  %v6440_v9 = vpop.f32.mrf.mxu0  ;;  %6748 = vmatprep.subr.bf16.mxu0 %v10480_v49  ;;  %v10448_v38 = vcombine.high %v1216_v31, %v1220_v32  ;;  %v1212_v41 = vld [vmem:[%s11643_s16 + $0x1830] sm:$0xff]  ;;  %v10447_v44 = vcombine.low %v1216_v31, %v1220_v32  ;;  %v561_v53 = vld [vmem:[%s11643_s16 + $0x3d8] sm:$0xff] }
 0x2db   : > { %v6481_v6 = vpop.f32.mrf.mxu1  ;;  %v6441_v12 = vadd.f32 %v6440_v9, %v6398_v3  ;;  %v9674_v49 = vcombine.high %v441_v42, %v445_v43  ;;  %v1332_v52 = vld [vmem:[%s11643_s16 + $0x1bf0] sm:$0xff]  ;;  %v565_v54 = vld [vmem:[%s11643_s16 + $0x3f8] sm:$0xff]  ;;  %v10439_v56 = vcombine.low %v1208_v40, %v1212_v41  ;;  %v9673_v57 = vcombine.low %v441_v42, %v445_v43 }
 0x2dc   : > { %6790 = vmatpush1.bf16.msra.mxu1 %v9721_v47  ;;  %7106 = vst [vmem:[#allocation2 + $0x58] sm:$0xff] %v7090_v61  ;;  %v7091_v48 = vadd.f32 %v6480_v4, %v411_v36  ;;  %v6482_v11 = vadd.f32 %v6481_v6, %v6439_v5  ;;  %v10440_v47 = vcombine.high %v1208_v40, %v1212_v41  ;;  %v1320_v36 = vld [vmem:[%s11643_s16 + $0x1b90] sm:$0xff]  ;;  %v545_v6 = vld [vmem:[%s11643_s16 + $0x358] sm:$0xff] }
 0x2dd   : > { %6791 = vmatprep.subr.bf16.mxu1 %v9714_v50  ;;  %v6483_v1 = vpop.f32.mrf.mxu1  ;;  %6749 = vmatpush1.bf16.msra.mxu0 %v10479_v62  ;;  %v1328_v50 = vld [vmem:[%s11643_s16 + $0x1bd0] sm:$0xff]  ;;  %v9794_v60 = vcombine.high %v561_v53, %v565_v54  ;;  %v553_v62 = vld [vmem:[%s11643_s16 + $0x398] sm:$0xff]  ;;  %v9793_v2 = vcombine.low %v561_v53, %v565_v54 }
 0x2de   : > { %7107 = vst [vmem:[#allocation2 + $0x18] sm:$0xff] %v7091_v48  ;;  %v7098_v18 = vadd.f32 %v6482_v11, %v418_v8  ;;  %v6484_v45 = vadd.f32 %v6483_v1, %v6441_v12  ;;  %6750 = vmatprep.subr.bf16.mxu0 %v10472_v7  ;;  %v10560_v58 = vcombine.high %v1328_v50, %v1332_v52  ;;  %v1324_v51 = vld [vmem:[%s11643_s16 + $0x1bb0] sm:$0xff]  ;;  %v549_v8 = vld [vmem:[%s11643_s16 + $0x378] sm:$0xff] }
 0x2df   : > { %v10559_v0 = vcombine.low %v1328_v50, %v1332_v52  ;;  %v10552_v3 = vcombine.high %v1320_v36, %v1324_v51  ;;  %v9786_v61 = vcombine.high %v553_v62, %v557_v63  ;;  %v1312_v4 = vld [vmem:[%s11643_s16 + $0x1b50] sm:$0xff]  ;;  %v10551_v9 = vcombine.low %v1320_v36, %v1324_v51  ;;  %v525_v26 = vld [vmem:[%s11643_s16 + $0x2b8] sm:$0xff] }
 0x2e0   : > { %6792 = vmatpush1.bf16.msra.mxu1 %v9713_v55  ;;  %7114 = vst [vmem:[#allocation2 + $0x10] sm:$0xff] %v7098_v18  ;;  %v7099_v22 = vadd.f32 %v6484_v45, %v419_v15  ;;  %v1316_v5 = vld [vmem:[%s11643_s16 + $0x1b70] sm:$0xff]  ;;  %v9785_v55 = vcombine.low %v553_v62, %v557_v63  ;;  %v9778_v48 = vcombine.high %v545_v6, %v549_v8  ;;  %v529_v45 = vld [vmem:[%s11643_s16 + $0x2d8] sm:$0xff] }
 0x2e1   : > { %6793 = vmatprep.subr.bf16.mxu1 %v9706_v59  ;;  %6751 = vmatpush1.bf16.msra.mxu0 %v10471_v19  ;;  %v10544_v7 = vcombine.high %v1312_v4, %v1316_v5  ;;  %v1304_v11 = vld [vmem:[%s11643_s16 + $0x1b10] sm:$0xff]  ;;  %v537_v59 = vld [vmem:[%s11643_s16 + $0x318] sm:$0xff]  ;;  %v10543_v14 = vcombine.low %v1312_v4, %v1316_v5  ;;  %v9777_v15 = vcombine.low %v545_v6, %v549_v8 }
 0x2e2   : > { %7115 = vst [vmem:[#allocation2 + $0x38] sm:$0xff] %v7099_v22  ;;  %6752 = vmatprep.subr.bf16.mxu0 %v10464_v21  ;;  %v1308_v12 = vld [vmem:[%s11643_s16 + $0x1b30] sm:$0xff]  ;;  %v9770_v17 = vcombine.high %v537_v59, %v541_v13  ;;  %v533_v19 = vld [vmem:[%s11643_s16 + $0x2f8] sm:$0xff]  ;;  %v9769_v21 = vcombine.low %v537_v59, %v541_v13 }
 0x2e3   : > { %v10536_v1 = vcombine.high %v1304_v11, %v1308_v12  ;;  %v1300_v18 = vld [vmem:[%s11643_s16 + $0x1af0] sm:$0xff]  ;;  %v513_v33 = vld [vmem:[%s11643_s16 + $0x258] sm:$0xff] }
 0x2e4   : > { %6794 = vmatpush1.bf16.msra.mxu1 %v9705_v20  ;;  %v10535_v20 = vcombine.low %v1304_v11, %v1308_v12  ;;  %v10528_v22 = vcombine.high %v1296_v16, %v1300_v18  ;;  %v1288_v24 = vld [vmem:[%s11643_s16 + $0x1a90] sm:$0xff]  ;;  %v517_v34 = vld [vmem:[%s11643_s16 + $0x278] sm:$0xff] }
 0x2e5   : > { %6795 = vmatprep.subr.bf16.mxu1 %v9698_v23  ;;  %6753 = vmatpush1.bf16.msra.mxu0 %v10463_v27  ;;  %v9762_v23 = vcombine.high %v529_v45, %v533_v19  ;;  %v1292_v10 = vld [vmem:[%s11643_s16 + $0x1ab0] sm:$0xff]  ;;  %v10527_v27 = vcombine.low %v1296_v16, %v1300_v18  ;;  %v505_v42 = vld [vmem:[%s11643_s16 + $0x218] sm:$0xff] }
 0x2e6   : > { %6754 = vmatprep.subr.bf16.mxu0 %v10456_v29  ;;  %v10520_v29 = vcombine.high %v1288_v24, %v1292_v10  ;;  %v1280_v31 = vld [vmem:[%s11643_s16 + $0x1a50] sm:$0xff]  ;;  %v509_v43 = vld [vmem:[%s11643_s16 + $0x238] sm:$0xff] }
 0x2e7   : > { %v1284_v32 = vld [vmem:[%s11643_s16 + $0x1a70] sm:$0xff]  ;;  %v625_v50 = vld [vmem:[%s11643_s16 + $0x5d8] sm:$0xff] }
 0x2e8   : > { %6796 = vmatpush1.bf16.msra.mxu1 %v9697_v28  ;;  %v9761_v28 = vcombine.low %v529_v45, %v533_v19  ;;  %v1272_v40 = vld [vmem:[%s11643_s16 + $0x1a10] sm:$0xff]  ;;  %v629_v52 = vld [vmem:[%s11643_s16 + $0x5f8] sm:$0xff] }
 0x2e9   : > { %6797 = vmatprep.subr.bf16.mxu1 %v9690_v30  ;;  %6755 = vmatpush1.bf16.msra.mxu0 %v10455_v35  ;;  %v9754_v30 = vcombine.high %v521_v25, %v525_v26  ;;  %v10519_v35 = vcombine.low %v1288_v24, %v1292_v10  ;;  %v1276_v41 = vld [vmem:[%s11643_s16 + $0x1a30] sm:$0xff]  ;;  %v753_v53 = vld [vmem:[%s11643_s16 + $0x9d8] sm:$0xff] }
 0x2ea   : > { %6756 = vmatprep.subr.bf16.mxu0 %v10448_v38  ;;  %v10512_v38 = vcombine.high %v1280_v31, %v1284_v32  ;;  %v757_v54 = vld [vmem:[%s11643_s16 + $0x9f8] sm:$0xff] }
 0x2eb   : > { %v617_v36 = vld [vmem:[%s11643_s16 + $0x598] sm:$0xff] }
 0x2ec   : > { %6798 = vmatpush1.bf16.msra.mxu1 %v9689_v37  ;;  %v9753_v37 = vcombine.low %v521_v25, %v525_v26  ;;  %v621_v51 = vld [vmem:[%s11643_s16 + $0x5b8] sm:$0xff] }
 0x2ed   : > { %6799 = vmatprep.subr.bf16.mxu1 %v9682_v39  ;;  %6757 = vmatpush1.bf16.msra.mxu0 %v10447_v44  ;;  %v9746_v39 = vcombine.high %v513_v33, %v517_v34  ;;  %v10511_v44 = vcombine.low %v1280_v31, %v1284_v32  ;;  %v745_v62 = vld [vmem:[%s11643_s16 + $0x998] sm:$0xff] }
 0x2ee   : > { %6758 = vmatprep.subr.bf16.mxu0 %v10440_v47  ;;  %v10504_v47 = vcombine.high %v1272_v40, %v1276_v41  ;;  %v749_v63 = vld [vmem:[%s11643_s16 + $0x9b8] sm:$0xff] }
 0x2ef   : > { %v609_v4 = vld [vmem:[%s11643_s16 + $0x558] sm:$0xff] }
 0x2f0   : > { %6800 = vmatpush1.bf16.msra.mxu1 %v9681_v46  ;;  %v9745_v46 = vcombine.low %v513_v33, %v517_v34  ;;  %v613_v5 = vld [vmem:[%s11643_s16 + $0x578] sm:$0xff] }
 0x2f1   : > { %6801 = vmatprep.subr.bf16.mxu1 %v9674_v49  ;;  %6759 = vmatpush1.bf16.msra.mxu0 %v10439_v56  ;;  %v9738_v49 = vcombine.high %v505_v42, %v509_v43  ;;  %v10503_v56 = vcombine.low %v1272_v40, %v1276_v41  ;;  %v11011_v6 = vld [vmem:[%s11641_s30 + $0x30] ss:$56 sps:$4 sm:$0xff]   ;;  %v9842_v11 = vcombine.high %v609_v4, %v613_v5 }
 0x2f2   : > { %6760 = vmatprep.subr.bf16.mxu0 %v10560_v58  ;;  %v9858_v58 = vcombine.high %v625_v50, %v629_v52  ;;  %v737_v8 = vld [vmem:[%s11643_s16 + $0x958] sm:$0xff]  ;;  %v9841_v16 = vcombine.low %v609_v4, %v613_v5 }
 0x2f3   : > { %v601_v59 = vld [vmem:[%s11643_s16 + $0x518] sm:$0xff] }
 0x2f4   : > { %6802 = vmatpush1.bf16.msra.mxu1 %v9673_v57  ;;  %v9737_v57 = vcombine.low %v505_v42, %v509_v43  ;;  %v605_v13 = vld [vmem:[%s11643_s16 + $0x538] sm:$0xff] }
 0x2f5   : > { %6803 = vmatprep.subr.bf16.mxu1 %v9794_v60  ;;  %6761 = vmatpush2.bf16.msra.mxu0 %v10559_v0  ;;  %v9986_v60 = vcombine.high %v753_v53, %v757_v54  ;;  %v9857_v0 = vcombine.low %v625_v50, %v629_v52  ;;  %v9834_v45 = vcombine.high %v601_v59, %v605_v13 }
 0x2f6   : > { %6762 = vmatprep.subr.bf16.mxu0 %v10552_v3  ;;  %v9850_v3 = vcombine.high %v617_v36, %v621_v51  ;;  %v9833_v24 = vcombine.low %v601_v59, %v605_v13 }
 0x2f8   : > { %6804 = vmatpush2.bf16.msra.mxu1 %v9793_v2  ;;  %v9985_v2 = vcombine.low %v753_v53, %v757_v54 }
 0x2f9   : > { %6805 = vmatprep.subr.bf16.mxu1 %v9786_v61  ;;  %6763 = vmatpush2.bf16.msra.mxu0 %v10551_v9  ;;  %v9978_v61 = vcombine.high %v745_v62, %v749_v63  ;;  %v741_v9 = vld [vmem:[%s11643_s16 + $0x978] sm:$0xff] }
 0x2fa   : > { %6764 = vmatprep.subr.bf16.mxu0 %v10544_v7  ;;  %v9849_v7 = vcombine.low %v617_v36, %v621_v51  ;;  %v9970_v12 = vcombine.high %v737_v8, %v741_v9  ;;  %v9969_v18 = vcombine.low %v737_v8, %v741_v9  ;;  %v673_v9 = vld [vmem:[%s11643_s16 + $0x758] sm:$0xff] }
 0x2fc   : > { %6806 = vmatpush2.bf16.msra.mxu1 %v9785_v55  ;;  %v11012_v55 = vld [vmem:[%s11641_s30] ss:$56 sps:$4 sm:$0xff]  }
 0x2fd   : > { %6807 = vmatprep.subr.bf16.mxu1 %v9778_v48  ;;  %6765 = vmatpush2.bf16.msra.mxu0 %v10543_v14  ;;  %v9977_v48 = vcombine.low %v745_v62, %v749_v63  ;;  %v11013_v14 = vld [vmem:[%s11641_s30 + $0xc] ss:$56 sps:$4 sm:$0xff]  }
 0x2fe   : > { %6766 = vmatprep.subr.bf16.mxu0 %v10536_v1  ;;  %v733_v1 = vld [vmem:[%s11643_s16 + $0x938] sm:$0xff] }
 0x300   : > { %6808 = vmatpush2.bf16.msra.mxu1 %v9777_v15  ;;  %v729_v15 = vld [vmem:[%s11643_s16 + $0x918] sm:$0xff] }
 0x301   : > { %6809 = vmatprep.subr.bf16.mxu1 %v9770_v17  ;;  %6767 = vmatpush2.bf16.msra.mxu0 %v10535_v20  ;;  %v11014_v17 = vld [vmem:[%s11641_s30 + $0x14] ss:$56 sps:$4 sm:$0xff]   ;;  %v9962_v19 = vcombine.high %v729_v15, %v733_v1  ;;  %v9961_v10 = vcombine.low %v729_v15, %v733_v1 }
 0x302   : > { %6768 = vmatprep.subr.bf16.mxu0 %v10528_v22  ;;  %v593_v20 = vld [vmem:[%s11643_s16 + $0x4d8] sm:$0xff] }
 0x303   : > { %v721_v22 = vld [vmem:[%s11643_s16 + $0x8d8] sm:$0xff] }
 0x304   : > { %6810 = vmatpush2.bf16.msra.mxu1 %v9769_v21  ;;  %v597_v21 = vld [vmem:[%s11643_s16 + $0x4f8] sm:$0xff] }
 0x305   : > { %6811 = vmatprep.subr.bf16.mxu1 %v9762_v23  ;;  %6769 = vmatpush2.bf16.msra.mxu0 %v10527_v27  ;;  %v725_v23 = vld [vmem:[%s11643_s16 + $0x8f8] sm:$0xff]  ;;  %v9826_v25 = vcombine.high %v593_v20, %v597_v21  ;;  %v9825_v31 = vcombine.low %v593_v20, %v597_v21 }
 0x306   : > { %6770 = vmatprep.subr.bf16.mxu0 %v10520_v29  ;;  %v9954_v26 = vcombine.high %v721_v22, %v725_v23  ;;  %v585_v27 = vld [vmem:[%s11643_s16 + $0x498] sm:$0xff]  ;;  %v9953_v32 = vcombine.low %v721_v22, %v725_v23 }
 0x307   : > { %v713_v29 = vld [vmem:[%s11643_s16 + $0x898] sm:$0xff] }
 0x308   : > { %6812 = vmatpush2.bf16.msra.mxu1 %v9761_v28  ;;  %v589_v28 = vld [vmem:[%s11643_s16 + $0x4b8] sm:$0xff] }
 0x309   : > { %6813 = vmatprep.subr.bf16.mxu1 %v9754_v30  ;;  %6771 = vmatpush2.bf16.msra.mxu0 %v10519_v35  ;;  %v717_v30 = vld [vmem:[%s11643_s16 + $0x8b8] sm:$0xff]  ;;  %v9818_v33 = vcombine.high %v585_v27, %v589_v28  ;;  %v9817_v40 = vcombine.low %v585_v27, %v589_v28 }
 0x30a   : > { %6772 = vmatprep.subr.bf16.mxu0 %v10512_v38  ;;  %v9946_v34 = vcombine.high %v713_v29, %v717_v30  ;;  %v577_v35 = vld [vmem:[%s11643_s16 + $0x458] sm:$0xff]  ;;  %v9945_v41 = vcombine.low %v713_v29, %v717_v30 }
 0x30b   : > { %v705_v38 = vld [vmem:[%s11643_s16 + $0x858] sm:$0xff] }
 0x30c   : > { %6814 = vmatpush2.bf16.msra.mxu1 %v9753_v37  ;;  %v581_v37 = vld [vmem:[%s11643_s16 + $0x478] sm:$0xff] }
 0x30d   : > { %6815 = vmatprep.subr.bf16.mxu1 %v9746_v39  ;;  %6773 = vmatpush2.bf16.msra.mxu0 %v10511_v44  ;;  %v709_v39 = vld [vmem:[%s11643_s16 + $0x878] sm:$0xff]  ;;  %v9810_v42 = vcombine.high %v577_v35, %v581_v37  ;;  %v9809_v50 = vcombine.low %v577_v35, %v581_v37 }
 0x30e   : > { %6774 = vmatprep.subr.bf16.mxu0 %v10504_v47  ;;  %v9938_v43 = vcombine.high %v705_v38, %v709_v39  ;;  %v569_v44 = vld [vmem:[%s11643_s16 + $0x418] sm:$0xff]  ;;  %v9937_v52 = vcombine.low %v705_v38, %v709_v39 }
 0x30f   : > { %v697_v47 = vld [vmem:[%s11643_s16 + $0x818] sm:$0xff] }
 0x310   : > { %6816 = vmatpush2.bf16.msra.mxu1 %v9745_v46  ;;  %v573_v46 = vld [vmem:[%s11643_s16 + $0x438] sm:$0xff] }
 0x311   : > { %6817 = vmatprep.subr.bf16.mxu1 %v9738_v49  ;;  %6775 = vmatpush2.bf16.msra.mxu0 %v10503_v56  ;;  %v701_v49 = vld [vmem:[%s11643_s16 + $0x838] sm:$0xff]  ;;  %v9802_v53 = vcombine.high %v569_v44, %v573_v46  ;;  %v9801_v36 = vcombine.low %v569_v44, %v573_v46 }
 0x312   : > { %6830 = vmatprep.subr.bf16.mxu0 %v9858_v58  ;;  %v9930_v54 = vcombine.high %v697_v47, %v701_v49  ;;  %v689_v56 = vld [vmem:[%s11643_s16 + $0x7d8] sm:$0xff]  ;;  %v9929_v51 = vcombine.low %v697_v47, %v701_v49 }
 0x313   : > { %v817_v58 = vld [vmem:[%s11643_s16 + $0xbd8] sm:$0xff] }
 0x314   : > { %6818 = vmatpush2.bf16.msra.mxu1 %v9737_v57  ;;  %6777 = vmatmul.mubr.bf16.vlgmr.msra.gmra.mxu0 %v11011_v6  ;;  %v693_v57 = vld [vmem:[%s11643_s16 + $0x7f8] sm:$0xff] }
 0x315   : > { %6873 = vmatprep.subr.bf16.mxu1 %v9986_v60  ;;  %6831 = vmatpush1.bf16.msra.mxu0 %v9857_v0  ;;  %v821_v60 = vld [vmem:[%s11643_s16 + $0xbf8] sm:$0xff]  ;;  %v9922_v62 = vcombine.high %v689_v56, %v693_v57  ;;  %v9921_v4 = vcombine.low %v689_v56, %v693_v57 }
 0x316   : > { %6832 = vmatprep.subr.bf16.mxu0 %v9850_v3  ;;  %6862 = vmatprep.mubr.bf16.mxu0 %v11013_v14  ;;  %v10050_v63 = vcombine.high %v817_v58, %v821_v60  ;;  %v681_v0 = vld [vmem:[%s11643_s16 + $0x798] sm:$0xff]  ;;  %v10049_v5 = vcombine.low %v817_v58, %v821_v60 }
 0x317   : > { %6820 = vmatmul.mubr.bf16.vlgmr.msra.gmra.mxu1 %v11012_v55  ;;  %v809_v3 = vld [vmem:[%s11643_s16 + $0xb98] sm:$0xff] }
 0x318   : > { %6874 = vmatpush1.bf16.msra.mxu1 %v9985_v2  ;;  %6905 = vmatprep.mubr.bf16.mxu1 %v11014_v17  ;;  %v685_v2 = vld [vmem:[%s11643_s16 + $0x7b8] sm:$0xff] }
 0x319   : > { %6875 = vmatprep.subr.bf16.mxu1 %v9978_v61  ;;  %6833 = vmatpush1.bf16.msra.mxu0 %v9849_v7  ;;  %v813_v61 = vld [vmem:[%s11643_s16 + $0xbb8] sm:$0xff]  ;;  %v9914_v6 = vcombine.high %v681_v0, %v685_v2 }
 0x31a   : > { %6834 = vmatprep.subr.bf16.mxu0 %v9842_v11  ;;  %v10042_v8 = vcombine.high %v809_v3, %v813_v61  ;;  %v677_v55 = vld [vmem:[%s11643_s16 + $0x778] sm:$0xff]  ;;  %v9913_v11 = vcombine.low %v681_v0, %v685_v2 }
 0x31b   : > { %v801_v7 = vld [vmem:[%s11643_s16 + $0xb58] sm:$0xff]  ;;  %v9906_v59 = vcombine.high %v673_v9, %v677_v55 }
 0x31c   : > { %6876 = vmatpush1.bf16.msra.mxu1 %v9977_v48  ;;  %v805_v48 = vld [vmem:[%s11643_s16 + $0xb78] sm:$0xff] }
 0x31d   : > { %6877 = vmatprep.subr.bf16.mxu1 %v9970_v12  ;;  %6835 = vmatpush1.bf16.msra.mxu0 %v9841_v16  ;;  %v10041_v12 = vcombine.low %v809_v3, %v813_v61  ;;  %v10034_v13 = vcombine.high %v801_v7, %v805_v48  ;;  %v665_v14 = vld [vmem:[%s11643_s16 + $0x718] sm:$0xff]  ;;  %v9905_v16 = vcombine.low %v673_v9, %v677_v55 }
 0x31e   : > { %6836 = vmatprep.subr.bf16.mxu0 %v9834_v45  ;;  %v669_v15 = vld [vmem:[%s11643_s16 + $0x738] sm:$0xff] }
 0x31f   : > { %v793_v1 = vld [vmem:[%s11643_s16 + $0xb18] sm:$0xff]  ;;  %v9898_v45 = vcombine.high %v665_v14, %v669_v15 }
 0x320   : > { %6878 = vmatpush1.bf16.msra.mxu1 %v9969_v18  ;;  %v797_v17 = vld [vmem:[%s11643_s16 + $0xb38] sm:$0xff]  ;;  %v10033_v18 = vcombine.low %v801_v7, %v805_v48 }
 0x321   : > { %6879 = vmatprep.subr.bf16.mxu1 %v9962_v19  ;;  %6837 = vmatpush1.bf16.msra.mxu0 %v9833_v24  ;;  %v10026_v19 = vcombine.high %v793_v1, %v797_v17  ;;  %v657_v20 = vld [vmem:[%s11643_s16 + $0x6d8] sm:$0xff]  ;;  %v9897_v24 = vcombine.low %v665_v14, %v669_v15 }
 0x322   : > { %6838 = vmatprep.subr.bf16.mxu0 %v9826_v25  ;;  %v661_v21 = vld [vmem:[%s11643_s16 + $0x6f8] sm:$0xff] }
 0x323   : > { %v785_v22 = vld [vmem:[%s11643_s16 + $0xad8] sm:$0xff]  ;;  %v9890_v25 = vcombine.high %v657_v20, %v661_v21 }
 0x324   : > { %6880 = vmatpush1.bf16.msra.mxu1 %v9961_v10  ;;  %v789_v23 = vld [vmem:[%s11643_s16 + $0xaf8] sm:$0xff]  ;;  %v10025_v10 = vcombine.low %v793_v1, %v797_v17 }
 0x325   : > { %6881 = vmatprep.subr.bf16.mxu1 %v9954_v26  ;;  %6839 = vmatpush1.bf16.msra.mxu0 %v9825_v31  ;;  %v10018_v26 = vcombine.high %v785_v22, %v789_v23  ;;  %v649_v27 = vld [vmem:[%s11643_s16 + $0x698] sm:$0xff]  ;;  %v9889_v31 = vcombine.low %v657_v20, %v661_v21 }
 0x326   : > { %6840 = vmatprep.subr.bf16.mxu0 %v9818_v33  ;;  %v653_v28 = vld [vmem:[%s11643_s16 + $0x6b8] sm:$0xff] }
 0x327   : > { %v777_v29 = vld [vmem:[%s11643_s16 + $0xa98] sm:$0xff]  ;;  %v9882_v33 = vcombine.high %v649_v27, %v653_v28 }
 0x328   : > { %6882 = vmatpush1.bf16.msra.mxu1 %v9953_v32  ;;  %v781_v30 = vld [vmem:[%s11643_s16 + $0xab8] sm:$0xff]  ;;  %v10017_v32 = vcombine.low %v785_v22, %v789_v23 }
 0x329   : > { %6883 = vmatprep.subr.bf16.mxu1 %v9946_v34  ;;  %6841 = vmatpush1.bf16.msra.mxu0 %v9817_v40  ;;  %v10010_v34 = vcombine.high %v777_v29, %v781_v30  ;;  %v641_v35 = vld [vmem:[%s11643_s16 + $0x658] sm:$0xff]  ;;  %v9881_v40 = vcombine.low %v649_v27, %v653_v28 }
 0x32a   : > { %6842 = vmatprep.subr.bf16.mxu0 %v9810_v42  ;;  %v645_v37 = vld [vmem:[%s11643_s16 + $0x678] sm:$0xff] }
 0x32b   : > { %v769_v38 = vld [vmem:[%s11643_s16 + $0xa58] sm:$0xff]  ;;  %v9874_v42 = vcombine.high %v641_v35, %v645_v37 }
 0x32c   : > { %6884 = vmatpush1.bf16.msra.mxu1 %v9945_v41  ;;  %v773_v39 = vld [vmem:[%s11643_s16 + $0xa78] sm:$0xff]  ;;  %v10009_v41 = vcombine.low %v777_v29, %v781_v30 }
 0x32d   : > { %6885 = vmatprep.subr.bf16.mxu1 %v9938_v43  ;;  %6843 = vmatpush1.bf16.msra.mxu0 %v9809_v50  ;;  %v10002_v43 = vcombine.high %v769_v38, %v773_v39  ;;  %v633_v44 = vld [vmem:[%s11643_s16 + $0x618] sm:$0xff]  ;;  %v9873_v50 = vcombine.low %v641_v35, %v645_v37 }
 0x32e   : > { %6844 = vmatprep.subr.bf16.mxu0 %v9802_v53  ;;  %v637_v46 = vld [vmem:[%s11643_s16 + $0x638] sm:$0xff] }
 0x32f   : > { %v761_v47 = vld [vmem:[%s11643_s16 + $0xa18] sm:$0xff]  ;;  %v9866_v53 = vcombine.high %v633_v44, %v637_v46 }
 0x330   : > { %6886 = vmatpush1.bf16.msra.mxu1 %v9937_v52  ;;  %v765_v49 = vld [vmem:[%s11643_s16 + $0xa38] sm:$0xff]  ;;  %v10001_v52 = vcombine.low %v769_v38, %v773_v39 }
 0x331   : > { %6887 = vmatprep.subr.bf16.mxu1 %v9930_v54  ;;  %6845 = vmatpush1.bf16.msra.mxu0 %v9801_v36  ;;  %v9994_v54 = vcombine.high %v761_v47, %v765_v49  ;;  %v881_v56 = vld [vmem:[%s11643_s16 + $0xdd8] sm:$0xff]  ;;  %v9865_v36 = vcombine.low %v633_v44, %v637_v46 }
 0x332   : > { %6846 = vmatprep.subr.bf16.mxu0 %v9922_v62  ;;  %v885_v57 = vld [vmem:[%s11643_s16 + $0xdf8] sm:$0xff] }
 0x333   : > { %v1009_v58 = vld [vmem:[%s11643_s16 + $0x11d8] sm:$0xff]  ;;  %v10114_v62 = vcombine.high %v881_v56, %v885_v57 }
 0x334   : > { %6888 = vmatpush1.bf16.msra.mxu1 %v9929_v51  ;;  %v1013_v60 = vld [vmem:[%s11643_s16 + $0x11f8] sm:$0xff]  ;;  %v9993_v51 = vcombine.low %v761_v47, %v765_v49 }
 0x335   : > { %6889 = vmatprep.subr.bf16.mxu1 %v10050_v63  ;;  %6847 = vmatpush2.bf16.msra.mxu0 %v9921_v4  ;;  %v10242_v63 = vcombine.high %v1009_v58, %v1013_v60  ;;  %v873_v0 = vld [vmem:[%s11643_s16 + $0xd98] sm:$0xff]  ;;  %v10113_v4 = vcombine.low %v881_v56, %v885_v57 }
 0x336   : > { %6848 = vmatprep.subr.bf16.mxu0 %v9914_v6  ;;  %v877_v2 = vld [vmem:[%s11643_s16 + $0xdb8] sm:$0xff] }
 0x337   : > { %v1001_v3 = vld [vmem:[%s11643_s16 + $0x1198] sm:$0xff]  ;;  %v10106_v6 = vcombine.high %v873_v0, %v877_v2 }
 0x338   : > { %6890 = vmatpush2.bf16.msra.mxu1 %v10049_v5  ;;  %v1005_v61 = vld [vmem:[%s11643_s16 + $0x11b8] sm:$0xff]  ;;  %v10241_v5 = vcombine.low %v1009_v58, %v1013_v60 }
 0x339   : > { %6891 = vmatprep.subr.bf16.mxu1 %v10042_v8  ;;  %6849 = vmatpush2.bf16.msra.mxu0 %v9913_v11  ;;  %v10234_v8 = vcombine.high %v1001_v3, %v1005_v61  ;;  %v865_v9 = vld [vmem:[%s11643_s16 + $0xd58] sm:$0xff] }
 0x33a   : > { %6850 = vmatprep.subr.bf16.mxu0 %v9906_v59  ;;  %v869_v55 = vld [vmem:[%s11643_s16 + $0xd78] sm:$0xff]  ;;  %v10105_v59 = vcombine.low %v873_v0, %v877_v2 }
 0x33b   : > { %v11015_v7 = vld [vmem:[%s11641_s30 + $0x8] ss:$56 sps:$4 sm:$0xff]   ;;  %v10098_v14 = vcombine.high %v865_v9, %v869_v55  ;;  %v10097_v20 = vcombine.low %v865_v9, %v869_v55 }
 0x33c   : > { %6892 = vmatpush2.bf16.msra.mxu1 %v10041_v12  ;;  %v993_v48 = vld [vmem:[%s11643_s16 + $0x1158] sm:$0xff] }
 0x33d   : > { %6893 = vmatprep.subr.bf16.mxu1 %v10034_v13  ;;  %6851 = vmatpush2.bf16.msra.mxu0 %v9905_v16  ;;  %v997_v11 = vld [vmem:[%s11643_s16 + $0x1178] sm:$0xff]  ;;  %v10233_v13 = vcombine.low %v1001_v3, %v1005_v61 }
 0x33e   : > { %6852 = vmatprep.subr.bf16.mxu0 %v9898_v45  ;;  %v11016_v12 = vld [vmem:[%s11641_s30 + $0x10] ss:$56 sps:$4 sm:$0xff]   ;;  %v10226_v15 = vcombine.high %v993_v48, %v997_v11  ;;  %v11017_v16 = vld [vmem:[%s11641_s30 + $0x1c] ss:$56 sps:$4 sm:$0xff]   ;;  %v10225_v21 = vcombine.low %v993_v48, %v997_v11 }
 0x33f   : > { %v857_v1 = vld [vmem:[%s11643_s16 + $0xd18] sm:$0xff] }
 0x340   : > { %6894 = vmatpush2.bf16.msra.mxu1 %v10033_v18  ;;  %v861_v17 = vld [vmem:[%s11643_s16 + $0xd38] sm:$0xff] }
 0x341   : > { %6895 = vmatprep.subr.bf16.mxu1 %v10026_v19  ;;  %6853 = vmatpush2.bf16.msra.mxu0 %v9897_v24  ;;  %v985_v18 = vld [vmem:[%s11643_s16 + $0x1118] sm:$0xff]  ;;  %v10090_v22 = vcombine.high %v857_v1, %v861_v17  ;;  %v10089_v27 = vcombine.low %v857_v1, %v861_v17 }
 0x342   : > { %6854 = vmatprep.subr.bf16.mxu0 %v9890_v25  ;;  %v989_v45 = vld [vmem:[%s11643_s16 + $0x1138] sm:$0xff] }
 0x343   : > { %v11018_v19 = vld [vmem:[%s11641_s30 + $0x24] ss:$56 sps:$4 sm:$0xff]   ;;  %v10218_v23 = vcombine.high %v985_v18, %v989_v45  ;;  %v10217_v28 = vcombine.low %v985_v18, %v989_v45 }
 0x344   : > { %6896 = vmatpush2.bf16.msra.mxu1 %v10025_v10  ;;  %v849_v24 = vld [vmem:[%s11643_s16 + $0xcd8] sm:$0xff] }
 0x345   : > { %6897 = vmatprep.subr.bf16.mxu1 %v10018_v26  ;;  %6855 = vmatpush2.bf16.msra.mxu0 %v9889_v31  ;;  %v853_v10 = vld [vmem:[%s11643_s16 + $0xcf8] sm:$0xff] }
 0x346   : > { %6856 = vmatprep.subr.bf16.mxu0 %v9882_v33  ;;  %v977_v25 = vld [vmem:[%s11643_s16 + $0x10d8] sm:$0xff]  ;;  %v10082_v29 = vcombine.high %v849_v24, %v853_v10  ;;  %v10081_v35 = vcombine.low %v849_v24, %v853_v10 }
 0x347   : > { %v981_v26 = vld [vmem:[%s11643_s16 + $0x10f8] sm:$0xff] }
 0x348   : > { %6898 = vmatpush2.bf16.msra.mxu1 %v10017_v32  ;;  %v10210_v30 = vcombine.high %v977_v25, %v981_v26  ;;  %v841_v31 = vld [vmem:[%s11643_s16 + $0xc98] sm:$0xff]  ;;  %v10209_v37 = vcombine.low %v977_v25, %v981_v26 }
 0x349   : > { %6899 = vmatprep.subr.bf16.mxu1 %v10010_v34  ;;  %6857 = vmatpush2.bf16.msra.mxu0 %v9881_v40  ;;  %v845_v32 = vld [vmem:[%s11643_s16 + $0xcb8] sm:$0xff] }
 0x34a   : > { %6858 = vmatprep.subr.bf16.mxu0 %v9874_v42  ;;  %v969_v33 = vld [vmem:[%s11643_s16 + $0x1098] sm:$0xff]  ;;  %v10074_v38 = vcombine.high %v841_v31, %v845_v32  ;;  %v10073_v44 = vcombine.low %v841_v31, %v845_v32 }
 0x34b   : > { %v973_v34 = vld [vmem:[%s11643_s16 + $0x10b8] sm:$0xff] }
 0x34c   : > { %6900 = vmatpush2.bf16.msra.mxu1 %v10009_v41  ;;  %v10202_v39 = vcombine.high %v969_v33, %v973_v34  ;;  %v833_v40 = vld [vmem:[%s11643_s16 + $0xc58] sm:$0xff]  ;;  %v10201_v46 = vcombine.low %v969_v33, %v973_v34 }
 0x34d   : > { %6901 = vmatprep.subr.bf16.mxu1 %v10002_v43  ;;  %6859 = vmatpush2.bf16.msra.mxu0 %v9873_v50  ;;  %v837_v41 = vld [vmem:[%s11643_s16 + $0xc78] sm:$0xff] }
 0x34e   : > { %6860 = vmatprep.subr.bf16.mxu0 %v9866_v53  ;;  %v961_v42 = vld [vmem:[%s11643_s16 + $0x1058] sm:$0xff]  ;;  %v10066_v47 = vcombine.high %v833_v40, %v837_v41  ;;  %v10065_v56 = vcombine.low %v833_v40, %v837_v41 }
 0x34f   : > { %v965_v43 = vld [vmem:[%s11643_s16 + $0x1078] sm:$0xff] }
 0x350   : > { %6902 = vmatpush2.bf16.msra.mxu1 %v10001_v52  ;;  %v10194_v49 = vcombine.high %v961_v42, %v965_v43  ;;  %v825_v50 = vld [vmem:[%s11643_s16 + $0xc18] sm:$0xff]  ;;  %v10193_v57 = vcombine.low %v961_v42, %v965_v43 }
 0x351   : > { %6903 = vmatprep.subr.bf16.mxu1 %v9994_v54  ;;  %6861 = vmatpush2.bf16.msra.mxu0 %v9865_v36  ;;  %v829_v52 = vld [vmem:[%s11643_s16 + $0xc38] sm:$0xff] }
 0x352   : > { %6916 = vmatprep.subr.bf16.mxu0 %v10114_v62  ;;  %v953_v53 = vld [vmem:[%s11643_s16 + $0x1018] sm:$0xff]  ;;  %v10058_v58 = vcombine.high %v825_v50, %v829_v52  ;;  %v10057_v0 = vcombine.low %v825_v50, %v829_v52 }
 0x353   : > { %v957_v54 = vld [vmem:[%s11643_s16 + $0x1038] sm:$0xff] }
 0x354   : > { %6904 = vmatpush2.bf16.msra.mxu1 %v9993_v51  ;;  %6863 = vmatmul.mubr.bf16.vlgmr.msra.gmra.mxu0 %v11015_v7  ;;  %v10186_v60 = vcombine.high %v953_v53, %v957_v54  ;;  %v945_v36 = vld [vmem:[%s11643_s16 + $0xfd8] sm:$0xff]  ;;  %v10185_v2 = vcombine.low %v953_v53, %v957_v54 }
 0x355   : > { %6959 = vmatprep.subr.bf16.mxu1 %v10242_v63  ;;  %6917 = vmatpush1.bf16.msra.mxu0 %v10113_v4  ;;  %v949_v51 = vld [vmem:[%s11643_s16 + $0xff8] sm:$0xff] }
 0x356   : > { %6918 = vmatprep.subr.bf16.mxu0 %v10106_v6  ;;  %6948 = vmatprep.mubr.bf16.mxu0 %v11017_v16  ;;  %v1073_v62 = vld [vmem:[%s11643_s16 + $0x13d8] sm:$0xff]  ;;  %v10178_v3 = vcombine.high %v945_v36, %v949_v51  ;;  %v10177_v9 = vcombine.low %v945_v36, %v949_v51 }
 0x357   : > { %6906 = vmatmul.mubr.bf16.vlgmr.msra.gmra.mxu1 %v11016_v12  ;;  %v1077_v63 = vld [vmem:[%s11643_s16 + $0x13f8] sm:$0xff] }
 0x358   : > { %6960 = vmatpush1.bf16.msra.mxu1 %v10241_v5  ;;  %6991 = vmatprep.mubr.bf16.mxu1 %v11018_v19  ;;  %v10306_v61 = vcombine.high %v1073_v62, %v1077_v63  ;;  %v937_v4 = vld [vmem:[%s11643_s16 + $0xf98] sm:$0xff]  ;;  %v10305_v55 = vcombine.low %v1073_v62, %v1077_v63 }
 0x359   : > { %6961 = vmatprep.subr.bf16.mxu1 %v10234_v8  ;;  %6919 = vmatpush1.bf16.msra.mxu0 %v10105_v59  ;;  %v941_v5 = vld [vmem:[%s11643_s16 + $0xfb8] sm:$0xff] }
 0x35a   : > { %6920 = vmatprep.subr.bf16.mxu0 %v10098_v14  ;;  %v1065_v6 = vld [vmem:[%s11643_s16 + $0x1398] sm:$0xff]  ;;  %v10170_v7 = vcombine.high %v937_v4, %v941_v5  ;;  %v10169_v14 = vcombine.low %v937_v4, %v941_v5 }
 0x35b   : > { %v1069_v8 = vld [vmem:[%s11643_s16 + $0x13b8] sm:$0xff] }
 0x35c   : > { %6962 = vmatpush1.bf16.msra.mxu1 %v10233_v13  ;;  %v10298_v48 = vcombine.high %v1065_v6, %v1069_v8  ;;  %v929_v11 = vld [vmem:[%s11643_s16 + $0xf58] sm:$0xff] }
 0x35d   : > { %6963 = vmatprep.subr.bf16.mxu1 %v10226_v15  ;;  %6921 = vmatpush1.bf16.msra.mxu0 %v10097_v20  ;;  %v933_v12 = vld [vmem:[%s11643_s16 + $0xf78] sm:$0xff]  ;;  %v10297_v15 = vcombine.low %v1065_v6, %v1069_v8 }
 0x35e   : > { %6922 = vmatprep.subr.bf16.mxu0 %v10090_v22  ;;  %v1057_v59 = vld [vmem:[%s11643_s16 + $0x1358] sm:$0xff]  ;;  %v10162_v1 = vcombine.high %v929_v11, %v933_v12  ;;  %v10161_v20 = vcombine.low %v929_v11, %v933_v12 }
 0x35f   : > { %v1061_v13 = vld [vmem:[%s11643_s16 + $0x1378] sm:$0xff] }
 0x360   : > { %6964 = vmatpush1.bf16.msra.mxu1 %v10225_v21  ;;  %v10290_v17 = vcombine.high %v1057_v59, %v1061_v13  ;;  %v921_v16 = vld [vmem:[%s11643_s16 + $0xf18] sm:$0xff]  ;;  %v10289_v21 = vcombine.low %v1057_v59, %v1061_v13 }
 0x361   : > { %6965 = vmatprep.subr.bf16.mxu1 %v10218_v23  ;;  %6923 = vmatpush1.bf16.msra.mxu0 %v10089_v27  ;;  %v925_v18 = vld [vmem:[%s11643_s16 + $0xf38] sm:$0xff] }
 0x362   : > { %6924 = vmatprep.subr.bf16.mxu0 %v10082_v29  ;;  %v1049_v45 = vld [vmem:[%s11643_s16 + $0x1318] sm:$0xff]  ;;  %v10154_v22 = vcombine.high %v921_v16, %v925_v18  ;;  %v10153_v27 = vcombine.low %v921_v16, %v925_v18 }
 0x363   : > { %v1053_v19 = vld [vmem:[%s11643_s16 + $0x1338] sm:$0xff] }
 0x364   : > { %6966 = vmatpush1.bf16.msra.mxu1 %v10217_v28  ;;  %v10282_v23 = vcombine.high %v1049_v45, %v1053_v19  ;;  %v913_v24 = vld [vmem:[%s11643_s16 + $0xed8] sm:$0xff]  ;;  %v10281_v28 = vcombine.low %v1049_v45, %v1053_v19 }
 0x365   : > { %6967 = vmatprep.subr.bf16.mxu1 %v10210_v30  ;;  %6925 = vmatpush1.bf16.msra.mxu0 %v10081_v35  ;;  %v917_v10 = vld [vmem:[%s11643_s16 + $0xef8] sm:$0xff] }
 0x366   : > { %6926 = vmatprep.subr.bf16.mxu0 %v10074_v38  ;;  %v1041_v25 = vld [vmem:[%s11643_s16 + $0x12d8] sm:$0xff]  ;;  %v10146_v29 = vcombine.high %v913_v24, %v917_v10  ;;  %v10145_v35 = vcombine.low %v913_v24, %v917_v10 }
 0x367   : > { %v1045_v26 = vld [vmem:[%s11643_s16 + $0x12f8] sm:$0xff] }
 0x368   : > { %6968 = vmatpush1.bf16.msra.mxu1 %v10209_v37  ;;  %v10274_v30 = vcombine.high %v1041_v25, %v1045_v26  ;;  %v905_v31 = vld [vmem:[%s11643_s16 + $0xe98] sm:$0xff]  ;;  %v10273_v37 = vcombine.low %v1041_v25, %v1045_v26 }
 0x369   : > { %6969 = vmatprep.subr.bf16.mxu1 %v10202_v39  ;;  %6927 = vmatpush1.bf16.msra.mxu0 %v10073_v44  ;;  %v909_v32 = vld [vmem:[%s11643_s16 + $0xeb8] sm:$0xff] }
 0x36a   : > { %6928 = vmatprep.subr.bf16.mxu0 %v10066_v47  ;;  %v1033_v33 = vld [vmem:[%s11643_s16 + $0x1298] sm:$0xff]  ;;  %v10138_v38 = vcombine.high %v905_v31, %v909_v32  ;;  %v10137_v44 = vcombine.low %v905_v31, %v909_v32 }
 0x36b   : > { %v1037_v34 = vld [vmem:[%s11643_s16 + $0x12b8] sm:$0xff] }
 0x36c   : > { %6970 = vmatpush1.bf16.msra.mxu1 %v10201_v46  ;;  %v10266_v39 = vcombine.high %v1033_v33, %v1037_v34  ;;  %v897_v40 = vld [vmem:[%s11643_s16 + $0xe58] sm:$0xff]  ;;  %v10265_v46 = vcombine.low %v1033_v33, %v1037_v34 }
 0x36d   : > { %6971 = vmatprep.subr.bf16.mxu1 %v10194_v49  ;;  %6929 = vmatpush1.bf16.msra.mxu0 %v10065_v56  ;;  %v901_v41 = vld [vmem:[%s11643_s16 + $0xe78] sm:$0xff] }
 0x36e   : > { %6930 = vmatprep.subr.bf16.mxu0 %v10058_v58  ;;  %v1025_v42 = vld [vmem:[%s11643_s16 + $0x1258] sm:$0xff]  ;;  %v10130_v47 = vcombine.high %v897_v40, %v901_v41  ;;  %v10129_v56 = vcombine.low %v897_v40, %v901_v41 }
 0x36f   : > { %v1029_v43 = vld [vmem:[%s11643_s16 + $0x1278] sm:$0xff] }
 0x370   : > { %6972 = vmatpush1.bf16.msra.mxu1 %v10193_v57  ;;  %v10258_v49 = vcombine.high %v1025_v42, %v1029_v43  ;;  %v889_v50 = vld [vmem:[%s11643_s16 + $0xe18] sm:$0xff]  ;;  %v10257_v57 = vcombine.low %v1025_v42, %v1029_v43 }
 0x371   : > { %6973 = vmatprep.subr.bf16.mxu1 %v10186_v60  ;;  %6931 = vmatpush1.bf16.msra.mxu0 %v10057_v0  ;;  %v893_v52 = vld [vmem:[%s11643_s16 + $0xe38] sm:$0xff] }
 0x372   : > { %6932 = vmatprep.subr.bf16.mxu0 %v10178_v3  ;;  %v1017_v53 = vld [vmem:[%s11643_s16 + $0x1218] sm:$0xff]  ;;  %v10122_v58 = vcombine.high %v889_v50, %v893_v52  ;;  %v10121_v0 = vcombine.low %v889_v50, %v893_v52 }
 0x373   : > { %v1021_v54 = vld [vmem:[%s11643_s16 + $0x1238] sm:$0xff] }
 0x374   : > { %6974 = vmatpush1.bf16.msra.mxu1 %v10185_v2  ;;  %v10250_v60 = vcombine.high %v1017_v53, %v1021_v54  ;;  %v1137_v36 = vld [vmem:[%s11643_s16 + $0x15d8] sm:$0xff]  ;;  %v10249_v2 = vcombine.low %v1017_v53, %v1021_v54 }
 0x375   : > { %6975 = vmatprep.subr.bf16.mxu1 %v10306_v61  ;;  %6933 = vmatpush2.bf16.msra.mxu0 %v10177_v9  ;;  %v1141_v51 = vld [vmem:[%s11643_s16 + $0x15f8] sm:$0xff] }
 0x376   : > { %6934 = vmatprep.subr.bf16.mxu0 %v10170_v7  ;;  %v1265_v62 = vld [vmem:[%s11643_s16 + $0x19d8] sm:$0xff]  ;;  %v10370_v3 = vcombine.high %v1137_v36, %v1141_v51  ;;  %v10369_v9 = vcombine.low %v1137_v36, %v1141_v51  ;;  %v12633_v51 = vpop.f32.mrf.mxu0 }
 0x377   : > { %v1269_v63 = vld [vmem:[%s11643_s16 + $0x19f8] sm:$0xff] }
 0x378   : > { %6976 = vmatpush2.bf16.msra.mxu1 %v10305_v55  ;;  %v10498_v61 = vcombine.high %v1265_v62, %v1269_v63  ;;  %v1129_v4 = vld [vmem:[%s11643_s16 + $0x1598] sm:$0xff]  ;;  %v10497_v55 = vcombine.low %v1265_v62, %v1269_v63 }
 0x379   : > { %6977 = vmatprep.subr.bf16.mxu1 %v10298_v48  ;;  %6935 = vmatpush2.bf16.msra.mxu0 %v10169_v14  ;;  %v1133_v5 = vld [vmem:[%s11643_s16 + $0x15b8] sm:$0xff] }
 0x37a   : > { %6936 = vmatprep.subr.bf16.mxu0 %v10162_v1  ;;  %v1257_v6 = vld [vmem:[%s11643_s16 + $0x1998] sm:$0xff]  ;;  %v10362_v7 = vcombine.high %v1129_v4, %v1133_v5  ;;  %v10361_v1 = vcombine.low %v1129_v4, %v1133_v5 }
 0x37b   : > { %v1261_v8 = vld [vmem:[%s11643_s16 + $0x19b8] sm:$0xff] }
 0x37c   : > { %6978 = vmatpush2.bf16.msra.mxu1 %v10297_v15  ;;  %v10490_v48 = vcombine.high %v1257_v6, %v1261_v8  ;;  %v1121_v11 = vld [vmem:[%s11643_s16 + $0x1558] sm:$0xff] }
 0x37d   : > { %6979 = vmatprep.subr.bf16.mxu1 %v10290_v17  ;;  %6937 = vmatpush2.bf16.msra.mxu0 %v10161_v20  ;;  %v1125_v12 = vld [vmem:[%s11643_s16 + $0x1578] sm:$0xff]  ;;  %v10489_v17 = vcombine.low %v1257_v6, %v1261_v8  ;;  %v12639_v6 = vpop.f32.mrf.mxu0 }
 0x37e   : > { %6938 = vmatprep.subr.bf16.mxu0 %v10154_v22  ;;  %v11019_v59 = vld [vmem:[%s11641_s30 + $0x18] ss:$56 sps:$4 sm:$0xff]   ;;  %v10354_v16 = vcombine.high %v1121_v11, %v1125_v12  ;;  %v11021_v20 = vld [vmem:[%s11641_s30 + $0x2c] ss:$56 sps:$4 sm:$0xff]   ;;  %v10353_v24 = vcombine.low %v1121_v11, %v1125_v12  ;;  %v12643_v11 = vpop.f32.mrf.mxu1 }
 0x37f   : > { %v1249_v13 = vld [vmem:[%s11643_s16 + $0x1958] sm:$0xff] }
 0x380   : > { %6980 = vmatpush2.bf16.msra.mxu1 %v10289_v21  ;;  %v1253_v14 = vld [vmem:[%s11643_s16 + $0x1978] sm:$0xff] }
 0x381   : > { %6981 = vmatprep.subr.bf16.mxu1 %v10282_v23  ;;  %6939 = vmatpush2.bf16.msra.mxu0 %v10153_v27  ;;  %v11020_v15 = vld [vmem:[%s11641_s30 + $0x20] ss:$56 sps:$4 sm:$0xff]   ;;  %v10482_v18 = vcombine.high %v1249_v13, %v1253_v14  ;;  %v11022_v23 = vld [vmem:[%s11641_s30 + $0x34] ss:$56 sps:$4 sm:$0xff]   ;;  %v10481_v10 = vcombine.low %v1249_v13, %v1253_v14  ;;  %v12647_v14 = vpop.f32.mrf.mxu0 }
 0x382   : > { %6940 = vmatprep.subr.bf16.mxu0 %v10146_v29  ;;  %v1113_v45 = vld [vmem:[%s11643_s16 + $0x1518] sm:$0xff] }
 0x383   : > { %v1117_v19 = vld [vmem:[%s11643_s16 + $0x1538] sm:$0xff] }
 0x384   : > { %6982 = vmatpush2.bf16.msra.mxu1 %v10281_v28  ;;  %v1241_v21 = vld [vmem:[%s11643_s16 + $0x1918] sm:$0xff]  ;;  %v10346_v25 = vcombine.high %v1113_v45, %v1117_v19  ;;  %v10345_v31 = vcombine.low %v1113_v45, %v1117_v19  ;;  %v12651_v45 = vpop.f32.mrf.mxu1 }
 0x385   : > { %6983 = vmatprep.subr.bf16.mxu1 %v10274_v30  ;;  %6941 = vmatpush2.bf16.msra.mxu0 %v10145_v35  ;;  %v1245_v22 = vld [vmem:[%s11643_s16 + $0x1938] sm:$0xff] }
 0x386   : > { %6942 = vmatprep.subr.bf16.mxu0 %v10138_v38  ;;  %v10474_v26 = vcombine.high %v1241_v21, %v1245_v22  ;;  %v1105_v27 = vld [vmem:[%s11643_s16 + $0x14d8] sm:$0xff]  ;;  %v10473_v32 = vcombine.low %v1241_v21, %v1245_v22  ;;  %v12655_v22 = vpop.f32.mrf.mxu0 }
 0x387   : > { %v1109_v28 = vld [vmem:[%s11643_s16 + $0x14f8] sm:$0xff] }
 0x388   : > { %6984 = vmatpush2.bf16.msra.mxu1 %v10273_v37  ;;  %v1233_v29 = vld [vmem:[%s11643_s16 + $0x18d8] sm:$0xff]  ;;  %v10338_v33 = vcombine.high %v1105_v27, %v1109_v28  ;;  %v10337_v40 = vcombine.low %v1105_v27, %v1109_v28  ;;  %v12659_v27 = vpop.f32.mrf.mxu1  ;;  %v6606_v28 = vpop.f32.mrf.mxu0 }
 0x389   : > { %6985 = vmatprep.subr.bf16.mxu1 %v10266_v39  ;;  %6943 = vmatpush2.bf16.msra.mxu0 %v10137_v44  ;;  %v1237_v30 = vld [vmem:[%s11643_s16 + $0x18f8] sm:$0xff] }
 0x38a   : > { %6944 = vmatprep.subr.bf16.mxu0 %v10130_v47  ;;  %v10466_v34 = vcombine.high %v1233_v29, %v1237_v30  ;;  %v1097_v35 = vld [vmem:[%s11643_s16 + $0x1498] sm:$0xff]  ;;  %v10465_v41 = vcombine.low %v1233_v29, %v1237_v30 }
 0x38b   : > { %v1101_v37 = vld [vmem:[%s11643_s16 + $0x14b8] sm:$0xff] }
 0x38c   : > { %6986 = vmatpush2.bf16.msra.mxu1 %v10265_v46  ;;  %v1225_v38 = vld [vmem:[%s11643_s16 + $0x1898] sm:$0xff]  ;;  %v10330_v42 = vcombine.high %v1097_v35, %v1101_v37  ;;  %v10329_v50 = vcombine.low %v1097_v35, %v1101_v37 }
 0x38d   : > { %6987 = vmatprep.subr.bf16.mxu1 %v10258_v49  ;;  %6945 = vmatpush2.bf16.msra.mxu0 %v10129_v56  ;;  %v1229_v39 = vld [vmem:[%s11643_s16 + $0x18b8] sm:$0xff] }
 0x38e   : > { %6946 = vmatprep.subr.bf16.mxu0 %v10122_v58  ;;  %v10458_v43 = vcombine.high %v1225_v38, %v1229_v39  ;;  %v1089_v44 = vld [vmem:[%s11643_s16 + $0x1458] sm:$0xff]  ;;  %v10457_v52 = vcombine.low %v1225_v38, %v1229_v39  ;;  %v6569_v38 = vpop.f32.mrf.mxu1  ;;  %v6608_v39 = vpop.f32.mrf.mxu0 }
 0x38f   : > { %v1093_v46 = vld [vmem:[%s11643_s16 + $0x1478] sm:$0xff] }
 0x390   : > { %6988 = vmatpush2.bf16.msra.mxu1 %v10257_v57  ;;  %v1217_v47 = vld [vmem:[%s11643_s16 + $0x1858] sm:$0xff]  ;;  %v10322_v53 = vcombine.high %v1089_v44, %v1093_v46  ;;  %v10321_v36 = vcombine.low %v1089_v44, %v1093_v46 }
 0x391   : > { %6989 = vmatprep.subr.bf16.mxu1 %v10250_v60  ;;  %6947 = vmatpush2.bf16.msra.mxu0 %v10121_v0  ;;  %v1221_v49 = vld [vmem:[%s11643_s16 + $0x1878] sm:$0xff] }
 0x392   : > { %7002 = vmatprep.subr.bf16.mxu0 %v10370_v3  ;;  %v10450_v54 = vcombine.high %v1217_v47, %v1221_v49  ;;  %v1081_v56 = vld [vmem:[%s11643_s16 + $0x1418] sm:$0xff]  ;;  %v10449_v62 = vcombine.low %v1217_v47, %v1221_v49 }
 0x393   : > { %v1085_v57 = vld [vmem:[%s11643_s16 + $0x1438] sm:$0xff] }
 0x394   : > { %6990 = vmatpush2.bf16.msra.mxu1 %v10249_v2  ;;  %6949 = vmatmul.mubr.bf16.vlgmr.msra.gmra.mxu0 %v11019_v59  ;;  %v1209_v58 = vld [vmem:[%s11643_s16 + $0x1818] sm:$0xff]  ;;  %v10314_v63 = vcombine.high %v1081_v56, %v1085_v57  ;;  %v10313_v5 = vcombine.low %v1081_v56, %v1085_v57 }
 0x395   : > { %7045 = vmatprep.subr.bf16.mxu1 %v10498_v61  ;;  %7003 = vmatpush1.bf16.msra.mxu0 %v10369_v9  ;;  %v1213_v60 = vld [vmem:[%s11643_s16 + $0x1838] sm:$0xff] }
 0x396   : > { %7004 = vmatprep.subr.bf16.mxu0 %v10362_v7  ;;  %7034 = vmatprep.mubr.bf16.mxu0 %v11021_v20  ;;  %v10442_v0 = vcombine.high %v1209_v58, %v1213_v60  ;;  %v1201_v2 = vld [vmem:[%s11643_s16 + $0x17d8] sm:$0xff]  ;;  %v10441_v8 = vcombine.low %v1209_v58, %v1213_v60 }
 0x397   : > { %6992 = vmatmul.mubr.bf16.vlgmr.msra.gmra.mxu1 %v11020_v15  ;;  %v1205_v3 = vld [vmem:[%s11643_s16 + $0x17f8] sm:$0xff] }
 0x398   : > { %7046 = vmatpush1.bf16.msra.mxu1 %v10497_v55  ;;  %7077 = vmatprep.mubr.bf16.mxu1 %v11022_v23  ;;  %v1329_v61 = vld [vmem:[%s11643_s16 + $0x1bd8] sm:$0xff]  ;;  %v10434_v9 = vcombine.high %v1201_v2, %v1205_v3  ;;  %v10433_v13 = vcombine.low %v1201_v2, %v1205_v3 }
 0x399   : > { %7047 = vmatprep.subr.bf16.mxu1 %v10490_v48  ;;  %7005 = vmatpush1.bf16.msra.mxu0 %v10361_v1  ;;  %v1333_v4 = vld [vmem:[%s11643_s16 + $0x1bf8] sm:$0xff] }
 0x39a   : > { %7006 = vmatprep.subr.bf16.mxu0 %v10354_v16  ;;  %v10562_v55 = vcombine.high %v1329_v61, %v1333_v4  ;;  %v1193_v7 = vld [vmem:[%s11643_s16 + $0x1798] sm:$0xff]  ;;  %v10561_v15 = vcombine.low %v1329_v61, %v1333_v4 }
 0x39b   : > { %v1197_v48 = vld [vmem:[%s11643_s16 + $0x17b8] sm:$0xff] }
 0x39c   : > { %7048 = vmatpush1.bf16.msra.mxu1 %v10489_v17  ;;  %v1321_v12 = vld [vmem:[%s11643_s16 + $0x1b98] sm:$0xff]  ;;  %v10426_v1 = vcombine.high %v1193_v7, %v1197_v48  ;;  %v10425_v21 = vcombine.low %v1193_v7, %v1197_v48 }
 0x39d   : > { %7049 = vmatprep.subr.bf16.mxu1 %v10482_v18  ;;  %7007 = vmatpush1.bf16.msra.mxu0 %v10353_v24  ;;  %v1325_v59 = vld [vmem:[%s11643_s16 + $0x1bb8] sm:$0xff] }
 0x39e   : > { %7008 = vmatprep.subr.bf16.mxu0 %v10346_v25  ;;  %v10554_v17 = vcombine.high %v1321_v12, %v1325_v59  ;;  %v1185_v16 = vld [vmem:[%s11643_s16 + $0x1758] sm:$0xff]  ;;  %v10553_v23 = vcombine.low %v1321_v12, %v1325_v59 }
 0x39f   : > { %v1189_v18 = vld [vmem:[%s11643_s16 + $0x1778] sm:$0xff] }
 0x3a0   : > { %7050 = vmatpush1.bf16.msra.mxu1 %v10481_v10  ;;  %v1313_v19 = vld [vmem:[%s11643_s16 + $0x1b58] sm:$0xff]  ;;  %v10418_v24 = vcombine.high %v1185_v16, %v1189_v18 }
 0x3a1   : > { %7051 = vmatprep.subr.bf16.mxu1 %v10474_v26  ;;  %7009 = vmatpush1.bf16.msra.mxu0 %v10345_v31  ;;  %v1317_v20 = vld [vmem:[%s11643_s16 + $0x1b78] sm:$0xff]  ;;  %v10417_v31 = vcombine.low %v1185_v16, %v1189_v18 }
 0x3a2   : > { %7010 = vmatprep.subr.bf16.mxu0 %v10338_v33  ;;  %v10546_v10 = vcombine.high %v1313_v19, %v1317_v20  ;;  %v1177_v25 = vld [vmem:[%s11643_s16 + $0x1718] sm:$0xff] }
 0x3a3   : > { %v1181_v26 = vld [vmem:[%s11643_s16 + $0x1738] sm:$0xff] }
 0x3a4   : > { %7052 = vmatpush1.bf16.msra.mxu1 %v10473_v32  ;;  %v1305_v29 = vld [vmem:[%s11643_s16 + $0x1b18] sm:$0xff]  ;;  %v10545_v32 = vcombine.low %v1313_v19, %v1317_v20  ;;  %v10410_v33 = vcombine.high %v1177_v25, %v1181_v26 }
 0x3a5   : > { %7053 = vmatprep.subr.bf16.mxu1 %v10466_v34  ;;  %7011 = vmatpush1.bf16.msra.mxu0 %v10337_v40  ;;  %v1309_v30 = vld [vmem:[%s11643_s16 + $0x1b38] sm:$0xff] }
 0x3a6   : > { %7012 = vmatprep.subr.bf16.mxu0 %v10330_v42  ;;  %v10538_v34 = vcombine.high %v1305_v29, %v1309_v30  ;;  %v1169_v35 = vld [vmem:[%s11643_s16 + $0x16d8] sm:$0xff]  ;;  %v10409_v42 = vcombine.low %v1177_v25, %v1181_v26  ;;  %v10537_v44 = vcombine.low %v1305_v29, %v1309_v30 }
 0x3a7   : > { %v1173_v37 = vld [vmem:[%s11643_s16 + $0x16f8] sm:$0xff] }
 0x3a8   : > { %7054 = vmatpush1.bf16.msra.mxu1 %v10465_v41  ;;  %v1297_v40 = vld [vmem:[%s11643_s16 + $0x1ad8] sm:$0xff]  ;;  %v10402_v46 = vcombine.high %v1169_v35, %v1173_v37  ;;  %v10401_v56 = vcombine.low %v1169_v35, %v1173_v37  ;;  %v412_v37 = vld [vmem:[#allocation2 + $0x50] sm:$0xff] }
 0x3a9   : > { %7055 = vmatprep.subr.bf16.mxu1 %v10458_v43  ;;  %7013 = vmatpush1.bf16.msra.mxu0 %v10329_v50  ;;  %v1301_v41 = vld [vmem:[%s11643_s16 + $0x1af8] sm:$0xff]  ;;  %v6649_v43 = vpop.f32.mrf.mxu1 }
 0x3aa   : > { %7014 = vmatprep.subr.bf16.mxu0 %v10322_v53  ;;  %v10530_v47 = vcombine.high %v1297_v40, %v1301_v41  ;;  %v1161_v49 = vld [vmem:[%s11643_s16 + $0x1698] sm:$0xff]  ;;  %v10529_v58 = vcombine.low %v1297_v40, %v1301_v41 }
 0x3ab   : > { %v1165_v50 = vld [vmem:[%s11643_s16 + $0x16b8] sm:$0xff]  ;;  %v6651_v57 = vpop.f32.mrf.mxu1 }
 0x3ac   : > { %7056 = vmatpush1.bf16.msra.mxu1 %v10457_v52  ;;  %v6610_v52 = vpop.f32.mrf.mxu0  ;;  %v1289_v53 = vld [vmem:[%s11643_s16 + $0x1a98] sm:$0xff]  ;;  %v10394_v60 = vcombine.high %v1161_v49, %v1165_v50  ;;  %v10393_v61 = vcombine.low %v1161_v49, %v1165_v50 }
 0x3ad   : > { %7057 = vmatprep.subr.bf16.mxu1 %v10450_v54  ;;  %7015 = vmatpush1.bf16.msra.mxu0 %v10321_v36  ;;  %v1293_v54 = vld [vmem:[%s11643_s16 + $0x1ab8] sm:$0xff]  ;;  %v6653_v4 = vpop.f32.mrf.mxu1 }
 0x3ae   : > { %7016 = vmatprep.subr.bf16.mxu0 %v10314_v63  ;;  %v10522_v36 = vcombine.high %v1289_v53, %v1293_v54  ;;  %v1157_v63 = vld [vmem:[%s11643_s16 + $0x1678] sm:$0xff] }
 0x3af   : > { %v1281_v2 = vld [vmem:[%s11643_s16 + $0x1a58] sm:$0xff]  ;;  %v6655_v16 = vpop.f32.mrf.mxu1 }
 0x3b0   : > { %7058 = vmatpush1.bf16.msra.mxu1 %v10449_v62  ;;  %v1153_v62 = vld [vmem:[%s11643_s16 + $0x1658] sm:$0xff] }
 0x3b1   : > { %7059 = vmatprep.subr.bf16.mxu1 %v10442_v0  ;;  %7017 = vmatpush1.bf16.msra.mxu0 %v10313_v5  ;;  %v6612_v0 = vpop.f32.mrf.mxu0  ;;  %v1285_v3 = vld [vmem:[%s11643_s16 + $0x1a78] sm:$0xff] }
 0x3b2   : > { %7018 = vmatprep.subr.bf16.mxu0 %v10434_v9  ;;  %v10386_v9 = vcombine.high %v1153_v62, %v1157_v63  ;;  %v10514_v7 = vcombine.high %v1281_v2, %v1285_v3  ;;  %v1145_v48 = vld [vmem:[%s11643_s16 + $0x1618] sm:$0xff]  ;;  %v10513_v19 = vcombine.low %v1281_v2, %v1285_v3 }
 0x3b3   : > { %v6692_v5 = vpop.f32.mrf.mxu0  ;;  %v1149_v12 = vld [vmem:[%s11643_s16 + $0x1638] sm:$0xff] }
 0x3b4   : > { %7060 = vmatpush1.bf16.msra.mxu1 %v10441_v8  ;;  %v10521_v8 = vcombine.low %v1289_v53, %v1293_v54  ;;  %v1273_v59 = vld [vmem:[%s11643_s16 + $0x1a18] sm:$0xff]  ;;  %v10378_v20 = vcombine.high %v1145_v48, %v1149_v12  ;;  %v420_v53 = vld [vmem:[#allocation2 + $0x60] sm:$0xff] }
 0x3b5   : > { %7061 = vmatprep.subr.bf16.mxu1 %v10562_v55  ;;  %7019 = vmatpush2.bf16.msra.mxu0 %v10433_v13  ;;  %v6564_v55 = vadd.f32 %v12643_v11, %v12633_v51  ;;  %v1277_v13 = vld [vmem:[%s11643_s16 + $0x1a38] sm:$0xff]  ;;  %v6694_v18 = vpop.f32.mrf.mxu0  ;;  %v6568_v51 = vadd.f32 %v12659_v27, %v12647_v14 }
 0x3b6   : > { %7020 = vmatprep.subr.bf16.mxu0 %v10426_v1  ;;  %v10505_v26 = vcombine.low %v1273_v59, %v1277_v13 }
 0x3b7   : > { %v6607_v1 = vadd.f32 %v6606_v28, %v6564_v55  ;;  %v6696_v25 = vpop.f32.mrf.mxu0 }
 0x3b8   : > { %7062 = vmatpush2.bf16.msra.mxu1 %v10561_v15  ;;  %v6566_v15 = vadd.f32 %v12651_v45, %v12639_v6  ;;  %v6611_v6 = vadd.f32 %v6610_v52, %v6568_v51  ;;  %v10377_v45 = vcombine.low %v1145_v48, %v1149_v12 }
 0x3b9   : > { %7063 = vmatprep.subr.bf16.mxu1 %v10554_v17  ;;  %7021 = vmatpush2.bf16.msra.mxu0 %v10425_v21  ;;  %v10385_v17 = vcombine.low %v1153_v62, %v1157_v63  ;;  %v10506_v21 = vcombine.high %v1273_v59, %v1277_v13 }
 0x3ba   : > { %7022 = vmatprep.subr.bf16.mxu0 %v10418_v24  ;;  %v6609_v11 = vadd.f32 %v6608_v39, %v6566_v15  ;;  %v6570_v24 = vadd.f32 %v6569_v38, %v12655_v22  ;;  %v6654_v27 = vadd.f32 %v6653_v4, %v6611_v6  ;;  %v11023_v39 = vld [vmem:[%s11641_s30 + $0x28] ss:$56 sps:$4 sm:$0xff]  }
 0x3bc   : > { %7064 = vmatpush2.bf16.msra.mxu1 %v10553_v23  ;;  %v6735_v23 = vpop.f32.mrf.mxu1  ;;  %v6652_v28 = vadd.f32 %v6651_v57, %v6609_v11  ;;  %v6613_v29 = vadd.f32 %v6612_v0, %v6570_v24 }
 0x3bd   : > { %7065 = vmatprep.subr.bf16.mxu1 %v10546_v10  ;;  %7023 = vmatpush2.bf16.msra.mxu0 %v10417_v31  ;;  %v6650_v10 = vadd.f32 %v6649_v43, %v6607_v1  ;;  %v11024_v43 = vld [vmem:[%s11641_s30 + $0x30] ss:$56 sps:$4 sm:$0xff]  }
 0x3be   : > { %7024 = vmatprep.subr.bf16.mxu0 %v10410_v33  ;;  %v6737_v14 = vpop.f32.mrf.mxu1  ;;  %v6695_v31 = vadd.f32 %v6694_v18, %v6652_v28  ;;  %v6656_v22 = vadd.f32 %v6655_v16, %v6613_v29 }
 0x3bf   : > { %v6693_v30 = vadd.f32 %v6692_v5, %v6650_v10 }
 0x3c0   : > { %7066 = vmatpush2.bf16.msra.mxu1 %v10545_v32  ;;  %v6698_v32 = vpop.f32.mrf.mxu0  ;;  %v6739_v35 = vpop.f32.mrf.mxu1  ;;  %v6738_v40 = vadd.f32 %v6737_v14, %v6695_v31 }
 0x3c1   : > { %7067 = vmatprep.subr.bf16.mxu1 %v10538_v34  ;;  %7025 = vmatpush2.bf16.msra.mxu0 %v10409_v42  ;;  %v6736_v33 = vadd.f32 %v6735_v23, %v6693_v30  ;;  %v6697_v34 = vadd.f32 %v6696_v25, %v6654_v27  ;;  %v6699_v41 = vadd.f32 %v6698_v32, %v6656_v22  ;;  %v414_v22 = vld [vmem:[#allocation2 + $0x8] sm:$0xff] }
 0x3c2   : > { %7026 = vmatprep.subr.bf16.mxu0 %v10402_v46  ;;  %v6741_v52 = vpop.f32.mrf.mxu1 }
 0x3c4   : > { %7068 = vmatpush2.bf16.msra.mxu1 %v10537_v44  ;;  %v413_v44 = vld [vmem:[#allocation2 + $0x68] sm:$0xff] }
 0x3c5   : > { %7069 = vmatprep.subr.bf16.mxu1 %v10530_v47  ;;  %7027 = vmatpush2.bf16.msra.mxu0 %v10401_v56  ;;  %v6740_v47 = vadd.f32 %v6739_v35, %v6697_v34  ;;  %v6742_v56 = vadd.f32 %v6741_v52, %v6699_v41 }
 0x3c6   : > { %7028 = vmatprep.subr.bf16.mxu0 %v10394_v60  ;;  %v421_v60 = vld [vmem:[#allocation2 + $0x70] sm:$0xff] }
 0x3c8   : > { %7070 = vmatpush2.bf16.msra.mxu1 %v10529_v58 }
 0x3c9   : > { %7071 = vmatprep.subr.bf16.mxu1 %v10522_v36  ;;  %7029 = vmatpush2.bf16.msra.mxu0 %v10393_v61 }
 0x3ca   : > { %7030 = vmatprep.subr.bf16.mxu0 %v10386_v9 }
 0x3cc   : > { %7072 = vmatpush2.bf16.msra.mxu1 %v10521_v8 }
 0x3cd   : > { %7073 = vmatprep.subr.bf16.mxu1 %v10514_v7  ;;  %7031 = vmatpush2.bf16.msra.mxu0 %v10385_v17 }
 0x3ce   : > { %7032 = vmatprep.subr.bf16.mxu0 %v10378_v20 }
 0x3d0   : > { %7074 = vmatpush2.bf16.msra.mxu1 %v10513_v19 }
 0x3d1   : > { %7075 = vmatprep.subr.bf16.mxu1 %v10506_v21  ;;  %7033 = vmatpush2.bf16.msra.mxu0 %v10377_v45 }
 0x3d4   : > { %7076 = vmatpush2.bf16.msra.mxu1 %v10505_v26  ;;  %v6778_v38 = vpop.f32.mrf.mxu0  ;;  %7035 = vmatmul.mubr.bf16.vlgmr.msra.gmra.mxu0 %v11023_v39  ;;  %v415_v39 = vld [vmem:[#allocation2 + $0x48] sm:$0xff] }
 0x3d5   : > { %v6779_v42 = vadd.f32 %v6778_v38, %v6736_v33 }
 0x3d6   : > { %v6780_v46 = vpop.f32.mrf.mxu0 }
 0x3d7   : > { %7078 = vmatmul.mubr.bf16.vlgmr.msra.gmra.mxu1 %v11024_v43  ;;  %v7092_v49 = vadd.f32 %v6779_v42, %v412_v37  ;;  %v6781_v50 = vadd.f32 %v6780_v46, %v6738_v40  ;;  %v6821_v2 = vpop.f32.mrf.mxu1 }
 0x3d8   : > { %v6782_v54 = vpop.f32.mrf.mxu0 }
 0x3d9   : > { %7108 = vst [vmem:[#allocation2 + $0x50] sm:$0xff] %v7092_v49  ;;  %v7093_v57 = vadd.f32 %v6781_v50, %v413_v44  ;;  %v6783_v58 = vadd.f32 %v6782_v54, %v6740_v47  ;;  %v6823_v3 = vpop.f32.mrf.mxu1  ;;  %v422_v47 = vld [vmem:[#allocation2 + $0x78] sm:$0xff]  ;;  %v423_v54 = vld [vmem:[#allocation2 + $0x28] sm:$0xff] }
 0x3da   : > { %v6784_v36 = vpop.f32.mrf.mxu0 }
 0x3db   : > { %7109 = vst [vmem:[#allocation2 + $0x68] sm:$0xff] %v7093_v57  ;;  %v7100_v62 = vadd.f32 %v6783_v58, %v420_v53  ;;  %v6785_v63 = vadd.f32 %v6784_v36, %v6742_v56  ;;  %v6825_v61 = vpop.f32.mrf.mxu1 }
 0x3dd   : > { %7116 = vst [vmem:[#allocation2 + $0x60] sm:$0xff] %v7100_v62  ;;  %v7101_v0 = vadd.f32 %v6785_v63, %v421_v60  ;;  %v6827_v4 = vpop.f32.mrf.mxu1 }
 0x3df   : > { %7117 = vst [vmem:[#allocation2 + $0x70] sm:$0xff] %v7101_v0 }
 0x414   : > { %v6864_v5 = vpop.f32.mrf.mxu0 }
 0x415   : > { %v6865_v1 = vadd.f32 %v6864_v5, %v6821_v2 }
 0x416   : > { %v6866_v9 = vpop.f32.mrf.mxu0 }
 0x417   : > { %v6907_v8 = vpop.f32.mrf.mxu1  ;;  %v6867_v16 = vadd.f32 %v6866_v9, %v6823_v3 }
 0x418   : > { %v6868_v7 = vpop.f32.mrf.mxu0  ;;  %v6908_v19 = vadd.f32 %v6907_v8, %v6865_v1 }
 0x419   : > { %v6909_v55 = vpop.f32.mrf.mxu1  ;;  %v6869_v20 = vadd.f32 %v6868_v7, %v6825_v61 }
 0x41a   : > { %v6870_v12 = vpop.f32.mrf.mxu0  ;;  %v6910_v11 = vadd.f32 %v6909_v55, %v6867_v16 }
 0x41b   : > { %v6911_v48 = vpop.f32.mrf.mxu1  ;;  %v6871_v21 = vadd.f32 %v6870_v12, %v6827_v4 }
 0x41c   : > { %v6912_v10 = vadd.f32 %v6911_v48, %v6869_v20 }
 0x41d   : > { %v6913_v59 = vpop.f32.mrf.mxu1 }
 0x41e   : > { %v6914_v25 = vadd.f32 %v6913_v59, %v6871_v21 }
 0x454   : > { %v6950_v13 = vpop.f32.mrf.mxu0 }
 0x455   : > { %v6951_v23 = vadd.f32 %v6950_v13, %v6908_v19 }
 0x456   : > { %v6952_v17 = vpop.f32.mrf.mxu0 }
 0x457   : > { %v6993_v15 = vpop.f32.mrf.mxu1  ;;  %v6953_v6 = vadd.f32 %v6952_v17, %v6910_v11 }
 0x458   : > { %v6954_v51 = vpop.f32.mrf.mxu0  ;;  %v6994_v26 = vadd.f32 %v6993_v15, %v6951_v23 }
 0x459   : > { %v6995_v18 = vpop.f32.mrf.mxu1  ;;  %v6955_v28 = vadd.f32 %v6954_v51, %v6912_v10 }
 0x45a   : > { %v6956_v45 = vpop.f32.mrf.mxu0  ;;  %v6996_v14 = vadd.f32 %v6995_v18, %v6953_v6 }
 0x45b   : > { %v6997_v24 = vpop.f32.mrf.mxu1  ;;  %v6957_v27 = vadd.f32 %v6956_v45, %v6914_v25 }
 0x45c   : > { %v6998_v34 = vadd.f32 %v6997_v24, %v6955_v28 }
 0x45d   : > { %v6999_v29 = vpop.f32.mrf.mxu1 }
 0x45e   : > { %v7000_v41 = vadd.f32 %v6999_v29, %v6957_v27 }
 0x494   : > { %v7036_v30 = vpop.f32.mrf.mxu0 }
 0x495   : > { %v7037_v31 = vadd.f32 %v7036_v30, %v6994_v26 }
 0x496   : > { %v7038_v33 = vpop.f32.mrf.mxu0 }
 0x497   : > { %v7079_v32 = vpop.f32.mrf.mxu1  ;;  %v7039_v37 = vadd.f32 %v7038_v33, %v6996_v14 }
 0x498   : > { %v7080_v35 = vadd.f32 %v7079_v32, %v7037_v31  ;;  %v7040_v40 = vpop.f32.mrf.mxu0 }
 0x499   : > { %v7081_v38 = vpop.f32.mrf.mxu1  ;;  %v7041_v44 = vadd.f32 %v7040_v40, %v6998_v34 }
 0x49a   : > { %v7094_v42 = vadd.f32 %v7080_v35, %v414_v22  ;;  %v7082_v43 = vadd.f32 %v7081_v38, %v7039_v37  ;;  %v7042_v49 = vpop.f32.mrf.mxu0 }
 0x49b   : > { %v7083_v46 = vpop.f32.mrf.mxu1  ;;  %v7043_v53 = vadd.f32 %v7042_v49, %v7000_v41 }
 0x49c   : > { %7110 = vst [vmem:[#allocation2 + $0x8] sm:$0xff] %v7094_v42  ;;  %v7095_v50 = vadd.f32 %v7082_v43, %v415_v39  ;;  %v7084_v52 = vadd.f32 %v7083_v46, %v7041_v44 }
 0x49d   : > { %v7085_v56 = vpop.f32.mrf.mxu1 }
 0x49e   : > { %7111 = vst [vmem:[#allocation2 + $0x48] sm:$0xff] %v7095_v50  ;;  %v7102_v57 = vadd.f32 %v7084_v52, %v422_v47  ;;  %v7086_v58 = vadd.f32 %v7085_v56, %v7043_v53  ;;  %7123 = sbr.rel (%p10563_p6) target bundleno = 1896 (0x768), region = 83 }
 0x4a0   : > { %7118 = vst [vmem:[#allocation2 + $0x78] sm:$0xff] %v7102_v57  ;;  %v7103_v60 = vadd.f32 %v7086_v58, %v423_v54 }
 0x4a2   : > { %7119 = vst [vmem:[#allocation2 + $0x28] sm:$0xff] %v7103_v60 }
 0x4a3   : > { %v11025_v36 = vld [vmem:[%s13671_s3 + $0xe4] ss:$16 sps:$4 sm:$0xff]   ;;  %v11029_v63 = vld [vmem:[%s13671_s3 + $0xe0] ss:$16 sps:$4 sm:$0xff]   ;;  %v7142_v14 = vlaneseq  ;;  %v7127_v47 = vld [vmem:[#allocation2 + $0x18] sm:$0xff] }
 0x4a4   : > { %v11027_v62 = vld [vmem:[%s13671_s3 + $0x2e4] ss:$16 sps:$4 sm:$0xff]   ;;  %8812 = vmatprep.subr.bf16.mxu0 %v11025_v36  ;;  %v11030_v0 = vld [vmem:[%s13671_s3 + $0x2e0] ss:$16 sps:$4 sm:$0xff]   ;;  %v7135_v54 = vld [vmem:[#allocation2 + $0x38] sm:$0xff] }
 0x4a5   : > { %8855 = vmatprep.subr.bf16.mxu1 %v11027_v62  ;;  %v11031_v2 = vld [vmem:[%s13671_s3 + $0xc4] ss:$16 sps:$4 sm:$0xff]   ;;  %8813 = vmatpush1.bf16.msra.mxu0 %v11029_v63  ;;  %v11035_v61 = vld [vmem:[%s13671_s3 + $0xc0] ss:$16 sps:$4 sm:$0xff]   ;;  %v12812_v33 = vshrl.u32 %v7142_v14, 7 }
 0x4a6   : > { %8856 = vmatpush1.bf16.msra.mxu1 %v11030_v0  ;;  %v11033_v3 = vld [vmem:[%s13671_s3 + $0x2c4] ss:$16 sps:$4 sm:$0xff]   ;;  %8814 = vmatprep.subr.bf16.mxu0 %v11031_v2  ;;  %v11036_v4 = vld [vmem:[%s13671_s3 + $0x2c0] ss:$16 sps:$4 sm:$0xff]  }
 0x4a7   : > { %8857 = vmatprep.subr.bf16.mxu1 %v11033_v3  ;;  %v11037_v5 = vld [vmem:[%s13671_s3 + $0xa4] ss:$16 sps:$4 sm:$0xff]   ;;  %v11041_v9 = vld [vmem:[%s13671_s3 + $0xa0] ss:$16 sps:$4 sm:$0xff]   ;;  %v7148_v39 = vsub.s32 1, %v12812_v33  ;;  %v7156_v40 = vsub.s32 3, %v12812_v33 }
 0x4a8   : > { %v11039_v8 = vld [vmem:[%s13671_s3 + $0x2a4] ss:$16 sps:$4 sm:$0xff]   ;;  %v11042_v55 = vld [vmem:[%s13671_s3 + $0x2a0] ss:$16 sps:$4 sm:$0xff]   ;;  %v7144_v42 = vsub.s32 0, %v12812_v33  ;;  %v7152_v49 = vsub.s32 2, %v12812_v33 }
 0x4a9   : > { %8815 = vmatpush1.bf16.msra.mxu0 %v11035_v61  ;;  %v11043_v7 = vld [vmem:[%s13671_s3 + $0x84] ss:$16 sps:$4 sm:$0xff]   ;;  %v11047_v12 = vld [vmem:[%s13671_s3 + $0x80] ss:$16 sps:$4 sm:$0xff]  }
 0x4aa   : > { %8858 = vmatpush1.bf16.msra.mxu1 %v11036_v4  ;;  %8816 = vmatprep.subr.bf16.mxu0 %v11037_v5  ;;  %v11045_v48 = vld [vmem:[%s13671_s3 + $0x284] ss:$16 sps:$4 sm:$0xff]   ;;  %v11048_v59 = vld [vmem:[%s13671_s3 + $0x280] ss:$16 sps:$4 sm:$0xff]  }
 0x4ab   : > { %8859 = vmatprep.subr.bf16.mxu1 %v11039_v8  ;;  %v11049_v13 = vld [vmem:[%s13671_s3 + $0x64] ss:$16 sps:$4 sm:$0xff]   ;;  %v11053_v1 = vld [vmem:[%s13671_s3 + $0x60] ss:$16 sps:$4 sm:$0xff]  }
 0x4ac   : > { %v11051_v15 = vld [vmem:[%s13671_s3 + $0x264] ss:$16 sps:$4 sm:$0xff]   ;;  %v11054_v17 = vld [vmem:[%s13671_s3 + $0x260] ss:$16 sps:$4 sm:$0xff]  }
 0x4ad   : > { %8817 = vmatpush1.bf16.msra.mxu0 %v11041_v9  ;;  %v11055_v16 = vld [vmem:[%s13671_s3 + $0x44] ss:$16 sps:$4 sm:$0xff]   ;;  %v11059_v19 = vld [vmem:[%s13671_s3 + $0x40] ss:$16 sps:$4 sm:$0xff]   ;;  %v7126_v9 = vld [vmem:[#allocation2 + $0x58] sm:$0xff] }
 0x4ae   : > { %8860 = vmatpush1.bf16.msra.mxu1 %v11042_v55  ;;  %8818 = vmatprep.subr.bf16.mxu0 %v11043_v7  ;;  %v11057_v18 = vld [vmem:[%s13671_s3 + $0x244] ss:$16 sps:$4 sm:$0xff]   ;;  %v11060_v20 = vld [vmem:[%s13671_s3 + $0x240] ss:$16 sps:$4 sm:$0xff]  }
 0x4af   : > { %8861 = vmatprep.subr.bf16.mxu1 %v11045_v48  ;;  %v11061_v51 = vld [vmem:[%s13671_s3 + $0x24] ss:$16 sps:$4 sm:$0xff]   ;;  %v11065_v21 = vld [vmem:[%s13671_s3 + $0x20] ss:$16 sps:$4 sm:$0xff]   ;;  %v7160_v48 = vsub.s32 4, %v12812_v33 }
 0x4b0   : > { %v11063_v11 = vld [vmem:[%s13671_s3 + $0x224] ss:$16 sps:$4 sm:$0xff]   ;;  %v11066_v23 = vld [vmem:[%s13671_s3 + $0x220] ss:$16 sps:$4 sm:$0xff]  }
 0x4b1   : > { %8819 = vmatpush1.bf16.msra.mxu0 %v11047_v12  ;;  %v11067_v24 = vld [vmem:[%s13671_s3 + $0x4] ss:$16 sps:$4 sm:$0xff]   ;;  %v11071_v6 = vld [vmem:[%s13671_s3] ss:$16 sps:$4 sm:$0xff]  }
 0x4b2   : > { %8862 = vmatpush1.bf16.msra.mxu1 %v11048_v59  ;;  %8820 = vmatprep.subr.bf16.mxu0 %v11049_v13  ;;  %v11069_v10 = vld [vmem:[%s13671_s3 + $0x204] ss:$16 sps:$4 sm:$0xff]   ;;  %v11072_v45 = vld [vmem:[%s13671_s3 + $0x200] ss:$16 sps:$4 sm:$0xff]  }
 0x4b3   : > { %8863 = vmatprep.subr.bf16.mxu1 %v11051_v15  ;;  %v11073_v25 = vld [vmem:[%s13671_s3 + $0x1e4] ss:$16 sps:$4 sm:$0xff]   ;;  %v11077_v28 = vld [vmem:[%s13671_s3 + $0x1e0] ss:$16 sps:$4 sm:$0xff]  }
 0x4b4   : > { %v11075_v26 = vld [vmem:[%s13671_s3 + $0x3e4] ss:$16 sps:$4 sm:$0xff]   ;;  %v11078_v29 = vld [vmem:[%s13671_s3 + $0x3e0] ss:$16 sps:$4 sm:$0xff]  }
 0x4b5   : > { %8821 = vmatpush1.bf16.msra.mxu0 %v11053_v1  ;;  %v11079_v30 = vld [vmem:[%s13671_s3 + $0x1c4] ss:$16 sps:$4 sm:$0xff]   ;;  %v11083_v31 = vld [vmem:[%s13671_s3 + $0x1c0] ss:$16 sps:$4 sm:$0xff]  }
 0x4b6   : > { %8864 = vmatpush1.bf16.msra.mxu1 %v11054_v17  ;;  %8822 = vmatprep.subr.bf16.mxu0 %v11055_v16  ;;  %v11081_v27 = vld [vmem:[%s13671_s3 + $0x3c4] ss:$16 sps:$4 sm:$0xff]   ;;  %v11084_v32 = vld [vmem:[%s13671_s3 + $0x3c0] ss:$16 sps:$4 sm:$0xff]  }
 0x4b7   : > { %8865 = vmatprep.subr.bf16.mxu1 %v11057_v18  ;;  %v11085_v22 = vld [vmem:[%s13671_s3 + $0x1a4] ss:$16 sps:$4 sm:$0xff]   ;;  %v11089_v35 = vld [vmem:[%s13671_s3 + $0x1a0] ss:$16 sps:$4 sm:$0xff]   ;;  %v7168_v18 = vsub.s32 6, %v12812_v33 }
 0x4b8   : > { %v11087_v34 = vld [vmem:[%s13671_s3 + $0x3a4] ss:$16 sps:$4 sm:$0xff]   ;;  %v11090_v37 = vld [vmem:[%s13671_s3 + $0x3a0] ss:$16 sps:$4 sm:$0xff]  }
 0x4b9   : > { %8823 = vmatpush1.bf16.msra.mxu0 %v11059_v19  ;;  %v11091_v38 = vld [vmem:[%s13671_s3 + $0x184] ss:$16 sps:$4 sm:$0xff]   ;;  %v11095_v50 = vld [vmem:[%s13671_s3 + $0x180] ss:$16 sps:$4 sm:$0xff]  }
 0x4ba   : > { %8866 = vmatpush1.bf16.msra.mxu1 %v11060_v20  ;;  %8824 = vmatprep.subr.bf16.mxu0 %v11061_v51  ;;  %v11093_v41 = vld [vmem:[%s13671_s3 + $0x384] ss:$16 sps:$4 sm:$0xff]   ;;  %v11096_v52 = vld [vmem:[%s13671_s3 + $0x380] ss:$16 sps:$4 sm:$0xff]  }
 0x4bb   : > { %8867 = vmatprep.subr.bf16.mxu1 %v11063_v11  ;;  %v7125_v43 = vld [vmem:[#allocation2] sm:$0xff]  ;;  %v7124_v61 = vld [vmem:[#allocation2 + $0x30] sm:$0xff] }
 0x4bc   : > { %v7133_v44 = vld [vmem:[#allocation2 + $0x20] sm:$0xff]  ;;  %v7134_v55 = vld [vmem:[#allocation2 + $0x10] sm:$0xff] }
 0x4bd   : > { %8825 = vmatpush1.bf16.msra.mxu0 %v11065_v21  ;;  %v12835_v46 = vld [vmem:[%s13670_s2] sm:$0xff] }
 0x4be   : > { %8868 = vmatpush1.bf16.msra.mxu1 %v11066_v23  ;;  %8826 = vmatprep.subr.bf16.mxu0 %v11067_v24  ;;  %v7149_v53 = vrot.slane %v12835_v46, %v7148_v39  ;;  %v7157_v56 = vrot.slane %v12835_v46, %v7156_v40  ;;  %v11097_v57 = vld [vmem:[%s13671_s3 + $0x164] ss:$16 sps:$4 sm:$0xff]   ;;  %v7145_v60 = vrot.slane %v12835_v46, %v7144_v42  ;;  %v11101_v36 = vld [vmem:[%s13671_s3 + $0x160] ss:$16 sps:$4 sm:$0xff]  }
 0x4bf   : > { %8869 = vmatprep.subr.bf16.mxu1 %v11069_v10  ;;  %v11099_v58 = vld [vmem:[%s13671_s3 + $0x364] ss:$16 sps:$4 sm:$0xff]   ;;  %v11102_v62 = vld [vmem:[%s13671_s3 + $0x360] ss:$16 sps:$4 sm:$0xff]   ;;  %v7153_v7 = vrot.slane %v12835_v46, %v7152_v49 }
 0x4c0   : > { %v7183_v63 = vadd.f32 %v7149_v53, %v7125_v43  ;;  %v7191_v0 = vadd.f32 %v7149_v53, %v7133_v44  ;;  %v7185_v2 = vadd.f32 %v7157_v56, %v7127_v47  ;;  %v7193_v3 = vadd.f32 %v7157_v56, %v7135_v54  ;;  %v7132_v4 = vld [vmem:[#allocation2 + $0x40] sm:$0xff] }
 0x4c1   : > { %8827 = vmatpush1.bf16.msra.mxu0 %v11071_v6  ;;  %v11103_v5 = vld [vmem:[%s13671_s3 + $0x144] ss:$16 sps:$4 sm:$0xff]   ;;  %v7182_v16 = vadd.f32 %v7145_v60, %v7124_v61  ;;  %v11107_v19 = vld [vmem:[%s13671_s3 + $0x140] ss:$16 sps:$4 sm:$0xff]   ;;  %v7190_v21 = vadd.f32 %v7145_v60, %v7132_v4  ;;  %v7184_v10 = vadd.f32 %v7153_v7, %v7126_v9  ;;  %v7192_v6 = vadd.f32 %v7153_v7, %v7134_v55 }
 0x4c2   : > { %8870 = vmatpush1.bf16.msra.mxu1 %v11072_v45  ;;  %8828 = vmatprep.subr.bf16.mxu0 %v11073_v25  ;;  %v11105_v8 = vld [vmem:[%s13671_s3 + $0x344] ss:$16 sps:$4 sm:$0xff]   ;;  %vm7199_vm0 = vcmp.gt.f32.partialorder %v7183_v63, 0.0  ;;  %vm7207_vm1 = vcmp.gt.f32.partialorder %v7191_v0, 0.0  ;;  %v7215_v12 = vmul.f32 0.01, %v7183_v63 }
 0x4c3   : > { %8871 = vmatprep.subr.bf16.mxu1 %v11075_v26  ;;  %v7223_v59 = vmul.f32 0.01, %v7191_v0  ;;  %vm7201_vm2 = vcmp.gt.f32.partialorder %v7185_v2, 0.0  ;;  %vm7209_vm3 = vcmp.gt.f32.partialorder %v7193_v3, 0.0  ;;  %v7217_v13 = vmul.f32 0.01, %v7185_v2 }
 0x4c4   : > { %v7225_v15 = vmul.f32 0.01, %v7193_v3  ;;  %v7231_v1 = vsel %vm7199_vm0, %v7183_v63, %v7215_v12  ;;  %v11108_v23 = vld [vmem:[%s13671_s3 + $0x340] ss:$16 sps:$4 sm:$0xff]   ;;  %v11109_v45 = vld [vmem:[%s13671_s3 + $0x124] ss:$16 sps:$4 sm:$0xff]   ;;  %v12893_v26 = vrot.slane %v12835_v46, %v7160_v48 }
 0x4c5   : > { %8829 = vmatpush2.bf16.msra.mxu0 %v11077_v28  ;;  %v7239_v17 = vsel %vm7207_vm1, %v7191_v0, %v7223_v59  ;;  %v7233_v51 = vsel %vm7201_vm2, %v7185_v2, %v7217_v13  ;;  %v11111_v25 = vld [vmem:[%s13671_s3 + $0x324] ss:$16 sps:$4 sm:$0xff]   ;;  %v11113_v28 = vld [vmem:[%s13671_s3 + $0x120] ss:$16 sps:$4 sm:$0xff]   ;;  %vm7198_vm4 = vcmp.gt.f32.partialorder %v7182_v16, 0.0  ;;  %vm7206_vm5 = vcmp.gt.f32.partialorder %v7190_v21, 0.0 }
 0x4c6   : > { %8872 = vmatpush2.bf16.msra.mxu1 %v11078_v29  ;;  %8830 = vmatprep.subr.bf16.mxu0 %v11079_v30  ;;  %v12879_v20 = vpack.c.bf16 %v7239_v17, %v7231_v1  ;;  %v7241_v11 = vsel %vm7209_vm3, %v7193_v3, %v7225_v15  ;;  %v11114_v29 = vld [vmem:[%s13671_s3 + $0x320] ss:$16 sps:$4 sm:$0xff]   ;;  %v12904_v30 = vrot.slane %v12835_v46, %v7168_v18  ;;  %v11115_v14 = vld [vmem:[%s13671_s3 + $0x104] ss:$16 sps:$4 sm:$0xff]   ;;  %vm7200_vm6 = vcmp.gt.f32.partialorder %v7184_v10, 0.0 }
 0x4c7   : > { %8873 = vmatprep.subr.bf16.mxu1 %v11081_v27  ;;  %v12884_v24 = vpack.c.bf16 %v7241_v11, %v7233_v51  ;;  %v11117_v27 = vld [vmem:[%s13671_s3 + $0x304] ss:$16 sps:$4 sm:$0xff]   ;;  %vm7208_vm7 = vcmp.gt.f32.partialorder %v7192_v6, 0.0  ;;  %v11121_v54 = vld [vmem:[%s13671_s3 + $0x4e0] ss:$16 sps:$4 sm:$0xff]   ;;  %v7164_v1 = vsub.s32 5, %v12812_v33 }
 0x4c8   : > { %8844 = vmatprep.mubr.bf16.mxu0 %v12879_v20  ;;  %v11123_v47 = vld [vmem:[%s13671_s3 + $0x4e4] ss:$16 sps:$4 sm:$0xff]   ;;  %v11124_v56 = vld [vmem:[%s13671_s3 + $0x6e0] ss:$16 sps:$4 sm:$0xff]  }
 0x4c9   : > { %8831 = vmatpush2.bf16.msra.mxu0 %v11083_v31  ;;  %8887 = vmatprep.mubr.bf16.mxu1 %v12884_v24  ;;  %v7214_v31 = vmul.f32 0.01, %v7182_v16  ;;  %v11127_v60 = vld [vmem:[%s13671_s3 + $0x4c0] ss:$16 sps:$4 sm:$0xff]   ;;  %v11138_v63 = vld [vmem:[%s13671_s3 + $0x6a4] ss:$16 sps:$4 sm:$0xff]   ;;  %v7165_v11 = vrot.slane %v12835_v46, %v7164_v1 }
 0x4ca   : > { %8874 = vmatpush2.bf16.msra.mxu1 %v11084_v32  ;;  %8832 = vmatprep.subr.bf16.mxu0 %v11085_v22  ;;  %v7222_v32 = vmul.f32 0.01, %v7190_v21  ;;  %v7216_v22 = vmul.f32 0.01, %v7184_v10  ;;  %v11133_v0 = vld [vmem:[%s13671_s3 + $0x4a0] ss:$16 sps:$4 sm:$0xff]  }
 0x4cb   : > { %8875 = vmatprep.subr.bf16.mxu1 %v11087_v34  ;;  %v7224_v34 = vmul.f32 0.01, %v7192_v6  ;;  %v11136_v2 = vld [vmem:[%s13671_s3 + $0x6a0] ss:$16 sps:$4 sm:$0xff]   ;;  %v11141_v3 = vld [vmem:[%s13671_s3 + $0x484] ss:$16 sps:$4 sm:$0xff]  }
 0x4cc   : > { %v7232_v43 = vsel %vm7200_vm6, %v7184_v10, %v7216_v22  ;;  %v11144_v61 = vld [vmem:[%s13671_s3 + $0x684] ss:$16 sps:$4 sm:$0xff]   ;;  %v11139_v4 = vld [vmem:[%s13671_s3 + $0x480] ss:$16 sps:$4 sm:$0xff]   ;;  %v7130_v1 = vld [vmem:[#allocation2 + $0x8] sm:$0xff] }
 0x4cd   : > { %8833 = vmatpush2.bf16.msra.mxu0 %v11089_v35  ;;  %v11119_v35 = vld [vmem:[%s13671_s3 + $0x100] ss:$16 sps:$4 sm:$0xff]   ;;  %v7240_v44 = vsel %vm7208_vm7, %v7192_v6, %v7224_v34  ;;  %v11150_v9 = vld [vmem:[%s13671_s3 + $0x664] ss:$16 sps:$4 sm:$0xff]  }
 0x4ce   : > { %8876 = vmatpush2.bf16.msra.mxu1 %v11090_v37  ;;  %8834 = vmatprep.subr.bf16.mxu0 %v11091_v38  ;;  %v7230_v37 = vsel %vm7198_vm4, %v7182_v16, %v7214_v31  ;;  %v11120_v38 = vld [vmem:[%s13671_s3 + $0x300] ss:$16 sps:$4 sm:$0xff]   ;;  %v12926_v53 = vpack.c.bf16 %v7240_v44, %v7232_v43  ;;  %v11153_v48 = vld [vmem:[%s13671_s3 + $0x444] ss:$16 sps:$4 sm:$0xff]   ;;  %v7172_v16 = vsub.s32 7, %v12812_v33 }
 0x4cf   : > { %8877 = vmatprep.subr.bf16.mxu1 %v11093_v41  ;;  %v7238_v41 = vsel %vm7206_vm5, %v7190_v21, %v7222_v32  ;;  %v11145_v55 = vld [vmem:[%s13671_s3 + $0x460] ss:$16 sps:$4 sm:$0xff]   ;;  %v11156_v12 = vld [vmem:[%s13671_s3 + $0x644] ss:$16 sps:$4 sm:$0xff]  }
 0x4d0   : > { %v11148_v7 = vld [vmem:[%s13671_s3 + $0x660] ss:$16 sps:$4 sm:$0xff]   ;;  %v11159_v15 = vld [vmem:[%s13671_s3 + $0x424] ss:$16 sps:$4 sm:$0xff]  }
 0x4d1   : > { %8835 = vmatpush2.bf16.msra.mxu0 %v11095_v50  ;;  %v11126_v50 = vld [vmem:[%s13671_s3 + $0x6e4] ss:$16 sps:$4 sm:$0xff]   ;;  %v11151_v59 = vld [vmem:[%s13671_s3 + $0x440] ss:$16 sps:$4 sm:$0xff]  }
 0x4d2   : > { %8878 = vmatpush2.bf16.msra.mxu1 %v11096_v52  ;;  %8836 = vmatprep.subr.bf16.mxu0 %v11097_v57  ;;  %v12924_v52 = vpack.c.bf16 %v7238_v41, %v7230_v37  ;;  %v11129_v57 = vld [vmem:[%s13671_s3 + $0x4c4] ss:$16 sps:$4 sm:$0xff]   ;;  %v11154_v13 = vld [vmem:[%s13671_s3 + $0x640] ss:$16 sps:$4 sm:$0xff]  }
 0x4d3   : > { %8879 = vmatprep.subr.bf16.mxu1 %v11099_v58  ;;  %v11132_v58 = vld [vmem:[%s13671_s3 + $0x6c4] ss:$16 sps:$4 sm:$0xff]   ;;  %v11157_v18 = vld [vmem:[%s13671_s3 + $0x420] ss:$16 sps:$4 sm:$0xff]  }
 0x4d4   : > { %v11162_v17 = vld [vmem:[%s13671_s3 + $0x624] ss:$16 sps:$4 sm:$0xff]   ;;  %v11163_v10 = vld [vmem:[%s13671_s3 + $0x400] ss:$16 sps:$4 sm:$0xff]  }
 0x4d5   : > { %8837 = vmatpush2.bf16.msra.mxu0 %v11101_v36  ;;  %v11130_v36 = vld [vmem:[%s13671_s3 + $0x6c0] ss:$16 sps:$4 sm:$0xff]   ;;  %v11165_v51 = vld [vmem:[%s13671_s3 + $0x404] ss:$16 sps:$4 sm:$0xff]  }
 0x4d6   : > { %8880 = vmatpush2.bf16.msra.mxu1 %v11102_v62  ;;  %8838 = vmatprep.subr.bf16.mxu0 %v11103_v5  ;;  %v11135_v62 = vld [vmem:[%s13671_s3 + $0x4a4] ss:$16 sps:$4 sm:$0xff]   ;;  %v11142_v5 = vld [vmem:[%s13671_s3 + $0x680] ss:$16 sps:$4 sm:$0xff]  }
 0x4d7   : > { %8881 = vmatprep.subr.bf16.mxu1 %v11105_v8  ;;  %v11147_v8 = vld [vmem:[%s13671_s3 + $0x464] ss:$16 sps:$4 sm:$0xff]   ;;  %v11166_v6 = vld [vmem:[%s13671_s3 + $0x600] ss:$16 sps:$4 sm:$0xff]  }
 0x4d8   : > { %v11168_v21 = vld [vmem:[%s13671_s3 + $0x604] ss:$16 sps:$4 sm:$0xff]   ;;  %v11169_v34 = vld [vmem:[%s13671_s3 + $0x5e0] ss:$16 sps:$4 sm:$0xff]  }
 0x4d9   : > { %8839 = vmatpush2.bf16.msra.mxu0 %v11107_v19  ;;  %v11160_v19 = vld [vmem:[%s13671_s3 + $0x620] ss:$16 sps:$4 sm:$0xff]  }
 0x4da   : > { %8882 = vmatpush2.bf16.msra.mxu1 %v11108_v23  ;;  %8840 = vmatprep.subr.bf16.mxu0 %v11109_v45  ;;  %v7173_v23 = vrot.slane %v12835_v46, %v7172_v16  ;;  %v7129_v45 = vld [vmem:[#allocation2 + $0x68] sm:$0xff]  ;;  %v11171_v46 = vld [vmem:[%s13671_s3 + $0x5e4] ss:$16 sps:$4 sm:$0xff]   ;;  %v11199_v16 = vld [vmem:[%s13671_s3 + $0x540] ss:$16 sps:$4 sm:$0xff]  }
 0x4db   : > { %8883 = vmatprep.subr.bf16.mxu1 %v11111_v25  ;;  %v7137_v25 = vld [vmem:[#allocation2 + $0x70] sm:$0xff] }
 0x4dc   : > { %v7195_v31 = vadd.f32 %v7165_v11, %v7137_v25 }
 0x4dd   : > { %8841 = vmatpush2.bf16.msra.mxu0 %v11113_v28  ;;  %v7187_v28 = vadd.f32 %v7165_v11, %v7129_v45  ;;  %v11207_v11 = vld [vmem:[%s13671_s3 + $0x524] ss:$16 sps:$4 sm:$0xff]  }
 0x4de   : > { %8884 = vmatpush2.bf16.msra.mxu1 %v11114_v29  ;;  %8842 = vmatprep.subr.bf16.mxu0 %v11115_v14  ;;  %v7131_v29 = vld [vmem:[#allocation2 + $0x48] sm:$0xff]  ;;  %vm7211_vm9 = vcmp.gt.f32.partialorder %v7195_v31, 0.0  ;;  %v11213_v45 = vld [vmem:[%s13671_s3 + $0x504] ss:$16 sps:$4 sm:$0xff]  }
 0x4df   : > { %8885 = vmatprep.subr.bf16.mxu1 %v11117_v27  ;;  %v7139_v14 = vld [vmem:[#allocation2 + $0x28] sm:$0xff]  ;;  %v11174_v27 = vld [vmem:[%s13671_s3 + $0x7e4] ss:$16 sps:$4 sm:$0xff]   ;;  %v7189_v32 = vadd.f32 %v7173_v23, %v7131_v29  ;;  %vm7203_vm8 = vcmp.gt.f32.partialorder %v7187_v28, 0.0  ;;  %v7219_v37 = vmul.f32 0.01, %v7187_v28 }
 0x4e0   : > { %v7197_v22 = vadd.f32 %v7173_v23, %v7139_v14 }
 0x4e1   : > { %8843 = vmatpush2.bf16.msra.mxu0 %v11119_v35  ;;  %v11172_v35 = vld [vmem:[%s13671_s3 + $0x7e0] ss:$16 sps:$4 sm:$0xff]   ;;  %vm7205_vm10 = vcmp.gt.f32.partialorder %v7189_v32, 0.0  ;;  %v7235_v41 = vsel %vm7203_vm8, %v7187_v28, %v7219_v37  ;;  %v7221_v43 = vmul.f32 0.01, %v7189_v32 }
 0x4e2   : > { %8886 = vmatpush2.bf16.msra.mxu1 %v11120_v38  ;;  %8898 = vmatprep.subr.bf16.mxu0 %v11123_v47  ;;  %v7227_v38 = vmul.f32 0.01, %v7195_v31  ;;  %vm7213_vm11 = vcmp.gt.f32.partialorder %v7197_v22, 0.0  ;;  %v7229_v44 = vmul.f32 0.01, %v7197_v22 }
 0x4e3   : > { %8941 = vmatprep.subr.bf16.mxu1 %v11126_v50  ;;  %v11177_v47 = vld [vmem:[%s13671_s3 + $0x5c4] ss:$16 sps:$4 sm:$0xff]   ;;  %v11222_v37 = vld [vmem:[%s13671_s3 + $0x2ec] ss:$16 sps:$4 sm:$0xff]  }
 0x4e4   : > { %8845 = vmatmul.mubr.bf16.vlgmr.msra.gmra.mxu0 %v12924_v52  ;;  %v11180_v50 = vld [vmem:[%s13671_s3 + $0x7c4] ss:$16 sps:$4 sm:$0xff]  }
 0x4e5   : > { %8888 = vmatmul.mubr.bf16.vlgmr.msra.gmra.mxu1 %v12926_v53  ;;  %8899 = vmatpush1.bf16.msra.mxu0 %v11121_v54  ;;  %v7243_v54 = vsel %vm7211_vm9, %v7195_v31, %v7227_v38  ;;  %v11214_v31 = vld [vmem:[%s13671_s3 + $0x700] ss:$16 sps:$4 sm:$0xff]  }
 0x4e6   : > { %8942 = vmatpush1.bf16.msra.mxu1 %v11124_v56  ;;  %8900 = vmatprep.subr.bf16.mxu0 %v11129_v57  ;;  %v13042_v56 = vpack.c.bf16 %v7243_v54, %v7235_v41  ;;  %v7237_v57 = vsel %vm7205_vm10, %v7189_v32, %v7221_v43  ;;  %v11217_v43 = vld [vmem:[%s13671_s3 + $0xe8] ss:$16 sps:$4 sm:$0xff]  }
 0x4e7   : > { %8943 = vmatprep.subr.bf16.mxu1 %v11132_v58  ;;  %v7245_v58 = vsel %vm7213_vm11, %v7197_v22, %v7229_v44  ;;  %v11220_v44 = vld [vmem:[%s13671_s3 + $0x2e8] ss:$16 sps:$4 sm:$0xff]  }
 0x4e8   : > { %8930 = vmatprep.mubr.bf16.mxu0 %v13042_v56  ;;  %v11223_v54 = vld [vmem:[%s13671_s3 + $0xc8] ss:$16 sps:$4 sm:$0xff]  }
 0x4e9   : > { %8901 = vmatpush1.bf16.msra.mxu0 %v11127_v60  ;;  %v13044_v60 = vpack.c.bf16 %v7245_v58, %v7237_v57  ;;  %v11226_v57 = vld [vmem:[%s13671_s3 + $0x2c8] ss:$16 sps:$4 sm:$0xff]   ;;  %v11231_v58 = vld [vmem:[%s13671_s3 + $0xac] ss:$16 sps:$4 sm:$0xff]  }
 0x4ea   : > { %8944 = vmatpush1.bf16.msra.mxu1 %v11130_v36  ;;  %8902 = vmatprep.subr.bf16.mxu0 %v11135_v62  ;;  %v11175_v36 = vld [vmem:[%s13671_s3 + $0x5c0] ss:$16 sps:$4 sm:$0xff]  }
 0x4eb   : > { %8945 = vmatprep.subr.bf16.mxu1 %v11138_v63  ;;  %v11178_v62 = vld [vmem:[%s13671_s3 + $0x7c0] ss:$16 sps:$4 sm:$0xff]   ;;  %v11183_v63 = vld [vmem:[%s13671_s3 + $0x5a4] ss:$16 sps:$4 sm:$0xff]   ;;  %8973 = vmatprep.mubr.bf16.mxu1 %v13044_v60 }
 0x4ed   : > { %8903 = vmatpush1.bf16.msra.mxu0 %v11133_v0  ;;  %v11186_v0 = vld [vmem:[%s13671_s3 + $0x7a4] ss:$16 sps:$4 sm:$0xff]  }
 0x4ee   : > { %8946 = vmatpush1.bf16.msra.mxu1 %v11136_v2  ;;  %8904 = vmatprep.subr.bf16.mxu0 %v11141_v3  ;;  %v11181_v2 = vld [vmem:[%s13671_s3 + $0x5a0] ss:$16 sps:$4 sm:$0xff]  }
 0x4ef   : > { %8947 = vmatprep.subr.bf16.mxu1 %v11144_v61  ;;  %v11184_v3 = vld [vmem:[%s13671_s3 + $0x7a0] ss:$16 sps:$4 sm:$0xff]   ;;  %v11189_v61 = vld [vmem:[%s13671_s3 + $0x584] ss:$16 sps:$4 sm:$0xff]  }
 0x4f1   : > { %8905 = vmatpush1.bf16.msra.mxu0 %v11139_v4  ;;  %v11192_v4 = vld [vmem:[%s13671_s3 + $0x784] ss:$16 sps:$4 sm:$0xff]  }
 0x4f2   : > { %8948 = vmatpush1.bf16.msra.mxu1 %v11142_v5  ;;  %8906 = vmatprep.subr.bf16.mxu0 %v11147_v8  ;;  %v11187_v5 = vld [vmem:[%s13671_s3 + $0x580] ss:$16 sps:$4 sm:$0xff]  }
 0x4f3   : > { %8949 = vmatprep.subr.bf16.mxu1 %v11150_v9  ;;  %v11190_v8 = vld [vmem:[%s13671_s3 + $0x780] ss:$16 sps:$4 sm:$0xff]   ;;  %v11195_v9 = vld [vmem:[%s13671_s3 + $0x564] ss:$16 sps:$4 sm:$0xff]  }
 0x4f5   : > { %8907 = vmatpush1.bf16.msra.mxu0 %v11145_v55  ;;  %v11198_v55 = vld [vmem:[%s13671_s3 + $0x764] ss:$16 sps:$4 sm:$0xff]  }
 0x4f6   : > { %8950 = vmatpush1.bf16.msra.mxu1 %v11148_v7  ;;  %8908 = vmatprep.subr.bf16.mxu0 %v11153_v48  ;;  %v11193_v7 = vld [vmem:[%s13671_s3 + $0x560] ss:$16 sps:$4 sm:$0xff]  }
 0x4f7   : > { %8951 = vmatprep.subr.bf16.mxu1 %v11156_v12  ;;  %v11196_v48 = vld [vmem:[%s13671_s3 + $0x760] ss:$16 sps:$4 sm:$0xff]   ;;  %v11201_v12 = vld [vmem:[%s13671_s3 + $0x544] ss:$16 sps:$4 sm:$0xff]  }
 0x4f9   : > { %8909 = vmatpush1.bf16.msra.mxu0 %v11151_v59  ;;  %v11204_v59 = vld [vmem:[%s13671_s3 + $0x744] ss:$16 sps:$4 sm:$0xff]  }
 0x4fa   : > { %8952 = vmatpush1.bf16.msra.mxu1 %v11154_v13  ;;  %8910 = vmatprep.subr.bf16.mxu0 %v11159_v15  ;;  %v7128_v13 = vld [vmem:[#allocation2 + $0x50] sm:$0xff]  ;;  %v7136_v15 = vld [vmem:[#allocation2 + $0x60] sm:$0xff] }
 0x4fb   : > { %8953 = vmatprep.subr.bf16.mxu1 %v11162_v17  ;;  %v7138_v17 = vld [vmem:[#allocation2 + $0x78] sm:$0xff] }
 0x4fc   : > { %v7196_v23 = vadd.f32 %v12904_v30, %v7138_v17  ;;  %v11259_v17 = vld [vmem:[%s13671_s3 + $0x8] ss:$16 sps:$4 sm:$0xff]  }
 0x4fd   : > { %8911 = vmatpush1.bf16.msra.mxu0 %v11157_v18  ;;  %v7186_v18 = vadd.f32 %v12893_v26, %v7128_v13  ;;  %v11256_v13 = vld [vmem:[%s13671_s3 + $0x228] ss:$16 sps:$4 sm:$0xff]  }
 0x4fe   : > { %8954 = vmatpush1.bf16.msra.mxu1 %v11160_v19  ;;  %8912 = vmatprep.subr.bf16.mxu0 %v11165_v51  ;;  %v7194_v19 = vadd.f32 %v12893_v26, %v7136_v15  ;;  %v11202_v51 = vld [vmem:[%s13671_s3 + $0x740] ss:$16 sps:$4 sm:$0xff]   ;;  %v11210_v26 = vld [vmem:[%s13671_s3 + $0x724] ss:$16 sps:$4 sm:$0xff]   ;;  %v7228_v14 = vmul.f32 0.01, %v7196_v23 }
 0x4ff   : > { %8955 = vmatprep.subr.bf16.mxu1 %v11168_v21  ;;  %v7188_v21 = vadd.f32 %v12904_v30, %v7130_v1  ;;  %v11216_v30 = vld [vmem:[%s13671_s3 + $0x704] ss:$16 sps:$4 sm:$0xff]   ;;  %v7218_v25 = vmul.f32 0.01, %v7186_v18  ;;  %vm7202_vm12 = vcmp.gt.f32.partialorder %v7186_v18, 0.0  ;;  %vm7212_vm15 = vcmp.gt.f32.partialorder %v7196_v23, 0.0 }
 0x500   : > { %v7226_v28 = vmul.f32 0.01, %v7194_v19  ;;  %vm7210_vm13 = vcmp.gt.f32.partialorder %v7194_v19, 0.0  ;;  %v11261_v15 = vld [vmem:[%s13671_s3 + $0xc] ss:$16 sps:$4 sm:$0xff]  }
 0x501   : > { %8913 = vmatpush1.bf16.msra.mxu0 %v11163_v10  ;;  %v11205_v10 = vld [vmem:[%s13671_s3 + $0x520] ss:$16 sps:$4 sm:$0xff]   ;;  %v7220_v29 = vmul.f32 0.01, %v7188_v21  ;;  %vm7204_vm14 = vcmp.gt.f32.partialorder %v7188_v21, 0.0 }
 0x502   : > { %8956 = vmatpush1.bf16.msra.mxu1 %v11166_v6  ;;  %8914 = vmatprep.subr.bf16.mxu0 %v11171_v46  ;;  %v11208_v6 = vld [vmem:[%s13671_s3 + $0x720] ss:$16 sps:$4 sm:$0xff]   ;;  %v7242_v32 = vsel %vm7210_vm13, %v7194_v19, %v7226_v28  ;;  %v11264_v1 = vld [vmem:[%s13671_s3 + $0x20c] ss:$16 sps:$4 sm:$0xff]  }
 0x503   : > { %8957 = vmatprep.subr.bf16.mxu1 %v11174_v27  ;;  %v11211_v46 = vld [vmem:[%s13671_s3 + $0x500] ss:$16 sps:$4 sm:$0xff]   ;;  %v7234_v27 = vsel %vm7202_vm12, %v7186_v18, %v7218_v25  ;;  %v7236_v22 = vsel %vm7204_vm14, %v7188_v21, %v7220_v29  ;;  %v11267_v18 = vld [vmem:[%s13671_s3 + $0x1ec] ss:$16 sps:$4 sm:$0xff]   ;;  %v11280_v25 = vld [vmem:[%s13671_s3 + $0x3a8] ss:$16 sps:$4 sm:$0xff]  }
 0x504   : > { %v13136_v38 = vpack.c.bf16 %v7242_v32, %v7234_v27  ;;  %v11270_v19 = vld [vmem:[%s13671_s3 + $0x3ec] ss:$16 sps:$4 sm:$0xff]   ;;  %v11289_v32 = vld [vmem:[%s13671_s3 + $0x168] ss:$16 sps:$4 sm:$0xff]  }
 0x505   : > { %8915 = vmatpush2.bf16.msra.mxu0 %v11169_v34  ;;  %v7244_v34 = vsel %vm7212_vm15, %v7196_v23, %v7228_v14  ;;  %v11273_v21 = vld [vmem:[%s13671_s3 + $0x1cc] ss:$16 sps:$4 sm:$0xff]   ;;  %v11283_v14 = vld [vmem:[%s13671_s3 + $0x188] ss:$16 sps:$4 sm:$0xff]  }
 0x506   : > { %8958 = vmatpush2.bf16.msra.mxu1 %v11172_v35  ;;  %8916 = vmatprep.subr.bf16.mxu0 %v11177_v47  ;;  %v11219_v35 = vld [vmem:[%s13671_s3 + $0xec] ss:$16 sps:$4 sm:$0xff]   ;;  %v13138_v41 = vpack.c.bf16 %v7244_v34, %v7236_v22  ;;  %v11292_v22 = vld [vmem:[%s13671_s3 + $0x368] ss:$16 sps:$4 sm:$0xff]  }
 0x507   : > { %8959 = vmatprep.subr.bf16.mxu1 %v11180_v50  ;;  %v11225_v47 = vld [vmem:[%s13671_s3 + $0xcc] ss:$16 sps:$4 sm:$0xff]  }
 0x508   : > { %v11228_v50 = vld [vmem:[%s13671_s3 + $0x2cc] ss:$16 sps:$4 sm:$0xff]  }
 0x509   : > { %8917 = vmatpush2.bf16.msra.mxu0 %v11175_v36  ;;  %v11234_v36 = vld [vmem:[%s13671_s3 + $0x2ac] ss:$16 sps:$4 sm:$0xff]  }
 0x50a   : > { %8960 = vmatpush2.bf16.msra.mxu1 %v11178_v62  ;;  %8918 = vmatprep.subr.bf16.mxu0 %v11183_v63  ;;  %v11229_v62 = vld [vmem:[%s13671_s3 + $0xa8] ss:$16 sps:$4 sm:$0xff]   ;;  %v11276_v23 = vld [vmem:[%s13671_s3 + $0x3cc] ss:$16 sps:$4 sm:$0xff]  }
 0x50b   : > { %8961 = vmatprep.subr.bf16.mxu1 %v11186_v0  ;;  %v11232_v63 = vld [vmem:[%s13671_s3 + $0x2a8] ss:$16 sps:$4 sm:$0xff]   ;;  %v11237_v0 = vld [vmem:[%s13671_s3 + $0x8c] ss:$16 sps:$4 sm:$0xff]  }
 0x50c   : > { %v11285_v28 = vld [vmem:[%s13671_s3 + $0x18c] ss:$16 sps:$4 sm:$0xff]  }
 0x50d   : > { %8919 = vmatpush2.bf16.msra.mxu0 %v11181_v2  ;;  %v11238_v2 = vld [vmem:[%s13671_s3 + $0x288] ss:$16 sps:$4 sm:$0xff]   ;;  %v11288_v29 = vld [vmem:[%s13671_s3 + $0x38c] ss:$16 sps:$4 sm:$0xff]  }
 0x50e   : > { %8962 = vmatpush2.bf16.msra.mxu1 %v11184_v3  ;;  %8920 = vmatprep.subr.bf16.mxu0 %v11189_v61  ;;  %v11243_v3 = vld [vmem:[%s13671_s3 + $0x6c] ss:$16 sps:$4 sm:$0xff]  }
 0x50f   : > { %8963 = vmatprep.subr.bf16.mxu1 %v11192_v4  ;;  %v11246_v61 = vld [vmem:[%s13671_s3 + $0x26c] ss:$16 sps:$4 sm:$0xff]   ;;  %v11241_v4 = vld [vmem:[%s13671_s3 + $0x68] ss:$16 sps:$4 sm:$0xff]  }
 0x510   : > { %v11291_v27 = vld [vmem:[%s13671_s3 + $0x16c] ss:$16 sps:$4 sm:$0xff]  }
 0x511   : > { %8921 = vmatpush2.bf16.msra.mxu0 %v11187_v5  ;;  %v11244_v5 = vld [vmem:[%s13671_s3 + $0x268] ss:$16 sps:$4 sm:$0xff]   ;;  %v11297_v34 = vld [vmem:[%s13671_s3 + $0x14c] ss:$16 sps:$4 sm:$0xff]  }
 0x512   : > { %8964 = vmatpush2.bf16.msra.mxu1 %v11190_v8  ;;  %8922 = vmatprep.subr.bf16.mxu0 %v11195_v9  ;;  %v11249_v8 = vld [vmem:[%s13671_s3 + $0x4c] ss:$16 sps:$4 sm:$0xff]  }
 0x513   : > { %8965 = vmatprep.subr.bf16.mxu1 %v11198_v55  ;;  %v11252_v9 = vld [vmem:[%s13671_s3 + $0x24c] ss:$16 sps:$4 sm:$0xff]   ;;  %v11247_v55 = vld [vmem:[%s13671_s3 + $0x48] ss:$16 sps:$4 sm:$0xff]  }
 0x515   : > { %8923 = vmatpush2.bf16.msra.mxu0 %v11193_v7  ;;  %v11250_v7 = vld [vmem:[%s13671_s3 + $0x248] ss:$16 sps:$4 sm:$0xff]  }
 0x516   : > { %8966 = vmatpush2.bf16.msra.mxu1 %v11196_v48  ;;  %8924 = vmatprep.subr.bf16.mxu0 %v11201_v12  ;;  %v11255_v48 = vld [vmem:[%s13671_s3 + $0x2c] ss:$16 sps:$4 sm:$0xff]  }
 0x517   : > { %8967 = vmatprep.subr.bf16.mxu1 %v11204_v59  ;;  %v11258_v12 = vld [vmem:[%s13671_s3 + $0x22c] ss:$16 sps:$4 sm:$0xff]   ;;  %v11253_v59 = vld [vmem:[%s13671_s3 + $0x28] ss:$16 sps:$4 sm:$0xff]  }
 0x519   : > { %8925 = vmatpush2.bf16.msra.mxu0 %v11199_v16  ;;  %v11262_v16 = vld [vmem:[%s13671_s3 + $0x208] ss:$16 sps:$4 sm:$0xff]  }
 0x51a   : > { %8968 = vmatpush2.bf16.msra.mxu1 %v11202_v51  ;;  %8926 = vmatprep.subr.bf16.mxu0 %v11207_v11  ;;  %v11265_v51 = vld [vmem:[%s13671_s3 + $0x1e8] ss:$16 sps:$4 sm:$0xff]  }
 0x51b   : > { %8969 = vmatprep.subr.bf16.mxu1 %v11210_v26  ;;  %v11268_v11 = vld [vmem:[%s13671_s3 + $0x3e8] ss:$16 sps:$4 sm:$0xff]  }
 0x51c   : > { %v11271_v26 = vld [vmem:[%s13671_s3 + $0x1c8] ss:$16 sps:$4 sm:$0xff]  }
 0x51d   : > { %8927 = vmatpush2.bf16.msra.mxu0 %v11205_v10  ;;  %v11274_v10 = vld [vmem:[%s13671_s3 + $0x3c8] ss:$16 sps:$4 sm:$0xff]  }
 0x51e   : > { %8970 = vmatpush2.bf16.msra.mxu1 %v11208_v6  ;;  %8928 = vmatprep.subr.bf16.mxu0 %v11213_v45  ;;  %v11279_v6 = vld [vmem:[%s13671_s3 + $0x1ac] ss:$16 sps:$4 sm:$0xff]  }
 0x51f   : > { %8971 = vmatprep.subr.bf16.mxu1 %v11216_v30  ;;  %v11282_v45 = vld [vmem:[%s13671_s3 + $0x3ac] ss:$16 sps:$4 sm:$0xff]   ;;  %v11277_v30 = vld [vmem:[%s13671_s3 + $0x1a8] ss:$16 sps:$4 sm:$0xff]  }
 0x521   : > { %8929 = vmatpush2.bf16.msra.mxu0 %v11211_v46  ;;  %v11286_v46 = vld [vmem:[%s13671_s3 + $0x388] ss:$16 sps:$4 sm:$0xff]  }
 0x522   : > { %8972 = vmatpush2.bf16.msra.mxu1 %v11214_v31  ;;  %8984 = vmatprep.subr.bf16.mxu0 %v11219_v35  ;;  %v11294_v31 = vld [vmem:[%s13671_s3 + $0x36c] ss:$16 sps:$4 sm:$0xff]  }
 0x523   : > { %9027 = vmatprep.subr.bf16.mxu1 %v11222_v37  ;;  %v11300_v35 = vld [vmem:[%s13671_s3 + $0x34c] ss:$16 sps:$4 sm:$0xff]   ;;  %v11295_v37 = vld [vmem:[%s13671_s3 + $0x148] ss:$16 sps:$4 sm:$0xff]  }
 0x524   : > { %8931 = vmatmul.mubr.bf16.vlgmr.msra.gmra.mxu0 %v13136_v38 }
 0x525   : > { %8974 = vmatmul.mubr.bf16.vlgmr.msra.gmra.mxu1 %v13138_v41  ;;  %8985 = vmatpush1.bf16.msra.mxu0 %v11217_v43  ;;  %v11298_v43 = vld [vmem:[%s13671_s3 + $0x348] ss:$16 sps:$4 sm:$0xff]  }
 0x526   : > { %9028 = vmatpush1.bf16.msra.mxu1 %v11220_v44  ;;  %8986 = vmatprep.subr.bf16.mxu0 %v11225_v47  ;;  %v11303_v44 = vld [vmem:[%s13671_s3 + $0x12c] ss:$16 sps:$4 sm:$0xff]  }
 0x527   : > { %9029 = vmatprep.subr.bf16.mxu1 %v11228_v50  ;;  %9016 = vmatprep.mubr.bf16.mxu0 %v12879_v20  ;;  %v11240_v20 = vld [vmem:[%s13671_s3 + $0x28c] ss:$16 sps:$4 sm:$0xff]   ;;  %v11301_v50 = vld [vmem:[%s13671_s3 + $0x128] ss:$16 sps:$4 sm:$0xff]  }
 0x528   : > { %9059 = vmatprep.mubr.bf16.mxu1 %v12884_v24  ;;  %v11235_v24 = vld [vmem:[%s13671_s3 + $0x88] ss:$16 sps:$4 sm:$0xff]   ;;  %v11306_v47 = vld [vmem:[%s13671_s3 + $0x32c] ss:$16 sps:$4 sm:$0xff]  }
 0x529   : > { %8987 = vmatpush1.bf16.msra.mxu0 %v11223_v54  ;;  %v11304_v54 = vld [vmem:[%s13671_s3 + $0x328] ss:$16 sps:$4 sm:$0xff]  }
 0x52a   : > { %9030 = vmatpush1.bf16.msra.mxu1 %v11226_v57  ;;  %8988 = vmatprep.subr.bf16.mxu0 %v11231_v58  ;;  %v11309_v57 = vld [vmem:[%s13671_s3 + $0x10c] ss:$16 sps:$4 sm:$0xff]  }
 0x52b   : > { %9031 = vmatprep.subr.bf16.mxu1 %v11234_v36  ;;  %v11312_v58 = vld [vmem:[%s13671_s3 + $0x30c] ss:$16 sps:$4 sm:$0xff]   ;;  %v11307_v36 = vld [vmem:[%s13671_s3 + $0x108] ss:$16 sps:$4 sm:$0xff]  }
 0x52d   : > { %8989 = vmatpush1.bf16.msra.mxu0 %v11229_v62  ;;  %v11310_v62 = vld [vmem:[%s13671_s3 + $0x308] ss:$16 sps:$4 sm:$0xff]  }
 0x52e   : > { %9032 = vmatpush1.bf16.msra.mxu1 %v11232_v63  ;;  %8990 = vmatprep.subr.bf16.mxu0 %v11237_v0  ;;  %v11315_v63 = vld [vmem:[%s13671_s3 + $0x4ec] ss:$16 sps:$4 sm:$0xff]  }
 0x52f   : > { %9033 = vmatprep.subr.bf16.mxu1 %v11240_v20  ;;  %v11318_v0 = vld [vmem:[%s13671_s3 + $0x6ec] ss:$16 sps:$4 sm:$0xff]   ;;  %v11313_v20 = vld [vmem:[%s13671_s3 + $0x4e8] ss:$16 sps:$4 sm:$0xff]  }
 0x531   : > { %8991 = vmatpush1.bf16.msra.mxu0 %v11235_v24  ;;  %v11316_v24 = vld [vmem:[%s13671_s3 + $0x6e8] ss:$16 sps:$4 sm:$0xff]  }
 0x532   : > { %9034 = vmatpush1.bf16.msra.mxu1 %v11238_v2  ;;  %8992 = vmatprep.subr.bf16.mxu0 %v11243_v3  ;;  %v11321_v2 = vld [vmem:[%s13671_s3 + $0x4cc] ss:$16 sps:$4 sm:$0xff]  }
 0x533   : > { %9035 = vmatprep.subr.bf16.mxu1 %v11246_v61  ;;  %v11324_v3 = vld [vmem:[%s13671_s3 + $0x6cc] ss:$16 sps:$4 sm:$0xff]   ;;  %v11319_v61 = vld [vmem:[%s13671_s3 + $0x4c8] ss:$16 sps:$4 sm:$0xff]  }
 0x535   : > { %8993 = vmatpush1.bf16.msra.mxu0 %v11241_v4  ;;  %v11322_v4 = vld [vmem:[%s13671_s3 + $0x6c8] ss:$16 sps:$4 sm:$0xff]  }
 0x536   : > { %9036 = vmatpush1.bf16.msra.mxu1 %v11244_v5  ;;  %8994 = vmatprep.subr.bf16.mxu0 %v11249_v8  ;;  %v11327_v5 = vld [vmem:[%s13671_s3 + $0x4ac] ss:$16 sps:$4 sm:$0xff]  }
 0x537   : > { %9037 = vmatprep.subr.bf16.mxu1 %v11252_v9  ;;  %v11330_v8 = vld [vmem:[%s13671_s3 + $0x6ac] ss:$16 sps:$4 sm:$0xff]   ;;  %v11325_v9 = vld [vmem:[%s13671_s3 + $0x4a8] ss:$16 sps:$4 sm:$0xff]  }
 0x539   : > { %8995 = vmatpush1.bf16.msra.mxu0 %v11247_v55  ;;  %v11336_v55 = vld [vmem:[%s13671_s3 + $0x68c] ss:$16 sps:$4 sm:$0xff]  }
 0x53a   : > { %9038 = vmatpush1.bf16.msra.mxu1 %v11250_v7  ;;  %8996 = vmatprep.subr.bf16.mxu0 %v11255_v48  ;;  %v11331_v7 = vld [vmem:[%s13671_s3 + $0x488] ss:$16 sps:$4 sm:$0xff]   ;;  %v11342_v48 = vld [vmem:[%s13671_s3 + $0x66c] ss:$16 sps:$4 sm:$0xff]  }
 0x53b   : > { %9039 = vmatprep.subr.bf16.mxu1 %v11258_v12  ;;  %v11337_v12 = vld [vmem:[%s13671_s3 + $0x468] ss:$16 sps:$4 sm:$0xff]  }
 0x53d   : > { %8997 = vmatpush1.bf16.msra.mxu0 %v11253_v59  ;;  %v11340_v59 = vld [vmem:[%s13671_s3 + $0x668] ss:$16 sps:$4 sm:$0xff]  }
 0x53e   : > { %9040 = vmatpush1.bf16.msra.mxu1 %v11256_v13  ;;  %8998 = vmatprep.subr.bf16.mxu0 %v11261_v15  ;;  %v11345_v13 = vld [vmem:[%s13671_s3 + $0x44c] ss:$16 sps:$4 sm:$0xff]  }
 0x53f   : > { %9041 = vmatprep.subr.bf16.mxu1 %v11264_v1  ;;  %v11348_v15 = vld [vmem:[%s13671_s3 + $0x64c] ss:$16 sps:$4 sm:$0xff]   ;;  %v11343_v1 = vld [vmem:[%s13671_s3 + $0x448] ss:$16 sps:$4 sm:$0xff]  }
 0x541   : > { %8999 = vmatpush1.bf16.msra.mxu0 %v11259_v17  ;;  %v11346_v17 = vld [vmem:[%s13671_s3 + $0x648] ss:$16 sps:$4 sm:$0xff]  }
 0x542   : > { %9042 = vmatpush1.bf16.msra.mxu1 %v11262_v16  ;;  %9000 = vmatprep.subr.bf16.mxu0 %v11267_v18  ;;  %v11351_v16 = vld [vmem:[%s13671_s3 + $0x42c] ss:$16 sps:$4 sm:$0xff]  }
 0x543   : > { %9043 = vmatprep.subr.bf16.mxu1 %v11270_v19  ;;  %v11354_v18 = vld [vmem:[%s13671_s3 + $0x62c] ss:$16 sps:$4 sm:$0xff]   ;;  %v11349_v19 = vld [vmem:[%s13671_s3 + $0x428] ss:$16 sps:$4 sm:$0xff]  }
 0x545   : > { %9001 = vmatpush2.bf16.msra.mxu0 %v11265_v51  ;;  %v11352_v51 = vld [vmem:[%s13671_s3 + $0x628] ss:$16 sps:$4 sm:$0xff]  }
 0x546   : > { %9044 = vmatpush2.bf16.msra.mxu1 %v11268_v11  ;;  %9002 = vmatprep.subr.bf16.mxu0 %v11273_v21  ;;  %v11357_v11 = vld [vmem:[%s13671_s3 + $0x40c] ss:$16 sps:$4 sm:$0xff]  }
 0x547   : > { %9045 = vmatprep.subr.bf16.mxu1 %v11276_v23  ;;  %v11360_v21 = vld [vmem:[%s13671_s3 + $0x60c] ss:$16 sps:$4 sm:$0xff]   ;;  %v11355_v23 = vld [vmem:[%s13671_s3 + $0x408] ss:$16 sps:$4 sm:$0xff]  }
 0x549   : > { %9003 = vmatpush2.bf16.msra.mxu0 %v11271_v26  ;;  %v11358_v26 = vld [vmem:[%s13671_s3 + $0x608] ss:$16 sps:$4 sm:$0xff]  }
 0x54a   : > { %9046 = vmatpush2.bf16.msra.mxu1 %v11274_v10  ;;  %9004 = vmatprep.subr.bf16.mxu0 %v11279_v6  ;;  %v11363_v10 = vld [vmem:[%s13671_s3 + $0x5ec] ss:$16 sps:$4 sm:$0xff]  }
 0x54b   : > { %9047 = vmatprep.subr.bf16.mxu1 %v11282_v45  ;;  %v11366_v6 = vld [vmem:[%s13671_s3 + $0x7ec] ss:$16 sps:$4 sm:$0xff]   ;;  %v11361_v45 = vld [vmem:[%s13671_s3 + $0x5e8] ss:$16 sps:$4 sm:$0xff]  }
 0x54d   : > { %9005 = vmatpush2.bf16.msra.mxu0 %v11277_v30  ;;  %v11364_v30 = vld [vmem:[%s13671_s3 + $0x7e8] ss:$16 sps:$4 sm:$0xff]  }
 0x54e   : > { %9048 = vmatpush2.bf16.msra.mxu1 %v11280_v25  ;;  %9006 = vmatprep.subr.bf16.mxu0 %v11285_v28  ;;  %v11369_v25 = vld [vmem:[%s13671_s3 + $0x5cc] ss:$16 sps:$4 sm:$0xff]  }
 0x54f   : > { %9049 = vmatprep.subr.bf16.mxu1 %v11288_v29  ;;  %v11372_v28 = vld [vmem:[%s13671_s3 + $0x7cc] ss:$16 sps:$4 sm:$0xff]   ;;  %v11367_v29 = vld [vmem:[%s13671_s3 + $0x5c8] ss:$16 sps:$4 sm:$0xff]  }
 0x551   : > { %9007 = vmatpush2.bf16.msra.mxu0 %v11283_v14  ;;  %v11370_v14 = vld [vmem:[%s13671_s3 + $0x7c8] ss:$16 sps:$4 sm:$0xff]  }
 0x552   : > { %9050 = vmatpush2.bf16.msra.mxu1 %v11286_v46  ;;  %9008 = vmatprep.subr.bf16.mxu0 %v11291_v27  ;;  %v11375_v46 = vld [vmem:[%s13671_s3 + $0x5ac] ss:$16 sps:$4 sm:$0xff]  }
 0x553   : > { %9051 = vmatprep.subr.bf16.mxu1 %v11294_v31  ;;  %v11378_v27 = vld [vmem:[%s13671_s3 + $0x7ac] ss:$16 sps:$4 sm:$0xff]   ;;  %v11373_v31 = vld [vmem:[%s13671_s3 + $0x5a8] ss:$16 sps:$4 sm:$0xff]  }
 0x555   : > { %9009 = vmatpush2.bf16.msra.mxu0 %v11289_v32  ;;  %v11376_v32 = vld [vmem:[%s13671_s3 + $0x7a8] ss:$16 sps:$4 sm:$0xff]  }
 0x556   : > { %9052 = vmatpush2.bf16.msra.mxu1 %v11292_v22  ;;  %9010 = vmatprep.subr.bf16.mxu0 %v11297_v34  ;;  %v11381_v22 = vld [vmem:[%s13671_s3 + $0x58c] ss:$16 sps:$4 sm:$0xff]  }
 0x557   : > { %9053 = vmatprep.subr.bf16.mxu1 %v11300_v35  ;;  %v11384_v34 = vld [vmem:[%s13671_s3 + $0x78c] ss:$16 sps:$4 sm:$0xff]   ;;  %v11379_v35 = vld [vmem:[%s13671_s3 + $0x588] ss:$16 sps:$4 sm:$0xff]  }
 0x559   : > { %9011 = vmatpush2.bf16.msra.mxu0 %v11295_v37  ;;  %v11382_v37 = vld [vmem:[%s13671_s3 + $0x788] ss:$16 sps:$4 sm:$0xff]  }
 0x55a   : > { %9054 = vmatpush2.bf16.msra.mxu1 %v11298_v43  ;;  %9012 = vmatprep.subr.bf16.mxu0 %v11303_v44  ;;  %v11387_v43 = vld [vmem:[%s13671_s3 + $0x56c] ss:$16 sps:$4 sm:$0xff]  }
 0x55b   : > { %9055 = vmatprep.subr.bf16.mxu1 %v11306_v47  ;;  %v11390_v44 = vld [vmem:[%s13671_s3 + $0x76c] ss:$16 sps:$4 sm:$0xff]   ;;  %v11385_v47 = vld [vmem:[%s13671_s3 + $0x568] ss:$16 sps:$4 sm:$0xff]  }
 0x55d   : > { %9013 = vmatpush2.bf16.msra.mxu0 %v11301_v50  ;;  %v11388_v50 = vld [vmem:[%s13671_s3 + $0x768] ss:$16 sps:$4 sm:$0xff]  }
 0x55e   : > { %9056 = vmatpush2.bf16.msra.mxu1 %v11304_v54  ;;  %9014 = vmatprep.subr.bf16.mxu0 %v11309_v57  ;;  %v11393_v54 = vld [vmem:[%s13671_s3 + $0x54c] ss:$16 sps:$4 sm:$0xff]  }
 0x55f   : > { %9057 = vmatprep.subr.bf16.mxu1 %v11312_v58  ;;  %v11396_v57 = vld [vmem:[%s13671_s3 + $0x74c] ss:$16 sps:$4 sm:$0xff]   ;;  %v11391_v58 = vld [vmem:[%s13671_s3 + $0x548] ss:$16 sps:$4 sm:$0xff]  }
 0x561   : > { %9015 = vmatpush2.bf16.msra.mxu0 %v11307_v36  ;;  %v11394_v36 = vld [vmem:[%s13671_s3 + $0x748] ss:$16 sps:$4 sm:$0xff]  }
 0x562   : > { %9058 = vmatpush2.bf16.msra.mxu1 %v11310_v62  ;;  %9070 = vmatprep.subr.bf16.mxu0 %v11315_v63  ;;  %v11399_v62 = vld [vmem:[%s13671_s3 + $0x52c] ss:$16 sps:$4 sm:$0xff]  }
 0x563   : > { %9113 = vmatprep.subr.bf16.mxu1 %v11318_v0  ;;  %v11402_v63 = vld [vmem:[%s13671_s3 + $0x72c] ss:$16 sps:$4 sm:$0xff]   ;;  %v11397_v0 = vld [vmem:[%s13671_s3 + $0x528] ss:$16 sps:$4 sm:$0xff]  }
 0x564   : > { %9017 = vmatmul.mubr.bf16.vlgmr.msra.gmra.mxu0 %v12924_v52  ;;  %v11328_v52 = vld [vmem:[%s13671_s3 + $0x6a8] ss:$16 sps:$4 sm:$0xff]  }
 0x565   : > { %9060 = vmatmul.mubr.bf16.vlgmr.msra.gmra.mxu1 %v12926_v53  ;;  %9071 = vmatpush1.bf16.msra.mxu0 %v11313_v20  ;;  %v11333_v53 = vld [vmem:[%s13671_s3 + $0x48c] ss:$16 sps:$4 sm:$0xff]   ;;  %v11400_v20 = vld [vmem:[%s13671_s3 + $0x728] ss:$16 sps:$4 sm:$0xff]  }
 0x566   : > { %9114 = vmatpush1.bf16.msra.mxu1 %v11316_v24  ;;  %9072 = vmatprep.subr.bf16.mxu0 %v11321_v2  ;;  %v11405_v24 = vld [vmem:[%s13671_s3 + $0x50c] ss:$16 sps:$4 sm:$0xff]  }
 0x567   : > { %9115 = vmatprep.subr.bf16.mxu1 %v11324_v3  ;;  %9102 = vmatprep.mubr.bf16.mxu0 %v13042_v56  ;;  %v11334_v56 = vld [vmem:[%s13671_s3 + $0x688] ss:$16 sps:$4 sm:$0xff]   ;;  %v11408_v2 = vld [vmem:[%s13671_s3 + $0x70c] ss:$16 sps:$4 sm:$0xff]  }
 0x568   : > { %9145 = vmatprep.mubr.bf16.mxu1 %v13044_v60  ;;  %v11339_v60 = vld [vmem:[%s13671_s3 + $0x46c] ss:$16 sps:$4 sm:$0xff]   ;;  %v11403_v3 = vld [vmem:[%s13671_s3 + $0x508] ss:$16 sps:$4 sm:$0xff]  }
 0x569   : > { %9073 = vmatpush1.bf16.msra.mxu0 %v11319_v61  ;;  %v11406_v61 = vld [vmem:[%s13671_s3 + $0x708] ss:$16 sps:$4 sm:$0xff]  }
 0x56a   : > { %9116 = vmatpush1.bf16.msra.mxu1 %v11322_v4  ;;  %9074 = vmatprep.subr.bf16.mxu0 %v11327_v5  ;;  %v11409_v4 = vld [vmem:[%s13673_s5 + $0x78] sm:$0xff]  }
 0x56b   : > { %9117 = vmatprep.subr.bf16.mxu1 %v11330_v8  ;;  %v11410_v5 = vld [vmem:[%s13673_s5 + $0x38] sm:$0xff]   ;;  %v11411_v8 = vld [vmem:[%s13673_s5 + $0x70] sm:$0xff]  }
 0x56d   : > { %9075 = vmatpush1.bf16.msra.mxu0 %v11325_v9  ;;  %v11412_v9 = vld [vmem:[%s13673_s5 + $0x30] sm:$0xff]  }
 0x56e   : > { %9118 = vmatpush1.bf16.msra.mxu1 %v11328_v52  ;;  %9076 = vmatprep.subr.bf16.mxu0 %v11333_v53  ;;  %v11413_v52 = vld [vmem:[%s13673_s5 + $0x68] sm:$0xff]  }
 0x56f   : > { %9119 = vmatprep.subr.bf16.mxu1 %v11336_v55  ;;  %v11414_v53 = vld [vmem:[%s13673_s5 + $0x28] sm:$0xff]   ;;  %v11425_v55 = vld [vmem:[%s13673_s5 + $0xf8] sm:$0xff]  }
 0x571   : > { %9077 = vmatpush1.bf16.msra.mxu0 %v11331_v7  ;;  %v11426_v7 = vld [vmem:[%s13673_s5 + $0xb8] sm:$0xff]  }
 0x572   : > { %9120 = vmatpush1.bf16.msra.mxu1 %v11334_v56  ;;  %9078 = vmatprep.subr.bf16.mxu0 %v11339_v60  ;;  %v11427_v56 = vld [vmem:[%s13673_s5 + $0xf0] sm:$0xff]   ;;  %v11417_v60 = vld [vmem:[%s13673_s5 + $0x58] sm:$0xff]  }
 0x573   : > { %9121 = vmatprep.subr.bf16.mxu1 %v11342_v48  ;;  %v11428_v48 = vld [vmem:[%s13673_s5 + $0xb0] sm:$0xff]  }
 0x575   : > { %9079 = vmatpush1.bf16.msra.mxu0 %v11337_v12  ;;  %v11418_v12 = vld [vmem:[%s13673_s5 + $0x18] sm:$0xff]  }
 0x576   : > { %9122 = vmatpush1.bf16.msra.mxu1 %v11340_v59  ;;  %9080 = vmatprep.subr.bf16.mxu0 %v11345_v13  ;;  %v11429_v59 = vld [vmem:[%s13673_s5 + $0xe8] sm:$0xff]   ;;  %v11419_v13 = vld [vmem:[%s13673_s5 + $0x50] sm:$0xff]  }
 0x577   : > { %9123 = vmatprep.subr.bf16.mxu1 %v11348_v15  ;;  %v11430_v15 = vld [vmem:[%s13673_s5 + $0xa8] sm:$0xff]  }
 0x579   : > { %9081 = vmatpush1.bf16.msra.mxu0 %v11343_v1  ;;  %v11420_v1 = vld [vmem:[%s13673_s5 + $0x10] sm:$0xff]  }
 0x57a   : > { %9124 = vmatpush1.bf16.msra.mxu1 %v11346_v17  ;;  %9082 = vmatprep.subr.bf16.mxu0 %v11351_v16  ;;  %v11431_v17 = vld [vmem:[%s13673_s5 + $0xe0] sm:$0xff]   ;;  %v11421_v16 = vld [vmem:[%s13673_s5 + $0x48] sm:$0xff]  }
 0x57b   : > { %9125 = vmatprep.subr.bf16.mxu1 %v11354_v18  ;;  %v11432_v18 = vld [vmem:[%s13673_s5 + $0xa0] sm:$0xff]  }
 0x57d   : > { %9083 = vmatpush1.bf16.msra.mxu0 %v11349_v19  ;;  %v11422_v19 = vld [vmem:[%s13673_s5 + $0x8] sm:$0xff]  }
 0x57e   : > { %9126 = vmatpush1.bf16.msra.mxu1 %v11352_v51  ;;  %9084 = vmatprep.subr.bf16.mxu0 %v11357_v11  ;;  %v11423_v51 = vld [vmem:[%s13673_s5 + $0x40] sm:$0xff]  }
 0x57f   : > { %9127 = vmatprep.subr.bf16.mxu1 %v11360_v21  ;;  %v11424_v11 = vld [vmem:[%s13673_s5] sm:$0xff]  }
 0x581   : > { %9085 = vmatpush1.bf16.msra.mxu0 %v11355_v23 }
 0x582   : > { %9128 = vmatpush1.bf16.msra.mxu1 %v11358_v26  ;;  %9086 = vmatprep.subr.bf16.mxu0 %v11363_v10  ;;  %v13603_v26 = vld [vmem:[%s13672_s4] sm:$0xf] }
 0x583   : > { %9129 = vmatprep.subr.bf16.mxu1 %v11366_v6 }
 0x585   : > { %9087 = vmatpush2.bf16.msra.mxu0 %v11361_v45  ;;  %v7515_v45 = vrot.slane %v13603_v26, %v7144_v42  ;;  %v11434_v42 = vld [vmem:[%s13673_s5 + $0x98] sm:$0xff]  }
 0x586   : > { %9130 = vmatpush2.bf16.msra.mxu1 %v11364_v30  ;;  %9088 = vmatprep.subr.bf16.mxu0 %v11369_v25  ;;  %v7519_v30 = vrot.slane %v13603_v26, %v7148_v39 }
 0x587   : > { %9131 = vmatprep.subr.bf16.mxu1 %v11372_v28 }
 0x589   : > { %9089 = vmatpush2.bf16.msra.mxu0 %v11367_v29 }
 0x58a   : > { %9132 = vmatpush2.bf16.msra.mxu1 %v11370_v14  ;;  %9090 = vmatprep.subr.bf16.mxu0 %v11375_v46 }
 0x58b   : > { %9133 = vmatprep.subr.bf16.mxu1 %v11378_v27 }
 0x58d   : > { %9091 = vmatpush2.bf16.msra.mxu0 %v11373_v31 }
 0x58e   : > { %9134 = vmatpush2.bf16.msra.mxu1 %v11376_v32  ;;  %9092 = vmatprep.subr.bf16.mxu0 %v11381_v22 }
 0x58f   : > { %9135 = vmatprep.subr.bf16.mxu1 %v11384_v34  ;;  %v11433_v34 = vld [vmem:[%s13673_s5 + $0xd8] sm:$0xff]  }
 0x591   : > { %9093 = vmatpush2.bf16.msra.mxu0 %v11379_v35 }
 0x592   : > { %9136 = vmatpush2.bf16.msra.mxu1 %v11382_v37  ;;  %9094 = vmatprep.subr.bf16.mxu0 %v11387_v43 }
 0x593   : > { %9137 = vmatprep.subr.bf16.mxu1 %v11390_v44 }
 0x595   : > { %9095 = vmatpush2.bf16.msra.mxu0 %v11385_v47 }
 0x596   : > { %9138 = vmatpush2.bf16.msra.mxu1 %v11388_v50  ;;  %9096 = vmatprep.subr.bf16.mxu0 %v11393_v54 }
 0x597   : > { %9139 = vmatprep.subr.bf16.mxu1 %v11396_v57 }
 0x599   : > { %9097 = vmatpush2.bf16.msra.mxu0 %v11391_v58  ;;  %v11435_v58 = vld [vmem:[%s13673_s5 + $0xd0] sm:$0xff]  }
 0x59a   : > { %9140 = vmatpush2.bf16.msra.mxu1 %v11394_v36  ;;  %9098 = vmatprep.subr.bf16.mxu0 %v11399_v62 }
 0x59b   : > { %9141 = vmatprep.subr.bf16.mxu1 %v11402_v63  ;;  %v11436_v63 = vld [vmem:[%s13673_s5 + $0x90] sm:$0xff]  }
 0x59d   : > { %9099 = vmatpush2.bf16.msra.mxu0 %v11397_v0 }
 0x59e   : > { %9142 = vmatpush2.bf16.msra.mxu1 %v11400_v20  ;;  %9100 = vmatprep.subr.bf16.mxu0 %v11405_v24 }
 0x59f   : > { %9143 = vmatprep.subr.bf16.mxu1 %v11408_v2 }
 0x5a1   : > { %9101 = vmatpush2.bf16.msra.mxu0 %v11403_v3 }
 0x5a2   : > { %9144 = vmatpush2.bf16.msra.mxu1 %v11406_v61  ;;  %10861 = vmatprep.subr.bf16.mxu0 %v11409_v4  ;;  %v11437_v4 = vld [vmem:[%s13673_s5 + $0xc8] sm:$0xff]  }
 0x5a3   : > { %10883 = vmatprep.subr.bf16.mxu1 %v11425_v55  ;;  %v11439_v55 = vld [vmem:[%s13673_s5 + $0xc0] sm:$0xff]  }
 0x5a4   : > { %9103 = vmatmul.mubr.bf16.vlgmr.msra.gmra.mxu0 %v13136_v38  ;;  %v11415_v38 = vld [vmem:[%s13673_s5 + $0x60] sm:$0xff]   ;;  %v8846_v21 = vpop.f32.mrf.mxu0 }
 0x5a5   : > { %9146 = vmatmul.mubr.bf16.vlgmr.msra.gmra.mxu1 %v13138_v41  ;;  %10862 = vmatpush3.bf16.msra.mxu0 %v11410_v5  ;;  %v11416_v41 = vld [vmem:[%s13673_s5 + $0x20] sm:$0xff]   ;;  %v8889_v23 = vpop.f32.mrf.mxu1  ;;  %v8847_v29 = vadd.f32 %v8846_v21, %v7515_v45 }
 0x5a6   : > { %10863 = vmatprep.subr.bf16.mxu0 %v11411_v8  ;;  %10884 = vmatpush3.bf16.msra.mxu1 %v11426_v7  ;;  %v8848_v10 = vpop.f32.mrf.mxu0  ;;  %v11440_v7 = vld [vmem:[%s13673_s5 + $0x80] sm:$0xff]  }
 0x5a7   : > { %10885 = vmatprep.subr.bf16.mxu1 %v11427_v56  ;;  %v8891_v6 = vpop.f32.mrf.mxu1  ;;  %v8849_v14 = vadd.f32 %v8848_v10, %v7519_v30  ;;  %v8890_v35 = vadd.f32 %v8889_v23, %v8847_v29 }
 0x5a8   : > { %v8850_v25 = vpop.f32.mrf.mxu0 }
 0x5a9   : > { %10864 = vmatpush3.bf16.msra.mxu0 %v11412_v9  ;;  %v8893_v28 = vpop.f32.mrf.mxu1  ;;  %v8851_v31 = vadd.f32 %v8850_v25, %v7515_v45  ;;  %v8892_v37 = vadd.f32 %v8891_v6, %v8849_v14  ;;  %v11438_v9 = vld [vmem:[%s13673_s5 + $0x88] sm:$0xff]  }
 0x5aa   : > { %10865 = vmatprep.subr.bf16.mxu0 %v11413_v52  ;;  %10886 = vmatpush3.bf16.msra.mxu1 %v11428_v48  ;;  %v8852_v46 = vpop.f32.mrf.mxu0 }
 0x5ab   : > { %10887 = vmatprep.subr.bf16.mxu1 %v11429_v59  ;;  %v8895_v27 = vpop.f32.mrf.mxu1  ;;  %v8853_v39 = vadd.f32 %v8852_v46, %v7519_v30  ;;  %v8894_v47 = vadd.f32 %v8893_v28, %v8851_v31 }
 0x5ad   : > { %10866 = vmatpush3.bf16.msra.mxu0 %v11414_v53  ;;  %v8896_v0 = vadd.f32 %v8895_v27, %v8853_v39 }
 0x5ae   : > { %10867 = vmatprep.subr.bf16.mxu0 %v11415_v38  ;;  %10888 = vmatpush3.bf16.msra.mxu1 %v11430_v15 }
 0x5af   : > { %10889 = vmatprep.subr.bf16.mxu1 %v11431_v17 }
 0x5b1   : > { %10868 = vmatpush3.bf16.msra.mxu0 %v11416_v41 }
 0x5b2   : > { %10869 = vmatprep.subr.bf16.mxu0 %v11417_v60  ;;  %10890 = vmatpush3.bf16.msra.mxu1 %v11432_v18  ;;  %v7523_v18 = vrot.slane %v13603_v26, %v7152_v49 }
 0x5b3   : > { %10891 = vmatprep.subr.bf16.mxu1 %v11433_v34 }
 0x5b5   : > { %10870 = vmatpush3.bf16.msra.mxu0 %v11418_v12 }
 0x5b6   : > { %10871 = vmatprep.subr.bf16.mxu0 %v11419_v13  ;;  %10892 = vmatpush3.bf16.msra.mxu1 %v11434_v42 }
 0x5b7   : > { %10893 = vmatprep.subr.bf16.mxu1 %v11435_v58 }
 0x5b9   : > { %10872 = vmatpush3.bf16.msra.mxu0 %v11420_v1 }
 0x5ba   : > { %10873 = vmatprep.subr.bf16.mxu0 %v11421_v16  ;;  %10894 = vmatpush3.bf16.msra.mxu1 %v11436_v63 }
 0x5bb   : > { %10895 = vmatprep.subr.bf16.mxu1 %v11437_v4  ;;  %v10820_v4 = vld [vmem:[%s13674_s6] ss:$0 sm:$0xff] }
 0x5bd   : > { %10874 = vmatpush3.bf16.msra.mxu0 %v11422_v19  ;;  %v7527_v19 = vrot.slane %v13603_v26, %v7156_v40 }
 0x5be   : > { %10875 = vmatprep.subr.bf16.mxu0 %v11423_v51  ;;  %10896 = vmatpush3.bf16.msra.mxu1 %v11438_v9 }
 0x5bf   : > { %10897 = vmatprep.subr.bf16.mxu1 %v11439_v55 }
 0x5c1   : > { %10876 = vmatpush3.bf16.msra.mxu0 %v11424_v11 }
 0x5c2   : > { %10898 = vmatpush3.bf16.msra.mxu1 %v11440_v7 }
 0x5e4   : > { %v8932_v32 = vpop.f32.mrf.mxu0 }
 0x5e5   : > { %v8975_v22 = vpop.f32.mrf.mxu1  ;;  %v8933_v50 = vadd.f32 %v8932_v32, %v8890_v35 }
 0x5e6   : > { %v8934_v43 = vpop.f32.mrf.mxu0 }
 0x5e7   : > { %v8977_v44 = vpop.f32.mrf.mxu1  ;;  %v8935_v54 = vadd.f32 %v8934_v43, %v8892_v37  ;;  %v8976_v2 = vadd.f32 %v8975_v22, %v8933_v50 }
 0x5e8   : > { %v8936_v57 = vpop.f32.mrf.mxu0 }
 0x5e9   : > { %v8937_v36 = vadd.f32 %v8936_v57, %v8894_v47  ;;  %v8979_v62 = vpop.f32.mrf.mxu1  ;;  %v8978_v20 = vadd.f32 %v8977_v44, %v8935_v54  ;;  %v9164_v38 = vmul.f32 0.01, %v8976_v2  ;;  %vm9156_vm2 = vcmp.gt.f32.partialorder %v8976_v2, 0.0 }
 0x5ea   : > { %v8938_v24 = vpop.f32.mrf.mxu0 }
 0x5eb   : > { %v8980_v3 = vadd.f32 %v8979_v62, %v8937_v36  ;;  %v8939_v61 = vadd.f32 %v8938_v24, %v8896_v0  ;;  %v8981_v8 = vpop.f32.mrf.mxu1  ;;  %v9165_v52 = vmul.f32 0.01, %v8978_v20  ;;  %vm9157_vm1 = vcmp.gt.f32.partialorder %v8978_v20, 0.0 }
 0x5ec   : > { %v9172_v12 = vsel %vm9156_vm2, %v8976_v2, %v9164_v38 }
 0x5ed   : > { %v9168_v5 = vmul.f32 0.01, %v8980_v3  ;;  %vm9160_vm0 = vcmp.gt.f32.partialorder %v8980_v3, 0.0  ;;  %v8982_v53 = vadd.f32 %v8981_v8, %v8939_v61  ;;  %v9173_v60 = vsel %vm9157_vm1, %v8978_v20, %v9165_v52 }
 0x5ef   : > { %vm9161_vm3 = vcmp.gt.f32.partialorder %v8982_v53, 0.0  ;;  %v9169_v41 = vmul.f32 0.01, %v8982_v53  ;;  %v9176_v56 = vsel %vm9160_vm0, %v8980_v3, %v9168_v5 }
 0x5f0   : > { %v9180_v13 = vpack.c.bf16 %v9176_v56, %v9172_v12 }
 0x5f1   : > { %v9177_v48 = vsel %vm9161_vm3, %v8982_v53, %v9169_v41 }
 0x5f2   : > { %v9181_v59 = vpack.c.bf16 %v9177_v48, %v9173_v60 }
 0x5f4   : > { %9479 = vmatprep.mubr.bf16.mxu0 %v9181_v59 }
 0x5f5   : > { %9480 = vmatmul.mubr.bf16.vlgmr.msra.gmra.mxu0 %v9180_v13 }
 0x624   : > { %v9018_v15 = vpop.f32.mrf.mxu0 }
 0x625   : > { %v9061_v1 = vpop.f32.mrf.mxu1  ;;  %v9019_v21 = vadd.f32 %v9018_v15, %v7523_v18 }
 0x626   : > { %v9020_v17 = vpop.f32.mrf.mxu0 }
 0x627   : > { %v9063_v16 = vpop.f32.mrf.mxu1  ;;  %v9021_v23 = vadd.f32 %v9020_v17, %v7527_v19  ;;  %v9062_v28 = vadd.f32 %v9061_v1, %v9019_v21 }
 0x628   : > { %v9022_v51 = vpop.f32.mrf.mxu0 }
 0x629   : > { %v9065_v11 = vpop.f32.mrf.mxu1  ;;  %v9023_v45 = vadd.f32 %v9022_v51, %v7523_v18  ;;  %v9064_v29 = vadd.f32 %v9063_v16, %v9021_v23 }
 0x62a   : > { %v9024_v10 = vpop.f32.mrf.mxu0 }
 0x62b   : > { %v9067_v6 = vpop.f32.mrf.mxu1  ;;  %v9025_v14 = vadd.f32 %v9024_v10, %v7527_v19  ;;  %v9066_v31 = vadd.f32 %v9065_v11, %v9023_v45 }
 0x62d   : > { %v9068_v26 = vadd.f32 %v9067_v6, %v9025_v14 }
 0x664   : > { %v9104_v30 = vpop.f32.mrf.mxu0 }
 0x665   : > { %v9147_v25 = vpop.f32.mrf.mxu1  ;;  %v9105_v49 = vadd.f32 %v9104_v30, %v9062_v28 }
 0x666   : > { %v9106_v46 = vpop.f32.mrf.mxu0 }
 0x667   : > { %v9149_v27 = vpop.f32.mrf.mxu1  ;;  %v9107_v32 = vadd.f32 %v9106_v46, %v9064_v29  ;;  %v9148_v37 = vadd.f32 %v9147_v25, %v9105_v49 }
 0x668   : > { %v9108_v33 = vpop.f32.mrf.mxu0 }
 0x669   : > { %v9109_v22 = vadd.f32 %v9108_v33, %v9066_v31  ;;  %v9151_v40 = vpop.f32.mrf.mxu1  ;;  %v9150_v34 = vadd.f32 %v9149_v27, %v9107_v32  ;;  %v9166_v54 = vmul.f32 0.01, %v9148_v37  ;;  %vm9158_vm6 = vcmp.gt.f32.partialorder %v9148_v37, 0.0 }
 0x66a   : > { %v9110_v35 = vpop.f32.mrf.mxu0 }
 0x66b   : > { %v9152_v42 = vadd.f32 %v9151_v40, %v9109_v22  ;;  %v9111_v39 = vadd.f32 %v9110_v35, %v9068_v26  ;;  %v9153_v44 = vpop.f32.mrf.mxu1  ;;  %v9167_v47 = vmul.f32 0.01, %v9150_v34  ;;  %vm9159_vm5 = vcmp.gt.f32.partialorder %v9150_v34, 0.0 }
 0x66c   : > { %v9174_v63 = vsel %vm9158_vm6, %v9148_v37, %v9166_v54 }
 0x66d   : > { %v9170_v43 = vmul.f32 0.01, %v9152_v42  ;;  %vm9162_vm4 = vcmp.gt.f32.partialorder %v9152_v42, 0.0  ;;  %v9154_v50 = vadd.f32 %v9153_v44, %v9111_v39  ;;  %v9175_v36 = vsel %vm9159_vm5, %v9150_v34, %v9167_v47 }
 0x66f   : > { %vm9163_vm7 = vcmp.gt.f32.partialorder %v9154_v50, 0.0  ;;  %v9171_v57 = vmul.f32 0.01, %v9154_v50  ;;  %v9178_v58 = vsel %vm9162_vm4, %v9152_v42, %v9170_v43 }
 0x670   : > { %v9182_v20 = vpack.c.bf16 %v9178_v58, %v9174_v63 }
 0x671   : > { %v9179_v62 = vsel %vm9163_vm7, %v9154_v50, %v9171_v57 }
 0x672   : > { %v9183_v0 = vpack.c.bf16 %v9179_v62, %v9175_v36 }
 0x674   : > { %9520 = vmatprep.mubr.bf16.mxu1 %v9183_v0 }
 0x675   : > { %9521 = vmatmul.mubr.bf16.vlgmr.msra.gmra.mxu1 %v9182_v20 }
 0x6b5   : > { %v10877_v24 = vpop.f32.mrf.mxu0 }
 0x6b7   : > { %v10878_v2 = vpop.f32.mrf.mxu0 }
 0x6b8   : > { %v10879_v61 = vadd.f32 %v10878_v2, %v10877_v24 }
 0x6b9   : > { %v10880_v3 = vpop.f32.mrf.mxu0 }
 0x6ba   : > { %v9482_v52 = vadd.f32 %v10879_v61, %v10820_v4 }
 0x6bb   : > { %v10881_v5 = vpop.f32.mrf.mxu0 }
 0x6bc   : > { %v10882_v53 = vadd.f32 %v10881_v5, %v10880_v3 }
 0x6be   : > { %v9485_v56 = vadd.f32 %v10882_v53, %v10820_v4 }
 0x735   : > { %v10899_v8 = vpop.f32.mrf.mxu1 }
 0x737   : > { %v10900_v9 = vpop.f32.mrf.mxu1 }
 0x738   : > { %v10901_v38 = vadd.f32 %v10900_v9, %v10899_v8 }
 0x739   : > { %v10902_v41 = vpop.f32.mrf.mxu1 }
 0x73a   : > { %v9523_v55 = vadd.f32 %v10901_v38, %v9482_v52 }
 0x73b   : > { %v10903_v7 = vpop.f32.mrf.mxu1 }
 0x73c   : > { %v9529_v60 = vand.u32 2147483647, %v9523_v55  ;;  %v10904_v48 = vadd.f32 %v10903_v7, %v10902_v41  ;;  %vm9537_vm8 = vcmp.ge.f32.partialorder %v9523_v55, 0.0 }
 0x73e   : > { %v9531_v12 = vsub.f32 0.0, %v9529_v60  ;;  %v9526_v59 = vadd.f32 %v10904_v48, %v9485_v56 }
 0x740   : > { %v9533_v13 = vmul.f32 1.442695, %v9531_v12  ;;  %v9530_v15 = vand.u32 2147483647, %v9526_v59  ;;  %vm9538_vm9 = vcmp.ge.f32.partialorder %v9526_v59, 0.0 }
 0x742   : > { %11441 = vpow2.f32 %v9533_v13  ;;  %v9532_v1 = vsub.f32 0.0, %v9530_v15 }
 0x744   : > { %v9535_v17 = vmul.f32 1.442695, %v9532_v1 }
 0x746   : > { %11443 = vpow2.f32 %v9535_v17 }
 0x74f   : > { %v11442_v16 = vpop.eup %11441 }
 0x750   : > { %v9539_v18 = vadd.f32 1.0, %v11442_v16 }
 0x752   : > { %11445 = vrcp.f32 %v9539_v18 }
 0x753   : > { %v11444_v19 = vpop.eup %11443 }
 0x754   : > { %v9540_v51 = vadd.f32 1.0, %v11444_v19 }
 0x756   : > { %11447 = vrcp.f32 %v9540_v51 }
 0x75f   : > { %v11446_v11 = vpop.eup %11445 }
 0x760   : > { %v9545_v21 = vmul.f32 %v11446_v11, %v11442_v16 }
 0x762   : > { %v9547_v23 = vsel %vm9537_vm8, %v11446_v11, %v9545_v21 }
 0x763   : > { %v11448_v10 = vpop.eup %11447  ;;  %9549 = vst [vmem:[%s13675_s7] sm:$0xff] %v9547_v23 }
 0x764   : > { %v9546_v6 = vmul.f32 %v11448_v10, %v11444_v19 }
 0x766   : > { %v9548_v45 = vsel %vm9538_vm9, %v11448_v10, %v9546_v6 }
 0x767   : > { %9550 = vst [vmem:[%s13675_s7 + $0x8] sm:$0xff] %v9548_v45 }
 0x768 PF: > { %s20_s29 = sadd.s32 1, %s11525_s29   ;;  %s13678_s24 = smov %s11509_s25 }
 0x769   : > { %p17_p7 = scmp.ge.s32.totalorder %s20_s29, 6   ;;  %s13679_s25 = smov %s11513_s26 }
 0x76a   : > { %s13680_s26 = smov %s11619_s13  ;;  %s13681_s27 = smov %s11521_s28 }
 0x76b   : > { %s13682_s28 = smov %s13684_s8  ;;  %19 = sbr.rel (!%p17_p7) target bundleno = 4 (0x4), region = 127 }
 0x770   :  { %9573 = vsyncpa [#allocation5], 1 }
 0x771   :  { %9575 = vsyncpa [#allocation5 + $0x1], 1 }

</bundles_post_ra>
